<compile_context>
chip_gen: v7x
topology: tpu7x:2x2x1
jax: 0.10.0
libtpu: 0.0.40
codegen_flags: <defaults>
</compile_context>

<pallas_src>
import jax
import jax.numpy as jnp
import numpy as np
from jax.experimental import pallas as pl
from jax.experimental.pallas import tpu as pltpu

B_TILE = 32      # images per grid step (sublane/bf16-tile aligned)
C1 = 32          # conv1 output channels
C2 = 64          # conv2 output channels
NCLS = 10        # classes
NCLS_PAD = 128   # padded logits width (lane-dense output store)


# ----------------------------------------------------------------------------
# Fused forward kernel: conv1+pool1, conv2+pool2, fc1, fc2 in one body.
# Activation row order everywhere is (h, b); lane order is (pool-phase,
# pooled-w, channel) so pooling never crosses an unaligned lane boundary.
# ----------------------------------------------------------------------------
def _cnn_fused_kernel(x5_ref, r1_ref, b1_ref, w2b_ref, b2_ref,
                      wf1_ref, bf1_ref, wf2_ref, bf2_ref,
                      out_ref, c1_ref, p1_ref, acc2_ref):
    B = B_TILE

    # ---- conv1: one banded MXU matmul for all 24 pre-pool rows -------------
    # lhs rows = (h_out, b), K = (kh, w_in) = 160, N = (pw, w2, c) = 768.
    c1_ref[...] = jnp.dot(x5_ref[...], r1_ref[...],
                          preferred_element_type=jnp.float32)

    # ---- pool1 (2x2) + bias + ReLU (pool commutes with per-channel bias) ---
    b1v = b1_ref[...]                                       # (1, 384)
    for j in range(12):
        rowa = c1_ref[(2 * j) * B:(2 * j + 1) * B]          # h_out = 2j
        rowb = c1_ref[(2 * j + 1) * B:(2 * j + 2) * B]      # h_out = 2j+1
        m = jnp.maximum(rowa, rowb)                         # H pool (free)
        m = jnp.maximum(m[:, :384], m[:, 384:])             # W pool, aligned
        p1_ref[j * B:(j + 1) * B] = jnp.maximum(m + b1v, 0.0).astype(jnp.bfloat16)

    # ---- conv2: 5 banded matmuls, K=384, M=8B=256, N=512 (no Cout padding) -
    for kh in range(5):
        lhs2 = p1_ref[kh * B:(kh + 8) * B]                  # (8B, 384) bf16
        part = jnp.dot(lhs2, w2b_ref[kh],
                       preferred_element_type=jnp.float32)  # (8B, 512) f32
        if kh == 0:
            acc2_ref[...] = part                            # write-once init
        else:
            acc2_ref[...] += part

    # ---- pool2 + bias + ReLU; fc1 lhs via 256-aligned lane concat ----------
    b2v = b2_ref[...]                                       # (1, 256)
    pieces = []
    for j in range(4):
        m = jnp.maximum(acc2_ref[(2 * j) * B:(2 * j + 1) * B],
                        acc2_ref[(2 * j + 1) * B:(2 * j + 2) * B])
        m = jnp.maximum(m[:, :256], m[:, 256:])             # W pool, aligned
        pieces.append(jnp.maximum(m + b2v, 0.0).astype(jnp.bfloat16))
    flat = jnp.concatenate(pieces, axis=-1)                 # (B, 1024) bf16

    # ---- fc1 (single K=1024 matmul) + ReLU, fc2 (K=512) --------------------
    h1 = jnp.dot(flat, wf1_ref[...],
                 preferred_element_type=jnp.float32) + bf1_ref[...]
    h1 = jnp.maximum(h1, 0.0).astype(jnp.bfloat16)
    out_ref[...] = (jnp.dot(h1, wf2_ref[...],
                            preferred_element_type=jnp.float32) + bf2_ref[...])


# ----------------------------------------------------------------------------
# One-time weight repack (off the hot path): banded conv matrices, fc1
# flatten-permutation fold, fc2 lane padding.
# ----------------------------------------------------------------------------
def prepare_params(params):
    w1 = np.asarray(params["conv1_w"], np.float32)          # (32, 1, 5, 5)
    b1 = np.asarray(params["conv1_b"], np.float32)
    w2 = np.asarray(params["conv2_w"], np.float32)          # (64, 32, 5, 5)
    b2 = np.asarray(params["conv2_b"], np.float32)
    f1 = np.asarray(params["fc1_w"], np.float32)            # (512, 1024)
    bf1 = np.asarray(params["fc1_b"], np.float32)
    f2 = np.asarray(params["fc2_w"], np.float32)            # (10, 512)
    bf2 = np.asarray(params["fc2_b"], np.float32)

    # conv1 banded rhs: rows (kh*32 + w_in), cols (pw*384 + q*32 + c),
    # with pre-pool w_out = 2*q + pw.
    r1 = np.zeros((160, 768), np.float32)
    for kh in range(5):
        for kw in range(5):
            for wo in range(24):
                w_in = wo + kw
                q, pw = wo // 2, wo % 2
                col = pw * 384 + q * 32
                r1[kh * 32 + w_in, col:col + C1] = w1[:, 0, kh, kw]
    b1p = np.tile(b1, 12).reshape(1, 384)                   # lanes (q, c)

    # conv2 banded rhs per kh: rows (w_in*32 + ci), cols (pwo*256 + q*64 + co),
    # with wo = 2*q + pwo.
    w2b = np.zeros((5, 384, 512), np.float32)
    for kh in range(5):
        for kw in range(5):
            for wo in range(8):
                w_in = wo + kw
                q, pwo = wo // 2, wo % 2
                col = pwo * 256 + q * 64
                w2b[kh, w_in * 32:(w_in + 1) * 32, col:col + C2] = w2[:, :, kh, kw].T
    b2p = np.tile(b2, 4).reshape(1, 256)                    # lanes (q, co)

    # fc1: our row (h2*256 + q*64 + co) <-> torch flat index (co*16 + h2*4 + q)
    rows = np.arange(1024)
    co = rows % 64
    q = (rows // 64) % 4
    h2 = rows // 256
    wf1p = f1[:, co * 16 + h2 * 4 + q].T                    # (1024, 512)

    wf2p = np.zeros((512, NCLS_PAD), np.float32)
    wf2p[:, :NCLS] = f2.T
    bf2p = np.zeros((1, NCLS_PAD), np.float32)
    bf2p[0, :NCLS] = bf2

    bf16 = lambda a: jnp.asarray(a, jnp.bfloat16)
    return {
        "r1": bf16(r1), "b1": jnp.asarray(b1p),
        "w2b": bf16(w2b), "b2": jnp.asarray(b2p),
        "wf1": bf16(wf1p), "bf1": jnp.asarray(bf1.reshape(1, 512)),
        "wf2": bf16(wf2p), "bf2": jnp.asarray(bf2p),
    }


# ----------------------------------------------------------------------------
# Host-side input prep: row-im2col (5 kh-shifted rows lane-concatenated) and
# (tile, h, b) row ordering.  ~15 KB/image, negligible vs. kernel compute.
# ----------------------------------------------------------------------------
def _build_x5(x_nchw, n_pad):
    n = x_nchw.shape[0]
    x = x_nchw[:, 0].astype(jnp.float32)                    # (N, 28, 28)
    if n_pad != n:
        x = jnp.pad(x, ((0, n_pad - n), (0, 0), (0, 0)))
    x = jnp.pad(x, ((0, 0), (0, 0), (0, 4)))                # W 28 -> 32
    x5 = jnp.concatenate([x[:, kh:kh + 24, :] for kh in range(5)], axis=-1)
    t = n_pad // B_TILE                                     # (n_pad, 24, 160)
    x5 = x5.reshape(t, B_TILE, 24, 160).transpose(0, 2, 1, 3)
    return x5.reshape(t * 24 * B_TILE, 160).astype(jnp.bfloat16)


# ----------------------------------------------------------------------------
# Forward pass (matches torch CNN.forward for cfg.dataset == 'mnist')
# ----------------------------------------------------------------------------
def cnn_forward(prepped, x_nchw):
    n, cin, h, w = x_nchw.shape
    assert (cin, h, w) == (1, 28, 28), "only the MNIST config is implemented"
    t = (n + B_TILE - 1) // B_TILE
    n_pad = t * B_TILE
    x5 = _build_x5(x_nchw, n_pad)

    out = pl.pallas_call(
        _cnn_fused_kernel,
        out_shape=jax.ShapeDtypeStruct((n_pad, NCLS_PAD), jnp.float32),
        grid_spec=pltpu.PrefetchScalarGridSpec(
            num_scalar_prefetch=0,
            grid=(t,),
            in_specs=[
                pl.BlockSpec((24 * B_TILE, 160), lambda i: (i, 0)),   # x5
                pl.BlockSpec((160, 768), lambda i: (0, 0)),           # conv1 rhs
                pl.BlockSpec((1, 384), lambda i: (0, 0)),             # conv1 bias
                pl.BlockSpec((5, 384, 512), lambda i: (0, 0, 0)),     # conv2 rhs
                pl.BlockSpec((1, 256), lambda i: (0, 0)),             # conv2 bias
                pl.BlockSpec((1024, 512), lambda i: (0, 0)),          # fc1 w
                pl.BlockSpec((1, 512), lambda i: (0, 0)),             # fc1 b
                pl.BlockSpec((512, NCLS_PAD), lambda i: (0, 0)),      # fc2 w
                pl.BlockSpec((1, NCLS_PAD), lambda i: (0, 0)),        # fc2 b
            ],
            out_specs=pl.BlockSpec((B_TILE, NCLS_PAD), lambda i: (i, 0)),
            scratch_shapes=[
                pltpu.VMEM((24 * B_TILE, 768), jnp.float32),   # conv1 raw
                pltpu.VMEM((12 * B_TILE, 384), jnp.bfloat16),  # pooled conv1
                pltpu.VMEM((8 * B_TILE, 512), jnp.float32),    # conv2 acc
            ],
        ),
        compiler_params=pltpu.CompilerParams(
            dimension_semantics=("parallel",)),
    )(x5, prepped["r1"], prepped["b1"], prepped["w2b"], prepped["b2"],
      prepped["wf1"], prepped["bf1"], prepped["wf2"], prepped["bf2"])

    return out[:n, :NCLS]


# ----------------------------------------------------------------------------
# Parameters (deterministic, PyTorch-style uniform init shapes)
# ----------------------------------------------------------------------------
def init_params(key, in_channels=1, in_fc=1024, num_classes=10):
    ks = jax.random.split(key, 8)

    def u(k, shape, fan_in):
        bound = 1.0 / jnp.sqrt(jnp.float32(fan_in))
        return jax.random.uniform(k, shape, jnp.float32, -bound, bound)

    return {
        "conv1_w": u(ks[0], (32, in_channels, 5, 5), in_channels * 25),
        "conv1_b": u(ks[1], (32,), in_channels * 25),
        "conv2_w": u(ks[2], (64, 32, 5, 5), 32 * 25),
        "conv2_b": u(ks[3], (64,), 32 * 25),
        "fc1_w":   u(ks[4], (512, in_fc), in_fc),
        "fc1_b":   u(ks[5], (512,), in_fc),
        "fc2_w":   u(ks[6], (num_classes, 512), 512),
        "fc2_b":   u(ks[7], (num_classes,), 512),
    }


# ----------------------------------------------------------------------------
# Pure-JAX reference (sanity check only)
# ----------------------------------------------------------------------------
def reference_forward(params, x_nchw):
    def conv(x, w, b):
        y = jax.lax.conv_general_dilated(
            x, w, window_strides=(1, 1), padding="VALID",
            dimension_numbers=("NCHW", "OIHW", "NCHW"))
        return jax.nn.relu(y + b[None, :, None, None])

    def pool(x):
        return jax.lax.reduce_window(x, -jnp.inf, jax.lax.max,
                                     (1, 1, 2, 2), (1, 1, 2, 2), "VALID")

    x = pool(conv(x_nchw, params["conv1_w"], params["conv1_b"]))
    x = pool(conv(x, params["conv2_w"], params["conv2_b"]))
    x = x.reshape(x.shape[0], -1)
    x = jax.nn.relu(x @ params["fc1_w"].T + params["fc1_b"])
    return x @ params["fc2_w"].T + params["fc2_b"]


if __name__ == "__main__":
    key = jax.random.PRNGKey(0)
    kx, kp = jax.random.split(key)

    # MNIST-shaped synthetic input: batch=2, 1 channel, 28x28 (NCHW like torch)
    x = jax.random.normal(kx, (2, 1, 28, 28), jnp.float32)
    params = init_params(kp, in_channels=1, in_fc=1024, num_classes=NCLS)

    prepped = prepare_params(params)            # one-time weight repack
    fwd = jax.jit(cnn_forward)

    out = jax.block_until_ready(fwd(prepped, x))
    assert out.shape == (2, NCLS), out.shape

    ref = jax.block_until_ready(reference_forward(params, x))
    max_err = float(jnp.max(jnp.abs(out - ref)))
    # bf16 operands with f32 accumulation at every layer -> ~1e-2 abs error.
    assert max_err < 2.5e-2, f"mismatch vs reference: max abs diff = {max_err}"

    print("KERNEL_OK")
</pallas_src>

<mosaic_0001>
module attributes {stable_mosaic.version = 11 : i64} {
  func.func @_cnn_fused_kernel(%arg0: i32, %arg1: memref<768x160xbf16, #tpu.memory_space<vmem>>, %arg2: memref<160x768xbf16, #tpu.memory_space<vmem>>, %arg3: memref<1x384xf32, #tpu.memory_space<vmem>>, %arg4: memref<5x384x512xbf16, #tpu.memory_space<vmem>>, %arg5: memref<1x256xf32, #tpu.memory_space<vmem>>, %arg6: memref<1024x512xbf16, #tpu.memory_space<vmem>>, %arg7: memref<1x512xf32, #tpu.memory_space<vmem>>, %arg8: memref<512x128xbf16, #tpu.memory_space<vmem>>, %arg9: memref<1x128xf32, #tpu.memory_space<vmem>>, %arg10: memref<32x128xf32, #tpu.memory_space<vmem>>, %arg11: memref<768x768xf32, #tpu.memory_space<vmem>>, %arg12: memref<384x384xbf16, #tpu.memory_space<vmem>>, %arg13: memref<256x512xf32, #tpu.memory_space<vmem>>) attributes {dimension_semantics = [#tpu.dimension_semantics<parallel>], iteration_bounds = array<i64: 1>, scalar_prefetch = 0 : i64, scratch_operands = 3 : i64, tpu.core_type = #tpu.core_type<tc>, window_params = [{transform_indices = @transform_0, window_bounds = array<i64: 768, 160>}, {pipeline_mode = #tpu.pipeline_mode<synchronous>, transform_indices = @transform_1, window_bounds = array<i64: 160, 768>}, {pipeline_mode = #tpu.pipeline_mode<synchronous>, transform_indices = @transform_2, window_bounds = array<i64: 1, 384>}, {pipeline_mode = #tpu.pipeline_mode<synchronous>, transform_indices = @transform_3, window_bounds = array<i64: 5, 384, 512>}, {pipeline_mode = #tpu.pipeline_mode<synchronous>, transform_indices = @transform_4, window_bounds = array<i64: 1, 256>}, {pipeline_mode = #tpu.pipeline_mode<synchronous>, transform_indices = @transform_5, window_bounds = array<i64: 1024, 512>}, {pipeline_mode = #tpu.pipeline_mode<synchronous>, transform_indices = @transform_6, window_bounds = array<i64: 1, 512>}, {pipeline_mode = #tpu.pipeline_mode<synchronous>, transform_indices = @transform_7, window_bounds = array<i64: 512, 128>}, {pipeline_mode = #tpu.pipeline_mode<synchronous>, transform_indices = @transform_8, window_bounds = array<i64: 1, 128>}, {transform_indices = @transform_9, window_bounds = array<i64: 32, 128>}]} {
    %c0 = arith.constant 0 : index
    %c0_0 = arith.constant 0 : index
    %0 = vector.load %arg1[%c0, %c0_0] : memref<768x160xbf16, #tpu.memory_space<vmem>>, vector<768x160xbf16>
    %c0_1 = arith.constant 0 : index
    %c0_2 = arith.constant 0 : index
    %1 = vector.load %arg2[%c0_1, %c0_2] : memref<160x768xbf16, #tpu.memory_space<vmem>>, vector<160x768xbf16>
    %cst = arith.constant dense<0.000000e+00> : vector<768x768xf32>
    %2 = tpu.matmul %0, %1, %cst {dimension_numbers = #tpu.dot_dimension_numbers<[1], [0], [0], [1], [0, 0, 1, 1], [], []>} : vector<768x160xbf16>, vector<160x768xbf16>, vector<768x768xf32> -> vector<768x768xf32>
    %c0_3 = arith.constant 0 : index
    %c0_4 = arith.constant 0 : index
    %3 = vector.load %arg11[%c0_3, %c0_4] : memref<768x768xf32, #tpu.memory_space<vmem>>, vector<768x768xf32>
    tpu.vector_store %arg11[%c0_3, %c0_4], %2 {strides = array<i32>} : memref<768x768xf32, #tpu.memory_space<vmem>>, vector<768x768xf32>,
    %c0_5 = arith.constant 0 : index
    %c0_6 = arith.constant 0 : index
    %4 = vector.load %arg3[%c0_5, %c0_6] : memref<1x384xf32, #tpu.memory_space<vmem>>, vector<1x384xf32>
    %c0_7 = arith.constant 0 : index
    %c0_8 = arith.constant 0 : index
    %5 = vector.load %arg11[%c0_7, %c0_8] : memref<768x768xf32, #tpu.memory_space<vmem>>, vector<32x768xf32>
    %c32 = arith.constant 32 : index
    %c0_9 = arith.constant 0 : index
    %6 = vector.load %arg11[%c32, %c0_9] : memref<768x768xf32, #tpu.memory_space<vmem>>, vector<32x768xf32>
    %7 = arith.maximumf %5, %6 : vector<32x768xf32>
    %8 = vector.extract_strided_slice %7 {offsets = [0, 0], sizes = [32, 384], strides = [1, 1]} : vector<32x768xf32> to vector<32x384xf32>
    %9 = vector.extract_strided_slice %7 {offsets = [0, 384], sizes = [32, 384], strides = [1, 1]} : vector<32x768xf32> to vector<32x384xf32>
    %10 = arith.maximumf %8, %9 : vector<32x384xf32>
    %11 = vector.broadcast %4 : vector<1x384xf32> to vector<32x384xf32>
    %12 = arith.addf %10, %11 : vector<32x384xf32>
    %cst_10 = arith.constant 0.000000e+00 : f32
    %13 = vector.broadcast %cst_10 : f32 to vector<32x384xf32>
    %14 = arith.maximumf %12, %13 : vector<32x384xf32>
    %15 = arith.truncf %14 : vector<32x384xf32> to vector<32x384xbf16>
    %c0_11 = arith.constant 0 : index
    %c0_12 = arith.constant 0 : index
    %16 = vector.load %arg12[%c0_11, %c0_12] : memref<384x384xbf16, #tpu.memory_space<vmem>>, vector<32x384xbf16>
    tpu.vector_store %arg12[%c0_11, %c0_12], %15 {strides = array<i32>} : memref<384x384xbf16, #tpu.memory_space<vmem>>, vector<32x384xbf16>,
    %c64 = arith.constant 64 : index
    %c0_13 = arith.constant 0 : index
    %17 = vector.load %arg11[%c64, %c0_13] : memref<768x768xf32, #tpu.memory_space<vmem>>, vector<32x768xf32>
    %c96 = arith.constant 96 : index
    %c0_14 = arith.constant 0 : index
    %18 = vector.load %arg11[%c96, %c0_14] : memref<768x768xf32, #tpu.memory_space<vmem>>, vector<32x768xf32>
    %19 = arith.maximumf %17, %18 : vector<32x768xf32>
    %20 = vector.extract_strided_slice %19 {offsets = [0, 0], sizes = [32, 384], strides = [1, 1]} : vector<32x768xf32> to vector<32x384xf32>
    %21 = vector.extract_strided_slice %19 {offsets = [0, 384], sizes = [32, 384], strides = [1, 1]} : vector<32x768xf32> to vector<32x384xf32>
    %22 = arith.maximumf %20, %21 : vector<32x384xf32>
    %23 = vector.broadcast %4 : vector<1x384xf32> to vector<32x384xf32>
    %24 = arith.addf %22, %23 : vector<32x384xf32>
    %cst_15 = arith.constant 0.000000e+00 : f32
    %25 = vector.broadcast %cst_15 : f32 to vector<32x384xf32>
    %26 = arith.maximumf %24, %25 : vector<32x384xf32>
    %27 = arith.truncf %26 : vector<32x384xf32> to vector<32x384xbf16>
    %c32_16 = arith.constant 32 : index
    %c0_17 = arith.constant 0 : index
    %28 = vector.load %arg12[%c32_16, %c0_17] : memref<384x384xbf16, #tpu.memory_space<vmem>>, vector<32x384xbf16>
    tpu.vector_store %arg12[%c32_16, %c0_17], %27 {strides = array<i32>} : memref<384x384xbf16, #tpu.memory_space<vmem>>, vector<32x384xbf16>,
    %c128 = arith.constant 128 : index
    %c0_18 = arith.constant 0 : index
    %29 = vector.load %arg11[%c128, %c0_18] : memref<768x768xf32, #tpu.memory_space<vmem>>, vector<32x768xf32>
    %c160 = arith.constant 160 : index
    %c0_19 = arith.constant 0 : index
    %30 = vector.load %arg11[%c160, %c0_19] : memref<768x768xf32, #tpu.memory_space<vmem>>, vector<32x768xf32>
    %31 = arith.maximumf %29, %30 : vector<32x768xf32>
    %32 = vector.extract_strided_slice %31 {offsets = [0, 0], sizes = [32, 384], strides = [1, 1]} : vector<32x768xf32> to vector<32x384xf32>
    %33 = vector.extract_strided_slice %31 {offsets = [0, 384], sizes = [32, 384], strides = [1, 1]} : vector<32x768xf32> to vector<32x384xf32>
    %34 = arith.maximumf %32, %33 : vector<32x384xf32>
    %35 = vector.broadcast %4 : vector<1x384xf32> to vector<32x384xf32>
    %36 = arith.addf %34, %35 : vector<32x384xf32>
    %cst_20 = arith.constant 0.000000e+00 : f32
    %37 = vector.broadcast %cst_20 : f32 to vector<32x384xf32>
    %38 = arith.maximumf %36, %37 : vector<32x384xf32>
    %39 = arith.truncf %38 : vector<32x384xf32> to vector<32x384xbf16>
    %c64_21 = arith.constant 64 : index
    %c0_22 = arith.constant 0 : index
    %40 = vector.load %arg12[%c64_21, %c0_22] : memref<384x384xbf16, #tpu.memory_space<vmem>>, vector<32x384xbf16>
    tpu.vector_store %arg12[%c64_21, %c0_22], %39 {strides = array<i32>} : memref<384x384xbf16, #tpu.memory_space<vmem>>, vector<32x384xbf16>,
    %c192 = arith.constant 192 : index
    %c0_23 = arith.constant 0 : index
    %41 = vector.load %arg11[%c192, %c0_23] : memref<768x768xf32, #tpu.memory_space<vmem>>, vector<32x768xf32>
    %c224 = arith.constant 224 : index
    %c0_24 = arith.constant 0 : index
    %42 = vector.load %arg11[%c224, %c0_24] : memref<768x768xf32, #tpu.memory_space<vmem>>, vector<32x768xf32>
    %43 = arith.maximumf %41, %42 : vector<32x768xf32>
    %44 = vector.extract_strided_slice %43 {offsets = [0, 0], sizes = [32, 384], strides = [1, 1]} : vector<32x768xf32> to vector<32x384xf32>
    %45 = vector.extract_strided_slice %43 {offsets = [0, 384], sizes = [32, 384], strides = [1, 1]} : vector<32x768xf32> to vector<32x384xf32>
    %46 = arith.maximumf %44, %45 : vector<32x384xf32>
    %47 = vector.broadcast %4 : vector<1x384xf32> to vector<32x384xf32>
    %48 = arith.addf %46, %47 : vector<32x384xf32>
    %cst_25 = arith.constant 0.000000e+00 : f32
    %49 = vector.broadcast %cst_25 : f32 to vector<32x384xf32>
    %50 = arith.maximumf %48, %49 : vector<32x384xf32>
    %51 = arith.truncf %50 : vector<32x384xf32> to vector<32x384xbf16>
    %c96_26 = arith.constant 96 : index
    %c0_27 = arith.constant 0 : index
    %52 = vector.load %arg12[%c96_26, %c0_27] : memref<384x384xbf16, #tpu.memory_space<vmem>>, vector<32x384xbf16>
    tpu.vector_store %arg12[%c96_26, %c0_27], %51 {strides = array<i32>} : memref<384x384xbf16, #tpu.memory_space<vmem>>, vector<32x384xbf16>,
    %c256 = arith.constant 256 : index
    %c0_28 = arith.constant 0 : index
    %53 = vector.load %arg11[%c256, %c0_28] : memref<768x768xf32, #tpu.memory_space<vmem>>, vector<32x768xf32>
    %c288 = arith.constant 288 : index
    %c0_29 = arith.constant 0 : index
    %54 = vector.load %arg11[%c288, %c0_29] : memref<768x768xf32, #tpu.memory_space<vmem>>, vector<32x768xf32>
    %55 = arith.maximumf %53, %54 : vector<32x768xf32>
    %56 = vector.extract_strided_slice %55 {offsets = [0, 0], sizes = [32, 384], strides = [1, 1]} : vector<32x768xf32> to vector<32x384xf32>
    %57 = vector.extract_strided_slice %55 {offsets = [0, 384], sizes = [32, 384], strides = [1, 1]} : vector<32x768xf32> to vector<32x384xf32>
    %58 = arith.maximumf %56, %57 : vector<32x384xf32>
    %59 = vector.broadcast %4 : vector<1x384xf32> to vector<32x384xf32>
    %60 = arith.addf %58, %59 : vector<32x384xf32>
    %cst_30 = arith.constant 0.000000e+00 : f32
    %61 = vector.broadcast %cst_30 : f32 to vector<32x384xf32>
    %62 = arith.maximumf %60, %61 : vector<32x384xf32>
    %63 = arith.truncf %62 : vector<32x384xf32> to vector<32x384xbf16>
    %c128_31 = arith.constant 128 : index
    %c0_32 = arith.constant 0 : index
    %64 = vector.load %arg12[%c128_31, %c0_32] : memref<384x384xbf16, #tpu.memory_space<vmem>>, vector<32x384xbf16>
    tpu.vector_store %arg12[%c128_31, %c0_32], %63 {strides = array<i32>} : memref<384x384xbf16, #tpu.memory_space<vmem>>, vector<32x384xbf16>,
    %c320 = arith.constant 320 : index
    %c0_33 = arith.constant 0 : index
    %65 = vector.load %arg11[%c320, %c0_33] : memref<768x768xf32, #tpu.memory_space<vmem>>, vector<32x768xf32>
    %c352 = arith.constant 352 : index
    %c0_34 = arith.constant 0 : index
    %66 = vector.load %arg11[%c352, %c0_34] : memref<768x768xf32, #tpu.memory_space<vmem>>, vector<32x768xf32>
    %67 = arith.maximumf %65, %66 : vector<32x768xf32>
    %68 = vector.extract_strided_slice %67 {offsets = [0, 0], sizes = [32, 384], strides = [1, 1]} : vector<32x768xf32> to vector<32x384xf32>
    %69 = vector.extract_strided_slice %67 {offsets = [0, 384], sizes = [32, 384], strides = [1, 1]} : vector<32x768xf32> to vector<32x384xf32>
    %70 = arith.maximumf %68, %69 : vector<32x384xf32>
    %71 = vector.broadcast %4 : vector<1x384xf32> to vector<32x384xf32>
    %72 = arith.addf %70, %71 : vector<32x384xf32>
    %cst_35 = arith.constant 0.000000e+00 : f32
    %73 = vector.broadcast %cst_35 : f32 to vector<32x384xf32>
    %74 = arith.maximumf %72, %73 : vector<32x384xf32>
    %75 = arith.truncf %74 : vector<32x384xf32> to vector<32x384xbf16>
    %c160_36 = arith.constant 160 : index
    %c0_37 = arith.constant 0 : index
    %76 = vector.load %arg12[%c160_36, %c0_37] : memref<384x384xbf16, #tpu.memory_space<vmem>>, vector<32x384xbf16>
    tpu.vector_store %arg12[%c160_36, %c0_37], %75 {strides = array<i32>} : memref<384x384xbf16, #tpu.memory_space<vmem>>, vector<32x384xbf16>,
    %c384 = arith.constant 384 : index
    %c0_38 = arith.constant 0 : index
    %77 = vector.load %arg11[%c384, %c0_38] : memref<768x768xf32, #tpu.memory_space<vmem>>, vector<32x768xf32>
    %c416 = arith.constant 416 : index
    %c0_39 = arith.constant 0 : index
    %78 = vector.load %arg11[%c416, %c0_39] : memref<768x768xf32, #tpu.memory_space<vmem>>, vector<32x768xf32>
    %79 = arith.maximumf %77, %78 : vector<32x768xf32>
    %80 = vector.extract_strided_slice %79 {offsets = [0, 0], sizes = [32, 384], strides = [1, 1]} : vector<32x768xf32> to vector<32x384xf32>
    %81 = vector.extract_strided_slice %79 {offsets = [0, 384], sizes = [32, 384], strides = [1, 1]} : vector<32x768xf32> to vector<32x384xf32>
    %82 = arith.maximumf %80, %81 : vector<32x384xf32>
    %83 = vector.broadcast %4 : vector<1x384xf32> to vector<32x384xf32>
    %84 = arith.addf %82, %83 : vector<32x384xf32>
    %cst_40 = arith.constant 0.000000e+00 : f32
    %85 = vector.broadcast %cst_40 : f32 to vector<32x384xf32>
    %86 = arith.maximumf %84, %85 : vector<32x384xf32>
    %87 = arith.truncf %86 : vector<32x384xf32> to vector<32x384xbf16>
    %c192_41 = arith.constant 192 : index
    %c0_42 = arith.constant 0 : index
    %88 = vector.load %arg12[%c192_41, %c0_42] : memref<384x384xbf16, #tpu.memory_space<vmem>>, vector<32x384xbf16>
    tpu.vector_store %arg12[%c192_41, %c0_42], %87 {strides = array<i32>} : memref<384x384xbf16, #tpu.memory_space<vmem>>, vector<32x384xbf16>,
    %c448 = arith.constant 448 : index
    %c0_43 = arith.constant 0 : index
    %89 = vector.load %arg11[%c448, %c0_43] : memref<768x768xf32, #tpu.memory_space<vmem>>, vector<32x768xf32>
    %c480 = arith.constant 480 : index
    %c0_44 = arith.constant 0 : index
    %90 = vector.load %arg11[%c480, %c0_44] : memref<768x768xf32, #tpu.memory_space<vmem>>, vector<32x768xf32>
    %91 = arith.maximumf %89, %90 : vector<32x768xf32>
    %92 = vector.extract_strided_slice %91 {offsets = [0, 0], sizes = [32, 384], strides = [1, 1]} : vector<32x768xf32> to vector<32x384xf32>
    %93 = vector.extract_strided_slice %91 {offsets = [0, 384], sizes = [32, 384], strides = [1, 1]} : vector<32x768xf32> to vector<32x384xf32>
    %94 = arith.maximumf %92, %93 : vector<32x384xf32>
    %95 = vector.broadcast %4 : vector<1x384xf32> to vector<32x384xf32>
    %96 = arith.addf %94, %95 : vector<32x384xf32>
    %cst_45 = arith.constant 0.000000e+00 : f32
    %97 = vector.broadcast %cst_45 : f32 to vector<32x384xf32>
    %98 = arith.maximumf %96, %97 : vector<32x384xf32>
    %99 = arith.truncf %98 : vector<32x384xf32> to vector<32x384xbf16>
    %c224_46 = arith.constant 224 : index
    %c0_47 = arith.constant 0 : index
    %100 = vector.load %arg12[%c224_46, %c0_47] : memref<384x384xbf16, #tpu.memory_space<vmem>>, vector<32x384xbf16>
    tpu.vector_store %arg12[%c224_46, %c0_47], %99 {strides = array<i32>} : memref<384x384xbf16, #tpu.memory_space<vmem>>, vector<32x384xbf16>,
    %c512 = arith.constant 512 : index
    %c0_48 = arith.constant 0 : index
    %101 = vector.load %arg11[%c512, %c0_48] : memref<768x768xf32, #tpu.memory_space<vmem>>, vector<32x768xf32>
    %c544 = arith.constant 544 : index
    %c0_49 = arith.constant 0 : index
    %102 = vector.load %arg11[%c544, %c0_49] : memref<768x768xf32, #tpu.memory_space<vmem>>, vector<32x768xf32>
    %103 = arith.maximumf %101, %102 : vector<32x768xf32>
    %104 = vector.extract_strided_slice %103 {offsets = [0, 0], sizes = [32, 384], strides = [1, 1]} : vector<32x768xf32> to vector<32x384xf32>
    %105 = vector.extract_strided_slice %103 {offsets = [0, 384], sizes = [32, 384], strides = [1, 1]} : vector<32x768xf32> to vector<32x384xf32>
    %106 = arith.maximumf %104, %105 : vector<32x384xf32>
    %107 = vector.broadcast %4 : vector<1x384xf32> to vector<32x384xf32>
    %108 = arith.addf %106, %107 : vector<32x384xf32>
    %cst_50 = arith.constant 0.000000e+00 : f32
    %109 = vector.broadcast %cst_50 : f32 to vector<32x384xf32>
    %110 = arith.maximumf %108, %109 : vector<32x384xf32>
    %111 = arith.truncf %110 : vector<32x384xf32> to vector<32x384xbf16>
    %c256_51 = arith.constant 256 : index
    %c0_52 = arith.constant 0 : index
    %112 = vector.load %arg12[%c256_51, %c0_52] : memref<384x384xbf16, #tpu.memory_space<vmem>>, vector<32x384xbf16>
    tpu.vector_store %arg12[%c256_51, %c0_52], %111 {strides = array<i32>} : memref<384x384xbf16, #tpu.memory_space<vmem>>, vector<32x384xbf16>,
    %c576 = arith.constant 576 : index
    %c0_53 = arith.constant 0 : index
    %113 = vector.load %arg11[%c576, %c0_53] : memref<768x768xf32, #tpu.memory_space<vmem>>, vector<32x768xf32>
    %c608 = arith.constant 608 : index
    %c0_54 = arith.constant 0 : index
    %114 = vector.load %arg11[%c608, %c0_54] : memref<768x768xf32, #tpu.memory_space<vmem>>, vector<32x768xf32>
    %115 = arith.maximumf %113, %114 : vector<32x768xf32>
    %116 = vector.extract_strided_slice %115 {offsets = [0, 0], sizes = [32, 384], strides = [1, 1]} : vector<32x768xf32> to vector<32x384xf32>
    %117 = vector.extract_strided_slice %115 {offsets = [0, 384], sizes = [32, 384], strides = [1, 1]} : vector<32x768xf32> to vector<32x384xf32>
    %118 = arith.maximumf %116, %117 : vector<32x384xf32>
    %119 = vector.broadcast %4 : vector<1x384xf32> to vector<32x384xf32>
    %120 = arith.addf %118, %119 : vector<32x384xf32>
    %cst_55 = arith.constant 0.000000e+00 : f32
    %121 = vector.broadcast %cst_55 : f32 to vector<32x384xf32>
    %122 = arith.maximumf %120, %121 : vector<32x384xf32>
    %123 = arith.truncf %122 : vector<32x384xf32> to vector<32x384xbf16>
    %c288_56 = arith.constant 288 : index
    %c0_57 = arith.constant 0 : index
    %124 = vector.load %arg12[%c288_56, %c0_57] : memref<384x384xbf16, #tpu.memory_space<vmem>>, vector<32x384xbf16>
    tpu.vector_store %arg12[%c288_56, %c0_57], %123 {strides = array<i32>} : memref<384x384xbf16, #tpu.memory_space<vmem>>, vector<32x384xbf16>,
    %c640 = arith.constant 640 : index
    %c0_58 = arith.constant 0 : index
    %125 = vector.load %arg11[%c640, %c0_58] : memref<768x768xf32, #tpu.memory_space<vmem>>, vector<32x768xf32>
    %c672 = arith.constant 672 : index
    %c0_59 = arith.constant 0 : index
    %126 = vector.load %arg11[%c672, %c0_59] : memref<768x768xf32, #tpu.memory_space<vmem>>, vector<32x768xf32>
    %127 = arith.maximumf %125, %126 : vector<32x768xf32>
    %128 = vector.extract_strided_slice %127 {offsets = [0, 0], sizes = [32, 384], strides = [1, 1]} : vector<32x768xf32> to vector<32x384xf32>
    %129 = vector.extract_strided_slice %127 {offsets = [0, 384], sizes = [32, 384], strides = [1, 1]} : vector<32x768xf32> to vector<32x384xf32>
    %130 = arith.maximumf %128, %129 : vector<32x384xf32>
    %131 = vector.broadcast %4 : vector<1x384xf32> to vector<32x384xf32>
    %132 = arith.addf %130, %131 : vector<32x384xf32>
    %cst_60 = arith.constant 0.000000e+00 : f32
    %133 = vector.broadcast %cst_60 : f32 to vector<32x384xf32>
    %134 = arith.maximumf %132, %133 : vector<32x384xf32>
    %135 = arith.truncf %134 : vector<32x384xf32> to vector<32x384xbf16>
    %c320_61 = arith.constant 320 : index
    %c0_62 = arith.constant 0 : index
    %136 = vector.load %arg12[%c320_61, %c0_62] : memref<384x384xbf16, #tpu.memory_space<vmem>>, vector<32x384xbf16>
    tpu.vector_store %arg12[%c320_61, %c0_62], %135 {strides = array<i32>} : memref<384x384xbf16, #tpu.memory_space<vmem>>, vector<32x384xbf16>,
    %c704 = arith.constant 704 : index
    %c0_63 = arith.constant 0 : index
    %137 = vector.load %arg11[%c704, %c0_63] : memref<768x768xf32, #tpu.memory_space<vmem>>, vector<32x768xf32>
    %c736 = arith.constant 736 : index
    %c0_64 = arith.constant 0 : index
    %138 = vector.load %arg11[%c736, %c0_64] : memref<768x768xf32, #tpu.memory_space<vmem>>, vector<32x768xf32>
    %139 = arith.maximumf %137, %138 : vector<32x768xf32>
    %140 = vector.extract_strided_slice %139 {offsets = [0, 0], sizes = [32, 384], strides = [1, 1]} : vector<32x768xf32> to vector<32x384xf32>
    %141 = vector.extract_strided_slice %139 {offsets = [0, 384], sizes = [32, 384], strides = [1, 1]} : vector<32x768xf32> to vector<32x384xf32>
    %142 = arith.maximumf %140, %141 : vector<32x384xf32>
    %143 = vector.broadcast %4 : vector<1x384xf32> to vector<32x384xf32>
    %144 = arith.addf %142, %143 : vector<32x384xf32>
    %cst_65 = arith.constant 0.000000e+00 : f32
    %145 = vector.broadcast %cst_65 : f32 to vector<32x384xf32>
    %146 = arith.maximumf %144, %145 : vector<32x384xf32>
    %147 = arith.truncf %146 : vector<32x384xf32> to vector<32x384xbf16>
    %c352_66 = arith.constant 352 : index
    %c0_67 = arith.constant 0 : index
    %148 = vector.load %arg12[%c352_66, %c0_67] : memref<384x384xbf16, #tpu.memory_space<vmem>>, vector<32x384xbf16>
    tpu.vector_store %arg12[%c352_66, %c0_67], %147 {strides = array<i32>} : memref<384x384xbf16, #tpu.memory_space<vmem>>, vector<32x384xbf16>,
    %c0_68 = arith.constant 0 : index
    %c0_69 = arith.constant 0 : index
    %149 = vector.load %arg12[%c0_68, %c0_69] : memref<384x384xbf16, #tpu.memory_space<vmem>>, vector<256x384xbf16>
    %c0_70 = arith.constant 0 : index
    %c0_71 = arith.constant 0 : index
    %c0_72 = arith.constant 0 : index
    %150 = vector.load %arg4[%c0_70, %c0_71, %c0_72] : memref<5x384x512xbf16, #tpu.memory_space<vmem>>, vector<1x384x512xbf16>
    %151 = vector.shape_cast %150 : vector<1x384x512xbf16> to vector<384x512xbf16>
    %cst_73 = arith.constant dense<0.000000e+00> : vector<256x512xf32>
    %152 = tpu.matmul %149, %151, %cst_73 {dimension_numbers = #tpu.dot_dimension_numbers<[1], [0], [0], [1], [0, 0, 1, 1], [], []>} : vector<256x384xbf16>, vector<384x512xbf16>, vector<256x512xf32> -> vector<256x512xf32>
    %c0_74 = arith.constant 0 : index
    %c0_75 = arith.constant 0 : index
    %153 = vector.load %arg13[%c0_74, %c0_75] : memref<256x512xf32, #tpu.memory_space<vmem>>, vector<256x512xf32>
    tpu.vector_store %arg13[%c0_74, %c0_75], %152 {strides = array<i32>} : memref<256x512xf32, #tpu.memory_space<vmem>>, vector<256x512xf32>,
    %c32_76 = arith.constant 32 : index
    %c0_77 = arith.constant 0 : index
    %154 = vector.load %arg12[%c32_76, %c0_77] : memref<384x384xbf16, #tpu.memory_space<vmem>>, vector<256x384xbf16>
    %c1 = arith.constant 1 : index
    %c0_78 = arith.constant 0 : index
    %c0_79 = arith.constant 0 : index
    %155 = vector.load %arg4[%c1, %c0_78, %c0_79] : memref<5x384x512xbf16, #tpu.memory_space<vmem>>, vector<1x384x512xbf16>
    %156 = vector.shape_cast %155 : vector<1x384x512xbf16> to vector<384x512xbf16>
    %cst_80 = arith.constant dense<0.000000e+00> : vector<256x512xf32>
    %157 = tpu.matmul %154, %156, %cst_80 {dimension_numbers = #tpu.dot_dimension_numbers<[1], [0], [0], [1], [0, 0, 1, 1], [], []>} : vector<256x384xbf16>, vector<384x512xbf16>, vector<256x512xf32> -> vector<256x512xf32>
    %c0_81 = arith.constant 0 : index
    %c0_82 = arith.constant 0 : index
    %158 = vector.load %arg13[%c0_81, %c0_82] : memref<256x512xf32, #tpu.memory_space<vmem>>, vector<256x512xf32>
    %159 = arith.addf %158, %157 : vector<256x512xf32>
    %c0_83 = arith.constant 0 : index
    %c0_84 = arith.constant 0 : index
    %160 = vector.load %arg13[%c0_83, %c0_84] : memref<256x512xf32, #tpu.memory_space<vmem>>, vector<256x512xf32>
    tpu.vector_store %arg13[%c0_83, %c0_84], %159 {strides = array<i32>} : memref<256x512xf32, #tpu.memory_space<vmem>>, vector<256x512xf32>,
    %c64_85 = arith.constant 64 : index
    %c0_86 = arith.constant 0 : index
    %161 = vector.load %arg12[%c64_85, %c0_86] : memref<384x384xbf16, #tpu.memory_space<vmem>>, vector<256x384xbf16>
    %c2 = arith.constant 2 : index
    %c0_87 = arith.constant 0 : index
    %c0_88 = arith.constant 0 : index
    %162 = vector.load %arg4[%c2, %c0_87, %c0_88] : memref<5x384x512xbf16, #tpu.memory_space<vmem>>, vector<1x384x512xbf16>
    %163 = vector.shape_cast %162 : vector<1x384x512xbf16> to vector<384x512xbf16>
    %cst_89 = arith.constant dense<0.000000e+00> : vector<256x512xf32>
    %164 = tpu.matmul %161, %163, %cst_89 {dimension_numbers = #tpu.dot_dimension_numbers<[1], [0], [0], [1], [0, 0, 1, 1], [], []>} : vector<256x384xbf16>, vector<384x512xbf16>, vector<256x512xf32> -> vector<256x512xf32>
    %c0_90 = arith.constant 0 : index
    %c0_91 = arith.constant 0 : index
    %165 = vector.load %arg13[%c0_90, %c0_91] : memref<256x512xf32, #tpu.memory_space<vmem>>, vector<256x512xf32>
    %166 = arith.addf %165, %164 : vector<256x512xf32>
    %c0_92 = arith.constant 0 : index
    %c0_93 = arith.constant 0 : index
    %167 = vector.load %arg13[%c0_92, %c0_93] : memref<256x512xf32, #tpu.memory_space<vmem>>, vector<256x512xf32>
    tpu.vector_store %arg13[%c0_92, %c0_93], %166 {strides = array<i32>} : memref<256x512xf32, #tpu.memory_space<vmem>>, vector<256x512xf32>,
    %c96_94 = arith.constant 96 : index
    %c0_95 = arith.constant 0 : index
    %168 = vector.load %arg12[%c96_94, %c0_95] : memref<384x384xbf16, #tpu.memory_space<vmem>>, vector<256x384xbf16>
    %c3 = arith.constant 3 : index
    %c0_96 = arith.constant 0 : index
    %c0_97 = arith.constant 0 : index
    %169 = vector.load %arg4[%c3, %c0_96, %c0_97] : memref<5x384x512xbf16, #tpu.memory_space<vmem>>, vector<1x384x512xbf16>
    %170 = vector.shape_cast %169 : vector<1x384x512xbf16> to vector<384x512xbf16>
    %cst_98 = arith.constant dense<0.000000e+00> : vector<256x512xf32>
    %171 = tpu.matmul %168, %170, %cst_98 {dimension_numbers = #tpu.dot_dimension_numbers<[1], [0], [0], [1], [0, 0, 1, 1], [], []>} : vector<256x384xbf16>, vector<384x512xbf16>, vector<256x512xf32> -> vector<256x512xf32>
    %c0_99 = arith.constant 0 : index
    %c0_100 = arith.constant 0 : index
    %172 = vector.load %arg13[%c0_99, %c0_100] : memref<256x512xf32, #tpu.memory_space<vmem>>, vector<256x512xf32>
    %173 = arith.addf %172, %171 : vector<256x512xf32>
    %c0_101 = arith.constant 0 : index
    %c0_102 = arith.constant 0 : index
    %174 = vector.load %arg13[%c0_101, %c0_102] : memref<256x512xf32, #tpu.memory_space<vmem>>, vector<256x512xf32>
    tpu.vector_store %arg13[%c0_101, %c0_102], %173 {strides = array<i32>} : memref<256x512xf32, #tpu.memory_space<vmem>>, vector<256x512xf32>,
    %c128_103 = arith.constant 128 : index
    %c0_104 = arith.constant 0 : index
    %175 = vector.load %arg12[%c128_103, %c0_104] : memref<384x384xbf16, #tpu.memory_space<vmem>>, vector<256x384xbf16>
    %c4 = arith.constant 4 : index
    %c0_105 = arith.constant 0 : index
    %c0_106 = arith.constant 0 : index
    %176 = vector.load %arg4[%c4, %c0_105, %c0_106] : memref<5x384x512xbf16, #tpu.memory_space<vmem>>, vector<1x384x512xbf16>
    %177 = vector.shape_cast %176 : vector<1x384x512xbf16> to vector<384x512xbf16>
    %cst_107 = arith.constant dense<0.000000e+00> : vector<256x512xf32>
    %178 = tpu.matmul %175, %177, %cst_107 {dimension_numbers = #tpu.dot_dimension_numbers<[1], [0], [0], [1], [0, 0, 1, 1], [], []>} : vector<256x384xbf16>, vector<384x512xbf16>, vector<256x512xf32> -> vector<256x512xf32>
    %c0_108 = arith.constant 0 : index
    %c0_109 = arith.constant 0 : index
    %179 = vector.load %arg13[%c0_108, %c0_109] : memref<256x512xf32, #tpu.memory_space<vmem>>, vector<256x512xf32>
    %180 = arith.addf %179, %178 : vector<256x512xf32>
    %c0_110 = arith.constant 0 : index
    %c0_111 = arith.constant 0 : index
    %181 = vector.load %arg13[%c0_110, %c0_111] : memref<256x512xf32, #tpu.memory_space<vmem>>, vector<256x512xf32>
    tpu.vector_store %arg13[%c0_110, %c0_111], %180 {strides = array<i32>} : memref<256x512xf32, #tpu.memory_space<vmem>>, vector<256x512xf32>,
    %c0_112 = arith.constant 0 : index
    %c0_113 = arith.constant 0 : index
    %182 = vector.load %arg5[%c0_112, %c0_113] : memref<1x256xf32, #tpu.memory_space<vmem>>, vector<1x256xf32>
    %c0_114 = arith.constant 0 : index
    %c0_115 = arith.constant 0 : index
    %183 = vector.load %arg13[%c0_114, %c0_115] : memref<256x512xf32, #tpu.memory_space<vmem>>, vector<32x512xf32>
    %c32_116 = arith.constant 32 : index
    %c0_117 = arith.constant 0 : index
    %184 = vector.load %arg13[%c32_116, %c0_117] : memref<256x512xf32, #tpu.memory_space<vmem>>, vector<32x512xf32>
    %185 = arith.maximumf %183, %184 : vector<32x512xf32>
    %186 = vector.extract_strided_slice %185 {offsets = [0, 0], sizes = [32, 256], strides = [1, 1]} : vector<32x512xf32> to vector<32x256xf32>
    %187 = vector.extract_strided_slice %185 {offsets = [0, 256], sizes = [32, 256], strides = [1, 1]} : vector<32x512xf32> to vector<32x256xf32>
    %188 = arith.maximumf %186, %187 : vector<32x256xf32>
    %189 = vector.broadcast %182 : vector<1x256xf32> to vector<32x256xf32>
    %190 = arith.addf %188, %189 : vector<32x256xf32>
    %cst_118 = arith.constant 0.000000e+00 : f32
    %191 = vector.broadcast %cst_118 : f32 to vector<32x256xf32>
    %192 = arith.maximumf %190, %191 : vector<32x256xf32>
    %193 = arith.truncf %192 : vector<32x256xf32> to vector<32x256xbf16>
    %c64_119 = arith.constant 64 : index
    %c0_120 = arith.constant 0 : index
    %194 = vector.load %arg13[%c64_119, %c0_120] : memref<256x512xf32, #tpu.memory_space<vmem>>, vector<32x512xf32>
    %c96_121 = arith.constant 96 : index
    %c0_122 = arith.constant 0 : index
    %195 = vector.load %arg13[%c96_121, %c0_122] : memref<256x512xf32, #tpu.memory_space<vmem>>, vector<32x512xf32>
    %196 = arith.maximumf %194, %195 : vector<32x512xf32>
    %197 = vector.extract_strided_slice %196 {offsets = [0, 0], sizes = [32, 256], strides = [1, 1]} : vector<32x512xf32> to vector<32x256xf32>
    %198 = vector.extract_strided_slice %196 {offsets = [0, 256], sizes = [32, 256], strides = [1, 1]} : vector<32x512xf32> to vector<32x256xf32>
    %199 = arith.maximumf %197, %198 : vector<32x256xf32>
    %200 = vector.broadcast %182 : vector<1x256xf32> to vector<32x256xf32>
    %201 = arith.addf %199, %200 : vector<32x256xf32>
    %cst_123 = arith.constant 0.000000e+00 : f32
    %202 = vector.broadcast %cst_123 : f32 to vector<32x256xf32>
    %203 = arith.maximumf %201, %202 : vector<32x256xf32>
    %204 = arith.truncf %203 : vector<32x256xf32> to vector<32x256xbf16>
    %c128_124 = arith.constant 128 : index
    %c0_125 = arith.constant 0 : index
    %205 = vector.load %arg13[%c128_124, %c0_125] : memref<256x512xf32, #tpu.memory_space<vmem>>, vector<32x512xf32>
    %c160_126 = arith.constant 160 : index
    %c0_127 = arith.constant 0 : index
    %206 = vector.load %arg13[%c160_126, %c0_127] : memref<256x512xf32, #tpu.memory_space<vmem>>, vector<32x512xf32>
    %207 = arith.maximumf %205, %206 : vector<32x512xf32>
    %208 = vector.extract_strided_slice %207 {offsets = [0, 0], sizes = [32, 256], strides = [1, 1]} : vector<32x512xf32> to vector<32x256xf32>
    %209 = vector.extract_strided_slice %207 {offsets = [0, 256], sizes = [32, 256], strides = [1, 1]} : vector<32x512xf32> to vector<32x256xf32>
    %210 = arith.maximumf %208, %209 : vector<32x256xf32>
    %211 = vector.broadcast %182 : vector<1x256xf32> to vector<32x256xf32>
    %212 = arith.addf %210, %211 : vector<32x256xf32>
    %cst_128 = arith.constant 0.000000e+00 : f32
    %213 = vector.broadcast %cst_128 : f32 to vector<32x256xf32>
    %214 = arith.maximumf %212, %213 : vector<32x256xf32>
    %215 = arith.truncf %214 : vector<32x256xf32> to vector<32x256xbf16>
    %c192_129 = arith.constant 192 : index
    %c0_130 = arith.constant 0 : index
    %216 = vector.load %arg13[%c192_129, %c0_130] : memref<256x512xf32, #tpu.memory_space<vmem>>, vector<32x512xf32>
    %c224_131 = arith.constant 224 : index
    %c0_132 = arith.constant 0 : index
    %217 = vector.load %arg13[%c224_131, %c0_132] : memref<256x512xf32, #tpu.memory_space<vmem>>, vector<32x512xf32>
    %218 = arith.maximumf %216, %217 : vector<32x512xf32>
    %219 = vector.extract_strided_slice %218 {offsets = [0, 0], sizes = [32, 256], strides = [1, 1]} : vector<32x512xf32> to vector<32x256xf32>
    %220 = vector.extract_strided_slice %218 {offsets = [0, 256], sizes = [32, 256], strides = [1, 1]} : vector<32x512xf32> to vector<32x256xf32>
    %221 = arith.maximumf %219, %220 : vector<32x256xf32>
    %222 = vector.broadcast %182 : vector<1x256xf32> to vector<32x256xf32>
    %223 = arith.addf %221, %222 : vector<32x256xf32>
    %cst_133 = arith.constant 0.000000e+00 : f32
    %224 = vector.broadcast %cst_133 : f32 to vector<32x256xf32>
    %225 = arith.maximumf %223, %224 : vector<32x256xf32>
    %226 = arith.truncf %225 : vector<32x256xf32> to vector<32x256xbf16>
    %227 = tpu.concatenate %193, %204, %215, %226 in 1 : vector<32x256xbf16>, vector<32x256xbf16>, vector<32x256xbf16>, vector<32x256xbf16> -> vector<32x1024xbf16>
    %c0_134 = arith.constant 0 : index
    %c0_135 = arith.constant 0 : index
    %228 = vector.load %arg6[%c0_134, %c0_135] : memref<1024x512xbf16, #tpu.memory_space<vmem>>, vector<1024x512xbf16>
    %cst_136 = arith.constant dense<0.000000e+00> : vector<32x512xf32>
    %229 = tpu.matmul %227, %228, %cst_136 {dimension_numbers = #tpu.dot_dimension_numbers<[1], [0], [0], [1], [0, 0, 1, 1], [], []>} : vector<32x1024xbf16>, vector<1024x512xbf16>, vector<32x512xf32> -> vector<32x512xf32>
    %c0_137 = arith.constant 0 : index
    %c0_138 = arith.constant 0 : index
    %230 = vector.load %arg7[%c0_137, %c0_138] : memref<1x512xf32, #tpu.memory_space<vmem>>, vector<1x512xf32>
    %231 = vector.broadcast %230 : vector<1x512xf32> to vector<32x512xf32>
    %232 = arith.addf %229, %231 : vector<32x512xf32>
    %cst_139 = arith.constant 0.000000e+00 : f32
    %233 = vector.broadcast %cst_139 : f32 to vector<32x512xf32>
    %234 = arith.maximumf %232, %233 : vector<32x512xf32>
    %235 = arith.truncf %234 : vector<32x512xf32> to vector<32x512xbf16>
    %c0_140 = arith.constant 0 : index
    %c0_141 = arith.constant 0 : index
    %236 = vector.load %arg8[%c0_140, %c0_141] : memref<512x128xbf16, #tpu.memory_space<vmem>>, vector<512x128xbf16>
    %cst_142 = arith.constant dense<0.000000e+00> : vector<32x128xf32>
    %237 = tpu.matmul %235, %236, %cst_142 {dimension_numbers = #tpu.dot_dimension_numbers<[1], [0], [0], [1], [0, 0, 1, 1], [], []>} : vector<32x512xbf16>, vector<512x128xbf16>, vector<32x128xf32> -> vector<32x128xf32>
    %c0_143 = arith.constant 0 : index
    %c0_144 = arith.constant 0 : index
    %238 = vector.load %arg9[%c0_143, %c0_144] : memref<1x128xf32, #tpu.memory_space<vmem>>, vector<1x128xf32>
    %239 = vector.broadcast %238 : vector<1x128xf32> to vector<32x128xf32>
    %240 = arith.addf %237, %239 : vector<32x128xf32>
    %c0_145 = arith.constant 0 : index
    %c0_146 = arith.constant 0 : index
    %241 = vector.load %arg10[%c0_145, %c0_146] : memref<32x128xf32, #tpu.memory_space<vmem>>, vector<32x128xf32>
    tpu.vector_store %arg10[%c0_145, %c0_146], %240 {strides = array<i32>} : memref<32x128xf32, #tpu.memory_space<vmem>>, vector<32x128xf32>,
    return
  }
  func.func @transform_0(%arg0: i32) -> (i32, i32) {
    %c0_i32 = arith.constant 0 : i32
    %c0_i32_0 = arith.constant 0 : i32
    return %arg0, %c0_i32 : i32, i32
  }
  func.func @transform_1(%arg0: i32) -> (i32, i32) {
    %c0_i32 = arith.constant 0 : i32
    %c0_i32_0 = arith.constant 0 : i32
    %c0_i32_1 = arith.constant 0 : i32
    return %c0_i32, %c0_i32_0 : i32, i32
  }
  func.func @transform_2(%arg0: i32) -> (i32, i32) {
    %c0_i32 = arith.constant 0 : i32
    %c0_i32_0 = arith.constant 0 : i32
    %c0_i32_1 = arith.constant 0 : i32
    return %c0_i32, %c0_i32_0 : i32, i32
  }
  func.func @transform_3(%arg0: i32) -> (i32, i32, i32) {
    %c0_i32 = arith.constant 0 : i32
    %c0_i32_0 = arith.constant 0 : i32
    %c0_i32_1 = arith.constant 0 : i32
    %c0_i32_2 = arith.constant 0 : i32
    return %c0_i32, %c0_i32_0, %c0_i32_1 : i32, i32, i32
  }
  func.func @transform_4(%arg0: i32) -> (i32, i32) {
    %c0_i32 = arith.constant 0 : i32
    %c0_i32_0 = arith.constant 0 : i32
    %c0_i32_1 = arith.constant 0 : i32
    return %c0_i32, %c0_i32_0 : i32, i32
  }
  func.func @transform_5(%arg0: i32) -> (i32, i32) {
    %c0_i32 = arith.constant 0 : i32
    %c0_i32_0 = arith.constant 0 : i32
    %c0_i32_1 = arith.constant 0 : i32
    return %c0_i32, %c0_i32_0 : i32, i32
  }
  func.func @transform_6(%arg0: i32) -> (i32, i32) {
    %c0_i32 = arith.constant 0 : i32
    %c0_i32_0 = arith.constant 0 : i32
    %c0_i32_1 = arith.constant 0 : i32
    return %c0_i32, %c0_i32_0 : i32, i32
  }
  func.func @transform_7(%arg0: i32) -> (i32, i32) {
    %c0_i32 = arith.constant 0 : i32
    %c0_i32_0 = arith.constant 0 : i32
    %c0_i32_1 = arith.constant 0 : i32
    return %c0_i32, %c0_i32_0 : i32, i32
  }
  func.func @transform_8(%arg0: i32) -> (i32, i32) {
    %c0_i32 = arith.constant 0 : i32
    %c0_i32_0 = arith.constant 0 : i32
    %c0_i32_1 = arith.constant 0 : i32
    return %c0_i32, %c0_i32_0 : i32, i32
  }
  func.func @transform_9(%arg0: i32) -> (i32, i32) {
    %c0_i32 = arith.constant 0 : i32
    %c0_i32_0 = arith.constant 0 : i32
    return %arg0, %c0_i32 : i32, i32
  }
}

</mosaic_0001>

<bundles_post_ra>
// kernel: cnn_forward.1
= control target key start
LH: loop header
LB: loop body
LE: loop exit
PB: predicated region body
PF: predicated region fallthrough
CT: control target
= control target key end

     0   :  { %vm921_vm0 = vcmask 261120   ;;  %s27055_s1 = inlined_call_operand.vmem [shape: bf16[160,768], index: 1, kind: input, shape index: {}]   ;;  %s27056_s0 = inlined_call_operand.vmem [shape: bf16[768,160], index: 0, kind: input, shape index: {}]   ;;  %s27057_s2 = inlined_call_operand.vmem [shape: f32[1,384], index: 2, kind: input, shape index: {}]   ;;  %s27058_s3 = inlined_call_operand.vmem [shape: bf16[5,384,512], index: 3, kind: input, shape index: {}]   ;;  %s27059_s5 = inlined_call_operand.vmem [shape: bf16[1024,512], index: 5, kind: input, shape index: {}]   ;;  %s27060_s4 = inlined_call_operand.vmem [shape: f32[1,256], index: 4, kind: input, shape index: {}]   ;;  %s27061_s7 = inlined_call_operand.vmem [shape: bf16[512,128], index: 7, kind: input, shape index: {}]   ;;  %s27062_s6 = inlined_call_operand.vmem [shape: f32[1,512], index: 6, kind: input, shape index: {}]   ;;  %s27063_s8 = inlined_call_operand.vmem [shape: f32[1,128], index: 8, kind: input, shape index: {}]   ;;  %s27064_s9 = inlined_call_operand.vmem [shape: f32[32,128], index: 9, kind: output, shape index: {}]  }
   0x1   :  { %v18719_v0 = vld [vmem:[%s27055_s1 + $0x4] ss:$24 sps:$4 sm:$0xff]   ;;  %v18721_v1 = vld [vmem:[%s27055_s1] ss:$24 sps:$4 sm:$0xff]   ;;  %v18722_v2 = vld [vmem:[%s27055_s1 + $0x34] ss:$24 sps:$4 sm:$0xff]  }
   0x2   :  { %1066 = vmatprep.subr.bf16.mxu0 %v18719_v0  ;;  %v18724_v3 = vld [vmem:[%s27055_s1 + $0x30] ss:$24 sps:$4 sm:$0xff]   ;;  %v18725_v4 = vld [vmem:[%s27055_s1 + $0x64] ss:$24 sps:$4 sm:$0xff]   ;;  %v18727_v5 = vld [vmem:[%s27055_s1 + $0x60] ss:$24 sps:$4 sm:$0xff]  }
   0x3   :  { %1067 = vmatpush1.bf16.msra.mxu0 %v18721_v1  ;;  %v18728_v6 = vld [vmem:[%s27055_s1 + $0x94] ss:$24 sps:$4 sm:$0xff]   ;;  %v18730_v7 = vld [vmem:[%s27055_s1 + $0x90] ss:$24 sps:$4 sm:$0xff]   ;;  %v18731_v8 = vld [vmem:[%s27055_s1 + $0xc4] ss:$24 sps:$4 sm:$0xff]  }
   0x4   :  { %1068 = vmatprep.subr.bf16.mxu0 %v18722_v2  ;;  %v18749_v9 = vld [vmem:[%s27056_s0 + $0x4] ss:$8 sps:$4 sm:$0xff]   ;;  %v18733_v10 = vld [vmem:[%s27055_s1 + $0xc0] ss:$24 sps:$4 sm:$0xff]   ;;  %v18736_v12 = vld [vmem:[%s27055_s1 + $0xf0] ss:$24 sps:$4 sm:$0xff]  }
   0x5   :  { %v18734_v11 = vld [vmem:[%s27055_s1 + $0xf4] ss:$24 sps:$4 sm:$0xff]   ;;  %16133 = vmatprep.mubr.msk.bf16.mxu0 %vm921_vm0, %v18749_v9  ;;  %v18737_v13 = vld [vmem:[%s27055_s1 + $0x124] ss:$24 sps:$4 sm:$0xff]   ;;  %v18739_v14 = vld [vmem:[%s27055_s1 + $0x120] ss:$24 sps:$4 sm:$0xff]  }
   0x6   :  { %v18740_v15 = vld [vmem:[%s27055_s1 + $0x154] ss:$24 sps:$4 sm:$0xff]   ;;  %v18742_v16 = vld [vmem:[%s27055_s1 + $0x150] ss:$24 sps:$4 sm:$0xff]   ;;  %v18743_v17 = vld [vmem:[%s27055_s1 + $0x184] ss:$24 sps:$4 sm:$0xff]  }
   0x7   :  { %1069 = vmatpush1.bf16.msra.mxu0 %v18724_v3  ;;  %v18745_v18 = vld [vmem:[%s27055_s1 + $0x180] ss:$24 sps:$4 sm:$0xff]   ;;  %v18746_v19 = vld [vmem:[%s27055_s1 + $0x1b4] ss:$24 sps:$4 sm:$0xff]   ;;  %v18748_v20 = vld [vmem:[%s27055_s1 + $0x1b0] ss:$24 sps:$4 sm:$0xff]  }
   0x8   :  { %1070 = vmatprep.subr.bf16.mxu0 %v18725_v4  ;;  %v18754_v21 = vld [vmem:[%s27055_s1 + $0xc] ss:$24 sps:$4 sm:$0xff]   ;;  %v20323_v22 = vld [vmem:[%s27056_s0] ss:$8 sps:$4 sm:$0xff]   ;;  %v20331_v24 = vld [vmem:[%s27056_s0 + $0x14] ss:$8 sps:$4 sm:$0xff]  }
   0x9   :  { %v18752_v23 = vld [vmem:[%s27055_s1 + $0x8] ss:$24 sps:$4 sm:$0xff]   ;;  %v18771_v25 = vld [vmem:[%s27055_s1 + $0x3c] ss:$24 sps:$4 sm:$0xff]   ;;  %v18769_v26 = vld [vmem:[%s27055_s1 + $0x38] ss:$24 sps:$4 sm:$0xff]  }
   0xa   :  { %v18787_v27 = vld [vmem:[%s27055_s1 + $0x6c] ss:$24 sps:$4 sm:$0xff]   ;;  %v20348_v28 = vld [vmem:[%s27056_s0 + $0x10] ss:$8 sps:$4 sm:$0xff]   ;;  %v18785_v30 = vld [vmem:[%s27055_s1 + $0x68] ss:$24 sps:$4 sm:$0xff]  }
   0xb   :  { %1071 = vmatpush1.bf16.msra.mxu0 %v18727_v5  ;;  %v20353_v29 = vld [vmem:[%s27056_s0 + $0x24] ss:$8 sps:$4 sm:$0xff]   ;;  %v18805_v31 = vld [vmem:[%s27055_s1 + $0x9c] ss:$24 sps:$4 sm:$0xff]   ;;  %v18803_v32 = vld [vmem:[%s27055_s1 + $0x98] ss:$24 sps:$4 sm:$0xff]  }
   0xc   :  { %1072 = vmatprep.subr.bf16.mxu0 %v18728_v6  ;;  %v20370_v33 = vld [vmem:[%s27056_s0 + $0x20] ss:$8 sps:$4 sm:$0xff]   ;;  %v20375_v34 = vld [vmem:[%s27056_s0 + $0x34] ss:$8 sps:$4 sm:$0xff]   ;;  %v20383_v35 = vld [vmem:[%s27056_s0 + $0x30] ss:$8 sps:$4 sm:$0xff]  }
   0xd   :  { %v20388_v36 = vld [vmem:[%s27056_s0 + $0x44] ss:$8 sps:$4 sm:$0xff]   ;;  %v18821_v37 = vld [vmem:[%s27055_s1 + $0xc8] ss:$24 sps:$4 sm:$0xff]   ;;  %v20407_v40 = vld [vmem:[%s27056_s0 + $0x54] ss:$8 sps:$4 sm:$0xff]  }
   0xe   :  { %v18823_v38 = vld [vmem:[%s27055_s1 + $0xcc] ss:$24 sps:$4 sm:$0xff]   ;;  %v20402_v39 = vld [vmem:[%s27056_s0 + $0x40] ss:$8 sps:$4 sm:$0xff]   ;;  %v20415_v41 = vld [vmem:[%s27056_s0 + $0x50] ss:$8 sps:$4 sm:$0xff]  }
   0xf   :  { %1073 = vmatpush1.bf16.msra.mxu0 %v18730_v7  ;;  %v20420_v42 = vld [vmem:[%s27056_s0 + $0x64] ss:$8 sps:$4 sm:$0xff]   ;;  %v20428_v43 = vld [vmem:[%s27056_s0 + $0x60] ss:$8 sps:$4 sm:$0xff]   ;;  %v20433_v44 = vld [vmem:[%s27056_s0 + $0x74] ss:$8 sps:$4 sm:$0xff]  }
  0x10   :  { %1074 = vmatprep.subr.bf16.mxu0 %v18731_v8  ;;  %v20441_v45 = vld [vmem:[%s27056_s0 + $0x70] ss:$8 sps:$4 sm:$0xff]   ;;  %v20446_v46 = vld [vmem:[%s27056_s0 + $0x84] ss:$8 sps:$4 sm:$0xff]   ;;  %v20454_v47 = vld [vmem:[%s27056_s0 + $0x80] ss:$8 sps:$4 sm:$0xff]  }
  0x11   :  { %v20459_v48 = vld [vmem:[%s27056_s0 + $0x94] ss:$8 sps:$4 sm:$0xff]   ;;  %v18839_v49 = vld [vmem:[%s27055_s1 + $0xf8] ss:$24 sps:$4 sm:$0xff]   ;;  %v20478_v52 = vld [vmem:[%s27056_s0 + $0xa4] ss:$8 sps:$4 sm:$0xff]  }
  0x12   :  { %v18841_v50 = vld [vmem:[%s27055_s1 + $0xfc] ss:$24 sps:$4 sm:$0xff]   ;;  %v20473_v51 = vld [vmem:[%s27056_s0 + $0x90] ss:$8 sps:$4 sm:$0xff]   ;;  %v20486_v53 = vld [vmem:[%s27056_s0 + $0xa0] ss:$8 sps:$4 sm:$0xff]  }
  0x13   :  { %1075 = vmatpush1.bf16.msra.mxu0 %v18733_v10  ;;  %v20491_v54 = vld [vmem:[%s27056_s0 + $0xb4] ss:$8 sps:$4 sm:$0xff]   ;;  %v20499_v55 = vld [vmem:[%s27056_s0 + $0xb0] ss:$8 sps:$4 sm:$0xff]   ;;  %v20504_v56 = vld [vmem:[%s27056_s0 + $0xc4] ss:$8 sps:$4 sm:$0xff]  }
  0x14   :  { %1076 = vmatprep.subr.bf16.mxu0 %v18734_v11  ;;  %v20512_v57 = vld [vmem:[%s27056_s0 + $0xc0] ss:$8 sps:$4 sm:$0xff]   ;;  %v20517_v58 = vld [vmem:[%s27056_s0 + $0xd4] ss:$8 sps:$4 sm:$0xff]   ;;  %v20525_v59 = vld [vmem:[%s27056_s0 + $0xd0] ss:$8 sps:$4 sm:$0xff]  }
  0x15   :  { %v20530_v60 = vld [vmem:[%s27056_s0 + $0xe4] ss:$8 sps:$4 sm:$0xff]   ;;  %v18856_v61 = vld [vmem:[%s27055_s1 + $0x128] ss:$24 sps:$4 sm:$0xff]   ;;  %v20549_v0 = vld [vmem:[%s27056_s0 + $0xf4] ss:$8 sps:$4 sm:$0xff]  }
  0x16   :  { %v18858_v62 = vld [vmem:[%s27055_s1 + $0x12c] ss:$24 sps:$4 sm:$0xff]   ;;  %v20544_v63 = vld [vmem:[%s27056_s0 + $0xe0] ss:$8 sps:$4 sm:$0xff]   ;;  %v20557_v1 = vld [vmem:[%s27056_s0 + $0xf0] ss:$8 sps:$4 sm:$0xff]  }
  0x17   :  { %1077 = vmatpush1.bf16.msra.mxu0 %v18736_v12  ;;  %v20562_v2 = vld [vmem:[%s27056_s0 + $0x104] ss:$8 sps:$4 sm:$0xff]   ;;  %v20570_v3 = vld [vmem:[%s27056_s0 + $0x100] ss:$8 sps:$4 sm:$0xff]   ;;  %v20575_v4 = vld [vmem:[%s27056_s0 + $0x114] ss:$8 sps:$4 sm:$0xff]  }
  0x18   :  { %1078 = vmatprep.subr.bf16.mxu0 %v18737_v13  ;;  %v20583_v5 = vld [vmem:[%s27056_s0 + $0x110] ss:$8 sps:$4 sm:$0xff]   ;;  %v20588_v6 = vld [vmem:[%s27056_s0 + $0x124] ss:$8 sps:$4 sm:$0xff]   ;;  %v20596_v7 = vld [vmem:[%s27056_s0 + $0x120] ss:$8 sps:$4 sm:$0xff]  }
  0x19   :  { %v20601_v8 = vld [vmem:[%s27056_s0 + $0x134] ss:$8 sps:$4 sm:$0xff]   ;;  %v18872_v9 = vld [vmem:[%s27055_s1 + $0x158] ss:$24 sps:$4 sm:$0xff]   ;;  %v20620_v12 = vld [vmem:[%s27056_s0 + $0x144] ss:$8 sps:$4 sm:$0xff]  }
  0x1a   :  { %v18874_v10 = vld [vmem:[%s27055_s1 + $0x15c] ss:$24 sps:$4 sm:$0xff]   ;;  %v20615_v11 = vld [vmem:[%s27056_s0 + $0x130] ss:$8 sps:$4 sm:$0xff]   ;;  %v20628_v13 = vld [vmem:[%s27056_s0 + $0x140] ss:$8 sps:$4 sm:$0xff]  }
  0x1b   :  { %1079 = vmatpush1.bf16.msra.mxu0 %v18739_v14  ;;  %v20633_v14 = vld [vmem:[%s27056_s0 + $0x154] ss:$8 sps:$4 sm:$0xff]  }
  0x1c   :  { %1080 = vmatprep.subr.bf16.mxu0 %v18740_v15  ;;  %v20641_v15 = vld [vmem:[%s27056_s0 + $0x150] ss:$8 sps:$4 sm:$0xff]  }
  0x1f   :  { %1081 = vmatpush1.bf16.msra.mxu0 %v18742_v16  ;;  %v20646_v16 = vld [vmem:[%s27056_s0 + $0x164] ss:$8 sps:$4 sm:$0xff]  }
  0x20   :  { %1082 = vmatprep.subr.bf16.mxu0 %v18743_v17  ;;  %v20654_v17 = vld [vmem:[%s27056_s0 + $0x160] ss:$8 sps:$4 sm:$0xff]  }
  0x23   :  { %1083 = vmatpush1.bf16.msra.mxu0 %v18745_v18  ;;  %v20659_v18 = vld [vmem:[%s27056_s0 + $0x174] ss:$8 sps:$4 sm:$0xff]  }
  0x24   :  { %1084 = vmatprep.subr.bf16.mxu0 %v18746_v19  ;;  %v20667_v19 = vld [vmem:[%s27056_s0 + $0x170] ss:$8 sps:$4 sm:$0xff]  }
  0x27   :  { %1085 = vmatpush1.bf16.msra.mxu0 %v18748_v20  ;;  %v18890_v20 = vld [vmem:[%s27055_s1 + $0x188] ss:$24 sps:$4 sm:$0xff]  }
  0x28   :  { %1579 = vmatprep.subr.bf16.mxu0 %v18754_v21  ;;  %v18892_v21 = vld [vmem:[%s27055_s1 + $0x18c] ss:$24 sps:$4 sm:$0xff]  }
  0x2a   :  { %1099 = vmatmul.mubr.bf16.vlgmr.msra.gmra.mrb[0].mxu0 %v20323_v22 }
  0x2b   :  { %1580 = vmatpush1.bf16.msra.mxu0 %v18752_v23  ;;  %16134 = vmatprep.mubr.msk.bf16.mxu0 %vm921_vm0, %v20331_v24  ;;  %v20678_v23 = vld [vmem:[%s27056_s0 + $0x184] ss:$8 sps:$4 sm:$0xff]  }
  0x2c   :  { %1581 = vmatprep.subr.bf16.mxu0 %v18771_v25  ;;  %v20686_v25 = vld [vmem:[%s27056_s0 + $0x180] ss:$8 sps:$4 sm:$0xff]  }
  0x2d   :  { %27438 = vst [vmem:[#allocation5_spill] sm:$0xff] %v20686_v25 }
  0x2f   :  { %1582 = vmatpush1.bf16.msra.mxu0 %v18769_v26  ;;  %v20691_v26 = vld [vmem:[%s27056_s0 + $0x194] ss:$8 sps:$4 sm:$0xff]  }
  0x30   :  { %1583 = vmatprep.subr.bf16.mxu0 %v18787_v27  ;;  %27439 = vst [vmem:[#allocation6_spill] sm:$0xff] %v20691_v26  ;;  %v20699_v27 = vld [vmem:[%s27056_s0 + $0x190] ss:$8 sps:$4 sm:$0xff]  }
  0x31   :  { %27440 = vst [vmem:[#allocation7_spill] sm:$0xff] %v20699_v27 }
  0x32   :  { %1109 = vmatmul.mubr.bf16.gmra.mrb[4].mxu0 %v20348_v28 }
  0x33   :  { %16135 = vmatprep.mubr.msk.bf16.mxu0 %vm921_vm0, %v20353_v29  ;;  %1584 = vmatpush1.bf16.msra.mxu0 %v18785_v30  ;;  %v20704_v30 = vld [vmem:[%s27056_s0 + $0x1a4] ss:$8 sps:$4 sm:$0xff]  }
  0x34   :  { %1585 = vmatprep.subr.bf16.mxu0 %v18805_v31  ;;  %27441 = vst [vmem:[#allocation8_spill] sm:$0xff] %v20704_v30  ;;  %v20712_v31 = vld [vmem:[%s27056_s0 + $0x1a0] ss:$8 sps:$4 sm:$0xff]  }
  0x35   :  { %27442 = vst [vmem:[#allocation9_spill] sm:$0xff] %v20712_v31 }
  0x37   :  { %1586 = vmatpush1.bf16.msra.mxu0 %v18803_v32  ;;  %v20717_v32 = vld [vmem:[%s27056_s0 + $0x1b4] ss:$8 sps:$4 sm:$0xff]  }
  0x38   :  { %1587 = vmatprep.subr.bf16.mxu0 %v18823_v38  ;;  %27443 = vst [vmem:[#allocation10_spill] sm:$0xff] %v20717_v32 }
  0x3a   :  { %1119 = vmatmul.mubr.bf16.gmra.mrb[8].mxu0 %v20370_v33 }
  0x3b   :  { %16136 = vmatprep.mubr.msk.bf16.mxu0 %vm921_vm0, %v20375_v34  ;;  %1588 = vmatpush1.bf16.msra.mxu0 %v18821_v37 }
  0x3c   :  { %1589 = vmatprep.subr.bf16.mxu0 %v18841_v50 }
  0x3f   :  { %1590 = vmatpush1.bf16.msra.mxu0 %v18839_v49  ;;  %v20729_v49 = vld [vmem:[%s27056_s0 + $0x1b0] ss:$8 sps:$4 sm:$0xff]  }
  0x40   :  { %1591 = vmatprep.subr.bf16.mxu0 %v18858_v62  ;;  %27446 = vst [vmem:[#allocation13_spill] sm:$0xff] %v20729_v49 }
  0x42   :  { %1129 = vmatmul.mubr.bf16.gmra.mrb[12].mxu0 %v20383_v35 }
  0x43   :  { %16137 = vmatprep.mubr.msk.bf16.mxu0 %vm921_vm0, %v20388_v36  ;;  %1592 = vmatpush1.bf16.msra.mxu0 %v18856_v61  ;;  %v20736_v61 = vld [vmem:[%s27056_s0 + $0x1c4] ss:$8 sps:$4 sm:$0xff]  }
  0x44   :  { %1593 = vmatprep.subr.bf16.mxu0 %v18874_v10  ;;  %27448 = vst [vmem:[#allocation15_spill] sm:$0xff] %v20736_v61  ;;  %v18910_v10 = vld [vmem:[%s27055_s1 + $0x1bc] ss:$24 sps:$4 sm:$0xff]  }
  0x47   :  { %1594 = vmatpush1.bf16.msra.mxu0 %v18872_v9  ;;  %v18908_v9 = vld [vmem:[%s27055_s1 + $0x1b8] ss:$24 sps:$4 sm:$0xff]  }
  0x48   :  { %1595 = vmatprep.subr.bf16.mxu0 %v18892_v21 }
  0x4a   :  { %1139 = vmatmul.mubr.bf16.gmra.mrb[16].mxu0 %v20402_v39 }
  0x4b   :  { %16138 = vmatprep.mubr.msk.bf16.mxu0 %vm921_vm0, %v20407_v40  ;;  %1596 = vmatpush1.bf16.msra.mxu0 %v18890_v20 }
  0x4c   :  { %1597 = vmatprep.subr.bf16.mxu0 %v18910_v10  ;;  %v20808_v10 = vld [vmem:[%s27056_s0 + $0x1e0] ss:$8 sps:$4 sm:$0xff]  }
  0x4d   :  { %27464 = vst [vmem:[#allocation31_spill] sm:$0xff] %v20808_v10 }
  0x4f   :  { %1598 = vmatpush1.bf16.msra.mxu0 %v18908_v9 }
  0x52   :  { %1149 = vmatmul.mubr.bf16.gmra.mrb[20].mxu0 %v20415_v41 }
  0x53   :  { %16139 = vmatprep.mubr.msk.bf16.mxu0 %vm921_vm0, %v20420_v42 }
  0x5a   :  { %1159 = vmatmul.mubr.bf16.gmra.mrb[24].mxu0 %v20428_v43 }
  0x5b   :  { %16140 = vmatprep.mubr.msk.bf16.mxu0 %vm921_vm0, %v20433_v44 }
  0x62   :  { %1169 = vmatmul.mubr.bf16.gmra.mrb[28].mxu0 %v20441_v45 }
  0x63   :  { %16141 = vmatprep.mubr.msk.bf16.mxu0 %vm921_vm0, %v20446_v46 }
  0x6a   :  { %1179 = vmatmul.mubr.bf16.gmra.mrb[32].mxu0 %v20454_v47 }
  0x6b   :  { %16142 = vmatprep.mubr.msk.bf16.mxu0 %vm921_vm0, %v20459_v48 }
  0x72   :  { %1189 = vmatmul.mubr.bf16.gmra.mrb[36].mxu0 %v20473_v51 }
  0x73   :  { %16143 = vmatprep.mubr.msk.bf16.mxu0 %vm921_vm0, %v20478_v52 }
  0x7a   :  { %1199 = vmatmul.mubr.bf16.gmra.mrb[40].mxu0 %v20486_v53 }
  0x7b   :  { %16144 = vmatprep.mubr.msk.bf16.mxu0 %vm921_vm0, %v20491_v54 }
  0x82   :  { %1209 = vmatmul.mubr.bf16.gmra.mrb[44].mxu0 %v20499_v55 }
  0x83   :  { %16145 = vmatprep.mubr.msk.bf16.mxu0 %vm921_vm0, %v20504_v56 }
  0x8a   :  { %1219 = vmatmul.mubr.bf16.gmra.mrb[48].mxu0 %v20512_v57 }
  0x8b   :  { %16146 = vmatprep.mubr.msk.bf16.mxu0 %vm921_vm0, %v20517_v58 }
  0x92   :  { %1229 = vmatmul.mubr.bf16.gmra.mrb[52].mxu0 %v20525_v59 }
  0x93   :  { %16147 = vmatprep.mubr.msk.bf16.mxu0 %vm921_vm0, %v20530_v60 }
  0x9a   :  { %1239 = vmatmul.mubr.bf16.gmra.mrb[56].mxu0 %v20544_v63 }
  0x9b   :  { %16148 = vmatprep.mubr.msk.bf16.mxu0 %vm921_vm0, %v20549_v0 }
  0xa2   :  { %1249 = vmatmul.mubr.bf16.gmra.mrb[60].mxu0 %v20557_v1 }
  0xa3   :  { %16149 = vmatprep.mubr.msk.bf16.mxu0 %vm921_vm0, %v20562_v2 }
  0xaa   :  { %1259 = vmatmul.mubr.bf16.gmra.mrb[64].mxu0 %v20570_v3 }
  0xab   :  { %16150 = vmatprep.mubr.msk.bf16.mxu0 %vm921_vm0, %v20575_v4 }
  0xb2   :  { %1269 = vmatmul.mubr.bf16.gmra.mrb[68].mxu0 %v20583_v5 }
  0xb3   :  { %16151 = vmatprep.mubr.msk.bf16.mxu0 %vm921_vm0, %v20588_v6 }
  0xba   :  { %1279 = vmatmul.mubr.bf16.gmra.mrb[72].mxu0 %v20596_v7 }
  0xbb   :  { %16152 = vmatprep.mubr.msk.bf16.mxu0 %vm921_vm0, %v20601_v8 }
  0xc2   :  { %1289 = vmatmul.mubr.bf16.gmra.mrb[76].mxu0 %v20615_v11 }
  0xc3   :  { %16153 = vmatprep.mubr.msk.bf16.mxu0 %vm921_vm0, %v20620_v12 }
  0xca   :  { %1299 = vmatmul.mubr.bf16.gmra.mrb[80].mxu0 %v20628_v13 }
  0xcb   :  { %16154 = vmatprep.mubr.msk.bf16.mxu0 %vm921_vm0, %v20633_v14 }
  0xd2   :  { %1309 = vmatmul.mubr.bf16.gmra.mrb[84].mxu0 %v20641_v15 }
  0xd3   :  { %16155 = vmatprep.mubr.msk.bf16.mxu0 %vm921_vm0, %v20646_v16 }
  0xda   :  { %1319 = vmatmul.mubr.bf16.gmra.mrb[88].mxu0 %v20654_v17 }
  0xdb   :  { %16156 = vmatprep.mubr.msk.bf16.mxu0 %vm921_vm0, %v20659_v18 }
  0xe2   :  { %1329 = vmatmul.mubr.bf16.gmra.mrb[92].mxu0 %v20667_v19 }
  0xe3   :  { %16157 = vmatprep.mubr.msk.bf16.mxu0 %vm921_vm0, %v20678_v23 }
  0xea   :  { %1339 = vmatmul.mubr.bf16.gmra.mrb[96].mxu0 %v20686_v25 }
  0xeb   :  { %16158 = vmatprep.mubr.msk.bf16.mxu0 %vm921_vm0, %v20691_v26 }
  0xf2   :  { %1349 = vmatmul.mubr.bf16.gmra.mrb[100].mxu0 %v20699_v27  ;;  %v20779_v27 = vld [vmem:[%s27056_s0 + $0x1d0] ss:$8 sps:$4 sm:$0xff]  }
  0xf3   :  { %16159 = vmatprep.mubr.msk.bf16.mxu0 %vm921_vm0, %v20704_v30  ;;  %27458 = vst [vmem:[#allocation25_spill] sm:$0xff] %v20779_v27 }
  0xfa   :  { %1359 = vmatmul.mubr.bf16.gmra.mrb[104].mxu0 %v20712_v31  ;;  %v20763_v31 = vld [vmem:[%s27056_s0 + $0x1d4] ss:$8 sps:$4 sm:$0xff]  }
  0xfb   :  { %16160 = vmatprep.mubr.msk.bf16.mxu0 %vm921_vm0, %v20717_v32  ;;  %27454 = vst [vmem:[#allocation21_spill] sm:$0xff] %v20763_v31 }
  0xfd   :  { %v20722_v37 = vpop.f32.mrb[0].mxu0 }
  0xfe   :  { %27444 = vst [vmem:[#allocation11_spill] sm:$0xff] %v20722_v37  ;;  %v20724_v38 = vpop.f32.mrb[1].mxu0 }
  0xff   :  { %27445 = vst [vmem:[#allocation12_spill] sm:$0xff] %v20724_v38  ;;  %v20731_v50 = vpop.f32.mrb[2].mxu0 }
 0x100   :  { %27447 = vst [vmem:[#allocation14_spill] sm:$0xff] %v20731_v50  ;;  %v20738_v62 = vpop.f32.mrb[3].mxu0 }
 0x101   :  { %27449 = vst [vmem:[#allocation16_spill] sm:$0xff] %v20738_v62  ;;  %v20817_v62 = vld [vmem:[%s27056_s0 + $0x1f4] ss:$8 sps:$4 sm:$0xff]  }
 0x102   :  { %1369 = vmatmul.mubr.bf16.gmra.mrb[108].mxu0 %v20729_v49  ;;  %v20756_v49 = vld [vmem:[%s27056_s0 + $0x1c0] ss:$8 sps:$4 sm:$0xff]   ;;  %27466 = vst [vmem:[#allocation33_spill] sm:$0xff] %v20817_v62 }
 0x103   :  { %16161 = vmatprep.mubr.msk.bf16.mxu0 %vm921_vm0, %v20736_v61  ;;  %27452 = vst [vmem:[#allocation19_spill] sm:$0xff] %v20756_v49 }
 0x105   :  { %v20749_v20 = vpop.f32.mrb[4].mxu0 }
 0x106   :  { %27450 = vst [vmem:[#allocation17_spill] sm:$0xff] %v20749_v20  ;;  %v20751_v21 = vpop.f32.mrb[5].mxu0  ;;  %v20842_v20 = vld [vmem:[%s27056_s0 + $0x204] ss:$8 sps:$4 sm:$0xff]  }
 0x107   :  { %27451 = vst [vmem:[#allocation18_spill] sm:$0xff] %v20751_v21  ;;  %v20758_v32 = vpop.f32.mrb[6].mxu0  ;;  %v20835_v21 = vld [vmem:[%s27056_s0 + $0x1f0] ss:$8 sps:$4 sm:$0xff]   ;;  %27472 = vst [vmem:[#allocation39_spill] sm:$0xff] %v20842_v20 }
 0x108   :  { %27453 = vst [vmem:[#allocation20_spill] sm:$0xff] %v20758_v32  ;;  %v20765_v30 = vpop.f32.mrb[7].mxu0  ;;  %27470 = vst [vmem:[#allocation37_spill] sm:$0xff] %v20835_v21 }
 0x109   :  { %27455 = vst [vmem:[#allocation22_spill] sm:$0xff] %v20765_v30 }
 0x10a   :  { %1379 = vmatmul.mubr.bf16.gmra.mrb[112].mxu0 %v20756_v49 }
 0x10b   :  { %16162 = vmatprep.mubr.msk.bf16.mxu0 %vm921_vm0, %v20763_v31  ;;  %v20788_v31 = vld [vmem:[%s27056_s0 + $0x1e4] ss:$8 sps:$4 sm:$0xff]  }
 0x10c   :  { %27460 = vst [vmem:[#allocation27_spill] sm:$0xff] %v20788_v31 }
 0x10d   :  { %v20770_v9 = vpop.f32.mrb[8].mxu0 }
 0x10e   :  { %27456 = vst [vmem:[#allocation23_spill] sm:$0xff] %v20770_v9  ;;  %v20774_v61 = vpop.f32.mrb[9].mxu0 }
 0x10f   :  { %27457 = vst [vmem:[#allocation24_spill] sm:$0xff] %v20774_v61  ;;  %v20783_v25 = vpop.f32.mrb[10].mxu0 }
 0x110   :  { %27459 = vst [vmem:[#allocation26_spill] sm:$0xff] %v20783_v25  ;;  %v20792_v9 = vpop.f32.mrb[11].mxu0  ;;  %v20911_v25 = vld [vmem:[%s27056_s0 + $0x220] ss:$8 sps:$4 sm:$0xff]  }
 0x111   :  { %27461 = vst [vmem:[#allocation28_spill] sm:$0xff] %v20792_v9  ;;  %27488 = vst [vmem:[#allocation55_spill] sm:$0xff] %v20911_v25 }
 0x112   :  { %1389 = vmatmul.mubr.bf16.gmra.mrb[116].mxu0 %v20779_v27  ;;  %v20882_v27 = vld [vmem:[%s27056_s0 + $0x210] ss:$8 sps:$4 sm:$0xff]  }
 0x113   :  { %16163 = vmatprep.mubr.msk.bf16.mxu0 %vm921_vm0, %v20788_v31  ;;  %27482 = vst [vmem:[#allocation49_spill] sm:$0xff] %v20882_v27 }
 0x115   :  { %v20799_v26 = vpop.f32.mrb[12].mxu0 }
 0x116   :  { %27462 = vst [vmem:[#allocation29_spill] sm:$0xff] %v20799_v26  ;;  %v20803_v38 = vpop.f32.mrb[13].mxu0 }
 0x117   :  { %27463 = vst [vmem:[#allocation30_spill] sm:$0xff] %v20803_v38  ;;  %v20812_v9 = vpop.f32.mrb[14].mxu0 }
 0x118   :  { %27465 = vst [vmem:[#allocation32_spill] sm:$0xff] %v20812_v9  ;;  %v20821_v26 = vpop.f32.mrb[15].mxu0  ;;  %v20856_v9 = vld [vmem:[%s27056_s0 + $0x200] ss:$8 sps:$4 sm:$0xff]  }
 0x119   :  { %27467 = vst [vmem:[#allocation34_spill] sm:$0xff] %v20821_v26  ;;  %27476 = vst [vmem:[#allocation43_spill] sm:$0xff] %v20856_v9 }
 0x11a   :  { %1399 = vmatmul.mubr.bf16.gmra.mrb[120].mxu0 %v20808_v10  ;;  %v20863_v10 = vld [vmem:[%s27056_s0 + $0x214] ss:$8 sps:$4 sm:$0xff]  }
 0x11b   :  { %16164 = vmatprep.mubr.msk.bf16.mxu0 %vm921_vm0, %v20817_v62  ;;  %27478 = vst [vmem:[#allocation45_spill] sm:$0xff] %v20863_v10 }
 0x11d   :  { %v20828_v37 = vpop.f32.mrb[16].mxu0 }
 0x11e   :  { %27468 = vst [vmem:[#allocation35_spill] sm:$0xff] %v20828_v37  ;;  %v20830_v38 = vpop.f32.mrb[17].mxu0 }
 0x11f   :  { %27469 = vst [vmem:[#allocation36_spill] sm:$0xff] %v20830_v38  ;;  %v20837_v61 = vpop.f32.mrb[18].mxu0 }
 0x120   :  { %27471 = vst [vmem:[#allocation38_spill] sm:$0xff] %v20837_v61  ;;  %v20844_v26 = vpop.f32.mrb[19].mxu0  ;;  %v20982_v61 = vld [vmem:[%s27056_s0 + $0x250] ss:$8 sps:$4 sm:$0xff]  }
 0x121   :  { %27473 = vst [vmem:[#allocation40_spill] sm:$0xff] %v20844_v26  ;;  %v20920_v26 = vld [vmem:[%s27056_s0 + $0x234] ss:$8 sps:$4 sm:$0xff]   ;;  %27506 = vst [vmem:[#allocation73_spill] sm:$0xff] %v20982_v61 }
 0x122   :  { %1409 = vmatmul.mubr.bf16.gmra.mrb[124].mxu0 %v20835_v21  ;;  %27490 = vst [vmem:[#allocation57_spill] sm:$0xff] %v20920_v26 }
 0x123   :  { %16165 = vmatprep.mubr.msk.bf16.mxu0 %vm921_vm0, %v20842_v20  ;;  %v18925_v20 = vld [vmem:[%s27055_s1 + $0x14] ss:$24 sps:$4 sm:$0xff]  }
 0x124   :  { %2092 = vmatprep.subr.bf16.mxu0 %v18925_v20  ;;  %v20891_v20 = vld [vmem:[%s27056_s0 + $0x224] ss:$8 sps:$4 sm:$0xff]  }
 0x125   :  { %v20849_v30 = vpop.f32.mrb[20].mxu0  ;;  %27484 = vst [vmem:[#allocation51_spill] sm:$0xff] %v20891_v20 }
 0x126   :  { %27474 = vst [vmem:[#allocation41_spill] sm:$0xff] %v20849_v30  ;;  %v20851_v62 = vpop.f32.mrb[21].mxu0  ;;  %v20945_v30 = vld [vmem:[%s27056_s0 + $0x244] ss:$8 sps:$4 sm:$0xff]  }
 0x127   :  { %27475 = vst [vmem:[#allocation42_spill] sm:$0xff] %v20851_v62  ;;  %v20858_v32 = vpop.f32.mrb[22].mxu0  ;;  %v20938_v62 = vld [vmem:[%s27056_s0 + $0x230] ss:$8 sps:$4 sm:$0xff]   ;;  %27496 = vst [vmem:[#allocation63_spill] sm:$0xff] %v20945_v30 }
 0x128   :  { %27477 = vst [vmem:[#allocation44_spill] sm:$0xff] %v20858_v32  ;;  %v20865_v21 = vpop.f32.mrb[23].mxu0  ;;  %27494 = vst [vmem:[#allocation61_spill] sm:$0xff] %v20938_v62 }
 0x129   :  { %27479 = vst [vmem:[#allocation46_spill] sm:$0xff] %v20865_v21 }
 0x12a   :  { %1419 = vmatmul.mubr.bf16.gmra.mrb[128].mxu0 %v20856_v9 }
 0x12b   :  { %16166 = vmatprep.mubr.msk.bf16.mxu0 %vm921_vm0, %v20863_v10 }
 0x12d   :  { %v20873_v31 = vpop.f32.mrb[24].mxu0 }
 0x12e   :  { %27480 = vst [vmem:[#allocation47_spill] sm:$0xff] %v20873_v31  ;;  %v20877_v50 = vpop.f32.mrb[25].mxu0 }
 0x12f   :  { %27481 = vst [vmem:[#allocation48_spill] sm:$0xff] %v20877_v50  ;;  %v20886_v49 = vpop.f32.mrb[26].mxu0 }
 0x130   :  { %27483 = vst [vmem:[#allocation50_spill] sm:$0xff] %v20886_v49  ;;  %v20895_v31 = vpop.f32.mrb[27].mxu0 }
 0x131   :  { %27485 = vst [vmem:[#allocation52_spill] sm:$0xff] %v20895_v31 }
 0x132   :  { %1429 = vmatmul.mubr.bf16.gmra.mrb[132].mxu0 %v20882_v27 }
 0x133   :  { %16167 = vmatprep.mubr.msk.bf16.mxu0 %vm921_vm0, %v20891_v20  ;;  %v21011_v20 = vld [vmem:[%s27056_s0 + $0x260] ss:$8 sps:$4 sm:$0xff]  }
 0x134   :  { %27512 = vst [vmem:[#allocation79_spill] sm:$0xff] %v21011_v20 }
 0x135   :  { %v20902_v9 = vpop.f32.mrb[28].mxu0 }
 0x136   :  { %27486 = vst [vmem:[#allocation53_spill] sm:$0xff] %v20902_v9  ;;  %v20906_v38 = vpop.f32.mrb[29].mxu0 }
 0x137   :  { %27487 = vst [vmem:[#allocation54_spill] sm:$0xff] %v20906_v38  ;;  %v20915_v31 = vpop.f32.mrb[30].mxu0 }
 0x138   :  { %27489 = vst [vmem:[#allocation56_spill] sm:$0xff] %v20915_v31  ;;  %v20924_v9 = vpop.f32.mrb[31].mxu0  ;;  %v20959_v31 = vld [vmem:[%s27056_s0 + $0x240] ss:$8 sps:$4 sm:$0xff]  }
 0x139   :  { %27491 = vst [vmem:[#allocation58_spill] sm:$0xff] %v20924_v9  ;;  %27500 = vst [vmem:[#allocation67_spill] sm:$0xff] %v20959_v31 }
 0x13a   :  { %1439 = vmatmul.mubr.bf16.gmra.mrb[136].mxu0 %v20911_v25  ;;  %v20966_v25 = vld [vmem:[%s27056_s0 + $0x254] ss:$8 sps:$4 sm:$0xff]  }
 0x13b   :  { %16168 = vmatprep.mubr.msk.bf16.mxu0 %vm921_vm0, %v20920_v26  ;;  %27502 = vst [vmem:[#allocation69_spill] sm:$0xff] %v20966_v25 }
 0x13d   :  { %v20931_v37 = vpop.f32.mrb[32].mxu0 }
 0x13e   :  { %27492 = vst [vmem:[#allocation59_spill] sm:$0xff] %v20931_v37  ;;  %v20933_v38 = vpop.f32.mrb[33].mxu0 }
 0x13f   :  { %27493 = vst [vmem:[#allocation60_spill] sm:$0xff] %v20933_v38  ;;  %v20940_v50 = vpop.f32.mrb[34].mxu0 }
 0x140   :  { %27495 = vst [vmem:[#allocation62_spill] sm:$0xff] %v20940_v50  ;;  %v20947_v9 = vpop.f32.mrb[35].mxu0  ;;  %v21082_v50 = vld [vmem:[%s27056_s0 + $0x290] ss:$8 sps:$4 sm:$0xff]  }
 0x141   :  { %27497 = vst [vmem:[#allocation64_spill] sm:$0xff] %v20947_v9  ;;  %v21020_v9 = vld [vmem:[%s27056_s0 + $0x274] ss:$8 sps:$4 sm:$0xff]   ;;  %27530 = vst [vmem:[#allocation97_spill] sm:$0xff] %v21082_v50 }
 0x142   :  { %1449 = vmatmul.mubr.bf16.gmra.mrb[140].mxu0 %v20938_v62  ;;  %27514 = vst [vmem:[#allocation81_spill] sm:$0xff] %v21020_v9 }
 0x143   :  { %16169 = vmatprep.mubr.msk.bf16.mxu0 %vm921_vm0, %v20945_v30 }
 0x145   :  { %v20952_v21 = vpop.f32.mrb[36].mxu0 }
 0x146   :  { %27498 = vst [vmem:[#allocation65_spill] sm:$0xff] %v20952_v21  ;;  %v20954_v26 = vpop.f32.mrb[37].mxu0  ;;  %v21045_v21 = vld [vmem:[%s27056_s0 + $0x284] ss:$8 sps:$4 sm:$0xff]  }
 0x147   :  { %27499 = vst [vmem:[#allocation66_spill] sm:$0xff] %v20954_v26  ;;  %v20961_v32 = vpop.f32.mrb[38].mxu0  ;;  %v21038_v26 = vld [vmem:[%s27056_s0 + $0x270] ss:$8 sps:$4 sm:$0xff]   ;;  %27520 = vst [vmem:[#allocation87_spill] sm:$0xff] %v21045_v21 }
 0x148   :  { %27501 = vst [vmem:[#allocation68_spill] sm:$0xff] %v20961_v32  ;;  %v20968_v62 = vpop.f32.mrb[39].mxu0  ;;  %27518 = vst [vmem:[#allocation85_spill] sm:$0xff] %v21038_v26 }
 0x149   :  { %27503 = vst [vmem:[#allocation70_spill] sm:$0xff] %v20968_v62 }
 0x14a   :  { %1459 = vmatmul.mubr.bf16.gmra.mrb[144].mxu0 %v20959_v31 }
 0x14b   :  { %16170 = vmatprep.mubr.msk.bf16.mxu0 %vm921_vm0, %v20966_v25  ;;  %v20991_v25 = vld [vmem:[%s27056_s0 + $0x264] ss:$8 sps:$4 sm:$0xff]  }
 0x14c   :  { %27508 = vst [vmem:[#allocation75_spill] sm:$0xff] %v20991_v25 }
 0x14d   :  { %v20973_v30 = vpop.f32.mrb[40].mxu0 }
 0x14e   :  { %27504 = vst [vmem:[#allocation71_spill] sm:$0xff] %v20973_v30  ;;  %v20977_v49 = vpop.f32.mrb[41].mxu0 }
 0x14f   :  { %27505 = vst [vmem:[#allocation72_spill] sm:$0xff] %v20977_v49  ;;  %v20986_v10 = vpop.f32.mrb[42].mxu0 }
 0x150   :  { %27507 = vst [vmem:[#allocation74_spill] sm:$0xff] %v20986_v10  ;;  %v20995_v30 = vpop.f32.mrb[43].mxu0 }
 0x151   :  { %27509 = vst [vmem:[#allocation76_spill] sm:$0xff] %v20995_v30 }
 0x152   :  { %1469 = vmatmul.mubr.bf16.gmra.mrb[148].mxu0 %v20982_v61 }
 0x153   :  { %16171 = vmatprep.mubr.msk.bf16.mxu0 %vm921_vm0, %v20991_v25  ;;  %v21111_v25 = vld [vmem:[%s27056_s0 + $0x2a0] ss:$8 sps:$4 sm:$0xff]  }
 0x154   :  { %27536 = vst [vmem:[#allocation103_spill] sm:$0xff] %v21111_v25 }
 0x155   :  { %v21002_v27 = vpop.f32.mrb[44].mxu0 }
 0x156   :  { %27510 = vst [vmem:[#allocation77_spill] sm:$0xff] %v21002_v27  ;;  %v21006_v38 = vpop.f32.mrb[45].mxu0 }
 0x157   :  { %27511 = vst [vmem:[#allocation78_spill] sm:$0xff] %v21006_v38  ;;  %v21015_v30 = vpop.f32.mrb[46].mxu0 }
 0x158   :  { %27513 = vst [vmem:[#allocation80_spill] sm:$0xff] %v21015_v30  ;;  %v21024_v27 = vpop.f32.mrb[47].mxu0  ;;  %v21059_v30 = vld [vmem:[%s27056_s0 + $0x280] ss:$8 sps:$4 sm:$0xff]  }
 0x159   :  { %27515 = vst [vmem:[#allocation82_spill] sm:$0xff] %v21024_v27  ;;  %27524 = vst [vmem:[#allocation91_spill] sm:$0xff] %v21059_v30 }
 0x15a   :  { %1479 = vmatmul.mubr.bf16.gmra.mrb[152].mxu0 %v21011_v20  ;;  %v21066_v20 = vld [vmem:[%s27056_s0 + $0x294] ss:$8 sps:$4 sm:$0xff]  }
 0x15b   :  { %16172 = vmatprep.mubr.msk.bf16.mxu0 %vm921_vm0, %v21020_v9  ;;  %27526 = vst [vmem:[#allocation93_spill] sm:$0xff] %v21066_v20 }
 0x15d   :  { %v21031_v37 = vpop.f32.mrb[48].mxu0 }
 0x15e   :  { %27516 = vst [vmem:[#allocation83_spill] sm:$0xff] %v21031_v37  ;;  %v21033_v38 = vpop.f32.mrb[49].mxu0 }
 0x15f   :  { %27517 = vst [vmem:[#allocation84_spill] sm:$0xff] %v21033_v38  ;;  %v21040_v49 = vpop.f32.mrb[50].mxu0 }
 0x160   :  { %27519 = vst [vmem:[#allocation86_spill] sm:$0xff] %v21040_v49  ;;  %v21047_v27 = vpop.f32.mrb[51].mxu0  ;;  %v21182_v49 = vld [vmem:[%s27056_s0 + $0x2d0] ss:$8 sps:$4 sm:$0xff]  }
 0x161   :  { %27521 = vst [vmem:[#allocation88_spill] sm:$0xff] %v21047_v27  ;;  %v21120_v27 = vld [vmem:[%s27056_s0 + $0x2b4] ss:$8 sps:$4 sm:$0xff]   ;;  %27554 = vst [vmem:[#allocation121_spill] sm:$0xff] %v21182_v49 }
 0x162   :  { %1489 = vmatmul.mubr.bf16.gmra.mrb[156].mxu0 %v21038_v26  ;;  %27538 = vst [vmem:[#allocation105_spill] sm:$0xff] %v21120_v27 }
 0x163   :  { %16173 = vmatprep.mubr.msk.bf16.mxu0 %vm921_vm0, %v21045_v21 }
 0x165   :  { %v21052_v62 = vpop.f32.mrb[52].mxu0 }
 0x166   :  { %27522 = vst [vmem:[#allocation89_spill] sm:$0xff] %v21052_v62  ;;  %v21054_v9 = vpop.f32.mrb[53].mxu0  ;;  %v21145_v62 = vld [vmem:[%s27056_s0 + $0x2c4] ss:$8 sps:$4 sm:$0xff]  }
 0x167   :  { %27523 = vst [vmem:[#allocation90_spill] sm:$0xff] %v21054_v9  ;;  %v21061_v32 = vpop.f32.mrb[54].mxu0  ;;  %v21138_v9 = vld [vmem:[%s27056_s0 + $0x2b0] ss:$8 sps:$4 sm:$0xff]   ;;  %27544 = vst [vmem:[#allocation111_spill] sm:$0xff] %v21145_v62 }
 0x168   :  { %27525 = vst [vmem:[#allocation92_spill] sm:$0xff] %v21061_v32  ;;  %v21068_v26 = vpop.f32.mrb[55].mxu0  ;;  %27542 = vst [vmem:[#allocation109_spill] sm:$0xff] %v21138_v9 }
 0x169   :  { %27527 = vst [vmem:[#allocation94_spill] sm:$0xff] %v21068_v26 }
 0x16a   :  { %1499 = vmatmul.mubr.bf16.gmra.mrb[160].mxu0 %v21059_v30 }
 0x16b   :  { %16174 = vmatprep.mubr.msk.bf16.mxu0 %vm921_vm0, %v21066_v20  ;;  %v21091_v20 = vld [vmem:[%s27056_s0 + $0x2a4] ss:$8 sps:$4 sm:$0xff]  }
 0x16c   :  { %27532 = vst [vmem:[#allocation99_spill] sm:$0xff] %v21091_v20 }
 0x16d   :  { %v21073_v21 = vpop.f32.mrb[56].mxu0 }
 0x16e   :  { %27528 = vst [vmem:[#allocation95_spill] sm:$0xff] %v21073_v21  ;;  %v21077_v10 = vpop.f32.mrb[57].mxu0 }
 0x16f   :  { %27529 = vst [vmem:[#allocation96_spill] sm:$0xff] %v21077_v10  ;;  %v21086_v31 = vpop.f32.mrb[58].mxu0 }
 0x170   :  { %27531 = vst [vmem:[#allocation98_spill] sm:$0xff] %v21086_v31  ;;  %v21095_v21 = vpop.f32.mrb[59].mxu0 }
 0x171   :  { %27533 = vst [vmem:[#allocation100_spill] sm:$0xff] %v21095_v21 }
 0x172   :  { %1509 = vmatmul.mubr.bf16.gmra.mrb[164].mxu0 %v21082_v50 }
 0x173   :  { %16175 = vmatprep.mubr.msk.bf16.mxu0 %vm921_vm0, %v21091_v20  ;;  %v21211_v20 = vld [vmem:[%s27056_s0 + $0x2e0] ss:$8 sps:$4 sm:$0xff]  }
 0x174   :  { %27560 = vst [vmem:[#allocation127_spill] sm:$0xff] %v21211_v20 }
 0x175   :  { %v21102_v61 = vpop.f32.mrb[60].mxu0 }
 0x176   :  { %27534 = vst [vmem:[#allocation101_spill] sm:$0xff] %v21102_v61  ;;  %v21106_v38 = vpop.f32.mrb[61].mxu0 }
 0x177   :  { %27535 = vst [vmem:[#allocation102_spill] sm:$0xff] %v21106_v38  ;;  %v21115_v21 = vpop.f32.mrb[62].mxu0 }
 0x178   :  { %27537 = vst [vmem:[#allocation104_spill] sm:$0xff] %v21115_v21  ;;  %v21124_v61 = vpop.f32.mrb[63].mxu0  ;;  %v21159_v21 = vld [vmem:[%s27056_s0 + $0x2c0] ss:$8 sps:$4 sm:$0xff]  }
 0x179   :  { %27539 = vst [vmem:[#allocation106_spill] sm:$0xff] %v21124_v61  ;;  %27548 = vst [vmem:[#allocation115_spill] sm:$0xff] %v21159_v21 }
 0x17a   :  { %1519 = vmatmul.mubr.bf16.gmra.mrb[168].mxu0 %v21111_v25  ;;  %v21166_v25 = vld [vmem:[%s27056_s0 + $0x2d4] ss:$8 sps:$4 sm:$0xff]  }
 0x17b   :  { %16176 = vmatprep.mubr.msk.bf16.mxu0 %vm921_vm0, %v21120_v27  ;;  %27550 = vst [vmem:[#allocation117_spill] sm:$0xff] %v21166_v25 }
 0x17d   :  { %v21131_v37 = vpop.f32.mrb[64].mxu0 }
 0x17e   :  { %27540 = vst [vmem:[#allocation107_spill] sm:$0xff] %v21131_v37  ;;  %v21133_v38 = vpop.f32.mrb[65].mxu0 }
 0x17f   :  { %27541 = vst [vmem:[#allocation108_spill] sm:$0xff] %v21133_v38  ;;  %v21140_v10 = vpop.f32.mrb[66].mxu0 }
 0x180   :  { %27543 = vst [vmem:[#allocation110_spill] sm:$0xff] %v21140_v10  ;;  %v21147_v61 = vpop.f32.mrb[67].mxu0  ;;  %v18934_v10 = vld [vmem:[%s27055_s1 + $0xa4] ss:$24 sps:$4 sm:$0xff]  }
 0x181   :  { %27545 = vst [vmem:[#allocation112_spill] sm:$0xff] %v21147_v61  ;;  %v21220_v61 = vld [vmem:[%s27056_s0 + $0x2f4] ss:$8 sps:$4 sm:$0xff]  }
 0x182   :  { %1529 = vmatmul.mubr.bf16.gmra.mrb[172].mxu0 %v21138_v9  ;;  %27562 = vst [vmem:[#allocation129_spill] sm:$0xff] %v21220_v61 }
 0x183   :  { %16177 = vmatprep.mubr.msk.bf16.mxu0 %vm921_vm0, %v21145_v62 }
 0x185   :  { %v21152_v26 = vpop.f32.mrb[68].mxu0 }
 0x186   :  { %27546 = vst [vmem:[#allocation113_spill] sm:$0xff] %v21152_v26  ;;  %v21154_v27 = vpop.f32.mrb[69].mxu0  ;;  %v21248_v26 = vld [vmem:[%s27056_s0 + $0x4] ss:$8 sps:$4 sm:$0xff]  }
 0x187   :  { %27547 = vst [vmem:[#allocation114_spill] sm:$0xff] %v21154_v27  ;;  %v21161_v32 = vpop.f32.mrb[70].mxu0  ;;  %v21238_v27 = vld [vmem:[%s27056_s0 + $0x2f0] ss:$8 sps:$4 sm:$0xff]   ;;  %27567 = vst [vmem:[#allocation134_spill] sm:$0xff] %v21248_v26 }
 0x188   :  { %27549 = vst [vmem:[#allocation116_spill] sm:$0xff] %v21161_v32  ;;  %v21168_v9 = vpop.f32.mrb[71].mxu0  ;;  %27565 = vst [vmem:[#allocation132_spill] sm:$0xff] %v21238_v27  ;;  %v18923_v32 = vld [vmem:[%s27055_s1 + $0x10] ss:$24 sps:$4 sm:$0xff]  }
 0x189   :  { %27551 = vst [vmem:[#allocation118_spill] sm:$0xff] %v21168_v9 }
 0x18a   :  { %1539 = vmatmul.mubr.bf16.gmra.mrb[176].mxu0 %v21159_v21 }
 0x18b   :  { %16178 = vmatprep.mubr.msk.bf16.mxu0 %vm921_vm0, %v21166_v25  ;;  %v21191_v25 = vld [vmem:[%s27056_s0 + $0x2e4] ss:$8 sps:$4 sm:$0xff]  }
 0x18c   :  { %27556 = vst [vmem:[#allocation123_spill] sm:$0xff] %v21191_v25 }
 0x18d   :  { %v21173_v62 = vpop.f32.mrb[72].mxu0 }
 0x18e   :  { %27552 = vst [vmem:[#allocation119_spill] sm:$0xff] %v21173_v62  ;;  %v21177_v31 = vpop.f32.mrb[73].mxu0 }
 0x18f   :  { %27553 = vst [vmem:[#allocation120_spill] sm:$0xff] %v21177_v31  ;;  %v21186_v30 = vpop.f32.mrb[74].mxu0 }
 0x190   :  { %27555 = vst [vmem:[#allocation122_spill] sm:$0xff] %v21186_v30  ;;  %v21195_v62 = vpop.f32.mrb[75].mxu0 }
 0x191   :  { %27557 = vst [vmem:[#allocation124_spill] sm:$0xff] %v21195_v62 }
 0x192   :  { %1549 = vmatmul.mubr.bf16.gmra.mrb[180].mxu0 %v21182_v49 }
 0x193   :  { %16179 = vmatprep.mubr.msk.bf16.mxu0 %vm921_vm0, %v21191_v25  ;;  %v18931_v25 = vld [vmem:[%s27055_s1 + $0x74] ss:$24 sps:$4 sm:$0xff]  }
 0x195   :  { %v21202_v50 = vpop.f32.mrb[76].mxu0 }
 0x196   :  { %27558 = vst [vmem:[#allocation125_spill] sm:$0xff] %v21202_v50  ;;  %v21206_v38 = vpop.f32.mrb[77].mxu0 }
 0x197   :  { %27559 = vst [vmem:[#allocation126_spill] sm:$0xff] %v21206_v38  ;;  %v21215_v62 = vpop.f32.mrb[78].mxu0 }
 0x198   :  { %27561 = vst [vmem:[#allocation128_spill] sm:$0xff] %v21215_v62  ;;  %v21224_v50 = vpop.f32.mrb[79].mxu0 }
 0x199   :  { %27563 = vst [vmem:[#allocation130_spill] sm:$0xff] %v21224_v50 }
 0x19a   :  { %1559 = vmatmul.mubr.bf16.gmra.mrb[184].mxu0 %v21211_v20 }
 0x19b   :  { %16180 = vmatprep.mubr.msk.bf16.mxu0 %vm921_vm0, %v21220_v61 }
 0x19d   :  { %v21231_v37 = vpop.f32.mrb[80].mxu0 }
 0x19e   :  { %v21233_v38 = vpop.f32.mrb[81].mxu0 }
 0x19f   :  { %27564 = vst [vmem:[#allocation131_spill] sm:$0xff] %v21233_v38  ;;  %v21240_v31 = vpop.f32.mrb[82].mxu0 }
 0x1a0   :  { %v21242_v62 = vpop.f32.mrb[83].mxu0 }
 0x1a1   :  { %27566 = vst [vmem:[#allocation133_spill] sm:$0xff] %v21242_v62 }
 0x1a2   :  { %1569 = vmatmul.mubr.bf16.gmra.mrb[188].mxu0 %v21238_v27  ;;  %v18928_v27 = vld [vmem:[%s27055_s1 + $0x44] ss:$24 sps:$4 sm:$0xff]  }
 0x1a3   :  { %16181 = vmatprep.mubr.msk.bf16.mxu0 %vm921_vm0, %v21248_v26  ;;  %v18926_v26 = vld [vmem:[%s27055_s1 + $0x40] ss:$24 sps:$4 sm:$0xff]  }
 0x1a5   :  { %v21252_v50 = vpop.f32.mrb[84].mxu0 }
 0x1a6   :  { %v21254_v9 = vpop.f32.mrb[85].mxu0 }
 0x1a7   :  { %27568 = vst [vmem:[#allocation135_spill] sm:$0xff] %v21254_v9  ;;  %v21256_v61 = vpop.f32.mrb[86].mxu0 }
 0x1a8   :  { %v21261_v20 = vpop.f32.mrb[87].mxu0 }
 0x1a9   :  { %27569 = vst [vmem:[#allocation136_spill] sm:$0xff] %v21261_v20 }
 0x1aa   :  { %1612 = vmatmul.mubr.bf16.vlgmr.msra.gmra.mrb[192].mxu0 %v20323_v22 }
 0x1ab   :  { %2093 = vmatpush1.bf16.msra.mxu0 %v18923_v32  ;;  %16182 = vmatprep.mubr.msk.bf16.mxu0 %vm921_vm0, %v20331_v24 }
 0x1ac   :  { %2094 = vmatprep.subr.bf16.mxu0 %v18928_v27  ;;  %v18929_v27 = vld [vmem:[%s27055_s1 + $0x70] ss:$24 sps:$4 sm:$0xff]  }
 0x1ad   :  { %v21275_v30 = vpop.f32.mrb[88].mxu0 }
 0x1ae   :  { %v21279_v49 = vpop.f32.mrb[89].mxu0 }
 0x1af   :  { %27570 = vst [vmem:[#allocation137_spill] sm:$0xff] %v21279_v49  ;;  %v21283_v24 = vpop.f32.mrb[90].mxu0  ;;  %2095 = vmatpush1.bf16.msra.mxu0 %v18926_v26  ;;  %v18932_v26 = vld [vmem:[%s27055_s1 + $0xa0] ss:$24 sps:$4 sm:$0xff]  }
 0x1b0   :  { %v21290_v21 = vpop.f32.mrb[91].mxu0  ;;  %2096 = vmatprep.subr.bf16.mxu0 %v18931_v25 }
 0x1b1   :  { %27571 = vst [vmem:[#allocation138_spill] sm:$0xff] %v21290_v21 }
 0x1b2   :  { %1622 = vmatmul.mubr.bf16.gmra.mrb[196].mxu0 %v20348_v28 }
 0x1b3   :  { %16183 = vmatprep.mubr.msk.bf16.mxu0 %vm921_vm0, %v20353_v29  ;;  %2097 = vmatpush1.bf16.msra.mxu0 %v18929_v27  ;;  %v18935_v29 = vld [vmem:[%s27055_s1 + $0xd0] ss:$24 sps:$4 sm:$0xff]  }
 0x1b4   :  { %2098 = vmatprep.subr.bf16.mxu0 %v18934_v10 }
 0x1b5   :  { %v21303_v32 = vpop.f32.mrb[92].mxu0 }
 0x1b6   :  { %v21307_v49 = vpop.f32.mrb[93].mxu0 }
 0x1b7   :  { %27572 = vst [vmem:[#allocation139_spill] sm:$0xff] %v21307_v49  ;;  %v21311_v28 = vpop.f32.mrb[94].mxu0  ;;  %2099 = vmatpush1.bf16.msra.mxu0 %v18932_v26 }
 0x1b8   :  { %v21315_v27 = vpop.f32.mrb[95].mxu0 }
 0x1b9   :  { %27573 = vst [vmem:[#allocation140_spill] sm:$0xff] %v21315_v27 }
 0x1ba   :  { %1632 = vmatmul.mubr.bf16.gmra.mrb[200].mxu0 %v20370_v33  ;;  %v18937_v33 = vld [vmem:[%s27055_s1 + $0xd4] ss:$24 sps:$4 sm:$0xff]  }
 0x1bb   :  { %16184 = vmatprep.mubr.msk.bf16.mxu0 %vm921_vm0, %v20375_v34  ;;  %2100 = vmatprep.subr.bf16.mxu0 %v18937_v33 }
 0x1bc   :  { %2101 = vmatpush1.bf16.msra.mxu0 %v18935_v29 }
 0x1bd   :  { %v21322_v25 = vpop.f32.mrb[96].mxu0 }
 0x1be   :  { %v21324_v21 = vpop.f32.mrb[97].mxu0 }
 0x1bf   :  { %27574 = vst [vmem:[#allocation141_spill] sm:$0xff] %v21324_v21  ;;  %v21326_v22 = vpop.f32.mrb[98].mxu0 }
 0x1c0   :  { %v21328_v26 = vpop.f32.mrb[99].mxu0 }
 0x1c1   :  { %27575 = vst [vmem:[#allocation142_spill] sm:$0xff] %v21328_v26 }
 0x1c2   :  { %1642 = vmatmul.mubr.bf16.gmra.mrb[204].mxu0 %v20383_v35 }
 0x1c3   :  { %16185 = vmatprep.mubr.msk.bf16.mxu0 %vm921_vm0, %v20388_v36 }
 0x1c5   :  { %v21339_v34 = vpop.f32.mrb[100].mxu0 }
 0x1c6   :  { %v21341_v10 = vpop.f32.mrb[101].mxu0 }
 0x1c7   :  { %27576 = vst [vmem:[#allocation143_spill] sm:$0xff] %v21341_v10  ;;  %v21343_v27 = vpop.f32.mrb[102].mxu0 }
 0x1c8   :  { %v21345_v35 = vpop.f32.mrb[103].mxu0 }
 0x1c9   :  { %27577 = vst [vmem:[#allocation144_spill] sm:$0xff] %v21345_v35 }
 0x1ca   :  { %1652 = vmatmul.mubr.bf16.gmra.mrb[208].mxu0 %v20402_v39 }
 0x1cb   :  { %16186 = vmatprep.mubr.msk.bf16.mxu0 %vm921_vm0, %v20407_v40 }
 0x1cd   :  { %v21350_v20 = vpop.f32.mrb[104].mxu0 }
 0x1ce   :  { %v21354_v33 = vpop.f32.mrb[105].mxu0 }
 0x1cf   :  { %27578 = vst [vmem:[#allocation145_spill] sm:$0xff] %v21354_v33  ;;  %v21358_v49 = vpop.f32.mrb[106].mxu0 }
 0x1d0   :  { %v21362_v62 = vpop.f32.mrb[107].mxu0 }
 0x1d1   :  { %27579 = vst [vmem:[#allocation146_spill] sm:$0xff] %v21362_v62 }
 0x1d2   :  { %1662 = vmatmul.mubr.bf16.gmra.mrb[212].mxu0 %v20415_v41 }
 0x1d3   :  { %16187 = vmatprep.mubr.msk.bf16.mxu0 %vm921_vm0, %v20420_v42 }
 0x1d5   :  { %v21369_v40 = vpop.f32.mrb[108].mxu0 }
 0x1d6   :  { %v21373_v36 = vpop.f32.mrb[109].mxu0 }
 0x1d7   :  { %27580 = vst [vmem:[#allocation147_spill] sm:$0xff] %v21373_v36  ;;  %v21377_v33 = vpop.f32.mrb[110].mxu0 }
 0x1d8   :  { %v21381_v62 = vpop.f32.mrb[111].mxu0 }
 0x1d9   :  { %27581 = vst [vmem:[#allocation148_spill] sm:$0xff] %v21381_v62  ;;  %v18938_v62 = vld [vmem:[%s27055_s1 + $0x100] ss:$24 sps:$4 sm:$0xff]  }
 0x1da   :  { %1672 = vmatmul.mubr.bf16.gmra.mrb[216].mxu0 %v20428_v43 }
 0x1db   :  { %16188 = vmatprep.mubr.msk.bf16.mxu0 %vm921_vm0, %v20433_v44 }
 0x1dd   :  { %v21388_v42 = vpop.f32.mrb[112].mxu0 }
 0x1de   :  { %v21390_v29 = vpop.f32.mrb[113].mxu0 }
 0x1df   :  { %27582 = vst [vmem:[#allocation149_spill] sm:$0xff] %v21390_v29  ;;  %v21392_v9 = vpop.f32.mrb[114].mxu0 }
 0x1e0   :  { %v21394_v36 = vpop.f32.mrb[115].mxu0 }
 0x1e1   :  { %27583 = vst [vmem:[#allocation150_spill] sm:$0xff] %v21394_v36 }
 0x1e2   :  { %1682 = vmatmul.mubr.bf16.gmra.mrb[220].mxu0 %v20441_v45  ;;  %v18940_v45 = vld [vmem:[%s27055_s1 + $0x104] ss:$24 sps:$4 sm:$0xff]  }
 0x1e3   :  { %16189 = vmatprep.mubr.msk.bf16.mxu0 %vm921_vm0, %v20446_v46  ;;  %2102 = vmatprep.subr.bf16.mxu0 %v18940_v45 }
 0x1e4   :  { %2103 = vmatpush1.bf16.msra.mxu0 %v18938_v62 }
 0x1e5   :  { %v21399_v39 = vpop.f32.mrb[116].mxu0 }
 0x1e6   :  { %v21401_v41 = vpop.f32.mrb[117].mxu0 }
 0x1e7   :  { %27584 = vst [vmem:[#allocation151_spill] sm:$0xff] %v21401_v41  ;;  %v21403_v43 = vpop.f32.mrb[118].mxu0 }
 0x1e8   :  { %v21405_v44 = vpop.f32.mrb[119].mxu0 }
 0x1e9   :  { %27585 = vst [vmem:[#allocation152_spill] sm:$0xff] %v21405_v44 }
 0x1ea   :  { %1692 = vmatmul.mubr.bf16.gmra.mrb[224].mxu0 %v20454_v47 }
 0x1eb   :  { %16190 = vmatprep.mubr.msk.bf16.mxu0 %vm921_vm0, %v20459_v48 }
 0x1ed   :  { %v21416_v46 = vpop.f32.mrb[120].mxu0 }
 0x1ee   :  { %v21420_v10 = vpop.f32.mrb[121].mxu0 }
 0x1ef   :  { %27586 = vst [vmem:[#allocation153_spill] sm:$0xff] %v21420_v10  ;;  %v21424_v26 = vpop.f32.mrb[122].mxu0 }
 0x1f0   :  { %v21428_v38 = vpop.f32.mrb[123].mxu0 }
 0x1f1   :  { %27587 = vst [vmem:[#allocation154_spill] sm:$0xff] %v21428_v38 }
 0x1f2   :  { %1702 = vmatmul.mubr.bf16.gmra.mrb[228].mxu0 %v20473_v51 }
 0x1f3   :  { %16191 = vmatprep.mubr.msk.bf16.mxu0 %vm921_vm0, %v20478_v52 }
 0x1f5   :  { %v21435_v62 = vpop.f32.mrb[124].mxu0 }
 0x1f6   :  { %v21439_v47 = vpop.f32.mrb[125].mxu0 }
 0x1f7   :  { %27588 = vst [vmem:[#allocation155_spill] sm:$0xff] %v21439_v47  ;;  %v21443_v35 = vpop.f32.mrb[126].mxu0 }
 0x1f8   :  { %v21447_v38 = vpop.f32.mrb[127].mxu0 }
 0x1f9   :  { %27589 = vst [vmem:[#allocation156_spill] sm:$0xff] %v21447_v38 }
 0x1fa   :  { %1712 = vmatmul.mubr.bf16.gmra.mrb[232].mxu0 %v20486_v53 }
 0x1fb   :  { %16192 = vmatprep.mubr.msk.bf16.mxu0 %vm921_vm0, %v20491_v54 }
 0x1fd   :  { %v21454_v52 = vpop.f32.mrb[128].mxu0 }
 0x1fe   :  { %v21456_v45 = vpop.f32.mrb[129].mxu0 }
 0x1ff   :  { %27590 = vst [vmem:[#allocation157_spill] sm:$0xff] %v21456_v45  ;;  %v21458_v21 = vpop.f32.mrb[130].mxu0 }
 0x200   :  { %v21460_v47 = vpop.f32.mrb[131].mxu0 }
 0x201   :  { %27591 = vst [vmem:[#allocation158_spill] sm:$0xff] %v21460_v47  ;;  %v18944_v47 = vld [vmem:[%s27055_s1 + $0x160] ss:$24 sps:$4 sm:$0xff]  }
 0x202   :  { %1722 = vmatmul.mubr.bf16.gmra.mrb[236].mxu0 %v20499_v55 }
 0x203   :  { %16193 = vmatprep.mubr.msk.bf16.mxu0 %vm921_vm0, %v20504_v56  ;;  %v18943_v56 = vld [vmem:[%s27055_s1 + $0x134] ss:$24 sps:$4 sm:$0xff]  }
 0x204   :  { %2104 = vmatprep.subr.bf16.mxu0 %v18943_v56 }
 0x205   :  { %v21465_v48 = vpop.f32.mrb[132].mxu0 }
 0x206   :  { %v21467_v51 = vpop.f32.mrb[133].mxu0 }
 0x207   :  { %27592 = vst [vmem:[#allocation159_spill] sm:$0xff] %v21467_v51  ;;  %v21469_v53 = vpop.f32.mrb[134].mxu0 }
 0x208   :  { %v21471_v54 = vpop.f32.mrb[135].mxu0 }
 0x209   :  { %27593 = vst [vmem:[#allocation160_spill] sm:$0xff] %v21471_v54 }
 0x20a   :  { %1732 = vmatmul.mubr.bf16.gmra.mrb[240].mxu0 %v20512_v57 }
 0x20b   :  { %16194 = vmatprep.mubr.msk.bf16.mxu0 %vm921_vm0, %v20517_v58 }
 0x20d   :  { %v21476_v38 = vpop.f32.mrb[136].mxu0 }
 0x20e   :  { %v21480_v44 = vpop.f32.mrb[137].mxu0 }
 0x20f   :  { %27594 = vst [vmem:[#allocation161_spill] sm:$0xff] %v21480_v44  ;;  %v21484_v41 = vpop.f32.mrb[138].mxu0 }
 0x210   :  { %v21488_v10 = vpop.f32.mrb[139].mxu0 }
 0x211   :  { %27595 = vst [vmem:[#allocation162_spill] sm:$0xff] %v21488_v10 }
 0x212   :  { %1742 = vmatmul.mubr.bf16.gmra.mrb[244].mxu0 %v20525_v59 }
 0x213   :  { %16195 = vmatprep.mubr.msk.bf16.mxu0 %vm921_vm0, %v20530_v60  ;;  %v18941_v60 = vld [vmem:[%s27055_s1 + $0x130] ss:$24 sps:$4 sm:$0xff]  }
 0x214   :  { %2105 = vmatpush1.bf16.msra.mxu0 %v18941_v60 }
 0x215   :  { %v21495_v58 = vpop.f32.mrb[140].mxu0 }
 0x216   :  { %v21499_v55 = vpop.f32.mrb[141].mxu0 }
 0x217   :  { %27596 = vst [vmem:[#allocation163_spill] sm:$0xff] %v21499_v55  ;;  %v21503_v44 = vpop.f32.mrb[142].mxu0 }
 0x218   :  { %v21507_v10 = vpop.f32.mrb[143].mxu0 }
 0x219   :  { %27597 = vst [vmem:[#allocation164_spill] sm:$0xff] %v21507_v10 }
 0x21a   :  { %1752 = vmatmul.mubr.bf16.gmra.mrb[248].mxu0 %v20544_v63 }
 0x21b   :  { %16196 = vmatprep.mubr.msk.bf16.mxu0 %vm921_vm0, %v20549_v0 }
 0x21d   :  { %v21520_v36 = vpop.f32.mrb[144].mxu0 }
 0x21e   :  { %v21522_v57 = vpop.f32.mrb[145].mxu0 }
 0x21f   :  { %27598 = vst [vmem:[#allocation165_spill] sm:$0xff] %v21522_v57  ;;  %v21524_v59 = vpop.f32.mrb[146].mxu0 }
 0x220   :  { %v21526_v10 = vpop.f32.mrb[147].mxu0 }
 0x221   :  { %27599 = vst [vmem:[#allocation166_spill] sm:$0xff] %v21526_v10 }
 0x222   :  { %1762 = vmatmul.mubr.bf16.gmra.mrb[252].mxu0 %v20557_v1 }
 0x223   :  { %16197 = vmatprep.mubr.msk.bf16.mxu0 %vm921_vm0, %v20562_v2 }
 0x225   :  { %v21531_v54 = vpop.f32.mrb[148].mxu0 }
 0x226   :  { %v21533_v63 = vpop.f32.mrb[149].mxu0 }
 0x227   :  { %27600 = vst [vmem:[#allocation167_spill] sm:$0xff] %v21533_v63  ;;  %v21535_v0 = vpop.f32.mrb[150].mxu0 }
 0x228   :  { %v21537_v56 = vpop.f32.mrb[151].mxu0 }
 0x229   :  { %27601 = vst [vmem:[#allocation168_spill] sm:$0xff] %v21537_v56 }
 0x22a   :  { %1772 = vmatmul.mubr.bf16.gmra.mrb[0].mxu0 %v20570_v3  ;;  %v18946_v3 = vld [vmem:[%s27055_s1 + $0x164] ss:$24 sps:$4 sm:$0xff]  }
 0x22b   :  { %16198 = vmatprep.mubr.msk.bf16.mxu0 %vm921_vm0, %v20575_v4  ;;  %2106 = vmatprep.subr.bf16.mxu0 %v18946_v3 }
 0x22c   :  { %2107 = vmatpush1.bf16.msra.mxu0 %v18944_v47 }
 0x22d   :  { %v21542_v60 = vpop.f32.mrb[152].mxu0 }
 0x22e   :  { %v21546_v55 = vpop.f32.mrb[153].mxu0 }
 0x22f   :  { %27602 = vst [vmem:[#allocation169_spill] sm:$0xff] %v21546_v55  ;;  %v21550_v51 = vpop.f32.mrb[154].mxu0 }
 0x230   :  { %v21554_v45 = vpop.f32.mrb[155].mxu0 }
 0x231   :  { %27603 = vst [vmem:[#allocation170_spill] sm:$0xff] %v21554_v45 }
 0x232   :  { %1782 = vmatmul.mubr.bf16.gmra.mrb[4].mxu0 %v20583_v5 }
 0x233   :  { %16199 = vmatprep.mubr.msk.bf16.mxu0 %vm921_vm0, %v20588_v6 }
 0x235   :  { %v21561_v4 = vpop.f32.mrb[156].mxu0 }
 0x236   :  { %v21565_v1 = vpop.f32.mrb[157].mxu0 }
 0x237   :  { %27604 = vst [vmem:[#allocation171_spill] sm:$0xff] %v21565_v1  ;;  %v21569_v55 = vpop.f32.mrb[158].mxu0 }
 0x238   :  { %27605 = vst [vmem:[#allocation172_spill] sm:$0xff] %v21569_v55  ;;  %v21573_v45 = vpop.f32.mrb[159].mxu0  ;;  %v27692_v55 = vld [vmem:[#allocation50_spill] sm:$0xff] }
 0x239   :  { %27606 = vst [vmem:[#allocation173_spill] sm:$0xff] %v21573_v45 }
 0x23a   :  { %1792 = vmatmul.mubr.bf16.gmra.mrb[8].mxu0 %v20596_v7 }
 0x23b   :  { %16200 = vmatprep.mubr.msk.bf16.mxu0 %vm921_vm0, %v20601_v8 }
 0x23d   :  { %v21580_v6 = vpop.f32.mrb[160].mxu0 }
 0x23e   :  { %27607 = vst [vmem:[#allocation174_spill] sm:$0xff] %v21580_v6  ;;  %v21588_v2 = vpop.f32.mrb[161].mxu0  ;;  %v27660_v6 = vld [vmem:[#allocation25_spill] sm:$0xff] }
 0x23f   :  { %27608 = vst [vmem:[#allocation175_spill] sm:$0xff] %v21588_v2  ;;  %v21590_v1 = vpop.f32.mrb[162].mxu0 }
 0x240   :  { %27609 = vst [vmem:[#allocation176_spill] sm:$0xff] %v21590_v1  ;;  %v21592_v5 = vpop.f32.mrb[163].mxu0 }
 0x241   :  { %27610 = vst [vmem:[#allocation177_spill] sm:$0xff] %v21592_v5  ;;  %v27632_v5 = vld [vmem:[#allocation6_spill] sm:$0xff] }
 0x242   :  { %1802 = vmatmul.mubr.bf16.gmra.mrb[12].mxu0 %v20615_v11 }
 0x243   :  { %16201 = vmatprep.mubr.msk.bf16.mxu0 %vm921_vm0, %v20620_v12 }
 0x245   :  { %v21597_v7 = vpop.f32.mrb[164].mxu0 }
 0x246   :  { %27611 = vst [vmem:[#allocation178_spill] sm:$0xff] %v21597_v7  ;;  %v21599_v8 = vpop.f32.mrb[165].mxu0  ;;  %v27658_v7 = vld [vmem:[#allocation23_spill] sm:$0xff] }
 0x247   :  { %27612 = vst [vmem:[#allocation179_spill] sm:$0xff] %v21599_v8  ;;  %v21601_v45 = vpop.f32.mrb[166].mxu0  ;;  %v27631_v8 = vld [vmem:[#allocation5_spill] sm:$0xff] }
 0x248   :  { %27613 = vst [vmem:[#allocation180_spill] sm:$0xff] %v21601_v45  ;;  %v21603_v56 = vpop.f32.mrb[167].mxu0  ;;  %v27638_v45 = vld [vmem:[#allocation8_spill] sm:$0xff] }
 0x249   :  { %27614 = vst [vmem:[#allocation181_spill] sm:$0xff] %v21603_v56 }
 0x24a   :  { %1812 = vmatmul.mubr.bf16.gmra.mrb[16].mxu0 %v20628_v13  ;;  %v18947_v13 = vld [vmem:[%s27055_s1 + $0x190] ss:$24 sps:$4 sm:$0xff]  }
 0x24b   :  { %16202 = vmatprep.mubr.msk.bf16.mxu0 %vm921_vm0, %v20633_v14 }
 0x24d   :  { %v21608_v3 = vpop.f32.mrb[168].mxu0 }
 0x24e   :  { %27615 = vst [vmem:[#allocation182_spill] sm:$0xff] %v21608_v3  ;;  %v21612_v47 = vpop.f32.mrb[169].mxu0 }
 0x24f   :  { %27616 = vst [vmem:[#allocation183_spill] sm:$0xff] %v21612_v47  ;;  %v21616_v63 = vpop.f32.mrb[170].mxu0 }
 0x250   :  { %27617 = vst [vmem:[#allocation184_spill] sm:$0xff] %v21616_v63  ;;  %v21620_v57 = vpop.f32.mrb[171].mxu0 }
 0x251   :  { %27618 = vst [vmem:[#allocation185_spill] sm:$0xff] %v21620_v57 }
 0x252   :  { %1822 = vmatmul.mubr.bf16.gmra.mrb[20].mxu0 %v20641_v15  ;;  %v18949_v15 = vld [vmem:[%s27055_s1 + $0x194] ss:$24 sps:$4 sm:$0xff]  }
 0x253   :  { %16203 = vmatprep.mubr.msk.bf16.mxu0 %vm921_vm0, %v20646_v16  ;;  %2108 = vmatprep.subr.bf16.mxu0 %v18949_v15 }
 0x254   :  { %2109 = vmatpush1.bf16.msra.mxu0 %v18947_v13 }
 0x255   :  { %v21627_v14 = vpop.f32.mrb[172].mxu0 }
 0x256   :  { %27619 = vst [vmem:[#allocation186_spill] sm:$0xff] %v21627_v14  ;;  %v21631_v11 = vpop.f32.mrb[173].mxu0  ;;  %v27657_v14 = vld [vmem:[#allocation11_spill] sm:$0xff] }
 0x257   :  { %27620 = vst [vmem:[#allocation187_spill] sm:$0xff] %v21631_v11  ;;  %v21635_v47 = vpop.f32.mrb[174].mxu0  ;;  %v27659_v63 = vmax.f32 %v27657_v14, %v27658_v7 }
 0x258   :  { %27621 = vst [vmem:[#allocation188_spill] sm:$0xff] %v21635_v47  ;;  %v21639_v57 = vpop.f32.mrb[175].mxu0 }
 0x259   :  { %27622 = vst [vmem:[#allocation189_spill] sm:$0xff] %v21639_v57 }
 0x25a   :  { %1832 = vmatmul.mubr.bf16.gmra.mrb[24].mxu0 %v20654_v17 }
 0x25b   :  { %16204 = vmatprep.mubr.msk.bf16.mxu0 %vm921_vm0, %v20659_v18 }
 0x25d   :  { %v21646_v16 = vpop.f32.mrb[176].mxu0 }
 0x25e   :  { %27623 = vst [vmem:[#allocation190_spill] sm:$0xff] %v21646_v16  ;;  %v21648_v12 = vpop.f32.mrb[177].mxu0 }
 0x25f   :  { %27624 = vst [vmem:[#allocation191_spill] sm:$0xff] %v21648_v12  ;;  %v21650_v10 = vpop.f32.mrb[178].mxu0 }
 0x260   :  { %27625 = vst [vmem:[#allocation192_spill] sm:$0xff] %v21650_v10  ;;  %v21652_v11 = vpop.f32.mrb[179].mxu0  ;;  %v27654_v10 = vld [vmem:[#allocation21_spill] sm:$0xff] }
 0x261   :  { %27626 = vst [vmem:[#allocation193_spill] sm:$0xff] %v21652_v11  ;;  %v27644_v11 = vld [vmem:[#allocation10_spill] sm:$0xff] }
 0x262   :  { %1842 = vmatmul.mubr.bf16.gmra.mrb[28].mxu0 %v20667_v19 }
 0x263   :  { %16205 = vmatprep.mubr.msk.bf16.mxu0 %vm921_vm0, %v20678_v23 }
 0x265   :  { %v21663_v17 = vpop.f32.mrb[180].mxu0 }
 0x266   :  { %27627 = vst [vmem:[#allocation194_spill] sm:$0xff] %v21663_v17  ;;  %v21665_v18 = vpop.f32.mrb[181].mxu0 }
 0x267   :  { %27628 = vst [vmem:[#allocation195_spill] sm:$0xff] %v21665_v18  ;;  %v21667_v57 = vpop.f32.mrb[182].mxu0 }
 0x268   :  { %27629 = vst [vmem:[#allocation196_spill] sm:$0xff] %v21667_v57  ;;  %v21669_v56 = vpop.f32.mrb[183].mxu0  ;;  %v27652_v57 = vld [vmem:[#allocation19_spill] sm:$0xff] }
 0x269   :  { %27630 = vst [vmem:[#allocation197_spill] sm:$0xff] %v21669_v56 }
 0x26a   :  { %1852 = vmatmul.mubr.bf16.gmra.mrb[32].mxu0 %v27631_v8  ;;  %v27637_v8 = vld [vmem:[#allocation7_spill] sm:$0xff] }
 0x26b   :  { %16206 = vmatprep.mubr.msk.bf16.mxu0 %vm921_vm0, %v27632_v5  ;;  %v18950_v5 = vld [vmem:[%s27055_s1 + $0x1c0] ss:$24 sps:$4 sm:$0xff]  }
 0x26d   :  { %v21674_v2 = vpop.f32.mrb[184].mxu0 }
 0x26e   :  { %27633 = vst [vmem:[#allocation5_spill] sm:$0xff] %v21674_v2  ;;  %v21678_v23 = vpop.f32.mrb[185].mxu0 }
 0x26f   :  { %27634 = vst [vmem:[#allocation6_spill] sm:$0xff] %v21678_v23  ;;  %v21682_v15 = vpop.f32.mrb[186].mxu0 }
 0x270   :  { %27635 = vst [vmem:[#allocation198_spill] sm:$0xff] %v21682_v15  ;;  %v21686_v47 = vpop.f32.mrb[187].mxu0 }
 0x271   :  { %27636 = vst [vmem:[#allocation199_spill] sm:$0xff] %v21686_v47 }
 0x272   :  { %1862 = vmatmul.mubr.bf16.gmra.mrb[36].mxu0 %v27637_v8  ;;  %v27643_v8 = vld [vmem:[#allocation9_spill] sm:$0xff] }
 0x273   :  { %16207 = vmatprep.mubr.msk.bf16.mxu0 %vm921_vm0, %v27638_v45  ;;  %v18952_v45 = vld [vmem:[%s27055_s1 + $0x1c4] ss:$24 sps:$4 sm:$0xff]  }
 0x274   :  { %2110 = vmatprep.subr.bf16.mxu0 %v18952_v45  ;;  %v3181_v45 = vld [vmem:[%s27057_s2] sm:$0x7] }
 0x275   :  { %v21693_v19 = vpop.f32.mrb[188].mxu0  ;;  %2111 = vmatpush1.bf16.msra.mxu0 %v18950_v5 }
 0x276   :  { %27639 = vst [vmem:[#allocation7_spill] sm:$0xff] %v21693_v19  ;;  %v21697_v23 = vpop.f32.mrb[189].mxu0 }
 0x277   :  { %27640 = vst [vmem:[#allocation8_spill] sm:$0xff] %v21697_v23  ;;  %v21701_v12 = vpop.f32.mrb[190].mxu0  ;;  %v27647_v23 = vld [vmem:[#allocation13_spill] sm:$0xff] }
 0x278   :  { %27641 = vst [vmem:[#allocation200_spill] sm:$0xff] %v21701_v12  ;;  %v21705_v47 = vpop.f32.mrb[191].mxu0 }
 0x279   :  { %27642 = vst [vmem:[#allocation201_spill] sm:$0xff] %v21705_v47 }
 0x27a   :  { %1872 = vmatmul.mubr.bf16.gmra.mrb[40].mxu0 %v27643_v8  ;;  %v27648_v8 = vld [vmem:[#allocation15_spill] sm:$0xff] }
 0x27b   :  { %16208 = vmatprep.mubr.msk.bf16.mxu0 %vm921_vm0, %v27644_v11  ;;  %v3267_v11 = vlaneseq }
 0x27d   :  { %v21712_v13 = vpop.f32.mrb[192].mxu0 }
 0x27e   :  { %27645 = vst [vmem:[#allocation9_spill] sm:$0xff] %v21712_v13  ;;  %v1615_v19 = vpop.f32.mrb[193].mxu0 }
 0x27f   :  { %v21714_v17 = vpop.f32.mrb[194].mxu0 }
 0x280   :  { %27646 = vst [vmem:[#allocation10_spill] sm:$0xff] %v21714_v17  ;;  %v1619_v29 = vpop.f32.mrb[195].mxu0  ;;  %v27691_v17 = vld [vmem:[#allocation38_spill] sm:$0xff] }
 0x282   :  { %1882 = vmatmul.mubr.bf16.gmra.mrb[44].mxu0 %v27647_v23  ;;  %v21729_v23 = vshrl.u32 %v3267_v11, 7 }
 0x283   :  { %16209 = vmatprep.mubr.msk.bf16.mxu0 %vm921_vm0, %v27648_v8 }
 0x284   :  { %27651 = vst [vmem:[#allocation202_spill] sm:$0xff] %v21729_v23  ;;  %v21733_v15 = vsub.s32 0, %v21729_v23 }
 0x285   :  { %v21725_v47 = vpop.f32.mrb[196].mxu0 }
 0x286   :  { %27649 = vst [vmem:[#allocation13_spill] sm:$0xff] %v21725_v47  ;;  %v1625_v56 = vpop.f32.mrb[197].mxu0  ;;  %27653 = vst [vmem:[#allocation19_spill] sm:$0xff] %v21733_v15  ;;  %v21745_v16 = vrot.slane %v3181_v45, %v21733_v15  ;;  %v27664_v15 = vld [vmem:[#allocation27_spill] sm:$0xff]  ;;  %v27690_v47 = vld [vmem:[#allocation49_spill] sm:$0xff] }
 0x287   :  { %v21727_v18 = vpop.f32.mrb[198].mxu0 }
 0x288   :  { %27650 = vst [vmem:[#allocation15_spill] sm:$0xff] %v21727_v18  ;;  %v1629_v12 = vpop.f32.mrb[199].mxu0 }
 0x28a   :  { %1892 = vmatmul.mubr.bf16.gmra.mrb[48].mxu0 %v27652_v57 }
 0x28b   :  { %16210 = vmatprep.mubr.msk.bf16.mxu0 %vm921_vm0, %v27654_v10 }
 0x28d   :  { %v21740_v8 = vpop.f32.mrb[200].mxu0 }
 0x28e   :  { %27655 = vst [vmem:[#allocation21_spill] sm:$0xff] %v21740_v8  ;;  %v1635_v11 = vpop.f32.mrb[201].mxu0  ;;  %v27661_v8 = vld [vmem:[#allocation14_spill] sm:$0xff] }
 0x28f   :  { %v3233_v2 = vmax.f32 %v1615_v19, %v1635_v11  ;;  %v21747_v57 = vpop.f32.mrb[202].mxu0  ;;  %v27662_v19 = vld [vmem:[#allocation26_spill] sm:$0xff] }
 0x290   :  { %27656 = vst [vmem:[#allocation203_spill] sm:$0xff] %v21747_v57  ;;  %v1639_v10 = vpop.f32.mrb[203].mxu0  ;;  %v27663_v11 = vmax.f32 %v27661_v8, %v27662_v19  ;;  %v27671_v57 = vld [vmem:[#allocation31_spill] sm:$0xff] }
 0x291   :  { %v3254_v1 = vmax.f32 %v27659_v63, %v3233_v2  ;;  %v3239_v3 = vmax.f32 %v1619_v29, %v1639_v10  ;;  %v27669_v10 = vld [vmem:[#allocation29_spill] sm:$0xff] }
 0x292   :  { %1902 = vmatmul.mubr.bf16.gmra.mrb[52].mxu0 %v27660_v6 }
 0x293   :  { %v3282_v5 = vadd.f32 %v21745_v16, %v3254_v1  ;;  %v3257_v45 = vmax.f32 %v27663_v11, %v3239_v3  ;;  %16211 = vmatprep.mubr.msk.bf16.mxu0 %vm921_vm0, %v27664_v15  ;;  %v27668_v15 = vld [vmem:[#allocation17_spill] sm:$0xff] }
 0x294   :  { %v27670_v19 = vmax.f32 %v27668_v15, %v27669_v10  ;;  %v27680_v10 = vld [vmem:[#allocation39_spill] sm:$0xff] }
 0x295   :  { %v3285_v13 = vadd.f32 %v21745_v16, %v3257_v45  ;;  %v21762_v23 = vpop.f32.mrb[204].mxu0  ;;  %v3294_v29 = vmax.f32 %v3282_v5, 0.0  ;;  %v27672_v5 = vld [vmem:[#allocation20_spill] sm:$0xff] }
 0x296   :  { %27665 = vst [vmem:[#allocation11_spill] sm:$0xff] %v21762_v23  ;;  %v1645_v63 = vpop.f32.mrb[205].mxu0  ;;  %v27675_v23 = vld [vmem:[#allocation33_spill] sm:$0xff] }
 0x297   :  { %v3297_v2 = vmax.f32 %v3285_v13, 0.0  ;;  %v3245_v6 = vmax.f32 %v1625_v56, %v1645_v63  ;;  %v21766_v14 = vpop.f32.mrb[206].mxu0  ;;  %v27673_v13 = vld [vmem:[#allocation32_spill] sm:$0xff] }
 0x298   :  { %27666 = vst [vmem:[#allocation23_spill] sm:$0xff] %v21766_v14  ;;  %v1649_v3 = vpop.f32.mrb[207].mxu0  ;;  %v27674_v56 = vmax.f32 %v27672_v5, %v27673_v13  ;;  %v27683_v5 = vld [vmem:[#allocation43_spill] sm:$0xff] }
 0x299   :  { %v21770_v8 = vpack.c.bf16 %v3297_v2, %v3294_v29  ;;  %v3260_v11 = vmax.f32 %v27670_v19, %v3245_v6  ;;  %v3251_v45 = vmax.f32 %v1629_v12, %v1649_v3  ;;  %v27679_v3 = vld [vmem:[#allocation37_spill] sm:$0xff] }
 0x29a   :  { %1912 = vmatmul.mubr.bf16.gmra.mrb[56].mxu0 %v27671_v57 }
 0x29b   :  { %27667 = vst [vmem:[#allocation25_spill] sm:$0xff] %v21770_v8  ;;  %v3288_v7 = vadd.f32 %v21745_v16, %v3260_v11  ;;  %v3263_v63 = vmax.f32 %v27674_v56, %v3251_v45  ;;  %16212 = vmatprep.mubr.msk.bf16.mxu0 %vm921_vm0, %v27675_v23 }
 0x29d   :  { %v3291_v1 = vadd.f32 %v21745_v16, %v3263_v63  ;;  %v21783_v29 = vpop.f32.mrb[208].mxu0  ;;  %v3300_v8 = vmax.f32 %v3288_v7, 0.0  ;;  %v27684_v7 = vld [vmem:[#allocation45_spill] sm:$0xff] }
 0x29e   :  { %27676 = vst [vmem:[#allocation14_spill] sm:$0xff] %v21783_v29  ;;  %v1655_v2 = vpop.f32.mrb[209].mxu0  ;;  %v27722_v29 = vld [vmem:[#allocation74_spill] sm:$0xff] }
 0x29f   :  { %v3303_v15 = vmax.f32 %v3291_v1, 0.0  ;;  %v21785_v6 = vpop.f32.mrb[210].mxu0 }
 0x2a0   :  { %27677 = vst [vmem:[#allocation26_spill] sm:$0xff] %v21785_v6  ;;  %v1659_v12 = vpop.f32.mrb[211].mxu0  ;;  %v27721_v6 = vld [vmem:[#allocation62_spill] sm:$0xff] }
 0x2a1   :  { %v21787_v57 = vpack.c.bf16 %v3303_v15, %v3300_v8  ;;  %v27693_v8 = vmax.f32 %v27691_v17, %v27692_v55 }
 0x2a2   :  { %1922 = vmatmul.mubr.bf16.gmra.mrb[60].mxu0 %v27679_v3 }
 0x2a3   :  { %27678 = vst [vmem:[#allocation27_spill] sm:$0xff] %v21787_v57  ;;  %16213 = vmatprep.mubr.msk.bf16.mxu0 %vm921_vm0, %v27680_v10  ;;  %v27687_v10 = vld [vmem:[#allocation35_spill] sm:$0xff] }
 0x2a4   :  { %v27688_v57 = vld [vmem:[#allocation47_spill] sm:$0xff] }
 0x2a5   :  { %v21792_v19 = vpop.f32.mrb[212].mxu0  ;;  %v27689_v14 = vmax.f32 %v27687_v10, %v27688_v57  ;;  %v27699_v10 = vld [vmem:[#allocation53_spill] sm:$0xff] }
 0x2a6   :  { %27681 = vst [vmem:[#allocation17_spill] sm:$0xff] %v21792_v19  ;;  %v1665_v23 = vpop.f32.mrb[213].mxu0  ;;  %v27720_v19 = vld [vmem:[#allocation73_spill] sm:$0xff] }
 0x2a7   :  { %v21794_v11 = vpop.f32.mrb[214].mxu0 }
 0x2a8   :  { %27682 = vst [vmem:[#allocation29_spill] sm:$0xff] %v21794_v11  ;;  %v1669_v45 = vpop.f32.mrb[215].mxu0 }
 0x2aa   :  { %1932 = vmatmul.mubr.bf16.gmra.mrb[64].mxu0 %v27683_v5 }
 0x2ab   :  { %16214 = vmatprep.mubr.msk.bf16.mxu0 %vm921_vm0, %v27684_v7 }
 0x2ad   :  { %v21799_v1 = vpop.f32.mrb[216].mxu0 }
 0x2ae   :  { %27685 = vst [vmem:[#allocation31_spill] sm:$0xff] %v21799_v1  ;;  %v1675_v13 = vpop.f32.mrb[217].mxu0 }
 0x2af   :  { %v3369_v56 = vmax.f32 %v1655_v2, %v1675_v13  ;;  %v21803_v63 = vpop.f32.mrb[218].mxu0  ;;  %v27694_v2 = vld [vmem:[#allocation51_spill] sm:$0xff] }
 0x2b0   :  { %27686 = vst [vmem:[#allocation20_spill] sm:$0xff] %v21803_v63  ;;  %v1679_v3 = vpop.f32.mrb[219].mxu0  ;;  %v27701_v63 = vld [vmem:[#allocation55_spill] sm:$0xff] }
 0x2b1   :  { %v3390_v5 = vmax.f32 %v27689_v14, %v3369_v56  ;;  %v3375_v18 = vmax.f32 %v1659_v12, %v1679_v3 }
 0x2b2   :  { %1942 = vmatmul.mubr.bf16.gmra.mrb[68].mxu0 %v27690_v47 }
 0x2b3   :  { %v3402_v7 = vadd.f32 %v3390_v5, %v21745_v16  ;;  %v3393_v1 = vmax.f32 %v27693_v8, %v3375_v18  ;;  %16215 = vmatprep.mubr.msk.bf16.mxu0 %vm921_vm0, %v27694_v2  ;;  %v27698_v8 = vld [vmem:[#allocation41_spill] sm:$0xff] }
 0x2b5   :  { %v3405_v13 = vadd.f32 %v3393_v1, %v21745_v16  ;;  %v21818_v15 = vpop.f32.mrb[220].mxu0  ;;  %v3414_v12 = vmax.f32 %v3402_v7, 0.0  ;;  %v27700_v1 = vmax.f32 %v27698_v8, %v27699_v10  ;;  %v27702_v7 = vld [vmem:[#allocation44_spill] sm:$0xff]  ;;  %v27710_v10 = vld [vmem:[#allocation63_spill] sm:$0xff] }
 0x2b6   :  { %27695 = vst [vmem:[#allocation32_spill] sm:$0xff] %v21818_v15  ;;  %v1685_v14 = vpop.f32.mrb[221].mxu0  ;;  %v27705_v15 = vld [vmem:[#allocation57_spill] sm:$0xff] }
 0x2b7   :  { %v3417_v56 = vmax.f32 %v3405_v13, 0.0  ;;  %v3381_v47 = vmax.f32 %v1665_v23, %v1685_v14  ;;  %v21822_v3 = vpop.f32.mrb[222].mxu0  ;;  %v27703_v13 = vld [vmem:[#allocation56_spill] sm:$0xff] }
 0x2b8   :  { %27696 = vst [vmem:[#allocation33_spill] sm:$0xff] %v21822_v3  ;;  %v1689_v17 = vpop.f32.mrb[223].mxu0  ;;  %v27704_v23 = vmax.f32 %v27702_v7, %v27703_v13  ;;  %v27713_v7 = vld [vmem:[#allocation67_spill] sm:$0xff] }
 0x2b9   :  { %v21826_v18 = vpack.c.bf16 %v3417_v56, %v3414_v12  ;;  %v3396_v5 = vmax.f32 %v27700_v1, %v3381_v47  ;;  %v3387_v2 = vmax.f32 %v1669_v45, %v1689_v17  ;;  %v27709_v17 = vld [vmem:[#allocation61_spill] sm:$0xff] }
 0x2ba   :  { %1952 = vmatmul.mubr.bf16.gmra.mrb[72].mxu0 %v27701_v63 }
 0x2bb   :  { %27697 = vst [vmem:[#allocation37_spill] sm:$0xff] %v21826_v18  ;;  %v3408_v57 = vadd.f32 %v3396_v5, %v21745_v16  ;;  %v3399_v14 = vmax.f32 %v27704_v23, %v3387_v2  ;;  %16216 = vmatprep.mubr.msk.bf16.mxu0 %vm921_vm0, %v27705_v15 }
 0x2bd   :  { %v3411_v55 = vadd.f32 %v3399_v14, %v21745_v16  ;;  %v21839_v12 = vpop.f32.mrb[224].mxu0  ;;  %v3420_v18 = vmax.f32 %v3408_v57, 0.0  ;;  %v27714_v57 = vld [vmem:[#allocation69_spill] sm:$0xff] }
 0x2be   :  { %27706 = vst [vmem:[#allocation39_spill] sm:$0xff] %v21839_v12  ;;  %v1695_v56 = vpop.f32.mrb[225].mxu0  ;;  %v27752_v12 = vld [vmem:[#allocation98_spill] sm:$0xff] }
 0x2bf   :  { %v3423_v8 = vmax.f32 %v3411_v55, 0.0  ;;  %v21841_v47 = vpop.f32.mrb[226].mxu0 }
 0x2c0   :  { %27707 = vst [vmem:[#allocation43_spill] sm:$0xff] %v21841_v47  ;;  %v1699_v45 = vpop.f32.mrb[227].mxu0  ;;  %v27751_v47 = vld [vmem:[#allocation86_spill] sm:$0xff] }
 0x2c1   :  { %v21843_v63 = vpack.c.bf16 %v3423_v8, %v3420_v18  ;;  %v27723_v18 = vmax.f32 %v27721_v6, %v27722_v29 }
 0x2c2   :  { %1962 = vmatmul.mubr.bf16.gmra.mrb[76].mxu0 %v27709_v17 }
 0x2c3   :  { %27708 = vst [vmem:[#allocation45_spill] sm:$0xff] %v21843_v63  ;;  %16217 = vmatprep.mubr.msk.bf16.mxu0 %vm921_vm0, %v27710_v10  ;;  %v27717_v10 = vld [vmem:[#allocation59_spill] sm:$0xff] }
 0x2c4   :  { %v27718_v63 = vld [vmem:[#allocation71_spill] sm:$0xff] }
 0x2c5   :  { %v21848_v1 = vpop.f32.mrb[228].mxu0  ;;  %v27719_v3 = vmax.f32 %v27717_v10, %v27718_v63  ;;  %v27729_v10 = vld [vmem:[#allocation77_spill] sm:$0xff] }
 0x2c6   :  { %27711 = vst [vmem:[#allocation35_spill] sm:$0xff] %v21848_v1  ;;  %v1705_v15 = vpop.f32.mrb[229].mxu0  ;;  %v27750_v1 = vld [vmem:[#allocation97_spill] sm:$0xff] }
 0x2c7   :  { %v21850_v5 = vpop.f32.mrb[230].mxu0 }
 0x2c8   :  { %27712 = vst [vmem:[#allocation47_spill] sm:$0xff] %v21850_v5  ;;  %v1709_v2 = vpop.f32.mrb[231].mxu0 }
 0x2ca   :  { %1972 = vmatmul.mubr.bf16.gmra.mrb[80].mxu0 %v27713_v7 }
 0x2cb   :  { %16218 = vmatprep.mubr.msk.bf16.mxu0 %vm921_vm0, %v27714_v57 }
 0x2cd   :  { %v21855_v55 = vpop.f32.mrb[232].mxu0 }
 0x2ce   :  { %27715 = vst [vmem:[#allocation49_spill] sm:$0xff] %v21855_v55  ;;  %v1715_v13 = vpop.f32.mrb[233].mxu0 }
 0x2cf   :  { %v3489_v23 = vmax.f32 %v1695_v56, %v1715_v13  ;;  %v21859_v14 = vpop.f32.mrb[234].mxu0  ;;  %v27724_v56 = vld [vmem:[#allocation75_spill] sm:$0xff] }
 0x2d0   :  { %27716 = vst [vmem:[#allocation38_spill] sm:$0xff] %v21859_v14  ;;  %v1719_v17 = vpop.f32.mrb[235].mxu0  ;;  %v27731_v14 = vld [vmem:[#allocation79_spill] sm:$0xff] }
 0x2d1   :  { %v3510_v7 = vmax.f32 %v27719_v3, %v3489_v23  ;;  %v3495_v11 = vmax.f32 %v1699_v45, %v1719_v17 }
 0x2d2   :  { %1982 = vmatmul.mubr.bf16.gmra.mrb[84].mxu0 %v27720_v19 }
 0x2d3   :  { %v3522_v57 = vadd.f32 %v3510_v7, %v21745_v16  ;;  %v3513_v55 = vmax.f32 %v27723_v18, %v3495_v11  ;;  %16219 = vmatprep.mubr.msk.bf16.mxu0 %vm921_vm0, %v27724_v56  ;;  %v27728_v18 = vld [vmem:[#allocation65_spill] sm:$0xff] }
 0x2d5   :  { %v3525_v13 = vadd.f32 %v3513_v55, %v21745_v16  ;;  %v21874_v8 = vpop.f32.mrb[236].mxu0  ;;  %v3534_v45 = vmax.f32 %v3522_v57, 0.0  ;;  %v27730_v55 = vmax.f32 %v27728_v18, %v27729_v10  ;;  %v27732_v57 = vld [vmem:[#allocation68_spill] sm:$0xff]  ;;  %v27740_v10 = vld [vmem:[#allocation87_spill] sm:$0xff] }
 0x2d6   :  { %27725 = vst [vmem:[#allocation50_spill] sm:$0xff] %v21874_v8  ;;  %v1725_v3 = vpop.f32.mrb[237].mxu0  ;;  %v27735_v8 = vld [vmem:[#allocation81_spill] sm:$0xff] }
 0x2d7   :  { %v3537_v23 = vmax.f32 %v3525_v13, 0.0  ;;  %v3501_v19 = vmax.f32 %v1705_v15, %v1725_v3  ;;  %v21878_v17 = vpop.f32.mrb[238].mxu0  ;;  %v27733_v13 = vld [vmem:[#allocation80_spill] sm:$0xff] }
 0x2d8   :  { %27726 = vst [vmem:[#allocation51_spill] sm:$0xff] %v21878_v17  ;;  %v1729_v6 = vpop.f32.mrb[239].mxu0  ;;  %v27734_v15 = vmax.f32 %v27732_v57, %v27733_v13  ;;  %v27743_v57 = vld [vmem:[#allocation91_spill] sm:$0xff] }
 0x2d9   :  { %v21882_v11 = vpack.c.bf16 %v3537_v23, %v3534_v45  ;;  %v3516_v7 = vmax.f32 %v27730_v55, %v3501_v19  ;;  %v3507_v56 = vmax.f32 %v1709_v2, %v1729_v6  ;;  %v27739_v6 = vld [vmem:[#allocation85_spill] sm:$0xff] }
 0x2da   :  { %1992 = vmatmul.mubr.bf16.gmra.mrb[88].mxu0 %v27731_v14 }
 0x2db   :  { %27727 = vst [vmem:[#allocation41_spill] sm:$0xff] %v21882_v11  ;;  %v3528_v63 = vadd.f32 %v3516_v7, %v21745_v16  ;;  %v3519_v3 = vmax.f32 %v27734_v15, %v3507_v56  ;;  %16220 = vmatprep.mubr.msk.bf16.mxu0 %vm921_vm0, %v27735_v8 }
 0x2dd   :  { %v3531_v29 = vadd.f32 %v3519_v3, %v21745_v16  ;;  %v21895_v45 = vpop.f32.mrb[240].mxu0  ;;  %v3540_v11 = vmax.f32 %v3528_v63, 0.0  ;;  %v27744_v63 = vld [vmem:[#allocation93_spill] sm:$0xff] }
 0x2de   :  { %27736 = vst [vmem:[#allocation53_spill] sm:$0xff] %v21895_v45  ;;  %v1735_v23 = vpop.f32.mrb[241].mxu0  ;;  %v27778_v45 = vld [vmem:[#allocation122_spill] sm:$0xff] }
 0x2df   :  { %v3543_v18 = vmax.f32 %v3531_v29, 0.0  ;;  %v21897_v19 = vpop.f32.mrb[242].mxu0 }
 0x2e0   :  { %27737 = vst [vmem:[#allocation55_spill] sm:$0xff] %v21897_v19  ;;  %v1739_v2 = vpop.f32.mrb[243].mxu0  ;;  %v27777_v19 = vld [vmem:[#allocation110_spill] sm:$0xff] }
 0x2e1   :  { %v21899_v14 = vpack.c.bf16 %v3543_v18, %v3540_v11  ;;  %v27753_v11 = vmax.f32 %v27751_v47, %v27752_v12 }
 0x2e2   :  { %2002 = vmatmul.mubr.bf16.gmra.mrb[92].mxu0 %v27739_v6 }
 0x2e3   :  { %27738 = vst [vmem:[#allocation44_spill] sm:$0xff] %v21899_v14  ;;  %16221 = vmatprep.mubr.msk.bf16.mxu0 %vm921_vm0, %v27740_v10  ;;  %v27747_v10 = vld [vmem:[#allocation83_spill] sm:$0xff] }
 0x2e4   :  { %v27748_v14 = vld [vmem:[#allocation95_spill] sm:$0xff] }
 0x2e5   :  { %v21904_v55 = vpop.f32.mrb[244].mxu0  ;;  %v27749_v17 = vmax.f32 %v27747_v10, %v27748_v14  ;;  %v27759_v10 = vld [vmem:[#allocation101_spill] sm:$0xff] }
 0x2e6   :  { %27741 = vst [vmem:[#allocation56_spill] sm:$0xff] %v21904_v55  ;;  %v1745_v8 = vpop.f32.mrb[245].mxu0  ;;  %v27776_v55 = vld [vmem:[#allocation121_spill] sm:$0xff] }
 0x2e7   :  { %v21906_v7 = vpop.f32.mrb[246].mxu0 }
 0x2e8   :  { %27742 = vst [vmem:[#allocation57_spill] sm:$0xff] %v21906_v7  ;;  %v1749_v56 = vpop.f32.mrb[247].mxu0 }
 0x2ea   :  { %2012 = vmatmul.mubr.bf16.gmra.mrb[96].mxu0 %v27743_v57 }
 0x2eb   :  { %16222 = vmatprep.mubr.msk.bf16.mxu0 %vm921_vm0, %v27744_v63 }
 0x2ed   :  { %v21911_v29 = vpop.f32.mrb[248].mxu0 }
 0x2ee   :  { %27745 = vst [vmem:[#allocation61_spill] sm:$0xff] %v21911_v29  ;;  %v1755_v13 = vpop.f32.mrb[249].mxu0 }
 0x2ef   :  { %v3609_v15 = vmax.f32 %v1735_v23, %v1755_v13  ;;  %v21915_v3 = vpop.f32.mrb[250].mxu0  ;;  %v27754_v23 = vld [vmem:[#allocation99_spill] sm:$0xff] }
 0x2f0   :  { %27746 = vst [vmem:[#allocation63_spill] sm:$0xff] %v21915_v3  ;;  %v1759_v6 = vpop.f32.mrb[251].mxu0  ;;  %v27761_v3 = vld [vmem:[#allocation103_spill] sm:$0xff] }
 0x2f1   :  { %v3630_v57 = vmax.f32 %v27749_v17, %v3609_v15  ;;  %v3615_v5 = vmax.f32 %v1739_v2, %v1759_v6 }
 0x2f2   :  { %2022 = vmatmul.mubr.bf16.gmra.mrb[100].mxu0 %v27750_v1 }
 0x2f3   :  { %v3642_v63 = vadd.f32 %v3630_v57, %v21745_v16  ;;  %v3633_v29 = vmax.f32 %v27753_v11, %v3615_v5  ;;  %16223 = vmatprep.mubr.msk.bf16.mxu0 %vm921_vm0, %v27754_v23  ;;  %v27758_v11 = vld [vmem:[#allocation89_spill] sm:$0xff] }
 0x2f5   :  { %v3645_v13 = vadd.f32 %v3633_v29, %v21745_v16  ;;  %v21930_v18 = vpop.f32.mrb[252].mxu0  ;;  %v3654_v2 = vmax.f32 %v3642_v63, 0.0  ;;  %v27760_v29 = vmax.f32 %v27758_v11, %v27759_v10  ;;  %v27762_v63 = vld [vmem:[#allocation92_spill] sm:$0xff]  ;;  %v27768_v10 = vld [vmem:[#allocation111_spill] sm:$0xff] }
 0x2f6   :  { %27755 = vst [vmem:[#allocation67_spill] sm:$0xff] %v21930_v18  ;;  %v1765_v17 = vpop.f32.mrb[253].mxu0  ;;  %v27765_v18 = vld [vmem:[#allocation105_spill] sm:$0xff] }
 0x2f7   :  { %v3657_v15 = vmax.f32 %v3645_v13, 0.0  ;;  %v3621_v1 = vmax.f32 %v1745_v8, %v1765_v17  ;;  %v21934_v6 = vpop.f32.mrb[254].mxu0  ;;  %v27763_v13 = vld [vmem:[#allocation104_spill] sm:$0xff] }
 0x2f8   :  { %27756 = vst [vmem:[#allocation69_spill] sm:$0xff] %v21934_v6  ;;  %v1769_v47 = vpop.f32.mrb[255].mxu0  ;;  %v27764_v8 = vmax.f32 %v27762_v63, %v27763_v13  ;;  %v27769_v63 = vld [vmem:[#allocation115_spill] sm:$0xff] }
 0x2f9   :  { %v21938_v5 = vpack.c.bf16 %v3657_v15, %v3654_v2  ;;  %v3636_v57 = vmax.f32 %v27760_v29, %v3621_v1  ;;  %v3627_v23 = vmax.f32 %v1749_v56, %v1769_v47  ;;  %v27767_v47 = vld [vmem:[#allocation109_spill] sm:$0xff] }
 0x2fa   :  { %2032 = vmatmul.mubr.bf16.gmra.mrb[104].mxu0 %v27761_v3 }
 0x2fb   :  { %27757 = vst [vmem:[#allocation59_spill] sm:$0xff] %v21938_v5  ;;  %v3648_v14 = vadd.f32 %v3636_v57, %v21745_v16  ;;  %v3639_v17 = vmax.f32 %v27764_v8, %v3627_v23  ;;  %16224 = vmatprep.mubr.msk.bf16.mxu0 %vm921_vm0, %v27765_v18 }
 0x2fd   :  { %v3651_v12 = vadd.f32 %v3639_v17, %v21745_v16  ;;  %v21951_v2 = vpop.f32.mrb[0].mxu0  ;;  %v3660_v5 = vmax.f32 %v3648_v14, 0.0  ;;  %v27770_v14 = vld [vmem:[#allocation117_spill] sm:$0xff] }
 0x2fe   :  { %v1775_v15 = vpop.f32.mrb[1].mxu0 }
 0x2ff   :  { %v3663_v11 = vmax.f32 %v3651_v12, 0.0  ;;  %v21953_v1 = vpop.f32.mrb[2].mxu0 }
 0x300   :  { %v1779_v56 = vpop.f32.mrb[3].mxu0 }
 0x301   :  { %v21955_v3 = vpack.c.bf16 %v3663_v11, %v3660_v5  ;;  %v27779_v5 = vmax.f32 %v27777_v19, %v27778_v45 }
 0x302   :  { %2042 = vmatmul.mubr.bf16.gmra.mrb[108].mxu0 %v27767_v47 }
 0x303   :  { %27766 = vst [vmem:[#allocation71_spill] sm:$0xff] %v21955_v3  ;;  %16225 = vmatprep.mubr.msk.bf16.mxu0 %vm921_vm0, %v27768_v10  ;;  %v27773_v10 = vld [vmem:[#allocation107_spill] sm:$0xff] }
 0x304   :  { %v27774_v3 = vld [vmem:[#allocation119_spill] sm:$0xff] }
 0x305   :  { %v21960_v29 = vpop.f32.mrb[4].mxu0  ;;  %v27775_v6 = vmax.f32 %v27773_v10, %v27774_v3  ;;  %v27784_v10 = vld [vmem:[#allocation125_spill] sm:$0xff] }
 0x306   :  { %v1785_v18 = vpop.f32.mrb[5].mxu0 }
 0x307   :  { %v21962_v57 = vpop.f32.mrb[6].mxu0 }
 0x308   :  { %v1789_v23 = vpop.f32.mrb[7].mxu0 }
 0x30a   :  { %2052 = vmatmul.mubr.bf16.gmra.mrb[112].mxu0 %v27769_v63 }
 0x30b   :  { %16226 = vmatprep.mubr.msk.bf16.mxu0 %vm921_vm0, %v27770_v14 }
 0x30d   :  { %v21967_v12 = vpop.f32.mrb[8].mxu0 }
 0x30e   :  { %27771 = vst [vmem:[#allocation73_spill] sm:$0xff] %v21967_v12  ;;  %v1795_v13 = vpop.f32.mrb[9].mxu0 }
 0x30f   :  { %v3729_v8 = vmax.f32 %v1775_v15, %v1795_v13  ;;  %v21971_v17 = vpop.f32.mrb[10].mxu0  ;;  %v27780_v15 = vld [vmem:[#allocation123_spill] sm:$0xff] }
 0x310   :  { %27772 = vst [vmem:[#allocation62_spill] sm:$0xff] %v21971_v17  ;;  %v1799_v47 = vpop.f32.mrb[11].mxu0  ;;  %v27786_v17 = vld [vmem:[#allocation127_spill] sm:$0xff] }
 0x311   :  { %v3750_v63 = vmax.f32 %v27775_v6, %v3729_v8  ;;  %v3735_v7 = vmax.f32 %v1779_v56, %v1799_v47 }
 0x312   :  { %2062 = vmatmul.mubr.bf16.gmra.mrb[116].mxu0 %v27776_v55 }
 0x313   :  { %v3762_v14 = vadd.f32 %v3750_v63, %v21745_v16  ;;  %v3753_v12 = vmax.f32 %v27779_v5, %v3735_v7  ;;  %16227 = vmatprep.mubr.msk.bf16.mxu0 %vm921_vm0, %v27780_v15  ;;  %v27783_v5 = vld [vmem:[#allocation113_spill] sm:$0xff] }
 0x315   :  { %v3765_v13 = vadd.f32 %v3753_v12, %v21745_v16  ;;  %v21986_v11 = vpop.f32.mrb[12].mxu0  ;;  %v3774_v56 = vmax.f32 %v3762_v14, 0.0  ;;  %v27785_v12 = vmax.f32 %v27783_v5, %v27784_v10  ;;  %v27787_v14 = vld [vmem:[#allocation116_spill] sm:$0xff]  ;;  %v27793_v10 = vld [vmem:[#allocation134_spill] sm:$0xff] }
 0x316   :  { %27781 = vst [vmem:[#allocation74_spill] sm:$0xff] %v21986_v11  ;;  %v1805_v6 = vpop.f32.mrb[13].mxu0  ;;  %v27790_v11 = vld [vmem:[#allocation129_spill] sm:$0xff] }
 0x317   :  { %v3777_v8 = vmax.f32 %v3765_v13, 0.0  ;;  %v3741_v55 = vmax.f32 %v1785_v18, %v1805_v6  ;;  %v21990_v47 = vpop.f32.mrb[14].mxu0  ;;  %v27788_v13 = vld [vmem:[#allocation128_spill] sm:$0xff] }
 0x318   :  { %v1809_v19 = vpop.f32.mrb[15].mxu0  ;;  %v27789_v18 = vmax.f32 %v27787_v14, %v27788_v13 }
 0x319   :  { %v21994_v7 = vpack.c.bf16 %v3777_v8, %v3774_v56  ;;  %v3756_v63 = vmax.f32 %v27785_v12, %v3741_v55  ;;  %v3747_v15 = vmax.f32 %v1789_v23, %v1809_v19  ;;  %v27792_v19 = vld [vmem:[#allocation132_spill] sm:$0xff] }
 0x31a   :  { %2072 = vmatmul.mubr.bf16.gmra.mrb[120].mxu0 %v27786_v17 }
 0x31b   :  { %27782 = vst [vmem:[#allocation75_spill] sm:$0xff] %v21994_v7  ;;  %v3768_v3 = vadd.f32 %v3756_v63, %v21745_v16  ;;  %v3759_v6 = vmax.f32 %v27789_v18, %v3747_v15  ;;  %16228 = vmatprep.mubr.msk.bf16.mxu0 %vm921_vm0, %v27790_v11 }
 0x31d   :  { %v3771_v45 = vadd.f32 %v3759_v6, %v21745_v16  ;;  %v22007_v56 = vpop.f32.mrb[16].mxu0  ;;  %v3780_v7 = vmax.f32 %v3768_v3, 0.0  ;;  %v20090_v3 = vld [vmem:[%s27056_s0] ss:$8 sps:$4 sm:$0xff]  }
 0x31e   :  { %v1815_v8 = vpop.f32.mrb[17].mxu0 }
 0x31f   :  { %v3783_v5 = vmax.f32 %v3771_v45, 0.0  ;;  %v22009_v55 = vpop.f32.mrb[18].mxu0  ;;  %v20091_v45 = vld [vmem:[%s27056_s0 + $0x14] ss:$8 sps:$4 sm:$0xff]  }
 0x320   :  { %v1819_v23 = vpop.f32.mrb[19].mxu0 }
 0x321   :  { %v22011_v17 = vpack.c.bf16 %v3783_v5, %v3780_v7  ;;  %v20093_v5 = vld [vmem:[%s27056_s0 + $0x24] ss:$8 sps:$4 sm:$0xff]  }
 0x322   :  { %2082 = vmatmul.mubr.bf16.gmra.mrb[124].mxu0 %v27792_v19 }
 0x323   :  { %27791 = vst [vmem:[#allocation65_spill] sm:$0xff] %v22011_v17  ;;  %16229 = vmatprep.mubr.msk.bf16.mxu0 %vm921_vm0, %v27793_v10  ;;  %v27794_v10 = vmax.f32 %v21231_v37, %v21275_v30 }
 0x325   :  { %v22016_v12 = vpop.f32.mrb[20].mxu0 }
 0x326   :  { %v1825_v11 = vpop.f32.mrb[21].mxu0 }
 0x327   :  { %v22018_v63 = vpop.f32.mrb[22].mxu0 }
 0x328   :  { %v1829_v15 = vpop.f32.mrb[23].mxu0 }
 0x32a   :  { %2125 = vmatmul.mubr.bf16.vlgmr.msra.gmra.mrb[128].mxu0 %v20090_v3 }
 0x32b   :  { %16230 = vmatprep.mubr.msk.bf16.mxu0 %vm921_vm0, %v20091_v45  ;;  %v20092_v45 = vld [vmem:[%s27056_s0 + $0x10] ss:$8 sps:$4 sm:$0xff]  }
 0x32d   :  { %v22027_v7 = vpop.f32.mrb[24].mxu0 }
 0x32e   :  { %v1835_v13 = vpop.f32.mrb[25].mxu0 }
 0x32f   :  { %v3849_v18 = vmax.f32 %v1815_v8, %v1835_v13  ;;  %v22031_v6 = vpop.f32.mrb[26].mxu0  ;;  %v27795_v8 = vmax.f32 %v21240_v31, %v21283_v24 }
 0x330   :  { %v1839_v19 = vpop.f32.mrb[27].mxu0 }
 0x331   :  { %v3870_v3 = vmax.f32 %v27794_v10, %v3849_v18  ;;  %v3855_v17 = vmax.f32 %v1819_v23, %v1839_v19  ;;  %v20094_v23 = vld [vmem:[%s27056_s0 + $0x20] ss:$8 sps:$4 sm:$0xff]  }
 0x332   :  { %2135 = vmatmul.mubr.bf16.gmra.mrb[132].mxu0 %v20092_v45 }
 0x333   :  { %v3882_v14 = vadd.f32 %v3870_v3, %v21745_v16  ;;  %v3873_v13 = vmax.f32 %v27795_v8, %v3855_v17  ;;  %16231 = vmatprep.mubr.msk.bf16.mxu0 %vm921_vm0, %v20093_v5  ;;  %v27797_v5 = vmax.f32 %v21252_v50, %v21303_v32 }
 0x335   :  { %v3885_v30 = vadd.f32 %v3873_v13, %v21745_v16  ;;  %v22050_v37 = vpop.f32.mrb[28].mxu0  ;;  %v3894_v19 = vmax.f32 %v3882_v14, 0.0  ;;  %v27798_v14 = vmax.f32 %v21256_v61, %v21311_v28  ;;  %v20096_v61 = vld [vmem:[%s27056_s0 + $0x30] ss:$8 sps:$4 sm:$0xff]   ;;  %v20097_v28 = vld [vmem:[%s27056_s0 + $0x44] ss:$8 sps:$4 sm:$0xff]  }
 0x336   :  { %v1845_v18 = vpop.f32.mrb[29].mxu0 }
 0x337   :  { %v3897_v10 = vmax.f32 %v3885_v30, 0.0  ;;  %v3861_v3 = vmax.f32 %v1825_v11, %v1845_v18  ;;  %v22054_v45 = vpop.f32.mrb[30].mxu0  ;;  %v20095_v18 = vld [vmem:[%s27056_s0 + $0x34] ss:$8 sps:$4 sm:$0xff]  }
 0x338   :  { %v1849_v24 = vpop.f32.mrb[31].mxu0 }
 0x339   :  { %v22058_v17 = vpack.c.bf16 %v3897_v10, %v3894_v19  ;;  %v3876_v8 = vmax.f32 %v27797_v5, %v3861_v3  ;;  %v3867_v13 = vmax.f32 %v1829_v15, %v1849_v24 }
 0x33a   :  { %2145 = vmatmul.mubr.bf16.gmra.mrb[136].mxu0 %v20094_v23 }
 0x33b   :  { %27796 = vst [vmem:[#allocation77_spill] sm:$0xff] %v22058_v17  ;;  %v3888_v11 = vadd.f32 %v3876_v8, %v21745_v16  ;;  %v3879_v30 = vmax.f32 %v27798_v14, %v3867_v13  ;;  %16232 = vmatprep.mubr.msk.bf16.mxu0 %vm921_vm0, %v20095_v18  ;;  %v20098_v14 = vld [vmem:[%s27056_s0 + $0x40] ss:$8 sps:$4 sm:$0xff]  }
 0x33d   :  { %v3891_v50 = vadd.f32 %v3879_v30, %v21745_v16  ;;  %v22075_v32 = vpop.f32.mrb[32].mxu0  ;;  %v3900_v19 = vmax.f32 %v3888_v11, 0.0  ;;  %v20099_v30 = vld [vmem:[%s27056_s0 + $0x54] ss:$8 sps:$4 sm:$0xff]  }
 0x33e   :  { %v1855_v15 = vpop.f32.mrb[33].mxu0 }
 0x33f   :  { %v3903_v10 = vmax.f32 %v3891_v50, 0.0  ;;  %v22077_v23 = vpop.f32.mrb[34].mxu0 }
 0x340   :  { %v1859_v3 = vpop.f32.mrb[35].mxu0 }
 0x341   :  { %v22079_v24 = vpack.c.bf16 %v3903_v10, %v3900_v19 }
 0x342   :  { %2155 = vmatmul.mubr.bf16.gmra.mrb[140].mxu0 %v20096_v61 }
 0x343   :  { %27799 = vst [vmem:[#allocation79_spill] sm:$0xff] %v22079_v24  ;;  %16233 = vmatprep.mubr.msk.bf16.mxu0 %vm921_vm0, %v20097_v28  ;;  %v20101_v28 = vld [vmem:[%s27056_s0 + $0x64] ss:$8 sps:$4 sm:$0xff]  }
 0x345   :  { %v22088_v5 = vpop.f32.mrb[36].mxu0 }
 0x346   :  { %v1865_v8 = vpop.f32.mrb[37].mxu0 }
 0x347   :  { %v22090_v13 = vpop.f32.mrb[38].mxu0 }
 0x348   :  { %v1869_v11 = vpop.f32.mrb[39].mxu0 }
 0x34a   :  { %2165 = vmatmul.mubr.bf16.gmra.mrb[144].mxu0 %v20098_v14  ;;  %v27800_v14 = vmax.f32 %v21322_v25, %v21350_v20 }
 0x34b   :  { %16234 = vmatprep.mubr.msk.bf16.mxu0 %vm921_vm0, %v20099_v30  ;;  %v20100_v30 = vld [vmem:[%s27056_s0 + $0x50] ss:$8 sps:$4 sm:$0xff]  }
 0x34d   :  { %v22099_v18 = vpop.f32.mrb[40].mxu0 }
 0x34e   :  { %v1875_v19 = vpop.f32.mrb[41].mxu0 }
 0x34f   :  { %v3969_v10 = vmax.f32 %v1855_v15, %v1875_v19  ;;  %v22103_v61 = vpop.f32.mrb[42].mxu0  ;;  %v27801_v15 = vmax.f32 %v21326_v22, %v21358_v49 }
 0x350   :  { %v1879_v31 = vpop.f32.mrb[43].mxu0 }
 0x351   :  { %v3990_v24 = vmax.f32 %v27800_v14, %v3969_v10  ;;  %v3975_v17 = vmax.f32 %v1859_v3, %v1879_v31  ;;  %v20102_v31 = vld [vmem:[%s27056_s0 + $0x60] ss:$8 sps:$4 sm:$0xff]  }
 0x352   :  { %2175 = vmatmul.mubr.bf16.gmra.mrb[148].mxu0 %v20100_v30 }
 0x353   :  { %v4002_v50 = vadd.f32 %v3990_v24, %v21745_v16  ;;  %v3993_v19 = vmax.f32 %v27801_v15, %v3975_v17  ;;  %16235 = vmatprep.mubr.msk.bf16.mxu0 %vm921_vm0, %v20101_v28  ;;  %v27803_v28 = vmax.f32 %v21339_v34, %v21369_v40 }
 0x355   :  { %v4005_v20 = vadd.f32 %v3993_v19, %v21745_v16  ;;  %v22122_v25 = vpop.f32.mrb[44].mxu0  ;;  %v4014_v10 = vmax.f32 %v4002_v50, 0.0  ;;  %v27804_v50 = vmax.f32 %v21343_v27, %v21377_v33  ;;  %v20104_v27 = vld [vmem:[%s27056_s0 + $0x70] ss:$8 sps:$4 sm:$0xff]   ;;  %v20105_v33 = vld [vmem:[%s27056_s0 + $0x84] ss:$8 sps:$4 sm:$0xff]  }
 0x356   :  { %v1885_v3 = vpop.f32.mrb[45].mxu0 }
 0x357   :  { %v4017_v24 = vmax.f32 %v4005_v20, 0.0  ;;  %v3981_v14 = vmax.f32 %v1865_v8, %v1885_v3  ;;  %v22126_v30 = vpop.f32.mrb[46].mxu0  ;;  %v20103_v3 = vld [vmem:[%s27056_s0 + $0x74] ss:$8 sps:$4 sm:$0xff]  }
 0x358   :  { %v1889_v22 = vpop.f32.mrb[47].mxu0 }
 0x359   :  { %v22130_v17 = vpack.c.bf16 %v4017_v24, %v4014_v10  ;;  %v3996_v15 = vmax.f32 %v27803_v28, %v3981_v14  ;;  %v3987_v19 = vmax.f32 %v1869_v11, %v1889_v22 }
 0x35a   :  { %2185 = vmatmul.mubr.bf16.gmra.mrb[152].mxu0 %v20102_v31 }
 0x35b   :  { %27802 = vst [vmem:[#allocation68_spill] sm:$0xff] %v22130_v17  ;;  %v4008_v8 = vadd.f32 %v3996_v15, %v21745_v16  ;;  %v3999_v20 = vmax.f32 %v27804_v50, %v3987_v19  ;;  %16236 = vmatprep.mubr.msk.bf16.mxu0 %vm921_vm0, %v20103_v3  ;;  %v20106_v50 = vld [vmem:[%s27056_s0 + $0x80] ss:$8 sps:$4 sm:$0xff]  }
 0x35d   :  { %v4011_v34 = vadd.f32 %v3999_v20, %v21745_v16  ;;  %v22147_v40 = vpop.f32.mrb[48].mxu0  ;;  %v4020_v10 = vmax.f32 %v4008_v8, 0.0  ;;  %v20107_v20 = vld [vmem:[%s27056_s0 + $0x94] ss:$8 sps:$4 sm:$0xff]  }
 0x35e   :  { %v1895_v11 = vpop.f32.mrb[49].mxu0 }
 0x35f   :  { %v4023_v24 = vmax.f32 %v4011_v34, 0.0  ;;  %v22149_v31 = vpop.f32.mrb[50].mxu0 }
 0x360   :  { %v1899_v14 = vpop.f32.mrb[51].mxu0 }
 0x361   :  { %v22151_v22 = vpack.c.bf16 %v4023_v24, %v4020_v10 }
 0x362   :  { %2195 = vmatmul.mubr.bf16.gmra.mrb[156].mxu0 %v20104_v27 }
 0x363   :  { %27805 = vst [vmem:[#allocation80_spill] sm:$0xff] %v22151_v22  ;;  %16237 = vmatprep.mubr.msk.bf16.mxu0 %vm921_vm0, %v20105_v33  ;;  %v20109_v33 = vld [vmem:[%s27056_s0 + $0xa4] ss:$8 sps:$4 sm:$0xff]  }
 0x365   :  { %v22160_v28 = vpop.f32.mrb[52].mxu0 }
 0x366   :  { %v1905_v15 = vpop.f32.mrb[53].mxu0 }
 0x367   :  { %v22162_v19 = vpop.f32.mrb[54].mxu0 }
 0x368   :  { %27806 = vst [vmem:[#allocation81_spill] sm:$0xff] %v22162_v19  ;;  %v1909_v8 = vpop.f32.mrb[55].mxu0 }
 0x36a   :  { %2205 = vmatmul.mubr.bf16.gmra.mrb[160].mxu0 %v20106_v50  ;;  %v27807_v50 = vmax.f32 %v21388_v42, %v21416_v46 }
 0x36b   :  { %16238 = vmatprep.mubr.msk.bf16.mxu0 %vm921_vm0, %v20107_v20  ;;  %v20108_v20 = vld [vmem:[%s27056_s0 + $0x90] ss:$8 sps:$4 sm:$0xff]  }
 0x36d   :  { %v22171_v3 = vpop.f32.mrb[56].mxu0 }
 0x36e   :  { %v1915_v10 = vpop.f32.mrb[57].mxu0 }
 0x36f   :  { %v4089_v24 = vmax.f32 %v1895_v11, %v1915_v10  ;;  %v22175_v27 = vpop.f32.mrb[58].mxu0  ;;  %v27808_v11 = vmax.f32 %v21392_v9, %v21424_v26  ;;  %v20117_v9 = vld [vmem:[%s27056_s0 + $0xe4] ss:$8 sps:$4 sm:$0xff]  }
 0x370   :  { %v1919_v49 = vpop.f32.mrb[59].mxu0 }
 0x371   :  { %v4110_v22 = vmax.f32 %v27807_v50, %v4089_v24  ;;  %v4095_v17 = vmax.f32 %v1899_v14, %v1919_v49  ;;  %v20110_v49 = vld [vmem:[%s27056_s0 + $0xa0] ss:$8 sps:$4 sm:$0xff]  }
 0x372   :  { %2215 = vmatmul.mubr.bf16.gmra.mrb[164].mxu0 %v20108_v20 }
 0x373   :  { %v4122_v34 = vadd.f32 %v4110_v22, %v21745_v16  ;;  %v4113_v10 = vmax.f32 %v27808_v11, %v4095_v17  ;;  %16239 = vmatprep.mubr.msk.bf16.mxu0 %vm921_vm0, %v20109_v33  ;;  %v27811_v33 = vmax.f32 %v21399_v39, %v21435_v62 }
 0x375   :  { %v4125_v42 = vadd.f32 %v4113_v10, %v21745_v16  ;;  %v22194_v46 = vpop.f32.mrb[60].mxu0  ;;  %v4134_v24 = vmax.f32 %v4122_v34, 0.0  ;;  %v27812_v34 = vmax.f32 %v21403_v43, %v21443_v35  ;;  %v20112_v35 = vld [vmem:[%s27056_s0 + $0xb0] ss:$8 sps:$4 sm:$0xff]   ;;  %v20113_v43 = vld [vmem:[%s27056_s0 + $0xc4] ss:$8 sps:$4 sm:$0xff]  }
 0x376   :  { %v1925_v14 = vpop.f32.mrb[61].mxu0 }
 0x377   :  { %v4137_v22 = vmax.f32 %v4125_v42, 0.0  ;;  %v4101_v50 = vmax.f32 %v1905_v15, %v1925_v14  ;;  %v22198_v20 = vpop.f32.mrb[62].mxu0  ;;  %v20111_v14 = vld [vmem:[%s27056_s0 + $0xb4] ss:$8 sps:$4 sm:$0xff]  }
 0x378   :  { %27809 = vst [vmem:[#allocation85_spill] sm:$0xff] %v22198_v20  ;;  %v1929_v26 = vpop.f32.mrb[63].mxu0 }
 0x379   :  { %v22202_v17 = vpack.c.bf16 %v4137_v22, %v4134_v24  ;;  %v4116_v11 = vmax.f32 %v27811_v33, %v4101_v50  ;;  %v4107_v10 = vmax.f32 %v1909_v8, %v1929_v26 }
 0x37a   :  { %2225 = vmatmul.mubr.bf16.gmra.mrb[168].mxu0 %v20110_v49 }
 0x37b   :  { %27810 = vst [vmem:[#allocation87_spill] sm:$0xff] %v22202_v17  ;;  %v4128_v15 = vadd.f32 %v4116_v11, %v21745_v16  ;;  %v4119_v42 = vmax.f32 %v27812_v34, %v4107_v10  ;;  %16240 = vmatprep.mubr.msk.bf16.mxu0 %vm921_vm0, %v20111_v14  ;;  %v20114_v34 = vld [vmem:[%s27056_s0 + $0xc0] ss:$8 sps:$4 sm:$0xff]  }
 0x37d   :  { %v4131_v39 = vadd.f32 %v4119_v42, %v21745_v16  ;;  %v22219_v62 = vpop.f32.mrb[64].mxu0  ;;  %v4140_v24 = vmax.f32 %v4128_v15, 0.0  ;;  %v20115_v42 = vld [vmem:[%s27056_s0 + $0xd4] ss:$8 sps:$4 sm:$0xff]  }
 0x37e   :  { %27813 = vst [vmem:[#allocation91_spill] sm:$0xff] %v22219_v62  ;;  %v1935_v8 = vpop.f32.mrb[65].mxu0 }
 0x37f   :  { %v4143_v22 = vmax.f32 %v4131_v39, 0.0  ;;  %v22221_v49 = vpop.f32.mrb[66].mxu0 }
 0x380   :  { %27814 = vst [vmem:[#allocation93_spill] sm:$0xff] %v22221_v49  ;;  %v1939_v50 = vpop.f32.mrb[67].mxu0 }
 0x381   :  { %v22223_v26 = vpack.c.bf16 %v4143_v22, %v4140_v24 }
 0x382   :  { %2235 = vmatmul.mubr.bf16.gmra.mrb[172].mxu0 %v20112_v35 }
 0x383   :  { %27815 = vst [vmem:[#allocation83_spill] sm:$0xff] %v22223_v26  ;;  %16241 = vmatprep.mubr.msk.bf16.mxu0 %vm921_vm0, %v20113_v43 }
 0x385   :  { %v22232_v33 = vpop.f32.mrb[68].mxu0 }
 0x386   :  { %27816 = vst [vmem:[#allocation95_spill] sm:$0xff] %v22232_v33  ;;  %v1945_v11 = vpop.f32.mrb[69].mxu0 }
 0x387   :  { %v22234_v10 = vpop.f32.mrb[70].mxu0 }
 0x388   :  { %27817 = vst [vmem:[#allocation97_spill] sm:$0xff] %v22234_v10  ;;  %v1949_v15 = vpop.f32.mrb[71].mxu0 }
 0x38a   :  { %2245 = vmatmul.mubr.bf16.gmra.mrb[176].mxu0 %v20114_v34  ;;  %v27820_v34 = vmax.f32 %v21454_v52, %v21476_v38 }
 0x38b   :  { %16242 = vmatprep.mubr.msk.bf16.mxu0 %vm921_vm0, %v20115_v42  ;;  %v20116_v42 = vld [vmem:[%s27056_s0 + $0xd0] ss:$8 sps:$4 sm:$0xff]  }
 0x38d   :  { %v22243_v14 = vpop.f32.mrb[72].mxu0 }
 0x38e   :  { %27818 = vst [vmem:[#allocation86_spill] sm:$0xff] %v22243_v14  ;;  %v1955_v39 = vpop.f32.mrb[73].mxu0  ;;  %v27977_v14 = vld [vmem:[#allocation88_spill] sm:$0xff] }
 0x38f   :  { %v4209_v22 = vmax.f32 %v1935_v8, %v1955_v39  ;;  %v22247_v35 = vpop.f32.mrb[74].mxu0  ;;  %v27821_v8 = vmax.f32 %v21458_v21, %v21484_v41  ;;  %v20125_v41 = vld [vmem:[%s27056_s0 + $0x124] ss:$8 sps:$4 sm:$0xff]  }
 0x390   :  { %27819 = vst [vmem:[#allocation98_spill] sm:$0xff] %v22247_v35  ;;  %v1959_v43 = vpop.f32.mrb[75].mxu0 }
 0x391   :  { %v4230_v26 = vmax.f32 %v27820_v34, %v4209_v22  ;;  %v4215_v17 = vmax.f32 %v1939_v50, %v1959_v43  ;;  %v20118_v22 = vld [vmem:[%s27056_s0 + $0xe0] ss:$8 sps:$4 sm:$0xff]  }
 0x392   :  { %2255 = vmatmul.mubr.bf16.gmra.mrb[180].mxu0 %v20116_v42 }
 0x393   :  { %v4242_v20 = vadd.f32 %v4230_v26, %v21745_v16  ;;  %v4233_v39 = vmax.f32 %v27821_v8, %v4215_v17  ;;  %16243 = vmatprep.mubr.msk.bf16.mxu0 %vm921_vm0, %v20117_v9  ;;  %v27825_v9 = vmax.f32 %v21465_v48, %v21495_v58 }
 0x395   :  { %v4245_v38 = vadd.f32 %v4233_v39, %v21745_v16  ;;  %v22266_v52 = vpop.f32.mrb[76].mxu0  ;;  %v4254_v43 = vmax.f32 %v4242_v20, 0.0 }
 0x396   :  { %27822 = vst [vmem:[#allocation99_spill] sm:$0xff] %v22266_v52  ;;  %v1965_v50 = vpop.f32.mrb[77].mxu0  ;;  %v27922_v52 = vld [vmem:[#allocation40_spill] sm:$0xff] }
 0x397   :  { %v4257_v26 = vmax.f32 %v4245_v38, 0.0  ;;  %v4221_v34 = vmax.f32 %v1945_v11, %v1965_v50  ;;  %v22270_v42 = vpop.f32.mrb[78].mxu0  ;;  %v27826_v11 = vmax.f32 %v21469_v53, %v21503_v44  ;;  %v20119_v50 = vld [vmem:[%s27056_s0 + $0xf4] ss:$8 sps:$4 sm:$0xff]   ;;  %v20120_v44 = vld [vmem:[%s27056_s0 + $0xf0] ss:$8 sps:$4 sm:$0xff]  }
 0x398   :  { %27823 = vst [vmem:[#allocation89_spill] sm:$0xff] %v22270_v42  ;;  %v1969_v21 = vpop.f32.mrb[79].mxu0  ;;  %v20121_v53 = vld [vmem:[%s27056_s0 + $0x104] ss:$8 sps:$4 sm:$0xff]  }
 0x399   :  { %v22274_v17 = vpack.c.bf16 %v4257_v26, %v4254_v43  ;;  %v4236_v8 = vmax.f32 %v27825_v9, %v4221_v34  ;;  %v4227_v39 = vmax.f32 %v1949_v15, %v1969_v21 }
 0x39a   :  { %2265 = vmatmul.mubr.bf16.gmra.mrb[184].mxu0 %v20118_v22 }
 0x39b   :  { %27824 = vst [vmem:[#allocation101_spill] sm:$0xff] %v22274_v17  ;;  %v4248_v20 = vadd.f32 %v4236_v8, %v21745_v16  ;;  %v4239_v38 = vmax.f32 %v27826_v11, %v4227_v39  ;;  %16244 = vmatprep.mubr.msk.bf16.mxu0 %vm921_vm0, %v20119_v50  ;;  %v20122_v11 = vld [vmem:[%s27056_s0 + $0x100] ss:$8 sps:$4 sm:$0xff]  }
 0x39d   :  { %v4251_v48 = vadd.f32 %v4239_v38, %v21745_v16  ;;  %v22291_v58 = vpop.f32.mrb[80].mxu0  ;;  %v4260_v43 = vmax.f32 %v4248_v20, 0.0  ;;  %v20123_v38 = vld [vmem:[%s27056_s0 + $0x114] ss:$8 sps:$4 sm:$0xff]  }
 0x39e   :  { %27827 = vst [vmem:[#allocation103_spill] sm:$0xff] %v22291_v58  ;;  %v1975_v15 = vpop.f32.mrb[81].mxu0  ;;  %v27920_v58 = vld [vmem:[#allocation31_spill] sm:$0xff] }
 0x39f   :  { %v4263_v26 = vmax.f32 %v4251_v48, 0.0  ;;  %v22293_v22 = vpop.f32.mrb[82].mxu0 }
 0x3a0   :  { %27828 = vst [vmem:[#allocation92_spill] sm:$0xff] %v22293_v22  ;;  %v1979_v34 = vpop.f32.mrb[83].mxu0  ;;  %v19003_v22 = vld [vmem:[%s27058_s3 + $0x144] ss:$16 sps:$4 sm:$0xff]  }
 0x3a1   :  { %v22295_v21 = vpack.c.bf16 %v4263_v26, %v4260_v43  ;;  %v20133_v43 = vld [vmem:[%s27056_s0 + $0x164] ss:$8 sps:$4 sm:$0xff]  }
 0x3a2   :  { %2275 = vmatmul.mubr.bf16.gmra.mrb[188].mxu0 %v20120_v44 }
 0x3a3   :  { %27829 = vst [vmem:[#allocation104_spill] sm:$0xff] %v22295_v21  ;;  %16245 = vmatprep.mubr.msk.bf16.mxu0 %vm921_vm0, %v20121_v53 }
 0x3a5   :  { %v22304_v9 = vpop.f32.mrb[84].mxu0 }
 0x3a6   :  { %27830 = vst [vmem:[#allocation105_spill] sm:$0xff] %v22304_v9  ;;  %v1985_v8 = vpop.f32.mrb[85].mxu0 }
 0x3a7   :  { %v22306_v39 = vpop.f32.mrb[86].mxu0 }
 0x3a8   :  { %27831 = vst [vmem:[#allocation109_spill] sm:$0xff] %v22306_v39  ;;  %v1989_v20 = vpop.f32.mrb[87].mxu0 }
 0x3aa   :  { %2285 = vmatmul.mubr.bf16.gmra.mrb[192].mxu0 %v20122_v11  ;;  %v27834_v11 = vmax.f32 %v21520_v36, %v21542_v60 }
 0x3ab   :  { %16246 = vmatprep.mubr.msk.bf16.mxu0 %vm921_vm0, %v20123_v38  ;;  %v20124_v38 = vld [vmem:[%s27056_s0 + $0x110] ss:$8 sps:$4 sm:$0xff]  }
 0x3ad   :  { %v22315_v50 = vpop.f32.mrb[88].mxu0 }
 0x3ae   :  { %27832 = vst [vmem:[#allocation111_spill] sm:$0xff] %v22315_v50  ;;  %v1995_v48 = vpop.f32.mrb[89].mxu0  ;;  %v27893_v50 = vld [vmem:[#allocation9_spill] sm:$0xff] }
 0x3af   :  { %v4329_v26 = vmax.f32 %v1975_v15, %v1995_v48  ;;  %v22319_v44 = vpop.f32.mrb[90].mxu0  ;;  %v27835_v15 = vmax.f32 %v21524_v59, %v21550_v51 }
 0x3b0   :  { %27833 = vst [vmem:[#allocation115_spill] sm:$0xff] %v22319_v44  ;;  %v1999_v53 = vpop.f32.mrb[91].mxu0 }
 0x3b1   :  { %v4350_v24 = vmax.f32 %v27834_v11, %v4329_v26  ;;  %v4335_v21 = vmax.f32 %v1979_v34, %v1999_v53  ;;  %v20126_v26 = vld [vmem:[%s27056_s0 + $0x120] ss:$8 sps:$4 sm:$0xff]  }
 0x3b2   :  { %2295 = vmatmul.mubr.bf16.gmra.mrb[196].mxu0 %v20124_v38 }
 0x3b3   :  { %v4362_v17 = vadd.f32 %v4350_v24, %v21745_v16  ;;  %v4353_v48 = vmax.f32 %v27835_v15, %v4335_v21  ;;  %16247 = vmatprep.mubr.msk.bf16.mxu0 %vm921_vm0, %v20125_v41  ;;  %v27839_v41 = vmax.f32 %v21531_v54, %v21561_v4 }
 0x3b5   :  { %v4365_v36 = vadd.f32 %v4353_v48, %v21745_v16  ;;  %v22338_v60 = vpop.f32.mrb[92].mxu0  ;;  %v4374_v53 = vmax.f32 %v4362_v17, 0.0 }
 0x3b6   :  { %27836 = vst [vmem:[#allocation117_spill] sm:$0xff] %v22338_v60  ;;  %v2005_v34 = vpop.f32.mrb[93].mxu0 }
 0x3b7   :  { %v4377_v24 = vmax.f32 %v4365_v36, 0.0  ;;  %v4341_v11 = vmax.f32 %v1985_v8, %v2005_v34  ;;  %v22342_v38 = vpop.f32.mrb[94].mxu0  ;;  %v27840_v8 = vld [vmem:[#allocation172_spill] sm:$0xff] }
 0x3b8   :  { %27837 = vst [vmem:[#allocation107_spill] sm:$0xff] %v22342_v38  ;;  %v2009_v51 = vpop.f32.mrb[95].mxu0  ;;  %v27841_v36 = vmax.f32 %v21535_v0, %v27840_v8  ;;  %v20128_v0 = vld [vmem:[%s27056_s0 + $0x130] ss:$8 sps:$4 sm:$0xff]  }
 0x3b9   :  { %v22346_v21 = vpack.c.bf16 %v4377_v24, %v4374_v53  ;;  %v4356_v15 = vmax.f32 %v27839_v41, %v4341_v11  ;;  %v4347_v48 = vmax.f32 %v1989_v20, %v2009_v51  ;;  %v20127_v53 = vld [vmem:[%s27056_s0 + $0x134] ss:$8 sps:$4 sm:$0xff]  }
 0x3ba   :  { %2305 = vmatmul.mubr.bf16.gmra.mrb[200].mxu0 %v20126_v26 }
 0x3bb   :  { %27838 = vst [vmem:[#allocation119_spill] sm:$0xff] %v22346_v21  ;;  %v4368_v17 = vadd.f32 %v4356_v15, %v21745_v16  ;;  %v4359_v34 = vmax.f32 %v27841_v36, %v4347_v48  ;;  %16248 = vmatprep.mubr.msk.bf16.mxu0 %vm921_vm0, %v20127_v53  ;;  %v20129_v15 = vld [vmem:[%s27056_s0 + $0x144] ss:$8 sps:$4 sm:$0xff]   ;;  %v20131_v53 = vld [vmem:[%s27056_s0 + $0x154] ss:$8 sps:$4 sm:$0xff]  }
 0x3bd   :  { %v4371_v54 = vadd.f32 %v4359_v34, %v21745_v16  ;;  %v22363_v4 = vpop.f32.mrb[96].mxu0  ;;  %v4380_v24 = vmax.f32 %v4368_v17, 0.0  ;;  %v20130_v34 = vld [vmem:[%s27056_s0 + $0x140] ss:$8 sps:$4 sm:$0xff]  }
 0x3be   :  { %27842 = vst [vmem:[#allocation121_spill] sm:$0xff] %v22363_v4  ;;  %v2015_v20 = vpop.f32.mrb[97].mxu0 }
 0x3bf   :  { %v4383_v11 = vmax.f32 %v4371_v54, 0.0  ;;  %v22365_v26 = vpop.f32.mrb[98].mxu0 }
 0x3c0   :  { %27843 = vst [vmem:[#allocation110_spill] sm:$0xff] %v22365_v26  ;;  %v2019_v51 = vpop.f32.mrb[99].mxu0 }
 0x3c1   :  { %v22367_v41 = vpack.c.bf16 %v4383_v11, %v4380_v24  ;;  %v27852_v11 = vld [vmem:[#allocation176_spill] sm:$0xff] }
 0x3c2   :  { %2315 = vmatmul.mubr.bf16.gmra.mrb[204].mxu0 %v20128_v0 }
 0x3c3   :  { %27844 = vst [vmem:[#allocation122_spill] sm:$0xff] %v22367_v41  ;;  %16249 = vmatprep.mubr.msk.bf16.mxu0 %vm921_vm0, %v20129_v15  ;;  %v27850_v41 = vld [vmem:[#allocation182_spill] sm:$0xff] }
 0x3c5   :  { %v22376_v48 = vpop.f32.mrb[100].mxu0 }
 0x3c6   :  { %27845 = vst [vmem:[#allocation123_spill] sm:$0xff] %v22376_v48  ;;  %v2025_v17 = vpop.f32.mrb[101].mxu0 }
 0x3c7   :  { %v22378_v8 = vpop.f32.mrb[102].mxu0 }
 0x3c8   :  { %27846 = vst [vmem:[#allocation113_spill] sm:$0xff] %v22378_v8  ;;  %v2029_v36 = vpop.f32.mrb[103].mxu0  ;;  %v27872_v8 = vld [vmem:[#allocation5_spill] sm:$0xff] }
 0x3ca   :  { %2325 = vmatmul.mubr.bf16.gmra.mrb[208].mxu0 %v20130_v34  ;;  %v27849_v34 = vld [vmem:[#allocation174_spill] sm:$0xff] }
 0x3cb   :  { %16250 = vmatprep.mubr.msk.bf16.mxu0 %vm921_vm0, %v20131_v53  ;;  %v27851_v21 = vmax.f32 %v27849_v34, %v27850_v41  ;;  %v20132_v53 = vld [vmem:[%s27056_s0 + $0x150] ss:$8 sps:$4 sm:$0xff]   ;;  %v20134_v41 = vld [vmem:[%s27056_s0 + $0x160] ss:$8 sps:$4 sm:$0xff]  }
 0x3cd   :  { %v22387_v54 = vpop.f32.mrb[104].mxu0 }
 0x3ce   :  { %27847 = vst [vmem:[#allocation125_spill] sm:$0xff] %v22387_v54  ;;  %v2035_v24 = vpop.f32.mrb[105].mxu0 }
 0x3cf   :  { %v4449_v0 = vmax.f32 %v2015_v20, %v2035_v24  ;;  %v22391_v15 = vpop.f32.mrb[106].mxu0  ;;  %v27853_v20 = vld [vmem:[#allocation184_spill] sm:$0xff] }
 0x3d0   :  { %27848 = vst [vmem:[#allocation127_spill] sm:$0xff] %v22391_v15  ;;  %v2039_v59 = vpop.f32.mrb[107].mxu0  ;;  %v27854_v24 = vmax.f32 %v27852_v11, %v27853_v20  ;;  %v27857_v20 = vld [vmem:[#allocation178_spill] sm:$0xff] }
 0x3d1   :  { %v4470_v38 = vmax.f32 %v27851_v21, %v4449_v0  ;;  %v4455_v39 = vmax.f32 %v2019_v51, %v2039_v59 }
 0x3d2   :  { %2335 = vmatmul.mubr.bf16.gmra.mrb[212].mxu0 %v20132_v53  ;;  %v20135_v53 = vld [vmem:[%s27056_s0 + $0x174] ss:$8 sps:$4 sm:$0xff]  }
 0x3d3   :  { %v4482_v60 = vadd.f32 %v4470_v38, %v21745_v16  ;;  %v4473_v54 = vmax.f32 %v27854_v24, %v4455_v39  ;;  %16251 = vmatprep.mubr.msk.bf16.mxu0 %vm921_vm0, %v20133_v43  ;;  %v27858_v24 = vld [vmem:[#allocation186_spill] sm:$0xff] }
 0x3d4   :  { %v27859_v43 = vmax.f32 %v27857_v20, %v27858_v24  ;;  %v20136_v24 = vld [vmem:[%s27056_s0 + $0x170] ss:$8 sps:$4 sm:$0xff]  }
 0x3d5   :  { %v4485_v21 = vadd.f32 %v4473_v54, %v21745_v16  ;;  %v22410_v59 = vpop.f32.mrb[108].mxu0  ;;  %v4494_v34 = vmax.f32 %v4482_v60, 0.0  ;;  %v27861_v60 = vld [vmem:[#allocation180_spill] sm:$0xff] }
 0x3d6   :  { %27855 = vst [vmem:[#allocation116_spill] sm:$0xff] %v22410_v59  ;;  %v2045_v51 = vpop.f32.mrb[109].mxu0 }
 0x3d7   :  { %v4461_v0 = vmax.f32 %v2025_v17, %v2045_v51  ;;  %v22414_v38 = vpop.f32.mrb[110].mxu0  ;;  %v4497_v11 = vmax.f32 %v4485_v21, 0.0  ;;  %v27862_v21 = vld [vmem:[#allocation188_spill] sm:$0xff] }
 0x3d8   :  { %27856 = vst [vmem:[#allocation128_spill] sm:$0xff] %v22414_v38  ;;  %v2049_v39 = vpop.f32.mrb[111].mxu0  ;;  %v27863_v51 = vmax.f32 %v27861_v60, %v27862_v21  ;;  %v18955_v60 = vld [vmem:[%s27058_s3 + $0x4] ss:$16 sps:$4 sm:$0xff]   ;;  %v18953_v21 = vld [vmem:[%s27058_s3] ss:$16 sps:$4 sm:$0xff]  }
 0x3d9   :  { %v4476_v15 = vmax.f32 %v27859_v43, %v4461_v0  ;;  %v4467_v54 = vmax.f32 %v2029_v36, %v2049_v39  ;;  %v22421_v26 = vpack.c.bf16 %v4497_v11, %v4494_v34  ;;  %5262 = vmatprep.subr.bf16.mxu0 %v18955_v60  ;;  %v27871_v38 = vld [vmem:[#allocation190_spill] sm:$0xff] }
 0x3da   :  { %2345 = vmatmul.mubr.bf16.gmra.mrb[216].mxu0 %v20134_v41  ;;  %v27873_v48 = vmax.f32 %v27871_v38, %v27872_v8  ;;  %v27875_v60 = vld [vmem:[#allocation198_spill] sm:$0xff]  ;;  %v18964_v38 = vld [vmem:[%s27058_s3 + $0x64] ss:$16 sps:$4 sm:$0xff]  }
 0x3db   :  { %27860 = vst [vmem:[#allocation129_spill] sm:$0xff] %v22421_v26  ;;  %v4488_v17 = vadd.f32 %v4476_v15, %v21745_v16  ;;  %v4479_v59 = vmax.f32 %v27863_v51, %v4467_v54  ;;  %16252 = vmatprep.mubr.msk.bf16.mxu0 %vm921_vm0, %v20135_v53  ;;  %v20137_v53 = vld [vmem:[%s27056_s0 + $0x184] ss:$8 sps:$4 sm:$0xff]   ;;  %v20138_v51 = vld [vmem:[%s27056_s0 + $0x180] ss:$8 sps:$4 sm:$0xff]   ;;  %5263 = vmatpush1.bf16.msra.mxu0 %v18953_v21  ;;  %v27880_v26 = vld [vmem:[#allocation7_spill] sm:$0xff] }
 0x3dc   :  { %v20141_v8 = vld [vmem:[%s27056_s0 + $0x1a4] ss:$8 sps:$4 sm:$0xff]  }
 0x3dd   :  { %v4491_v36 = vadd.f32 %v4479_v59, %v21745_v16  ;;  %v22435_v0 = vpop.f32.mrb[112].mxu0  ;;  %v4500_v41 = vmax.f32 %v4488_v17, 0.0 }
 0x3de   :  { %27864 = vst [vmem:[#allocation132_spill] sm:$0xff] %v22435_v0  ;;  %v2055_v34 = vpop.f32.mrb[113].mxu0 }
 0x3df   :  { %v22437_v11 = vpop.f32.mrb[114].mxu0  ;;  %v4503_v39 = vmax.f32 %v4491_v36, 0.0  ;;  %v20139_v36 = vld [vmem:[%s27056_s0 + $0x194] ss:$8 sps:$4 sm:$0xff]  }
 0x3e0   :  { %27865 = vst [vmem:[#allocation134_spill] sm:$0xff] %v22437_v11  ;;  %v2059_v15 = vpop.f32.mrb[115].mxu0 }
 0x3e1   :  { %v22439_v20 = vpack.c.bf16 %v4503_v39, %v4500_v41  ;;  %v18958_v41 = vld [vmem:[%s27058_s3 + $0x24] ss:$16 sps:$4 sm:$0xff]  }
 0x3e2   :  { %2355 = vmatmul.mubr.bf16.gmra.mrb[220].mxu0 %v20136_v24  ;;  %v18956_v24 = vld [vmem:[%s27058_s3 + $0x20] ss:$16 sps:$4 sm:$0xff]   ;;  %5264 = vmatprep.subr.bf16.mxu0 %v18958_v41 }
 0x3e3   :  { %27866 = vst [vmem:[#allocation172_spill] sm:$0xff] %v22439_v20  ;;  %16253 = vmatprep.mubr.msk.bf16.mxu0 %vm921_vm0, %v20137_v53  ;;  %5265 = vmatpush1.bf16.msra.mxu0 %v18956_v24  ;;  %v20140_v24 = vld [vmem:[%s27056_s0 + $0x190] ss:$8 sps:$4 sm:$0xff]  }
 0x3e5   :  { %v22448_v59 = vpop.f32.mrb[116].mxu0 }
 0x3e6   :  { %27867 = vst [vmem:[#allocation174_spill] sm:$0xff] %v22448_v59  ;;  %v2065_v43 = vpop.f32.mrb[117].mxu0  ;;  %v27891_v59 = vld [vmem:[#allocation24_spill] sm:$0xff] }
 0x3e7   :  { %v22450_v54 = vpop.f32.mrb[118].mxu0 }
 0x3e8   :  { %27868 = vst [vmem:[#allocation182_spill] sm:$0xff] %v22450_v54  ;;  %v2069_v17 = vpop.f32.mrb[119].mxu0 }
 0x3ea   :  { %2365 = vmatmul.mubr.bf16.gmra.mrb[224].mxu0 %v20138_v51 }
 0x3eb   :  { %16254 = vmatprep.mubr.msk.bf16.mxu0 %vm921_vm0, %v20139_v36  ;;  %v18961_v36 = vld [vmem:[%s27058_s3 + $0x44] ss:$16 sps:$4 sm:$0xff]  }
 0x3ec   :  { %5266 = vmatprep.subr.bf16.mxu0 %v18961_v36 }
 0x3ed   :  { %v22468_v39 = vpop.f32.mrb[120].mxu0 }
 0x3ee   :  { %27869 = vst [vmem:[#allocation176_spill] sm:$0xff] %v22468_v39  ;;  %v2075_v53 = vpop.f32.mrb[121].mxu0 }
 0x3ef   :  { %v4569_v51 = vmax.f32 %v2055_v34, %v2075_v53  ;;  %v22475_v20 = vpop.f32.mrb[122].mxu0  ;;  %v18959_v34 = vld [vmem:[%s27058_s3 + $0x40] ss:$16 sps:$4 sm:$0xff]   ;;  %v27874_v53 = vld [vmem:[#allocation192_spill] sm:$0xff] }
 0x3f0   :  { %27870 = vst [vmem:[#allocation184_spill] sm:$0xff] %v22475_v20  ;;  %v2079_v21 = vpop.f32.mrb[123].mxu0  ;;  %v27876_v39 = vmax.f32 %v27874_v53, %v27875_v60  ;;  %5267 = vmatpush1.bf16.msra.mxu0 %v18959_v34  ;;  %v18962_v60 = vld [vmem:[%s27058_s3 + $0x60] ss:$16 sps:$4 sm:$0xff]   ;;  %v18967_v53 = vld [vmem:[%s27058_s3 + $0x84] ss:$16 sps:$4 sm:$0xff]  }
 0x3f1   :  { %v4590_v4 = vmax.f32 %v27873_v48, %v4569_v51  ;;  %v4575_v41 = vmax.f32 %v2059_v15, %v2079_v21  ;;  %5268 = vmatprep.subr.bf16.mxu0 %v18964_v38  ;;  %v20147_v21 = vld [vmem:[%s27056_s0 + $0x1d4] ss:$8 sps:$4 sm:$0xff]  }
 0x3f2   :  { %2375 = vmatmul.mubr.bf16.gmra.mrb[228].mxu0 %v20140_v24 }
 0x3f3   :  { %v4593_v0 = vmax.f32 %v27876_v39, %v4575_v41  ;;  %16255 = vmatprep.mubr.msk.bf16.mxu0 %vm921_vm0, %v20141_v8  ;;  %v4602_v48 = vadd.f32 %v4590_v4, %v21745_v16  ;;  %v18998_v8 = vld [vmem:[%s27058_s3 + $0x2ac] ss:$16 sps:$4 sm:$0xff]  }
 0x3f4   :  { %5269 = vmatpush1.bf16.msra.mxu0 %v18962_v60 }
 0x3f5   :  { %v22502_v15 = vpop.f32.mrb[124].mxu0  ;;  %v4605_v39 = vadd.f32 %v4593_v0, %v21745_v16  ;;  %v4614_v4 = vmax.f32 %v4602_v48, 0.0  ;;  %v27879_v0 = vld [vmem:[#allocation194_spill] sm:$0xff]  ;;  %5270 = vmatprep.subr.bf16.mxu0 %v18967_v53 }
 0x3f6   :  { %27877 = vst [vmem:[#allocation178_spill] sm:$0xff] %v22502_v15  ;;  %v2085_v51 = vpop.f32.mrb[125].mxu0  ;;  %v27881_v38 = vmax.f32 %v27879_v0, %v27880_v26  ;;  %v18968_v48 = vld [vmem:[%s27058_s3 + $0x20c] ss:$16 sps:$4 sm:$0xff]   ;;  %v18970_v26 = vld [vmem:[%s27058_s3 + $0x208] ss:$16 sps:$4 sm:$0xff]  }
 0x3f7   :  { %v4581_v36 = vmax.f32 %v2065_v43, %v2085_v51  ;;  %v22510_v41 = vpop.f32.mrb[126].mxu0  ;;  %v4617_v34 = vmax.f32 %v4605_v39, 0.0  ;;  %v18965_v43 = vld [vmem:[%s27058_s3 + $0x80] ss:$16 sps:$4 sm:$0xff]   ;;  %v27884_v51 = vld [vmem:[#allocation200_spill] sm:$0xff]  ;;  %17486 = vmatprep.subr.bf16.mxu1 %v18968_v48 }
 0x3f8   :  { %27878 = vst [vmem:[#allocation186_spill] sm:$0xff] %v22510_v41  ;;  %v2089_v24 = vpop.f32.mrb[127].mxu0  ;;  %v20142_v39 = vld [vmem:[%s27056_s0 + $0x1a0] ss:$8 sps:$4 sm:$0xff]   ;;  %v20143_v0 = vld [vmem:[%s27056_s0 + $0x1b4] ss:$8 sps:$4 sm:$0xff]   ;;  %5271 = vmatpush1.bf16.msra.mxu0 %v18965_v43  ;;  %17494 = vmatpush1.bf16.msra.mxu1 %v18970_v26 }
 0x3f9   :  { %v4596_v20 = vmax.f32 %v27881_v38, %v4581_v36  ;;  %v4587_v11 = vmax.f32 %v2069_v17, %v2089_v24  ;;  %v22526_v60 = vpack.c.bf16 %v4617_v34, %v4614_v4  ;;  %v27883_v17 = vld [vmem:[#allocation196_spill] sm:$0xff]  ;;  %v18973_v34 = vld [vmem:[%s27058_s3 + $0xa4] ss:$16 sps:$4 sm:$0xff]  }
 0x3fa   :  { %2385 = vmatmul.mubr.bf16.gmra.mrb[232].mxu0 %v20142_v39  ;;  %v27885_v36 = vmax.f32 %v27883_v17, %v27884_v51  ;;  %v18974_v38 = vld [vmem:[%s27058_s3 + $0x22c] ss:$16 sps:$4 sm:$0xff]   ;;  %5272 = vmatprep.subr.bf16.mxu0 %v18973_v34  ;;  %v18982_v34 = vld [vmem:[%s27058_s3 + $0x248] ss:$16 sps:$4 sm:$0xff]  }
 0x3fb   :  { %27882 = vst [vmem:[#allocation180_spill] sm:$0xff] %v22526_v60  ;;  %16256 = vmatprep.mubr.msk.bf16.mxu0 %vm921_vm0, %v20143_v0  ;;  %v4608_v4 = vadd.f32 %v4596_v20, %v21745_v16  ;;  %v18976_v20 = vld [vmem:[%s27058_s3 + $0x228] ss:$16 sps:$4 sm:$0xff]   ;;  %17487 = vmatprep.subr.bf16.mxu1 %v18974_v38  ;;  %v18985_v38 = vld [vmem:[%s27058_s3 + $0xe4] ss:$16 sps:$4 sm:$0xff]  }
 0x3fc   :  { %v4599_v24 = vmax.f32 %v27885_v36, %v4587_v11  ;;  %v18971_v11 = vld [vmem:[%s27058_s3 + $0xa0] ss:$16 sps:$4 sm:$0xff]   ;;  %v18979_v36 = vld [vmem:[%s27058_s3 + $0xc4] ss:$16 sps:$4 sm:$0xff]   ;;  %17495 = vmatpush1.bf16.msra.mxu1 %v18976_v20 }
 0x3fd   :  { %v22545_v53 = vpop.f32.mrb[128].mxu0  ;;  %5273 = vmatpush1.bf16.msra.mxu0 %v18971_v11  ;;  %v4620_v26 = vmax.f32 %v4608_v4, 0.0  ;;  %v20144_v4 = vld [vmem:[%s27056_s0 + $0x1b0] ss:$8 sps:$4 sm:$0xff]   ;;  %v20145_v11 = vld [vmem:[%s27056_s0 + $0x1c4] ss:$8 sps:$4 sm:$0xff]  }
 0x3fe   :  { %v4611_v43 = vadd.f32 %v4599_v24, %v21745_v16  ;;  %v22554_v39 = vpop.f32.mrb[129].mxu0  ;;  %v18977_v16 = vld [vmem:[%s27058_s3 + $0xc0] ss:$16 sps:$4 sm:$0xff]   ;;  %v18980_v24 = vld [vmem:[%s27058_s3 + $0x24c] ss:$16 sps:$4 sm:$0xff]   ;;  %5274 = vmatprep.subr.bf16.mxu0 %v18979_v36 }
 0x3ff   :  { %v22559_v48 = vpop.f32.mrb[130].mxu0  ;;  %17488 = vmatprep.subr.bf16.mxu1 %v18980_v24  ;;  %v18983_v20 = vld [vmem:[%s27058_s3 + $0xe0] ss:$16 sps:$4 sm:$0xff]   ;;  %v18988_v36 = vld [vmem:[%s27058_s3 + $0x268] ss:$16 sps:$4 sm:$0xff]  }
 0x400   :  { %v4623_v17 = vmax.f32 %v4611_v43, 0.0  ;;  %v22561_v51 = vpop.f32.mrb[131].mxu0  ;;  %17496 = vmatpush1.bf16.msra.mxu1 %v18982_v34  ;;  %v18989_v34 = vld [vmem:[%s27058_s3 + $0x100] ss:$16 sps:$4 sm:$0xff]  }
 0x401   :  { %5275 = vmatpush1.bf16.msra.mxu0 %v18977_v16 }
 0x402   :  { %v22572_v0 = vpack.c.bf16 %v4623_v17, %v4620_v26  ;;  %2395 = vmatmul.mubr.bf16.gmra.mrb[236].mxu0 %v20144_v4  ;;  %v18986_v26 = vld [vmem:[%s27058_s3 + $0x26c] ss:$16 sps:$4 sm:$0xff]   ;;  %5276 = vmatprep.subr.bf16.mxu0 %v18985_v38  ;;  %v18991_v4 = vld [vmem:[%s27058_s3 + $0x104] ss:$16 sps:$4 sm:$0xff]   ;;  %v20146_v38 = vld [vmem:[%s27056_s0 + $0x1c0] ss:$8 sps:$4 sm:$0xff]  }
 0x403   :  { %16257 = vmatprep.mubr.msk.bf16.mxu0 %vm921_vm0, %v20145_v11  ;;  %17489 = vmatprep.subr.bf16.mxu1 %v18986_v26  ;;  %v18992_v11 = vld [vmem:[%s27058_s3 + $0x28c] ss:$16 sps:$4 sm:$0xff]  }
 0x404   :  { %27886 = vst [vmem:[#allocation188_spill] sm:$0xff] %v22572_v0  ;;  %17497 = vmatpush1.bf16.msra.mxu1 %v18988_v36  ;;  %v18994_v36 = vld [vmem:[%s27058_s3 + $0x288] ss:$16 sps:$4 sm:$0xff]  }
 0x405   :  { %v22587_v43 = vpop.f32.mrb[132].mxu0  ;;  %5277 = vmatpush1.bf16.msra.mxu0 %v18983_v20  ;;  %v27887_v20 = vld [vmem:[#allocation202_spill] sm:$0xff]  ;;  %17490 = vmatprep.subr.bf16.mxu1 %v18992_v11 }
 0x406   :  { %v22595_v17 = vpop.f32.mrb[133].mxu0  ;;  %v22617_v26 = vsub.s32 1, %v27887_v20  ;;  %5278 = vmatprep.subr.bf16.mxu0 %v18991_v4  ;;  %v18995_v4 = vld [vmem:[%s27058_s3 + $0x120] ss:$16 sps:$4 sm:$0xff]   ;;  %v19000_v11 = vld [vmem:[%s27058_s3 + $0x2a8] ss:$16 sps:$4 sm:$0xff]  }
 0x407   :  { %v22600_v16 = vpop.f32.mrb[134].mxu0  ;;  %v27889_v54 = vsub.s32 2, %v27887_v20 }
 0x408   :  { %v22602_v24 = vpop.f32.mrb[135].mxu0  ;;  %27888 = vst [vmem:[#allocation190_spill] sm:$0xff] %v22617_v26  ;;  %17498 = vmatpush1.bf16.msra.mxu1 %v18994_v36 }
 0x409   :  { %5279 = vmatpush1.bf16.msra.mxu0 %v18989_v34  ;;  %17491 = vmatprep.subr.bf16.mxu1 %v18998_v8  ;;  %v19001_v8 = vld [vmem:[%s27058_s3 + $0x140] ss:$16 sps:$4 sm:$0xff]  }
 0x40a   :  { %2405 = vmatmul.mubr.bf16.gmra.mrb[240].mxu0 %v20146_v38  ;;  %v18997_v38 = vld [vmem:[%s27058_s3 + $0x124] ss:$16 sps:$4 sm:$0xff]  }
 0x40b   :  { %16258 = vmatprep.mubr.msk.bf16.mxu0 %vm921_vm0, %v20147_v21  ;;  %v20148_v21 = vld [vmem:[%s27057_s2] sm:$0x7]  ;;  %5280 = vmatprep.subr.bf16.mxu0 %v18997_v38 }
 0x40c   :  { %v22641_v34 = vrot.slane %v20148_v21, %v22617_v26  ;;  %v22649_v15 = vrot.slane %v20148_v21, %v27889_v54  ;;  %17499 = vmatpush1.bf16.msra.mxu1 %v19000_v11 }
 0x40d   :  { %v2146_v0 = vpop.f32.mrb[136].mxu0  ;;  %5281 = vmatpush1.bf16.msra.mxu0 %v18995_v4 }
 0x40e   :  { %v3234_v60 = vmax.f32 %v22545_v53, %v2146_v0  ;;  %v2148_v41 = vpop.f32.mrb[137].mxu0  ;;  %v27890_v0 = vld [vmem:[#allocation12_spill] sm:$0xff]  ;;  %5282 = vmatprep.subr.bf16.mxu0 %v19003_v22  ;;  %v19009_v22 = vld [vmem:[%s27058_s3 + $0x164] ss:$16 sps:$4 sm:$0xff]  }
 0x40f   :  { %v3235_v36 = vmax.f32 %v22554_v39, %v2148_v41  ;;  %v2150_v53 = vpop.f32.mrb[138].mxu0  ;;  %v27892_v9 = vmax.f32 %v27890_v0, %v27891_v59  ;;  %v27894_v41 = vld [vmem:[#allocation21_spill] sm:$0xff]  ;;  %v27896_v59 = vld [vmem:[#allocation16_spill] sm:$0xff] }
 0x410   :  { %v3240_v26 = vmax.f32 %v22559_v48, %v2150_v53  ;;  %v2152_v38 = vpop.f32.mrb[139].mxu0  ;;  %v27895_v39 = vmax.f32 %v27893_v50, %v27894_v41  ;;  %v20149_v50 = vld [vmem:[%s27056_s0 + $0x1d0] ss:$8 sps:$4 sm:$0xff]  }
 0x411   :  { %v3255_v44 = vmax.f32 %v27892_v9, %v3234_v60  ;;  %v3241_v54 = vmax.f32 %v22561_v51, %v2152_v38  ;;  %v19004_v9 = vld [vmem:[%s27058_s3 + $0x2cc] ss:$16 sps:$4 sm:$0xff]   ;;  %v19006_v51 = vld [vmem:[%s27058_s3 + $0x2c8] ss:$16 sps:$4 sm:$0xff]   ;;  %v27900_v53 = vld [vmem:[#allocation203_spill] sm:$0xff]  ;;  %5283 = vmatpush1.bf16.msra.mxu0 %v19001_v8 }
 0x412   :  { %v3256_v20 = vmax.f32 %v27895_v39, %v3235_v36  ;;  %v27897_v60 = vld [vmem:[#allocation28_spill] sm:$0xff]  ;;  %2415 = vmatmul.mubr.bf16.gmra.mrb[244].mxu0 %v20149_v50  ;;  %v27899_v36 = vld [vmem:[#allocation10_spill] sm:$0xff]  ;;  %17492 = vmatprep.subr.bf16.mxu1 %v19004_v9  ;;  %v19007_v39 = vld [vmem:[%s27058_s3 + $0x160] ss:$16 sps:$4 sm:$0xff]  }
 0x413   :  { %v27898_v48 = vmax.f32 %v27896_v59, %v27897_v60  ;;  %v3283_v21 = vadd.f32 %v22641_v34, %v3255_v44  ;;  %v27901_v0 = vmax.f32 %v27899_v36, %v27900_v53  ;;  %17500 = vmatpush1.bf16.msra.mxu1 %v19006_v51  ;;  %5284 = vmatprep.subr.bf16.mxu0 %v19009_v22  ;;  %v19012_v60 = vld [vmem:[%s27058_s3 + $0x2e8] ss:$16 sps:$4 sm:$0xff]   ;;  %v19015_v22 = vld [vmem:[%s27058_s3 + $0x184] ss:$16 sps:$4 sm:$0xff]  }
 0x414   :  { %v3284_v11 = vadd.f32 %v22649_v15, %v3256_v20  ;;  %v27902_v53 = vld [vmem:[#allocation18_spill] sm:$0xff] }
 0x415   :  { %v3258_v4 = vmax.f32 %v27898_v48, %v3240_v26  ;;  %v3259_v38 = vmax.f32 %v27901_v0, %v3241_v54  ;;  %v20150_v26 = vld [vmem:[%s27056_s0 + $0x1e4] ss:$8 sps:$4 sm:$0xff]   ;;  %v2156_v41 = vpop.f32.mrb[140].mxu0  ;;  %v3295_v8 = vmax.f32 %v3283_v21, 0.0  ;;  %5285 = vmatpush1.bf16.msra.mxu0 %v19007_v39 }
 0x416   :  { %16259 = vmatprep.mubr.msk.bf16.mxu0 %vm921_vm0, %v20150_v26  ;;  %v19010_v54 = vld [vmem:[%s27058_s3 + $0x2ec] ss:$16 sps:$4 sm:$0xff]   ;;  %v3246_v9 = vmax.f32 %v22587_v43, %v2156_v41  ;;  %v2158_v59 = vpop.f32.mrb[141].mxu0  ;;  %5286 = vmatprep.subr.bf16.mxu0 %v19015_v22 }
 0x417   :  { %v3286_v44 = vadd.f32 %v22641_v34, %v3258_v4  ;;  %v3287_v20 = vadd.f32 %v22649_v15, %v3259_v38  ;;  %v3296_v4 = vmax.f32 %v3284_v11, 0.0  ;;  %v3247_v51 = vmax.f32 %v22595_v17, %v2158_v59  ;;  %v2160_v36 = vpop.f32.mrb[142].mxu0  ;;  %17493 = vmatprep.subr.bf16.mxu1 %v19010_v54  ;;  %v27903_v0 = vld [vmem:[#allocation30_spill] sm:$0xff]  ;;  %v27907_v17 = vld [vmem:[#allocation11_spill] sm:$0xff] }
 0x418   :  { %v27904_v38 = vmax.f32 %v27902_v53, %v27903_v0  ;;  %v3252_v43 = vmax.f32 %v22600_v16, %v2160_v36  ;;  %v2162_v26 = vpop.f32.mrb[143].mxu0  ;;  %17501 = vmatpush1.bf16.msra.mxu1 %v19012_v60  ;;  %v19013_v16 = vld [vmem:[%s27058_s3 + $0x180] ss:$16 sps:$4 sm:$0xff]   ;;  %v27910_v59 = vld [vmem:[#allocation34_spill] sm:$0xff]  ;;  %v20152_v0 = vld [vmem:[%s27056_s0 + $0x1f4] ss:$8 sps:$4 sm:$0xff]  }
 0x419   :  { %v3298_v48 = vmax.f32 %v3286_v44, 0.0  ;;  %v3299_v50 = vmax.f32 %v3287_v20, 0.0  ;;  %v27906_v44 = vld [vmem:[#allocation13_spill] sm:$0xff]  ;;  %v3253_v54 = vmax.f32 %v22602_v24, %v2162_v26  ;;  %v27912_v24 = vld [vmem:[#allocation15_spill] sm:$0xff]  ;;  %5287 = vmatpush1.bf16.msra.mxu0 %v19013_v16 }
 0x41a   :  { %v3261_v21 = vmax.f32 %v27904_v38, %v3246_v9  ;;  %v27908_v20 = vmax.f32 %v27906_v44, %v27907_v17  ;;  %v27909_v9 = vld [vmem:[#allocation22_spill] sm:$0xff]  ;;  %v27913_v60 = vld [vmem:[#allocation23_spill] sm:$0xff]  ;;  %v27356_v38 = vmov 0  }
 0x41b   :  { %v22709_v41 = vpack.c.bf16 %v3298_v48, %v3295_v8  ;;  %v22711_v11 = vpack.c.bf16 %v3299_v50, %v3296_v4  ;;  %v27911_v36 = vmax.f32 %v27909_v9, %v27910_v59  ;;  %v20151_v8 = vld [vmem:[%s27056_s0 + $0x1e0] ss:$8 sps:$4 sm:$0xff]   ;;  %v27914_v50 = vmax.f32 %v27912_v24, %v27913_v60  ;;  %5953 = vmatprep.mubr.bf16.mxu1 %v27356_v38  ;;  %v19024_v60 = vld [vmem:[%s27058_s3 + $0x1e4] ss:$16 sps:$4 sm:$0xff]  }
 0x41c   :  { %v3262_v39 = vmax.f32 %v27908_v20, %v3247_v51  ;;  %2425 = vmatmul.mubr.bf16.gmra.mrb[248].mxu0 %v20151_v8  ;;  %v3289_v48 = vadd.f32 %v22641_v34, %v3261_v21  ;;  %v19018_v21 = vld [vmem:[%s27058_s3 + $0x1a4] ss:$16 sps:$4 sm:$0xff]   ;;  %v19016_v44 = vld [vmem:[%s27058_s3 + $0x1a0] ss:$16 sps:$4 sm:$0xff]  }
 0x41d   :  { %27905 = vst [vmem:[#allocation5_spill] sm:$0xff] %v22711_v11  ;;  %v3264_v53 = vmax.f32 %v27911_v36, %v3252_v43  ;;  %v3265_v51 = vmax.f32 %v27914_v50, %v3253_v54  ;;  %16260 = vmatprep.mubr.msk.bf16.mxu0 %vm921_vm0, %v20152_v0  ;;  %v2166_v22 = vpop.f32.mrb[144].mxu0  ;;  %5288 = vmatprep.subr.bf16.mxu0 %v19018_v21  ;;  %v19021_v36 = vld [vmem:[%s27058_s3 + $0x1c4] ss:$16 sps:$4 sm:$0xff]   ;;  %v19019_v24 = vld [vmem:[%s27058_s3 + $0x1c0] ss:$16 sps:$4 sm:$0xff]  }
 0x41e   :  { %v3290_v4 = vadd.f32 %v22649_v15, %v3262_v39  ;;  %v2168_v17 = vpop.f32.mrb[145].mxu0  ;;  %v3301_v20 = vmax.f32 %v3289_v48, 0.0  ;;  %5289 = vmatpush1.bf16.msra.mxu0 %v19016_v44  ;;  %v20153_v48 = vld [vmem:[%s27056_s0 + $0x1f0] ss:$8 sps:$4 sm:$0xff]   ;;  %v20156_v44 = vld [vmem:[%s27056_s0 + $0x214] ss:$8 sps:$4 sm:$0xff]  }
 0x41f   :  { %v3292_v43 = vadd.f32 %v22641_v34, %v3264_v53  ;;  %v3293_v26 = vadd.f32 %v22649_v15, %v3265_v51  ;;  %v2170_v16 = vpop.f32.mrb[146].mxu0  ;;  %5290 = vmatprep.subr.bf16.mxu0 %v19021_v36  ;;  %v19022_v51 = vld [vmem:[%s27058_s3 + $0x1e0] ss:$16 sps:$4 sm:$0xff]  }
 0x420   :  { %v3302_v54 = vmax.f32 %v3290_v4, 0.0  ;;  %v2172_v59 = vpop.f32.mrb[147].mxu0  ;;  %v20154_v4 = vld [vmem:[%s27056_s0 + $0x204] ss:$8 sps:$4 sm:$0xff]  }
 0x421   :  { %v3304_v39 = vmax.f32 %v3292_v43, 0.0  ;;  %v3305_v9 = vmax.f32 %v3293_v26, 0.0  ;;  %v20155_v26 = vld [vmem:[%s27056_s0 + $0x200] ss:$8 sps:$4 sm:$0xff]  }
 0x422   :  { %5291 = vmatpush1.bf16.msra.mxu0 %v19019_v24  ;;  %v27916_v24 = vld [vmem:[#allocation36_spill] sm:$0xff] }
 0x423   :  { %v22747_v53 = vpack.c.bf16 %v3304_v39, %v3301_v20  ;;  %v22749_v8 = vpack.c.bf16 %v3305_v9, %v3302_v54  ;;  %5292 = vmatprep.subr.bf16.mxu0 %v19024_v60 }
 0x424   :  { %2435 = vmatmul.mubr.bf16.gmra.mrb[252].mxu0 %v20153_v48  ;;  %v27917_v48 = vld [vmem:[#allocation48_spill] sm:$0xff] }
 0x425   :  { %27915 = vst [vmem:[#allocation192_spill] sm:$0xff] %v22749_v8  ;;  %16261 = vmatprep.mubr.msk.bf16.mxu0 %vm921_vm0, %v20154_v4  ;;  %v2176_v50 = vpop.f32.mrb[148].mxu0  ;;  %v27918_v4 = vmax.f32 %v27916_v24, %v27917_v48  ;;  %v27919_v8 = vld [vmem:[#allocation14_spill] sm:$0xff] }
 0x426   :  { %v2178_v0 = vpop.f32.mrb[149].mxu0  ;;  %5293 = vmatpush1.bf16.msra.mxu0 %v19022_v51 }
 0x427   :  { %v2180_v21 = vpop.f32.mrb[150].mxu0 }
 0x428   :  { %v2182_v43 = vpop.f32.mrb[151].mxu0 }
 0x42c   :  { %2445 = vmatmul.mubr.bf16.gmra.mrb[0].mxu0 %v20155_v26  ;;  %v27921_v26 = vmax.f32 %v27919_v8, %v27920_v58  ;;  %v20158_v58 = vld [vmem:[%s27056_s0 + $0x224] ss:$8 sps:$4 sm:$0xff]  }
 0x42d   :  { %16262 = vmatprep.mubr.msk.bf16.mxu0 %vm921_vm0, %v20156_v44  ;;  %v2186_v20 = vpop.f32.mrb[152].mxu0  ;;  %v27923_v44 = vld [vmem:[#allocation52_spill] sm:$0xff] }
 0x42e   :  { %v3370_v39 = vmax.f32 %v2166_v22, %v2186_v20  ;;  %v2188_v54 = vpop.f32.mrb[153].mxu0  ;;  %v27924_v33 = vmax.f32 %v27922_v52, %v27923_v44 }
 0x42f   :  { %v3371_v9 = vmax.f32 %v2168_v17, %v2188_v54  ;;  %v2190_v36 = vpop.f32.mrb[154].mxu0  ;;  %v20157_v17 = vld [vmem:[%s27056_s0 + $0x210] ss:$8 sps:$4 sm:$0xff]  }
 0x430   :  { %v3391_v60 = vmax.f32 %v27918_v4, %v3370_v39  ;;  %v3376_v51 = vmax.f32 %v2170_v16, %v2190_v36  ;;  %v2192_v38 = vpop.f32.mrb[155].mxu0  ;;  %v27925_v16 = vld [vmem:[#allocation26_spill] sm:$0xff]  ;;  %v27926_v39 = vld [vmem:[#allocation20_spill] sm:$0xff] }
 0x431   :  { %v3392_v11 = vmax.f32 %v27921_v26, %v3371_v9  ;;  %v3377_v42 = vmax.f32 %v2172_v59, %v2192_v38  ;;  %v27927_v54 = vmax.f32 %v27925_v16, %v27926_v39 }
 0x432   :  { %v3403_v10 = vadd.f32 %v3391_v60, %v22641_v34  ;;  %v3394_v22 = vmax.f32 %v27924_v33, %v3376_v51  ;;  %v27929_v51 = vld [vmem:[#allocation54_spill] sm:$0xff] }
 0x433   :  { %v3404_v20 = vadd.f32 %v3392_v11, %v22649_v15  ;;  %v3395_v36 = vmax.f32 %v27927_v54, %v3377_v42  ;;  %v27928_v42 = vld [vmem:[#allocation42_spill] sm:$0xff]  ;;  %v27933_v54 = vld [vmem:[#allocation17_spill] sm:$0xff] }
 0x434   :  { %2455 = vmatmul.mubr.bf16.gmra.mrb[4].mxu0 %v20157_v17  ;;  %v3406_v52 = vadd.f32 %v3394_v22, %v22641_v34  ;;  %v3415_v9 = vmax.f32 %v3403_v10, 0.0  ;;  %v27930_v26 = vmax.f32 %v27928_v42, %v27929_v51 }
 0x435   :  { %16263 = vmatprep.mubr.msk.bf16.mxu0 %vm921_vm0, %v20158_v58  ;;  %v3407_v33 = vadd.f32 %v3395_v36, %v22649_v15  ;;  %v2196_v38 = vpop.f32.mrb[156].mxu0  ;;  %v3416_v11 = vmax.f32 %v3404_v20, 0.0  ;;  %v27934_v36 = vld [vmem:[#allocation32_spill] sm:$0xff] }
 0x436   :  { %v3382_v59 = vmax.f32 %v2176_v50, %v2196_v38  ;;  %v2198_v8 = vpop.f32.mrb[157].mxu0  ;;  %v3418_v24 = vmax.f32 %v3406_v52, 0.0  ;;  %v27935_v50 = vmax.f32 %v27933_v54, %v27934_v36  ;;  %v27936_v52 = vld [vmem:[#allocation46_spill] sm:$0xff] }
 0x437   :  { %v3419_v48 = vmax.f32 %v3407_v33, 0.0  ;;  %v3383_v4 = vmax.f32 %v2178_v0, %v2198_v8  ;;  %v2200_v60 = vpop.f32.mrb[158].mxu0  ;;  %v27937_v0 = vld [vmem:[#allocation58_spill] sm:$0xff]  ;;  %v27939_v8 = vld [vmem:[#allocation29_spill] sm:$0xff] }
 0x438   :  { %v3397_v44 = vmax.f32 %v27930_v26, %v3382_v59  ;;  %v3388_v17 = vmax.f32 %v2180_v21, %v2200_v60  ;;  %v2202_v16 = vpop.f32.mrb[159].mxu0  ;;  %v22800_v39 = vpack.c.bf16 %v3418_v24, %v3415_v9  ;;  %v27938_v33 = vmax.f32 %v27936_v52, %v27937_v0  ;;  %v20159_v21 = vld [vmem:[%s27056_s0 + $0x220] ss:$8 sps:$4 sm:$0xff]  }
 0x439   :  { %v22802_v22 = vpack.c.bf16 %v3419_v48, %v3416_v11  ;;  %v3398_v58 = vmax.f32 %v27935_v50, %v3383_v4  ;;  %v3389_v10 = vmax.f32 %v2182_v43, %v2202_v16  ;;  %v27940_v9 = vld [vmem:[#allocation33_spill] sm:$0xff]  ;;  %v20160_v43 = vld [vmem:[%s27056_s0 + $0x234] ss:$8 sps:$4 sm:$0xff]  }
 0x43a   :  { %27931 = vst [vmem:[#allocation198_spill] sm:$0xff] %v22800_v39  ;;  %v3409_v20 = vadd.f32 %v3397_v44, %v22641_v34  ;;  %v3400_v38 = vmax.f32 %v27938_v33, %v3388_v17  ;;  %v27941_v24 = vmax.f32 %v27939_v8, %v27940_v9 }
 0x43b   :  { %27932 = vst [vmem:[#allocation194_spill] sm:$0xff] %v22802_v22  ;;  %v3410_v59 = vadd.f32 %v3398_v58, %v22649_v15  ;;  %v20161_v58 = vld [vmem:[%s27056_s0 + $0x230] ss:$8 sps:$4 sm:$0xff]  }
 0x43c   :  { %2465 = vmatmul.mubr.bf16.gmra.mrb[8].mxu0 %v20159_v21  ;;  %v3401_v11 = vmax.f32 %v27941_v24, %v3389_v10  ;;  %v3412_v48 = vadd.f32 %v3400_v38, %v22641_v34  ;;  %v3421_v51 = vmax.f32 %v3409_v20, 0.0  ;;  %v20162_v10 = vld [vmem:[%s27056_s0 + $0x244] ss:$8 sps:$4 sm:$0xff]   ;;  %v20163_v21 = vld [vmem:[%s27056_s0 + $0x240] ss:$8 sps:$4 sm:$0xff]  }
 0x43d   :  { %16264 = vmatprep.mubr.msk.bf16.mxu0 %vm921_vm0, %v20160_v43  ;;  %v2206_v60 = vpop.f32.mrb[160].mxu0  ;;  %v3422_v44 = vmax.f32 %v3410_v59, 0.0  ;;  %v19027_v38 = vld [vmem:[%s27058_s3 + $0x304] ss:$16 sps:$4 sm:$0xff]  }
 0x43e   :  { %v3413_v4 = vadd.f32 %v3401_v11, %v22649_v15  ;;  %v2208_v42 = vpop.f32.mrb[161].mxu0  ;;  %v3424_v26 = vmax.f32 %v3412_v48, 0.0  ;;  %v20164_v59 = vld [vmem:[%s27056_s0 + $0x254] ss:$8 sps:$4 sm:$0xff]   ;;  %6787 = vmatprep.subr.bf16.mxu1 %v19027_v38 }
 0x43f   :  { %v2210_v16 = vpop.f32.mrb[162].mxu0  ;;  %v27944_v48 = vld [vmem:[#allocation60_spill] sm:$0xff] }
 0x440   :  { %v3425_v17 = vmax.f32 %v3413_v4, 0.0  ;;  %v2212_v54 = vpop.f32.mrb[163].mxu0  ;;  %v22824_v36 = vpack.c.bf16 %v3424_v26, %v3421_v51  ;;  %v27945_v4 = vld [vmem:[#allocation72_spill] sm:$0xff] }
 0x441   :  { %v27946_v51 = vmax.f32 %v27944_v48, %v27945_v4  ;;  %v27951_v38 = vld [vmem:[#allocation76_spill] sm:$0xff] }
 0x442   :  { %27942 = vst [vmem:[#allocation7_spill] sm:$0xff] %v22824_v36  ;;  %v22826_v50 = vpack.c.bf16 %v3425_v17, %v3422_v44 }
 0x444   :  { %27943 = vst [vmem:[#allocation196_spill] sm:$0xff] %v22826_v50  ;;  %2475 = vmatmul.mubr.bf16.gmra.mrb[12].mxu0 %v20161_v58  ;;  %v27947_v58 = vld [vmem:[#allocation39_spill] sm:$0xff] }
 0x445   :  { %16265 = vmatprep.mubr.msk.bf16.mxu0 %vm921_vm0, %v20162_v10  ;;  %v2216_v20 = vpop.f32.mrb[164].mxu0  ;;  %v27948_v10 = vld [vmem:[#allocation49_spill] sm:$0xff] }
 0x446   :  { %v2218_v52 = vpop.f32.mrb[165].mxu0 }
 0x447   :  { %v2220_v0 = vpop.f32.mrb[166].mxu0 }
 0x448   :  { %v2222_v33 = vpop.f32.mrb[167].mxu0 }
 0x44c   :  { %2485 = vmatmul.mubr.bf16.gmra.mrb[16].mxu0 %v20163_v21  ;;  %v27949_v21 = vmax.f32 %v27947_v58, %v27948_v10 }
 0x44d   :  { %16266 = vmatprep.mubr.msk.bf16.mxu0 %vm921_vm0, %v20164_v59  ;;  %v2226_v8 = vpop.f32.mrb[168].mxu0  ;;  %v27950_v59 = vld [vmem:[#allocation64_spill] sm:$0xff] }
 0x44e   :  { %v3490_v9 = vmax.f32 %v2206_v60, %v2226_v8  ;;  %v2228_v24 = vpop.f32.mrb[169].mxu0  ;;  %v27952_v49 = vmax.f32 %v27950_v59, %v27951_v38  ;;  %v27957_v59 = vld [vmem:[#allocation78_spill] sm:$0xff] }
 0x44f   :  { %v3491_v11 = vmax.f32 %v2208_v42, %v2228_v24  ;;  %v2230_v43 = vpop.f32.mrb[170].mxu0  ;;  %v20165_v42 = vld [vmem:[%s27056_s0 + $0x250] ss:$8 sps:$4 sm:$0xff]  }
 0x450   :  { %v3511_v26 = vmax.f32 %v27946_v51, %v3490_v9  ;;  %v3496_v44 = vmax.f32 %v2210_v16, %v2230_v43  ;;  %v2232_v17 = vpop.f32.mrb[171].mxu0  ;;  %v27953_v16 = vld [vmem:[#allocation43_spill] sm:$0xff]  ;;  %v27954_v9 = vld [vmem:[#allocation38_spill] sm:$0xff] }
 0x451   :  { %v3512_v50 = vmax.f32 %v27949_v21, %v3491_v11  ;;  %v3497_v22 = vmax.f32 %v2212_v54, %v2232_v17  ;;  %v27955_v24 = vmax.f32 %v27953_v16, %v27954_v9  ;;  %v20166_v54 = vld [vmem:[%s27056_s0 + $0x264] ss:$8 sps:$4 sm:$0xff]  }
 0x452   :  { %v3523_v35 = vadd.f32 %v3511_v26, %v22641_v34  ;;  %v3514_v60 = vmax.f32 %v27952_v49, %v3496_v44  ;;  %v27956_v21 = vld [vmem:[#allocation66_spill] sm:$0xff] }
 0x453   :  { %v3524_v8 = vadd.f32 %v3512_v50, %v22649_v15  ;;  %v3515_v43 = vmax.f32 %v27955_v24, %v3497_v22  ;;  %v27958_v38 = vmax.f32 %v27956_v21, %v27957_v59  ;;  %v27960_v24 = vld [vmem:[#allocation35_spill] sm:$0xff] }
 0x454   :  { %2495 = vmatmul.mubr.bf16.gmra.mrb[20].mxu0 %v20165_v42  ;;  %v3526_v11 = vadd.f32 %v3514_v60, %v22641_v34  ;;  %v3535_v4 = vmax.f32 %v3523_v35, 0.0 }
 0x455   :  { %16267 = vmatprep.mubr.msk.bf16.mxu0 %vm921_vm0, %v20166_v54  ;;  %v3527_v49 = vadd.f32 %v3515_v43, %v22649_v15  ;;  %v2236_v48 = vpop.f32.mrb[172].mxu0  ;;  %v3536_v50 = vmax.f32 %v3524_v8, 0.0  ;;  %v27961_v43 = vld [vmem:[#allocation50_spill] sm:$0xff] }
 0x456   :  { %v3538_v51 = vmax.f32 %v3526_v11, 0.0  ;;  %v3502_v26 = vmax.f32 %v2216_v20, %v2236_v48  ;;  %v2238_v44 = vpop.f32.mrb[173].mxu0  ;;  %v27962_v35 = vmax.f32 %v27960_v24, %v27961_v43  ;;  %v27963_v11 = vld [vmem:[#allocation70_spill] sm:$0xff] }
 0x457   :  { %v3539_v17 = vmax.f32 %v3527_v49, 0.0  ;;  %v3503_v58 = vmax.f32 %v2218_v52, %v2238_v44  ;;  %v2240_v10 = vpop.f32.mrb[174].mxu0  ;;  %v27964_v52 = vld [vmem:[#allocation82_spill] sm:$0xff] }
 0x458   :  { %v22868_v22 = vpack.c.bf16 %v3538_v51, %v3535_v4  ;;  %v3517_v42 = vmax.f32 %v27958_v38, %v3502_v26  ;;  %v3508_v16 = vmax.f32 %v2220_v0, %v2240_v10  ;;  %v2242_v9 = vpop.f32.mrb[175].mxu0  ;;  %v27965_v49 = vmax.f32 %v27963_v11, %v27964_v52  ;;  %v20167_v4 = vld [vmem:[%s27056_s0 + $0x260] ss:$8 sps:$4 sm:$0xff]   ;;  %v27966_v51 = vld [vmem:[#allocation47_spill] sm:$0xff] }
 0x459   :  { %v22873_v60 = vpack.c.bf16 %v3539_v17, %v3536_v50  ;;  %v3518_v54 = vmax.f32 %v27962_v35, %v3503_v58  ;;  %v3509_v20 = vmax.f32 %v2222_v33, %v2242_v9  ;;  %v27967_v26 = vld [vmem:[#allocation51_spill] sm:$0xff] }
 0x45a   :  { %v3529_v8 = vadd.f32 %v3517_v42, %v22641_v34  ;;  %v3520_v48 = vmax.f32 %v27965_v49, %v3508_v16  ;;  %v27968_v44 = vmax.f32 %v27966_v51, %v27967_v26  ;;  %v20168_v33 = vld [vmem:[%s27056_s0 + $0x274] ss:$8 sps:$4 sm:$0xff]  }
 0x45b   :  { %27959 = vst [vmem:[#allocation200_spill] sm:$0xff] %v22873_v60  ;;  %v3530_v0 = vadd.f32 %v3518_v54, %v22649_v15  ;;  %v20169_v54 = vld [vmem:[%s27056_s0 + $0x270] ss:$8 sps:$4 sm:$0xff]  }
 0x45c   :  { %2505 = vmatmul.mubr.bf16.gmra.mrb[24].mxu0 %v20167_v4  ;;  %v3521_v50 = vmax.f32 %v27968_v44, %v3509_v20  ;;  %v3532_v17 = vadd.f32 %v3520_v48, %v22641_v34  ;;  %v3541_v21 = vmax.f32 %v3529_v8, 0.0  ;;  %v20170_v20 = vld [vmem:[%s27056_s0 + $0x284] ss:$8 sps:$4 sm:$0xff]   ;;  %v20171_v48 = vld [vmem:[%s27056_s0 + $0x280] ss:$8 sps:$4 sm:$0xff]  }
 0x45d   :  { %16268 = vmatprep.mubr.msk.bf16.mxu0 %vm921_vm0, %v20168_v33  ;;  %v2246_v10 = vpop.f32.mrb[176].mxu0  ;;  %v3542_v42 = vmax.f32 %v3530_v0, 0.0  ;;  %v20172_v4 = vld [vmem:[%s27056_s0 + $0x294] ss:$8 sps:$4 sm:$0xff]  }
 0x45e   :  { %v3533_v58 = vadd.f32 %v3521_v50, %v22649_v15  ;;  %v3544_v59 = vmax.f32 %v3532_v17, 0.0  ;;  %v2248_v38 = vpop.f32.mrb[177].mxu0  ;;  %v27971_v33 = vld [vmem:[#allocation84_spill] sm:$0xff] }
 0x45f   :  { %v2250_v9 = vpop.f32.mrb[178].mxu0  ;;  %v27972_v17 = vld [vmem:[#allocation96_spill] sm:$0xff] }
 0x460   :  { %v3545_v16 = vmax.f32 %v3533_v58, 0.0  ;;  %v22895_v24 = vpack.c.bf16 %v3544_v59, %v3541_v21  ;;  %v2252_v43 = vpop.f32.mrb[179].mxu0  ;;  %v27973_v58 = vmax.f32 %v27971_v33, %v27972_v17 }
 0x462   :  { %27969 = vst [vmem:[#allocation12_spill] sm:$0xff] %v22895_v24  ;;  %v22897_v35 = vpack.c.bf16 %v3545_v16, %v3542_v42  ;;  %v27974_v16 = vld [vmem:[#allocation53_spill] sm:$0xff] }
 0x464   :  { %27970 = vst [vmem:[#allocation24_spill] sm:$0xff] %v22897_v35  ;;  %2515 = vmatmul.mubr.bf16.gmra.mrb[28].mxu0 %v20169_v54  ;;  %v27975_v54 = vld [vmem:[#allocation61_spill] sm:$0xff] }
 0x465   :  { %16269 = vmatprep.mubr.msk.bf16.mxu0 %vm921_vm0, %v20170_v20  ;;  %v2256_v8 = vpop.f32.mrb[180].mxu0  ;;  %v27976_v20 = vmax.f32 %v27974_v16, %v27975_v54 }
 0x466   :  { %v2258_v11 = vpop.f32.mrb[181].mxu0 }
 0x467   :  { %v2260_v52 = vpop.f32.mrb[182].mxu0 }
 0x468   :  { %v2262_v49 = vpop.f32.mrb[183].mxu0 }
 0x46c   :  { %2525 = vmatmul.mubr.bf16.gmra.mrb[32].mxu0 %v20171_v48 }
 0x46d   :  { %16270 = vmatprep.mubr.msk.bf16.mxu0 %vm921_vm0, %v20172_v4  ;;  %v2266_v0 = vpop.f32.mrb[184].mxu0  ;;  %v27978_v4 = vld [vmem:[#allocation100_spill] sm:$0xff] }
 0x46e   :  { %v3610_v51 = vmax.f32 %v2246_v10, %v2266_v0  ;;  %v2268_v26 = vpop.f32.mrb[185].mxu0  ;;  %v27979_v62 = vmax.f32 %v27977_v14, %v27978_v4 }
 0x46f   :  { %v3611_v44 = vmax.f32 %v2248_v38, %v2268_v26  ;;  %v2270_v50 = vpop.f32.mrb[186].mxu0  ;;  %v20173_v38 = vld [vmem:[%s27056_s0 + $0x290] ss:$8 sps:$4 sm:$0xff]  }
 0x470   :  { %v3631_v21 = vmax.f32 %v27973_v58, %v3610_v51  ;;  %v3616_v59 = vmax.f32 %v2250_v9, %v2270_v50  ;;  %v2272_v42 = vpop.f32.mrb[187].mxu0  ;;  %v27980_v9 = vld [vmem:[#allocation55_spill] sm:$0xff] }
 0x471   :  { %v3632_v48 = vmax.f32 %v27976_v20, %v3611_v44  ;;  %v3617_v35 = vmax.f32 %v2252_v43, %v2272_v42  ;;  %v27981_v51 = vld [vmem:[#allocation63_spill] sm:$0xff]  ;;  %v20174_v43 = vld [vmem:[%s27056_s0 + $0x2a4] ss:$8 sps:$4 sm:$0xff]  }
 0x472   :  { %v3643_v60 = vadd.f32 %v3631_v21, %v22641_v34  ;;  %v3634_v10 = vmax.f32 %v27979_v62, %v3616_v59  ;;  %v27982_v26 = vmax.f32 %v27980_v9, %v27981_v51  ;;  %v27984_v20 = vld [vmem:[#allocation90_spill] sm:$0xff] }
 0x473   :  { %v3644_v0 = vadd.f32 %v3632_v48, %v22649_v15  ;;  %v27985_v48 = vld [vmem:[#allocation102_spill] sm:$0xff] }
 0x474   :  { %2535 = vmatmul.mubr.bf16.gmra.mrb[36].mxu0 %v20173_v38  ;;  %v3635_v50 = vmax.f32 %v27982_v26, %v3617_v35  ;;  %v3646_v14 = vadd.f32 %v3634_v10, %v22641_v34  ;;  %v3655_v33 = vmax.f32 %v3643_v60, 0.0  ;;  %v27986_v4 = vmax.f32 %v27984_v20, %v27985_v48  ;;  %v27988_v26 = vld [vmem:[#allocation56_spill] sm:$0xff] }
 0x475   :  { %16271 = vmatprep.mubr.msk.bf16.mxu0 %vm921_vm0, %v20174_v43  ;;  %v2276_v44 = vpop.f32.mrb[188].mxu0  ;;  %v3656_v59 = vmax.f32 %v3644_v0, 0.0 }
 0x476   :  { %v3647_v62 = vadd.f32 %v3635_v50, %v22649_v15  ;;  %v3658_v17 = vmax.f32 %v3646_v14, 0.0  ;;  %v3622_v58 = vmax.f32 %v2256_v8, %v2276_v44  ;;  %v2278_v21 = vpop.f32.mrb[189].mxu0  ;;  %v27989_v50 = vld [vmem:[#allocation67_spill] sm:$0xff]  ;;  %v27991_v14 = vld [vmem:[#allocation94_spill] sm:$0xff] }
 0x477   :  { %v3623_v16 = vmax.f32 %v2258_v11, %v2278_v21  ;;  %v2280_v54 = vpop.f32.mrb[190].mxu0  ;;  %v27990_v60 = vmax.f32 %v27988_v26, %v27989_v50  ;;  %v27992_v11 = vld [vmem:[#allocation106_spill] sm:$0xff] }
 0x478   :  { %v3659_v42 = vmax.f32 %v3647_v62, 0.0  ;;  %v22936_v35 = vpack.c.bf16 %v3658_v17, %v3655_v33  ;;  %v3637_v38 = vmax.f32 %v27986_v4, %v3622_v58  ;;  %v3628_v9 = vmax.f32 %v2260_v52, %v2280_v54  ;;  %v2282_v51 = vpop.f32.mrb[191].mxu0  ;;  %v20175_v33 = vld [vmem:[%s27056_s0 + $0x2a0] ss:$8 sps:$4 sm:$0xff]  }
 0x479   :  { %v3638_v43 = vmax.f32 %v27990_v60, %v3623_v16  ;;  %v3629_v8 = vmax.f32 %v2262_v49, %v2282_v51  ;;  %v27993_v62 = vmax.f32 %v27991_v14, %v27992_v11  ;;  %v27994_v17 = vld [vmem:[#allocation57_spill] sm:$0xff]  ;;  %v20176_v49 = vld [vmem:[%s27056_s0 + $0x2b4] ss:$8 sps:$4 sm:$0xff]  }
 0x47a   :  { %27983 = vst [vmem:[#allocation9_spill] sm:$0xff] %v22936_v35  ;;  %v22941_v10 = vpack.c.bf16 %v3659_v42, %v3656_v59  ;;  %v3649_v0 = vadd.f32 %v3637_v38, %v22641_v34  ;;  %v27995_v58 = vld [vmem:[#allocation69_spill] sm:$0xff] }
 0x47b   :  { %v3640_v44 = vmax.f32 %v27993_v62, %v3628_v9  ;;  %v3650_v52 = vadd.f32 %v3638_v43, %v22649_v15  ;;  %v27996_v21 = vmax.f32 %v27994_v17, %v27995_v58  ;;  %v20177_v43 = vld [vmem:[%s27056_s0 + $0x2b0] ss:$8 sps:$4 sm:$0xff]  }
 0x47c   :  { %27987 = vst [vmem:[#allocation21_spill] sm:$0xff] %v22941_v10  ;;  %2545 = vmatmul.mubr.bf16.gmra.mrb[40].mxu0 %v20175_v33  ;;  %v3661_v20 = vmax.f32 %v3649_v0, 0.0  ;;  %v20179_v33 = vld [vmem:[%s27056_s0 + $0x2c0] ss:$8 sps:$4 sm:$0xff]   ;;  %v28004_v10 = vld [vmem:[#allocation112_spill] sm:$0xff] }
 0x47d   :  { %v3641_v59 = vmax.f32 %v27996_v21, %v3629_v8  ;;  %16272 = vmatprep.mubr.msk.bf16.mxu0 %vm921_vm0, %v20176_v49  ;;  %v3652_v42 = vadd.f32 %v3640_v44, %v22641_v34  ;;  %v2286_v54 = vpop.f32.mrb[192].mxu0  ;;  %v3662_v38 = vmax.f32 %v3650_v52, 0.0  ;;  %v20178_v8 = vld [vmem:[%s27056_s0 + $0x2c4] ss:$8 sps:$4 sm:$0xff]   ;;  %v20180_v52 = vld [vmem:[%s27056_s0 + $0x2d4] ss:$8 sps:$4 sm:$0xff]  }
 0x47e   :  { %v2288_v4 = vpop.f32.mrb[193].mxu0  ;;  %v19075_v44 = vld [vmem:[%s27058_s3 + $0x204] ss:$16 sps:$4 sm:$0xff]  }
 0x47f   :  { %v3653_v16 = vadd.f32 %v3641_v59, %v22649_v15  ;;  %v3664_v48 = vmax.f32 %v3652_v42, 0.0  ;;  %v2290_v51 = vpop.f32.mrb[194].mxu0  ;;  %5455 = vmatprep.subr.bf16.mxu0 %v19075_v44  ;;  %v27999_v42 = vld [vmem:[#allocation108_spill] sm:$0xff] }
 0x480   :  { %v2292_v50 = vpop.f32.mrb[195].mxu0 }
 0x481   :  { %v3665_v9 = vmax.f32 %v3653_v16, 0.0  ;;  %v22963_v26 = vpack.c.bf16 %v3664_v48, %v3661_v20  ;;  %v28000_v16 = vld [vmem:[#allocation120_spill] sm:$0xff] }
 0x482   :  { %v28001_v20 = vmax.f32 %v27999_v42, %v28000_v16 }
 0x483   :  { %27997 = vst [vmem:[#allocation16_spill] sm:$0xff] %v22963_v26  ;;  %v22965_v60 = vpack.c.bf16 %v3665_v9, %v3662_v38 }
 0x484   :  { %2555 = vmatmul.mubr.bf16.gmra.mrb[44].mxu0 %v20177_v43  ;;  %v28002_v43 = vld [vmem:[#allocation73_spill] sm:$0xff] }
 0x485   :  { %27998 = vst [vmem:[#allocation28_spill] sm:$0xff] %v22965_v60  ;;  %16273 = vmatprep.mubr.msk.bf16.mxu0 %vm921_vm0, %v20178_v8  ;;  %v2296_v0 = vpop.f32.mrb[196].mxu0  ;;  %v28003_v8 = vmax.f32 %v21951_v2, %v28002_v43  ;;  %v20182_v2 = vld [vmem:[%s27056_s0 + $0x2e4] ss:$8 sps:$4 sm:$0xff]  }
 0x486   :  { %v2298_v14 = vpop.f32.mrb[197].mxu0  ;;  %v28009_v43 = vld [vmem:[#allocation114_spill] sm:$0xff] }
 0x487   :  { %v2300_v11 = vpop.f32.mrb[198].mxu0 }
 0x488   :  { %v2302_v62 = vpop.f32.mrb[199].mxu0 }
 0x48c   :  { %2565 = vmatmul.mubr.bf16.gmra.mrb[48].mxu0 %v20179_v33 }
 0x48d   :  { %16274 = vmatprep.mubr.msk.bf16.mxu0 %vm921_vm0, %v20180_v52  ;;  %v2306_v17 = vpop.f32.mrb[200].mxu0  ;;  %v28005_v52 = vld [vmem:[#allocation124_spill] sm:$0xff] }
 0x48e   :  { %v3730_v58 = vmax.f32 %v2286_v54, %v2306_v17  ;;  %v2308_v21 = vpop.f32.mrb[201].mxu0  ;;  %v28006_v19 = vmax.f32 %v28004_v10, %v28005_v52 }
 0x48f   :  { %v3731_v59 = vmax.f32 %v2288_v4, %v2308_v21  ;;  %v2310_v49 = vpop.f32.mrb[202].mxu0  ;;  %v20181_v4 = vld [vmem:[%s27056_s0 + $0x2d0] ss:$8 sps:$4 sm:$0xff]  }
 0x490   :  { %v3751_v48 = vmax.f32 %v28001_v20, %v3730_v58  ;;  %v3736_v38 = vmax.f32 %v2290_v51, %v2310_v49  ;;  %v2312_v9 = vpop.f32.mrb[203].mxu0  ;;  %v28007_v51 = vld [vmem:[#allocation62_spill] sm:$0xff] }
 0x491   :  { %v3752_v44 = vmax.f32 %v28003_v8, %v3731_v59  ;;  %v3737_v33 = vmax.f32 %v2292_v50, %v2312_v9  ;;  %v28008_v58 = vmax.f32 %v21953_v1, %v28007_v51  ;;  %v28010_v8 = vld [vmem:[#allocation126_spill] sm:$0xff] }
 0x492   :  { %v3763_v60 = vadd.f32 %v3751_v48, %v22641_v34  ;;  %v3754_v54 = vmax.f32 %v28006_v19, %v3736_v38 }
 0x493   :  { %v3764_v17 = vadd.f32 %v3752_v44, %v22649_v15  ;;  %v3755_v21 = vmax.f32 %v28008_v58, %v3737_v33  ;;  %v28011_v44 = vmax.f32 %v28009_v43, %v28010_v8  ;;  %v19030_v58 = vld [vmem:[%s27058_s3 + $0x324] ss:$16 sps:$4 sm:$0xff]  }
 0x494   :  { %2575 = vmatmul.mubr.bf16.gmra.mrb[52].mxu0 %v20181_v4  ;;  %v3766_v10 = vadd.f32 %v3754_v54, %v22641_v34  ;;  %v3775_v59 = vmax.f32 %v3763_v60, 0.0  ;;  %v19025_v54 = vld [vmem:[%s27058_s3 + $0x300] ss:$16 sps:$4 sm:$0xff]  }
 0x495   :  { %16275 = vmatprep.mubr.msk.bf16.mxu0 %vm921_vm0, %v20182_v2  ;;  %v3767_v19 = vadd.f32 %v3755_v21, %v22649_v15  ;;  %v2316_v50 = vpop.f32.mrb[204].mxu0  ;;  %v3776_v20 = vmax.f32 %v3764_v17, 0.0  ;;  %v28014_v2 = vld [vmem:[#allocation118_spill] sm:$0xff] }
 0x496   :  { %v3778_v49 = vmax.f32 %v3766_v10, 0.0  ;;  %v3742_v42 = vmax.f32 %v2296_v0, %v2316_v50  ;;  %v2318_v16 = vpop.f32.mrb[205].mxu0  ;;  %v28012_v0 = vld [vmem:[#allocation74_spill] sm:$0xff] }
 0x497   :  { %v3779_v48 = vmax.f32 %v3767_v19, 0.0  ;;  %v3743_v38 = vmax.f32 %v2298_v14, %v2318_v16  ;;  %v2320_v1 = vpop.f32.mrb[206].mxu0  ;;  %v28013_v17 = vmax.f32 %v21960_v29, %v28012_v0  ;;  %v20183_v50 = vld [vmem:[%s27056_s0 + $0x2e0] ss:$8 sps:$4 sm:$0xff]   ;;  %v28017_v29 = vmax.f32 %v21962_v57, %v21990_v47 }
 0x498   :  { %v23007_v9 = vpack.c.bf16 %v3778_v49, %v3775_v59  ;;  %v3757_v33 = vmax.f32 %v28011_v44, %v3742_v42  ;;  %v3748_v52 = vmax.f32 %v2300_v11, %v2320_v1  ;;  %v2322_v4 = vpop.f32.mrb[207].mxu0  ;;  %v28015_v11 = vld [vmem:[#allocation130_spill] sm:$0xff]  ;;  %v20184_v49 = vld [vmem:[%s27056_s0 + $0x2f4] ss:$8 sps:$4 sm:$0xff]   ;;  %v28018_v16 = vmov 0  }
 0x499   :  { %v23015_v60 = vpack.c.bf16 %v3779_v48, %v3776_v20  ;;  %v3758_v51 = vmax.f32 %v28013_v17, %v3743_v38  ;;  %v3749_v14 = vmax.f32 %v2302_v62, %v2322_v4  ;;  %v28016_v10 = vmax.f32 %v28014_v2, %v28015_v11  ;;  %v19028_v20 = vld [vmem:[%s27058_s3 + $0x320] ss:$16 sps:$4 sm:$0xff]   ;;  %v19033_v48 = vld [vmem:[%s27058_s3 + $0x344] ss:$16 sps:$4 sm:$0xff]  }
 0x49a   :  { %v3769_v21 = vadd.f32 %v3757_v33, %v22641_v34  ;;  %v19036_v17 = vld [vmem:[%s27058_s3 + $0x364] ss:$16 sps:$4 sm:$0xff]   ;;  %v19073_v2 = vld [vmem:[%s27058_s3 + $0x200] ss:$16 sps:$4 sm:$0xff]  }
 0x49b   :  { %v3760_v19 = vmax.f32 %v28016_v10, %v3748_v52  ;;  %v3770_v59 = vadd.f32 %v3758_v51, %v22649_v15  ;;  %v3761_v62 = vmax.f32 %v28017_v29, %v3749_v14  ;;  %5954 = vmatmul.mubr.bf16.vlgmr.msra.gmra.mrb[0].mxu1 %v23015_v60  ;;  %v20185_v51 = vld [vmem:[%s27056_s0 + $0x2f0] ss:$8 sps:$4 sm:$0xff]   ;;  %v19042_v29 = vld [vmem:[%s27058_s3 + $0x3a4] ss:$16 sps:$4 sm:$0xff]  }
 0x49c   :  { %2585 = vmatmul.mubr.bf16.gmra.mrb[56].mxu0 %v20183_v50  ;;  %5963 = vmatprep.mubr.bf16.mxu1 %v28018_v16  ;;  %v3781_v38 = vmax.f32 %v3769_v21, 0.0  ;;  %v19034_v14 = vld [vmem:[%s27058_s3 + $0x360] ss:$16 sps:$4 sm:$0xff]  }
 0x49d   :  { %16276 = vmatprep.mubr.msk.bf16.mxu0 %vm921_vm0, %v20184_v49  ;;  %v3772_v42 = vadd.f32 %v3760_v19, %v22641_v34  ;;  %6788 = vmatpush1.bf16.msra.mxu1 %v19025_v54  ;;  %v3773_v57 = vadd.f32 %v3761_v62, %v22649_v15  ;;  %v2326_v47 = vpop.f32.mrb[208].mxu0  ;;  %v3782_v8 = vmax.f32 %v3770_v59, 0.0  ;;  %v19031_v54 = vld [vmem:[%s27058_s3 + $0x340] ss:$16 sps:$4 sm:$0xff]   ;;  %v19081_v19 = vld [vmem:[%s27058_s3 + $0x224] ss:$16 sps:$4 sm:$0xff]  }
 0x49e   :  { %6789 = vmatprep.subr.bf16.mxu1 %v19030_v58  ;;  %v2328_v43 = vpop.f32.mrb[209].mxu0  ;;  %v19039_v58 = vld [vmem:[%s27058_s3 + $0x384] ss:$16 sps:$4 sm:$0xff]   ;;  %v19037_v10 = vld [vmem:[%s27058_s3 + $0x380] ss:$16 sps:$4 sm:$0xff]  }
 0x49f   :  { %v3784_v1 = vmax.f32 %v3772_v42, 0.0  ;;  %v3785_v44 = vmax.f32 %v3773_v57, 0.0  ;;  %v2330_v33 = vpop.f32.mrb[210].mxu0  ;;  %v28019_v62 = vld [vmem:[#allocation25_spill] sm:$0xff] }
 0x4a0   :  { %v2332_v4 = vpop.f32.mrb[211].mxu0  ;;  %v19079_v49 = vld [vmem:[%s27058_s3 + $0x220] ss:$16 sps:$4 sm:$0xff]  }
 0x4a1   :  { %v23048_v52 = vpack.c.bf16 %v3784_v1, %v3781_v38  ;;  %6790 = vmatpush1.bf16.msra.mxu1 %v19028_v20  ;;  %v23053_v0 = vpack.c.bf16 %v3785_v44, %v3782_v8  ;;  %v19040_v42 = vld [vmem:[%s27058_s3 + $0x3a0] ss:$16 sps:$4 sm:$0xff]   ;;  %v19084_v20 = vld [vmem:[%s27058_s3 + $0x244] ss:$16 sps:$4 sm:$0xff]  }
 0x4a2   :  { %6791 = vmatprep.subr.bf16.mxu1 %v19033_v48  ;;  %v19045_v48 = vld [vmem:[%s27058_s3 + $0x3c4] ss:$16 sps:$4 sm:$0xff]  }
 0x4a3   :  { %5964 = vmatmul.mubr.bf16.gmra.mrb[4].mxu1 %v23053_v0 }
 0x4a4   :  { %2595 = vmatmul.mubr.bf16.gmra.mrb[60].mxu0 %v20185_v51  ;;  %5973 = vmatprep.mubr.bf16.mxu1 %v28018_v16  ;;  %v28021_v51 = vld [vmem:[#allocation137_spill] sm:$0xff] }
 0x4a5   :  { %5294 = vmatprep.mubr.bf16.mxu0 %v22709_v41  ;;  %6792 = vmatpush1.bf16.msra.mxu1 %v19031_v54  ;;  %v23070_v21 = vpop.f32.mrb[212].mxu0  ;;  %v19082_v54 = vld [vmem:[%s27058_s3 + $0x240] ss:$16 sps:$4 sm:$0xff]  }
 0x4a6   :  { %6793 = vmatprep.subr.bf16.mxu1 %v19036_v17  ;;  %v23075_v11 = vpop.f32.mrb[213].mxu0  ;;  %v28020_v17 = vld [vmem:[#allocation131_spill] sm:$0xff] }
 0x4a7   :  { %v23083_v50 = vpop.f32.mrb[214].mxu0 }
 0x4a8   :  { %v23085_v59 = vpop.f32.mrb[215].mxu0 }
 0x4a9   :  { %6794 = vmatpush1.bf16.msra.mxu1 %v19034_v14  ;;  %v28022_v14 = vmax.f32 %v28020_v17, %v28021_v51 }
 0x4aa   :  { %6795 = vmatprep.subr.bf16.mxu1 %v19039_v58 }
 0x4ac   :  { %5295 = vmatmul.mubr.bf16.vlgmr.msra.gmra.mrb[64].mxu0 %v28019_v62 }
 0x4ad   :  { %5304 = vmatprep.mubr.bf16.mxu0 %v22747_v53  ;;  %5456 = vmatpush1.bf16.msra.mxu0 %v19073_v2  ;;  %v2346_v57 = vpop.f32.mrb[216].mxu0 }
 0x4ae   :  { %6796 = vmatpush1.bf16.msra.mxu1 %v19037_v10  ;;  %5457 = vmatprep.subr.bf16.mxu0 %v19081_v19  ;;  %v3850_v38 = vmax.f32 %v2326_v47, %v2346_v57  ;;  %v2348_v1 = vpop.f32.mrb[217].mxu0  ;;  %v19043_v19 = vld [vmem:[%s27058_s3 + $0x3c0] ss:$16 sps:$4 sm:$0xff]   ;;  %v19087_v47 = vld [vmem:[%s27058_s3 + $0x264] ss:$16 sps:$4 sm:$0xff]  }
 0x4af   :  { %6797 = vmatprep.subr.bf16.mxu1 %v19042_v29  ;;  %v3851_v8 = vmax.f32 %v2328_v43, %v2348_v1  ;;  %v2350_v44 = vpop.f32.mrb[218].mxu0  ;;  %v28023_v43 = vmax.f32 %v22007_v56, %v22027_v7  ;;  %v28024_v57 = vld [vmem:[#allocation133_spill] sm:$0xff]  ;;  %v28028_v56 = vmax.f32 %v22009_v55, %v22031_v6 }
 0x4b0   :  { %v3871_v58 = vmax.f32 %v28022_v14, %v3850_v38  ;;  %v3856_v2 = vmax.f32 %v2330_v33, %v2350_v44  ;;  %v2352_v10 = vpop.f32.mrb[219].mxu0  ;;  %v19048_v33 = vld [vmem:[%s27058_s3 + $0x3e4] ss:$16 sps:$4 sm:$0xff]   ;;  %v28025_v38 = vld [vmem:[#allocation138_spill] sm:$0xff] }
 0x4b1   :  { %5458 = vmatpush1.bf16.msra.mxu0 %v19079_v49  ;;  %v3872_v29 = vmax.f32 %v28023_v43, %v3851_v8  ;;  %v3857_v49 = vmax.f32 %v2332_v4, %v2352_v10  ;;  %v28026_v1 = vmax.f32 %v28024_v57, %v28025_v38  ;;  %v28027_v44 = vld [vmem:[#allocation27_spill] sm:$0xff] }
 0x4b2   :  { %6798 = vmatpush1.bf16.msra.mxu1 %v19040_v42  ;;  %5459 = vmatprep.subr.bf16.mxu0 %v19084_v20  ;;  %v3883_v42 = vadd.f32 %v3871_v58, %v22641_v34  ;;  %v19085_v4 = vld [vmem:[%s27058_s3 + $0x260] ss:$16 sps:$4 sm:$0xff]   ;;  %v19090_v55 = vld [vmem:[%s27058_s3 + $0x284] ss:$16 sps:$4 sm:$0xff]  }
 0x4b3   :  { %6799 = vmatprep.subr.bf16.mxu1 %v19045_v48  ;;  %v3874_v20 = vmax.f32 %v28026_v1, %v3856_v2  ;;  %v3884_v17 = vadd.f32 %v3872_v29, %v22649_v15  ;;  %v3875_v7 = vmax.f32 %v28028_v56, %v3857_v49  ;;  %v19046_v8 = vld [vmem:[%s27058_s3 + $0x3e0] ss:$16 sps:$4 sm:$0xff]  }
 0x4b4   :  { %5305 = vmatmul.mubr.bf16.gmra.mrb[68].mxu0 %v28027_v44  ;;  %v3895_v14 = vmax.f32 %v3883_v42, 0.0  ;;  %v28030_v57 = vld [vmem:[#allocation135_spill] sm:$0xff] }
 0x4b5   :  { %5314 = vmatprep.mubr.bf16.mxu0 %v22800_v39  ;;  %5460 = vmatpush1.bf16.msra.mxu0 %v19082_v54  ;;  %v3886_v48 = vadd.f32 %v3874_v20, %v22641_v34  ;;  %v3887_v6 = vadd.f32 %v3875_v7, %v22649_v15  ;;  %v2356_v51 = vpop.f32.mrb[220].mxu0  ;;  %v19051_v54 = vld [vmem:[%s27058_s3 + $0x404] ss:$16 sps:$4 sm:$0xff]  }
 0x4b6   :  { %6800 = vmatpush1.bf16.msra.mxu1 %v19043_v19  ;;  %5461 = vmatprep.subr.bf16.mxu0 %v19087_v47  ;;  %v3862_v2 = vmax.f32 %v23070_v21, %v2356_v51  ;;  %v2358_v10 = vpop.f32.mrb[221].mxu0  ;;  %v3896_v19 = vmax.f32 %v3884_v17, 0.0  ;;  %v28031_v38 = vld [vmem:[#allocation139_spill] sm:$0xff] }
 0x4b7   :  { %6801 = vmatprep.subr.bf16.mxu1 %v19048_v33  ;;  %v3898_v58 = vmax.f32 %v3886_v48, 0.0  ;;  %v3899_v43 = vmax.f32 %v3887_v6, 0.0  ;;  %v3863_v47 = vmax.f32 %v23075_v11, %v2358_v10  ;;  %v2360_v29 = vpop.f32.mrb[222].mxu0  ;;  %v28032_v33 = vmax.f32 %v28030_v57, %v28031_v38  ;;  %v19049_v21 = vld [vmem:[%s27058_s3 + $0x400] ss:$16 sps:$4 sm:$0xff]  }
 0x4b8   :  { %v3868_v20 = vmax.f32 %v23083_v50, %v2360_v29  ;;  %v2362_v56 = vpop.f32.mrb[223].mxu0  ;;  %v28033_v11 = vmax.f32 %v22016_v12, %v22050_v37  ;;  %v19054_v50 = vld [vmem:[%s27058_s3 + $0x424] ss:$16 sps:$4 sm:$0xff]  }
 0x4b9   :  { %5462 = vmatpush1.bf16.msra.mxu0 %v19085_v4  ;;  %v23148_v49 = vpack.c.bf16 %v3898_v58, %v3895_v14  ;;  %v3877_v1 = vmax.f32 %v28032_v33, %v3862_v2  ;;  %v23157_v42 = vpack.c.bf16 %v3899_v43, %v3896_v19  ;;  %v3869_v7 = vmax.f32 %v23085_v59, %v2362_v56  ;;  %v19088_v4 = vld [vmem:[%s27058_s3 + $0x280] ss:$16 sps:$4 sm:$0xff]   ;;  %v19096_v12 = vld [vmem:[%s27058_s3 + $0x2a4] ss:$16 sps:$4 sm:$0xff]  }
 0x4ba   :  { %6802 = vmatpush1.bf16.msra.mxu1 %v19046_v8  ;;  %5463 = vmatprep.subr.bf16.mxu0 %v19090_v55  ;;  %v3878_v17 = vmax.f32 %v28033_v11, %v3863_v47  ;;  %v28034_v8 = vld [vmem:[#allocation136_spill] sm:$0xff]  ;;  %v28037_v14 = vld [vmem:[#allocation37_spill] sm:$0xff]  ;;  %v28038_v59 = vmax.f32 %v22018_v63, %v22054_v45 }
 0x4bb   :  { %28029 = vst [vmem:[#allocation10_spill] sm:$0xff] %v23148_v49  ;;  %6803 = vmatprep.subr.bf16.mxu1 %v19051_v54  ;;  %v3889_v48 = vadd.f32 %v3877_v1, %v22641_v34  ;;  %v28035_v55 = vld [vmem:[#allocation140_spill] sm:$0xff]  ;;  %5974 = vmatmul.mubr.bf16.gmra.mrb[8].mxu1 %v23157_v42  ;;  %v19052_v2 = vld [vmem:[%s27058_s3 + $0x420] ss:$16 sps:$4 sm:$0xff]   ;;  %v19057_v63 = vld [vmem:[%s27058_s3 + $0x444] ss:$16 sps:$4 sm:$0xff]  }
 0x4bc   :  { %v28036_v6 = vmax.f32 %v28034_v8, %v28035_v55  ;;  %5315 = vmatmul.mubr.bf16.gmra.mrb[72].mxu0 %v28037_v14  ;;  %v3890_v37 = vadd.f32 %v3878_v17, %v22649_v15  ;;  %v3881_v54 = vmax.f32 %v28038_v59, %v3869_v7  ;;  %5983 = vmatprep.mubr.bf16.mxu1 %v28018_v16  ;;  %v19094_v45 = vld [vmem:[%s27058_s3 + $0x2a0] ss:$16 sps:$4 sm:$0xff]   ;;  %v19099_v57 = vld [vmem:[%s27058_s3 + $0x2c4] ss:$16 sps:$4 sm:$0xff]  }
 0x4bd   :  { %5324 = vmatprep.mubr.bf16.mxu0 %v22824_v36  ;;  %v2366_v19 = vpop.f32.mrb[224].mxu0  ;;  %5464 = vmatpush1.bf16.msra.mxu0 %v19088_v4  ;;  %v3901_v43 = vmax.f32 %v3889_v48, 0.0  ;;  %v19060_v17 = vld [vmem:[%s27058_s3 + $0x464] ss:$16 sps:$4 sm:$0xff]   ;;  %v19097_v7 = vld [vmem:[%s27058_s3 + $0x2c0] ss:$16 sps:$4 sm:$0xff]  }
 0x4be   :  { %v3880_v51 = vmax.f32 %v28036_v6, %v3868_v20  ;;  %6804 = vmatpush1.bf16.msra.mxu1 %v19049_v21  ;;  %v3893_v10 = vadd.f32 %v3881_v54, %v22649_v15  ;;  %v2368_v29 = vpop.f32.mrb[225].mxu0  ;;  %5465 = vmatprep.subr.bf16.mxu0 %v19096_v12  ;;  %v3902_v38 = vmax.f32 %v3890_v37, 0.0  ;;  %v19055_v21 = vld [vmem:[%s27058_s3 + $0x440] ss:$16 sps:$4 sm:$0xff]   ;;  %v19102_v4 = vld [vmem:[%s27058_s3 + $0x2e4] ss:$16 sps:$4 sm:$0xff]  }
 0x4bf   :  { %6805 = vmatprep.subr.bf16.mxu1 %v19054_v50  ;;  %v2370_v1 = vpop.f32.mrb[226].mxu0  ;;  %v28040_v50 = vld [vmem:[#allocation45_spill] sm:$0xff] }
 0x4c0   :  { %v3892_v58 = vadd.f32 %v3880_v51, %v22641_v34  ;;  %v3905_v33 = vmax.f32 %v3893_v10, 0.0  ;;  %v2372_v56 = vpop.f32.mrb[227].mxu0  ;;  %v19058_v48 = vld [vmem:[%s27058_s3 + $0x460] ss:$16 sps:$4 sm:$0xff]   ;;  %v19063_v55 = vld [vmem:[%s27058_s3 + $0x484] ss:$16 sps:$4 sm:$0xff]  }
 0x4c1   :  { %5466 = vmatpush1.bf16.msra.mxu0 %v19094_v45  ;;  %v19100_v6 = vld [vmem:[%s27058_s3 + $0x2e0] ss:$16 sps:$4 sm:$0xff]   ;;  %v19066_v54 = vld [vmem:[%s27058_s3 + $0x4a4] ss:$16 sps:$4 sm:$0xff]  }
 0x4c2   :  { %v3904_v47 = vmax.f32 %v3892_v58, 0.0  ;;  %6806 = vmatpush1.bf16.msra.mxu1 %v19052_v2  ;;  %v23203_v11 = vpack.c.bf16 %v3905_v33, %v3902_v38  ;;  %5467 = vmatprep.subr.bf16.mxu0 %v19099_v57  ;;  %v19061_v59 = vld [vmem:[%s27058_s3 + $0x480] ss:$16 sps:$4 sm:$0xff]  }
 0x4c3   :  { %6807 = vmatprep.subr.bf16.mxu1 %v19057_v63  ;;  %v28041_v58 = vld [vmem:[#allocation41_spill] sm:$0xff] }
 0x4c4   :  { %v23198_v20 = vpack.c.bf16 %v3904_v47, %v3901_v43  ;;  %5325 = vmatmul.mubr.bf16.gmra.mrb[76].mxu0 %v28040_v50  ;;  %5984 = vmatmul.mubr.bf16.gmra.mrb[12].mxu1 %v23203_v11  ;;  %v19064_v2 = vld [vmem:[%s27058_s3 + $0x4a0] ss:$16 sps:$4 sm:$0xff]   ;;  %v19069_v63 = vld [vmem:[%s27058_s3 + $0x4c4] ss:$16 sps:$4 sm:$0xff]  }
 0x4c5   :  { %5334 = vmatprep.mubr.bf16.mxu0 %v22868_v22  ;;  %5993 = vmatprep.mubr.bf16.mxu1 %v28018_v16  ;;  %v2376_v8 = vpop.f32.mrb[228].mxu0  ;;  %v28042_v38 = vld [vmem:[#allocation141_spill] sm:$0xff] }
 0x4c6   :  { %28039 = vst [vmem:[#allocation203_spill] sm:$0xff] %v23198_v20  ;;  %6808 = vmatpush1.bf16.msra.mxu1 %v19055_v21  ;;  %5468 = vmatpush1.bf16.msra.mxu0 %v19097_v7  ;;  %v2378_v51 = vpop.f32.mrb[229].mxu0  ;;  %v28043_v33 = vld [vmem:[#allocation145_spill] sm:$0xff] }
 0x4c7   :  { %6809 = vmatprep.subr.bf16.mxu1 %v19060_v17  ;;  %5469 = vmatprep.subr.bf16.mxu0 %v19102_v4  ;;  %v2380_v12 = vpop.f32.mrb[230].mxu0  ;;  %v28044_v21 = vmax.f32 %v28042_v38, %v28043_v33  ;;  %v19078_v38 = vld [vmem:[%s27058_s3 + $0x504] ss:$16 sps:$4 sm:$0xff]  }
 0x4c8   :  { %v2382_v37 = vpop.f32.mrb[231].mxu0 }
 0x4ca   :  { %6810 = vmatpush1.bf16.msra.mxu1 %v19058_v48  ;;  %5470 = vmatpush1.bf16.msra.mxu0 %v19100_v6  ;;  %v19067_v48 = vld [vmem:[%s27058_s3 + $0x4c0] ss:$16 sps:$4 sm:$0xff]  }
 0x4cb   :  { %6811 = vmatprep.subr.bf16.mxu1 %v19063_v55  ;;  %v28045_v55 = vmax.f32 %v22075_v32, %v22099_v18  ;;  %v28050_v32 = vmax.f32 %v22077_v23, %v22103_v61 }
 0x4cc   :  { %5335 = vmatmul.mubr.bf16.gmra.mrb[80].mxu0 %v28041_v58 }
 0x4cd   :  { %5344 = vmatprep.mubr.bf16.mxu0 %v22895_v24  ;;  %v2386_v10 = vpop.f32.mrb[232].mxu0 }
 0x4ce   :  { %6812 = vmatpush1.bf16.msra.mxu1 %v19061_v59  ;;  %v3970_v45 = vmax.f32 %v2366_v19, %v2386_v10  ;;  %v2388_v43 = vpop.f32.mrb[233].mxu0  ;;  %v19072_v19 = vld [vmem:[%s27058_s3 + $0x4e4] ss:$16 sps:$4 sm:$0xff]  }
 0x4cf   :  { %6813 = vmatprep.subr.bf16.mxu1 %v19066_v54  ;;  %v3971_v47 = vmax.f32 %v2368_v29, %v2388_v43  ;;  %v2390_v57 = vpop.f32.mrb[234].mxu0  ;;  %v28046_v54 = vld [vmem:[#allocation142_spill] sm:$0xff] }
 0x4d0   :  { %v3991_v17 = vmax.f32 %v28044_v21, %v3970_v45  ;;  %v3976_v7 = vmax.f32 %v2370_v1, %v2390_v57  ;;  %v2392_v4 = vpop.f32.mrb[235].mxu0  ;;  %v28047_v1 = vld [vmem:[#allocation146_spill] sm:$0xff]  ;;  %v28049_v45 = vld [vmem:[#allocation44_spill] sm:$0xff] }
 0x4d1   :  { %v3992_v6 = vmax.f32 %v28045_v55, %v3971_v47  ;;  %v3977_v59 = vmax.f32 %v2372_v56, %v2392_v4  ;;  %v28048_v10 = vmax.f32 %v28046_v54, %v28047_v1 }
 0x4d2   :  { %6814 = vmatpush1.bf16.msra.mxu1 %v19064_v2  ;;  %v4003_v29 = vadd.f32 %v3991_v17, %v22641_v34 }
 0x4d3   :  { %6815 = vmatprep.subr.bf16.mxu1 %v19069_v63  ;;  %v3994_v2 = vmax.f32 %v28048_v10, %v3976_v7  ;;  %v4004_v43 = vadd.f32 %v3992_v6, %v22649_v15  ;;  %v3995_v18 = vmax.f32 %v28050_v32, %v3977_v59  ;;  %v19070_v63 = vld [vmem:[%s27058_s3 + $0x4e0] ss:$16 sps:$4 sm:$0xff]  }
 0x4d4   :  { %5345 = vmatmul.mubr.bf16.gmra.mrb[84].mxu0 %v28049_v45  ;;  %v4015_v33 = vmax.f32 %v4003_v29, 0.0  ;;  %v28051_v6 = vld [vmem:[#allocation143_spill] sm:$0xff]  ;;  %v28054_v29 = vmax.f32 %v22088_v5, %v22122_v25 }
 0x4d5   :  { %5354 = vmatprep.mubr.bf16.mxu0 %v22936_v35  ;;  %v4006_v56 = vadd.f32 %v3994_v2, %v22641_v34  ;;  %v4007_v47 = vadd.f32 %v3995_v18, %v22649_v15  ;;  %v2396_v57 = vpop.f32.mrb[236].mxu0  ;;  %v4016_v17 = vmax.f32 %v4004_v43, 0.0  ;;  %v28052_v59 = vld [vmem:[#allocation147_spill] sm:$0xff]  ;;  %v28055_v43 = vld [vmem:[#allocation144_spill] sm:$0xff] }
 0x4d6   :  { %6816 = vmatpush1.bf16.msra.mxu1 %v19067_v48  ;;  %v3982_v61 = vmax.f32 %v2376_v8, %v2396_v57  ;;  %v2398_v21 = vpop.f32.mrb[237].mxu0  ;;  %v28053_v54 = vmax.f32 %v28051_v6, %v28052_v59  ;;  %v28056_v18 = vld [vmem:[#allocation148_spill] sm:$0xff]  ;;  %v28058_v57 = vld [vmem:[#allocation59_spill] sm:$0xff] }
 0x4d7   :  { %6817 = vmatprep.subr.bf16.mxu1 %v19072_v19  ;;  %v4018_v23 = vmax.f32 %v4006_v56, 0.0  ;;  %v4019_v7 = vmax.f32 %v4007_v47, 0.0  ;;  %v3983_v4 = vmax.f32 %v2378_v51, %v2398_v21  ;;  %v2400_v48 = vpop.f32.mrb[238].mxu0  ;;  %v28057_v56 = vmax.f32 %v28055_v43, %v28056_v18  ;;  %v28062_v18 = vld [vmem:[#allocation149_spill] sm:$0xff] }
 0x4d8   :  { %v3997_v1 = vmax.f32 %v28053_v54, %v3982_v61  ;;  %v3988_v10 = vmax.f32 %v2380_v12, %v2400_v48  ;;  %v2402_v19 = vpop.f32.mrb[239].mxu0  ;;  %v28060_v48 = vld [vmem:[#allocation71_spill] sm:$0xff] }
 0x4d9   :  { %v23271_v55 = vpack.c.bf16 %v4018_v23, %v4015_v33  ;;  %v23276_v2 = vpack.c.bf16 %v4019_v7, %v4016_v17  ;;  %v3998_v8 = vmax.f32 %v28054_v29, %v3983_v4  ;;  %v3989_v32 = vmax.f32 %v2382_v37, %v2402_v19  ;;  %v28061_v19 = vld [vmem:[#allocation75_spill] sm:$0xff] }
 0x4da   :  { %6818 = vmatpush1.bf16.msra.mxu1 %v19070_v63  ;;  %v4009_v51 = vadd.f32 %v3997_v1, %v22641_v34  ;;  %v4000_v47 = vmax.f32 %v28057_v56, %v3988_v10  ;;  %v28059_v63 = vmax.f32 %v22090_v13, %v22126_v30  ;;  %v19117_v10 = vld [vmem:[%s27058_s3 + $0xc] ss:$16 sps:$4 sm:$0xff]   ;;  %v28063_v56 = vld [vmem:[#allocation153_spill] sm:$0xff] }
 0x4db   :  { %6980 = vmatprep.subr.bf16.mxu1 %v19078_v38  ;;  %v4010_v12 = vadd.f32 %v3998_v8, %v22649_v15  ;;  %5994 = vmatmul.mubr.bf16.gmra.mrb[16].mxu1 %v23276_v2 }
 0x4dc   :  { %5355 = vmatmul.mubr.bf16.gmra.mrb[88].mxu0 %v28058_v57  ;;  %v4001_v33 = vmax.f32 %v28059_v63, %v3989_v32  ;;  %v4012_v5 = vadd.f32 %v4000_v47, %v22641_v34  ;;  %6003 = vmatprep.mubr.bf16.mxu1 %v28018_v16  ;;  %v4021_v38 = vmax.f32 %v4009_v51, 0.0  ;;  %v28064_v47 = vmax.f32 %v28062_v18, %v28063_v56 }
 0x4dd   :  { %5364 = vmatprep.mubr.bf16.mxu0 %v22963_v26  ;;  %v2406_v37 = vpop.f32.mrb[240].mxu0  ;;  %v4022_v21 = vmax.f32 %v4010_v12, 0.0  ;;  %5648 = vmatprep.subr.bf16.mxu0 %v19117_v10 }
 0x4de   :  { %v4013_v25 = vadd.f32 %v4001_v33, %v22649_v15  ;;  %v4024_v23 = vmax.f32 %v4012_v5, 0.0  ;;  %v2408_v61 = vpop.f32.mrb[241].mxu0  ;;  %v28065_v5 = vmax.f32 %v22147_v40, %v22171_v3 }
 0x4df   :  { %v2410_v7 = vpop.f32.mrb[242].mxu0 }
 0x4e0   :  { %v4025_v17 = vmax.f32 %v4013_v25, 0.0  ;;  %v23295_v4 = vpack.c.bf16 %v4024_v23, %v4021_v38  ;;  %v2412_v13 = vpop.f32.mrb[243].mxu0 }
 0x4e2   :  { %v23297_v30 = vpack.c.bf16 %v4025_v17, %v4022_v21  ;;  %v28066_v21 = vld [vmem:[#allocation150_spill] sm:$0xff] }
 0x4e3   :  { %v28067_v17 = vld [vmem:[#allocation154_spill] sm:$0xff] }
 0x4e4   :  { %5365 = vmatmul.mubr.bf16.gmra.mrb[92].mxu0 %v28060_v48  ;;  %6004 = vmatmul.mubr.bf16.gmra.mrb[20].mxu1 %v23297_v30  ;;  %v28068_v10 = vmax.f32 %v28066_v21, %v28067_v17 }
 0x4e5   :  { %5374 = vmatprep.mubr.bf16.mxu0 %v23007_v9  ;;  %6013 = vmatprep.mubr.bf16.mxu1 %v28018_v16  ;;  %v2416_v6 = vpop.f32.mrb[244].mxu0 }
 0x4e6   :  { %v2418_v59 = vpop.f32.mrb[245].mxu0 }
 0x4e7   :  { %v2420_v54 = vpop.f32.mrb[246].mxu0 }
 0x4e8   :  { %v2422_v1 = vpop.f32.mrb[247].mxu0 }
 0x4ec   :  { %5375 = vmatmul.mubr.bf16.gmra.mrb[96].mxu0 %v28061_v19 }
 0x4ed   :  { %5384 = vmatprep.mubr.bf16.mxu0 %v23048_v52 }
 0x4ef   :  { %v2426_v29 = vpop.f32.mrb[248].mxu0 }
 0x4f0   :  { %v4090_v8 = vmax.f32 %v2406_v37, %v2426_v29  ;;  %v2428_v32 = vpop.f32.mrb[249].mxu0  ;;  %v28069_v29 = vld [vmem:[#allocation65_spill] sm:$0xff] }
 0x4f1   :  { %v4091_v51 = vmax.f32 %v2408_v61, %v2428_v32  ;;  %v2430_v43 = vpop.f32.mrb[250].mxu0 }
 0x4f2   :  { %v4111_v12 = vmax.f32 %v28064_v47, %v4090_v8  ;;  %v4096_v63 = vmax.f32 %v2410_v7, %v2430_v43  ;;  %v2432_v33 = vpop.f32.mrb[251].mxu0  ;;  %v28070_v8 = vmax.f32 %v22149_v31, %v22175_v27  ;;  %v28073_v31 = vld [vmem:[#allocation155_spill] sm:$0xff] }
 0x4f3   :  { %v4112_v25 = vmax.f32 %v28065_v5, %v4091_v51  ;;  %v4097_v38 = vmax.f32 %v2412_v13, %v2432_v33  ;;  %v28072_v5 = vld [vmem:[#allocation151_spill] sm:$0xff] }
 0x4f4   :  { %v4123_v23 = vadd.f32 %v4111_v12, %v22641_v34  ;;  %v4114_v37 = vmax.f32 %v28068_v10, %v4096_v63  ;;  %5385 = vmatmul.mubr.bf16.gmra.mrb[100].mxu0 %v28069_v29  ;;  %v28074_v27 = vmax.f32 %v28072_v5, %v28073_v31 }
 0x4f5   :  { %v4124_v61 = vadd.f32 %v4112_v25, %v22649_v15  ;;  %v4115_v7 = vmax.f32 %v28070_v8, %v4097_v38  ;;  %5394 = vmatprep.mubr.bf16.mxu0 %v23148_v49 }
 0x4f6   :  { %v4126_v40 = vadd.f32 %v4114_v37, %v22641_v34  ;;  %v4135_v32 = vmax.f32 %v4123_v23, 0.0  ;;  %v28075_v23 = vmax.f32 %v22160_v28, %v22194_v46 }
 0x4f7   :  { %v4127_v3 = vadd.f32 %v4115_v7, %v22649_v15  ;;  %v2436_v13 = vpop.f32.mrb[252].mxu0  ;;  %v4136_v56 = vmax.f32 %v4124_v61, 0.0  ;;  %v28076_v61 = vld [vmem:[#allocation152_spill] sm:$0xff] }
 0x4f8   :  { %v4138_v51 = vmax.f32 %v4126_v40, 0.0  ;;  %v4102_v43 = vmax.f32 %v2416_v6, %v2436_v13  ;;  %v2438_v18 = vpop.f32.mrb[253].mxu0  ;;  %v28079_v40 = vld [vmem:[#allocation77_spill] sm:$0xff] }
 0x4f9   :  { %v4139_v47 = vmax.f32 %v4127_v3, 0.0  ;;  %v4103_v12 = vmax.f32 %v2418_v59, %v2438_v18  ;;  %v2440_v63 = vpop.f32.mrb[254].mxu0  ;;  %v28077_v59 = vld [vmem:[#allocation156_spill] sm:$0xff]  ;;  %v28080_v13 = vld [vmem:[#allocation81_spill] sm:$0xff] }
 0x4fa   :  { %v23326_v33 = vpack.c.bf16 %v4138_v51, %v4135_v32  ;;  %v4117_v25 = vmax.f32 %v28074_v27, %v4102_v43  ;;  %v4108_v38 = vmax.f32 %v2420_v54, %v2440_v63  ;;  %v2442_v21 = vpop.f32.mrb[255].mxu0  ;;  %v28078_v8 = vmax.f32 %v28076_v61, %v28077_v59  ;;  %v28081_v54 = vld [vmem:[#allocation85_spill] sm:$0xff]  ;;  %v28085_v61 = vld [vmem:[#allocation68_spill] sm:$0xff] }
 0x4fb   :  { %v23331_v17 = vpack.c.bf16 %v4139_v47, %v4136_v56  ;;  %v4118_v10 = vmax.f32 %v28075_v23, %v4103_v12  ;;  %v4109_v6 = vmax.f32 %v2422_v1, %v2442_v21  ;;  %v28082_v32 = vmax.f32 %v28080_v13, %v28081_v54  ;;  %v19091_v59 = vld [vmem:[%s27058_s3 + $0x520] ss:$16 sps:$4 sm:$0xff]  }
 0x4fc   :  { %28071 = vst [vmem:[#allocation18_spill] sm:$0xff] %v23326_v33  ;;  %v4129_v37 = vadd.f32 %v4117_v25, %v22641_v34  ;;  %v4120_v7 = vmax.f32 %v28078_v8, %v4108_v38  ;;  %5395 = vmatmul.mubr.bf16.gmra.mrb[104].mxu0 %v28079_v40  ;;  %v28084_v25 = vld [vmem:[#allocation79_spill] sm:$0xff] }
 0x4fd   :  { %v4130_v3 = vadd.f32 %v4118_v10, %v22649_v15  ;;  %v4121_v51 = vmax.f32 %v28082_v32, %v4109_v6  ;;  %5404 = vmatprep.mubr.bf16.mxu0 %v23198_v20  ;;  %6014 = vmatmul.mubr.bf16.gmra.mrb[24].mxu1 %v23331_v17  ;;  %v19076_v10 = vld [vmem:[%s27058_s3 + $0x500] ss:$16 sps:$4 sm:$0xff]  }
 0x4fe   :  { %v4132_v28 = vadd.f32 %v4120_v7, %v22641_v34  ;;  %6023 = vmatprep.mubr.bf16.mxu1 %v28018_v16  ;;  %v4141_v43 = vmax.f32 %v4129_v37, 0.0  ;;  %v19093_v37 = vld [vmem:[%s27058_s3 + $0x524] ss:$16 sps:$4 sm:$0xff]  }
 0x4ff   :  { %v4133_v46 = vadd.f32 %v4121_v51, %v22649_v15  ;;  %v2446_v1 = vpop.f32.mrb[0].mxu0  ;;  %v4142_v47 = vmax.f32 %v4130_v3, 0.0  ;;  %v19105_v7 = vld [vmem:[%s27058_s3 + $0x544] ss:$16 sps:$4 sm:$0xff]  }
 0x500   :  { %v4144_v18 = vmax.f32 %v4132_v28, 0.0  ;;  %v2448_v56 = vpop.f32.mrb[1].mxu0  ;;  %v28086_v51 = vld [vmem:[#allocation157_spill] sm:$0xff] }
 0x501   :  { %v4145_v12 = vmax.f32 %v4133_v46, 0.0  ;;  %v2450_v63 = vpop.f32.mrb[2].mxu0  ;;  %v28087_v28 = vld [vmem:[#allocation161_spill] sm:$0xff] }
 0x502   :  { %v23350_v5 = vpack.c.bf16 %v4144_v18, %v4141_v43  ;;  %v2452_v31 = vpop.f32.mrb[3].mxu0  ;;  %v28088_v46 = vmax.f32 %v28086_v51, %v28087_v28  ;;  %v28096_v51 = vld [vmem:[#allocation93_spill] sm:$0xff]  ;;  %v28097_v28 = vld [vmem:[#allocation98_spill] sm:$0xff] }
 0x503   :  { %v23352_v27 = vpack.c.bf16 %v4145_v12, %v4142_v47  ;;  %v19103_v12 = vld [vmem:[%s27058_s3 + $0x540] ss:$16 sps:$4 sm:$0xff]  }
 0x504   :  { %28083 = vst [vmem:[#allocation30_spill] sm:$0xff] %v23350_v5  ;;  %5405 = vmatmul.mubr.bf16.gmra.mrb[108].mxu0 %v28084_v25 }
 0x505   :  { %5414 = vmatprep.mubr.bf16.mxu0 %v23271_v55  ;;  %6024 = vmatmul.mubr.bf16.gmra.mrb[28].mxu1 %v23352_v27 }
 0x506   :  { %6819 = vmatprep.mubr.bf16.mxu1 %v22800_v39 }
 0x507   :  { %v2456_v38 = vpop.f32.mrb[4].mxu0 }
 0x508   :  { %v2458_v21 = vpop.f32.mrb[5].mxu0 }
 0x509   :  { %v2460_v23 = vpop.f32.mrb[6].mxu0 }
 0x50a   :  { %v23361_v6 = vpop.f32.mrb[7].mxu0 }
 0x50c   :  { %5415 = vmatmul.mubr.bf16.gmra.mrb[112].mxu0 %v28085_v61 }
 0x50d   :  { %5424 = vmatprep.mubr.bf16.mxu0 %v23295_v4  ;;  %6820 = vmatmul.mubr.bf16.vlgmr.msra.gmra.mrb[32].mxu1 %v28037_v14 }
 0x50e   :  { %6829 = vmatprep.mubr.bf16.mxu1 %v22824_v36  ;;  %6981 = vmatpush1.bf16.msra.mxu1 %v19076_v10  ;;  %v28089_v10 = vld [vmem:[#allocation91_spill] sm:$0xff] }
 0x50f   :  { %v2466_v8 = vpop.f32.mrb[8].mxu0  ;;  %6982 = vmatprep.subr.bf16.mxu1 %v19093_v37  ;;  %v28090_v37 = vld [vmem:[#allocation86_spill] sm:$0xff] }
 0x510   :  { %v4210_v3 = vmax.f32 %v2446_v1, %v2466_v8  ;;  %v2468_v13 = vpop.f32.mrb[9].mxu0  ;;  %v28091_v36 = vmax.f32 %v28089_v10, %v28090_v37  ;;  %v19108_v1 = vld [vmem:[%s27058_s3 + $0x564] ss:$16 sps:$4 sm:$0xff]   ;;  %v28092_v8 = vld [vmem:[#allocation158_spill] sm:$0xff] }
 0x511   :  { %v4211_v54 = vmax.f32 %v2448_v56, %v2468_v13  ;;  %v2470_v32 = vpop.f32.mrb[10].mxu0  ;;  %v28095_v13 = vld [vmem:[#allocation80_spill] sm:$0xff] }
 0x512   :  { %v4231_v43 = vmax.f32 %v28088_v46, %v4210_v3  ;;  %v4216_v18 = vmax.f32 %v2450_v63, %v2470_v32  ;;  %v2472_v47 = vpop.f32.mrb[11].mxu0  ;;  %6983 = vmatpush1.bf16.msra.mxu1 %v19091_v59  ;;  %v28093_v63 = vld [vmem:[#allocation162_spill] sm:$0xff]  ;;  %v28098_v46 = vmax.f32 %v28096_v51, %v28097_v28  ;;  %v28100_v51 = vld [vmem:[#allocation163_spill] sm:$0xff] }
 0x513   :  { %v4232_v14 = vmax.f32 %v28091_v36, %v4211_v54  ;;  %v4217_v39 = vmax.f32 %v2452_v31, %v2472_v47  ;;  %6984 = vmatprep.subr.bf16.mxu1 %v19105_v7  ;;  %v28094_v3 = vmax.f32 %v28092_v8, %v28093_v63  ;;  %v19106_v7 = vld [vmem:[%s27058_s3 + $0x560] ss:$16 sps:$4 sm:$0xff]  }
 0x514   :  { %v4243_v56 = vadd.f32 %v4231_v43, %v22641_v34  ;;  %5425 = vmatmul.mubr.bf16.gmra.mrb[116].mxu0 %v28095_v13 }
 0x515   :  { %v4234_v59 = vmax.f32 %v28094_v3, %v4216_v18  ;;  %v4244_v32 = vadd.f32 %v4232_v14, %v22649_v15  ;;  %v4235_v36 = vmax.f32 %v28098_v46, %v4217_v39  ;;  %5434 = vmatprep.mubr.bf16.mxu0 %v23326_v33  ;;  %6830 = vmatmul.mubr.bf16.gmra.mrb[36].mxu1 %v28040_v50  ;;  %v19111_v39 = vld [vmem:[%s27058_s3 + $0x584] ss:$16 sps:$4 sm:$0xff]  }
 0x516   :  { %6839 = vmatprep.mubr.bf16.mxu1 %v22868_v22  ;;  %6985 = vmatpush1.bf16.msra.mxu1 %v19103_v12  ;;  %v4255_v43 = vmax.f32 %v4243_v56, 0.0  ;;  %v19109_v56 = vld [vmem:[%s27058_s3 + $0x580] ss:$16 sps:$4 sm:$0xff]  }
 0x517   :  { %v4246_v31 = vadd.f32 %v4234_v59, %v22641_v34  ;;  %v4247_v54 = vadd.f32 %v4235_v36, %v22649_v15  ;;  %v2476_v14 = vpop.f32.mrb[12].mxu0  ;;  %6986 = vmatprep.subr.bf16.mxu1 %v19108_v1  ;;  %v4256_v37 = vmax.f32 %v4244_v32, 0.0  ;;  %v28099_v59 = vld [vmem:[#allocation159_spill] sm:$0xff] }
 0x518   :  { %v4222_v47 = vmax.f32 %v2456_v38, %v2476_v14  ;;  %v2478_v10 = vpop.f32.mrb[13].mxu0  ;;  %v28101_v28 = vmax.f32 %v28099_v59, %v28100_v51  ;;  %v28103_v38 = vld [vmem:[#allocation95_spill] sm:$0xff]  ;;  %v28111_v59 = vld [vmem:[#allocation89_spill] sm:$0xff] }
 0x519   :  { %v4258_v18 = vmax.f32 %v4246_v31, 0.0  ;;  %v4259_v8 = vmax.f32 %v4247_v54, 0.0  ;;  %v4223_v63 = vmax.f32 %v2458_v21, %v2478_v10  ;;  %v2480_v12 = vpop.f32.mrb[14].mxu0  ;;  %v28104_v32 = vld [vmem:[#allocation99_spill] sm:$0xff] }
 0x51a   :  { %v4237_v46 = vmax.f32 %v28101_v28, %v4222_v47  ;;  %v4228_v36 = vmax.f32 %v2460_v23, %v2480_v12  ;;  %v2482_v1 = vpop.f32.mrb[15].mxu0  ;;  %6987 = vmatpush1.bf16.msra.mxu1 %v19106_v7  ;;  %v28105_v54 = vmax.f32 %v28103_v38, %v28104_v32  ;;  %v28106_v7 = vld [vmem:[#allocation160_spill] sm:$0xff]  ;;  %v28109_v12 = vld [vmem:[#allocation87_spill] sm:$0xff] }
 0x51b   :  { %v23408_v3 = vpack.c.bf16 %v4258_v18, %v4255_v43  ;;  %v23416_v31 = vpack.c.bf16 %v4259_v8, %v4256_v37  ;;  %v4229_v14 = vmax.f32 %v23361_v6, %v2482_v1  ;;  %6988 = vmatprep.subr.bf16.mxu1 %v19111_v39  ;;  %v19114_v43 = vld [vmem:[%s27058_s3 + $0x5a4] ss:$16 sps:$4 sm:$0xff]   ;;  %v28107_v18 = vld [vmem:[#allocation164_spill] sm:$0xff]  ;;  %v19112_v39 = vld [vmem:[%s27058_s3 + $0x5a0] ss:$16 sps:$4 sm:$0xff]  }
 0x51c   :  { %v4238_v21 = vmax.f32 %v28105_v54, %v4223_v63  ;;  %v4249_v23 = vadd.f32 %v4237_v46, %v22641_v34  ;;  %v28108_v47 = vmax.f32 %v28106_v7, %v28107_v18  ;;  %5435 = vmatmul.mubr.bf16.gmra.mrb[120].mxu0 %v28109_v12  ;;  %v28110_v8 = vld [vmem:[#allocation97_spill] sm:$0xff] }
 0x51d   :  { %28102 = vst [vmem:[#allocation13_spill] sm:$0xff] %v23416_v31  ;;  %v28112_v63 = vmax.f32 %v28110_v8, %v28111_v59  ;;  %5444 = vmatprep.mubr.bf16.mxu0 %v23350_v5  ;;  %6840 = vmatmul.mubr.bf16.gmra.mrb[40].mxu1 %v28041_v58  ;;  %v19118_v18 = vld [vmem:[%s27058_s3 + $0x5c0] ss:$16 sps:$4 sm:$0xff]   ;;  %v19150_v8 = vld [vmem:[%s27058_s3 + $0x30c] ss:$16 sps:$4 sm:$0xff]  }
 0x51e   :  { %v4240_v10 = vmax.f32 %v28108_v47, %v4228_v36  ;;  %v4250_v37 = vadd.f32 %v4238_v21, %v22649_v15  ;;  %6849 = vmatprep.mubr.bf16.mxu1 %v22895_v24  ;;  %6989 = vmatpush1.bf16.msra.mxu1 %v19109_v56  ;;  %v19120_v36 = vld [vmem:[%s27058_s3 + $0x5c4] ss:$16 sps:$4 sm:$0xff]   ;;  %v4261_v1 = vmax.f32 %v4249_v23, 0.0 }
 0x51f   :  { %v4241_v51 = vmax.f32 %v28112_v63, %v4229_v14  ;;  %v2486_v46 = vpop.f32.mrb[16].mxu0  ;;  %6990 = vmatprep.subr.bf16.mxu1 %v19114_v43  ;;  %v19135_v43 = vld [vmem:[%s27058_s3 + $0x5e4] ss:$16 sps:$4 sm:$0xff]  }
 0x520   :  { %v4252_v6 = vadd.f32 %v4240_v10, %v22641_v34  ;;  %v2488_v32 = vpop.f32.mrb[17].mxu0  ;;  %v4262_v54 = vmax.f32 %v4250_v37, 0.0  ;;  %v28114_v23 = vld [vmem:[#allocation83_spill] sm:$0xff] }
 0x521   :  { %v4253_v28 = vadd.f32 %v4241_v51, %v22649_v15  ;;  %v2490_v14 = vpop.f32.mrb[18].mxu0  ;;  %v19133_v10 = vld [vmem:[%s27058_s3 + $0x5e0] ss:$16 sps:$4 sm:$0xff]  }
 0x522   :  { %v4264_v38 = vmax.f32 %v4252_v6, 0.0  ;;  %v2492_v56 = vpop.f32.mrb[19].mxu0  ;;  %6991 = vmatpush1.bf16.msra.mxu1 %v19112_v39  ;;  %v19115_v6 = vld [vmem:[%s27058_s3 + $0x8] ss:$16 sps:$4 sm:$0xff]   ;;  %v19123_v39 = vld [vmem:[%s27058_s3 + $0x2c] ss:$16 sps:$4 sm:$0xff]  }
 0x523   :  { %v4265_v21 = vmax.f32 %v4253_v28, 0.0  ;;  %6992 = vmatprep.subr.bf16.mxu1 %v19120_v36  ;;  %v28115_v28 = vld [vmem:[#allocation5_spill] sm:$0xff]  ;;  %v19121_v36 = vld [vmem:[%s27058_s3 + $0x28] ss:$16 sps:$4 sm:$0xff]  }
 0x524   :  { %v23445_v7 = vpack.c.bf16 %v4264_v38, %v4261_v1  ;;  %5445 = vmatmul.mubr.bf16.gmra.mrb[124].mxu0 %v28114_v23  ;;  %v19126_v38 = vld [vmem:[%s27058_s3 + $0x4c] ss:$16 sps:$4 sm:$0xff]  }
 0x525   :  { %v23450_v47 = vpack.c.bf16 %v4265_v21, %v4262_v54  ;;  %6850 = vmatmul.mubr.bf16.gmra.mrb[44].mxu1 %v28049_v45  ;;  %5487 = vmatprep.mubr.bf16.mxu0 %v28018_v16 }
 0x526   :  { %6859 = vmatprep.mubr.bf16.mxu1 %v22936_v35  ;;  %6993 = vmatpush1.bf16.msra.mxu1 %v19118_v18 }
 0x527   :  { %28113 = vst [vmem:[#allocation11_spill] sm:$0xff] %v23450_v47  ;;  %v2496_v37 = vpop.f32.mrb[20].mxu0  ;;  %6994 = vmatprep.subr.bf16.mxu1 %v19135_v43 }
 0x528   :  { %v2498_v59 = vpop.f32.mrb[21].mxu0 }
 0x529   :  { %v23465_v63 = vpop.f32.mrb[22].mxu0 }
 0x52a   :  { %v23467_v51 = vpop.f32.mrb[23].mxu0  ;;  %6995 = vmatpush1.bf16.msra.mxu1 %v19133_v10  ;;  %v28116_v10 = vld [vmem:[#allocation165_spill] sm:$0xff] }
 0x52b   :  { %7173 = vmatprep.subr.bf16.mxu1 %v19150_v8  ;;  %v28117_v8 = vld [vmem:[#allocation169_spill] sm:$0xff] }
 0x52c   :  { %5488 = vmatmul.mubr.bf16.vlgmr.msra.gmra.mrb[64].mxu0 %v28115_v28  ;;  %v28118_v28 = vmax.f32 %v28116_v10, %v28117_v8  ;;  %v28127_v10 = vld [vmem:[#allocation115_spill] sm:$0xff] }
 0x52d   :  { %6860 = vmatmul.mubr.bf16.gmra.mrb[48].mxu1 %v28058_v57  ;;  %5497 = vmatprep.mubr.bf16.mxu0 %v28018_v16  ;;  %v28120_v57 = vld [vmem:[#allocation111_spill] sm:$0xff] }
 0x52e   :  { %6869 = vmatprep.mubr.bf16.mxu1 %v22963_v26  ;;  %5649 = vmatpush1.bf16.msra.mxu0 %v19115_v6  ;;  %v19124_v26 = vld [vmem:[%s27058_s3 + $0x48] ss:$16 sps:$4 sm:$0xff]  }
 0x52f   :  { %v2506_v1 = vpop.f32.mrb[24].mxu0  ;;  %5650 = vmatprep.subr.bf16.mxu0 %v19123_v39  ;;  %v28119_v39 = vld [vmem:[#allocation103_spill] sm:$0xff] }
 0x530   :  { %v4330_v54 = vmax.f32 %v2486_v46, %v2506_v1  ;;  %v2508_v21 = vpop.f32.mrb[25].mxu0  ;;  %v28121_v35 = vmax.f32 %v28119_v39, %v28120_v57  ;;  %v19129_v46 = vld [vmem:[%s27058_s3 + $0x6c] ss:$16 sps:$4 sm:$0xff]  }
 0x531   :  { %v4331_v18 = vmax.f32 %v2488_v32, %v2508_v21  ;;  %v2510_v43 = vpop.f32.mrb[26].mxu0 }
 0x532   :  { %v4351_v47 = vmax.f32 %v28118_v28, %v4330_v54  ;;  %v4336_v31 = vmax.f32 %v2490_v14, %v2510_v43  ;;  %v2512_v6 = vpop.f32.mrb[27].mxu0  ;;  %5651 = vmatpush1.bf16.msra.mxu0 %v19121_v36  ;;  %v28122_v28 = vld [vmem:[#allocation166_spill] sm:$0xff]  ;;  %v28125_v54 = vld [vmem:[#allocation192_spill] sm:$0xff] }
 0x533   :  { %v4352_v45 = vmax.f32 %v28121_v35, %v4331_v18  ;;  %v4337_v24 = vmax.f32 %v2492_v56, %v2512_v6  ;;  %5652 = vmatprep.subr.bf16.mxu0 %v19126_v38  ;;  %v28123_v14 = vld [vmem:[#allocation170_spill] sm:$0xff]  ;;  %v28126_v43 = vld [vmem:[#allocation92_spill] sm:$0xff] }
 0x534   :  { %v4363_v32 = vadd.f32 %v4351_v47, %v22641_v34  ;;  %v28124_v1 = vmax.f32 %v28122_v28, %v28123_v14  ;;  %5498 = vmatmul.mubr.bf16.gmra.mrb[68].mxu0 %v28125_v54  ;;  %v28128_v57 = vmax.f32 %v28126_v43, %v28127_v10  ;;  %v28131_v43 = vld [vmem:[#allocation171_spill] sm:$0xff]  ;;  %v28152_v54 = vld [vmem:[#allocation125_spill] sm:$0xff] }
 0x535   :  { %v4364_v21 = vadd.f32 %v4352_v45, %v22649_v15  ;;  %6870 = vmatmul.mubr.bf16.gmra.mrb[52].mxu1 %v28060_v48  ;;  %5507 = vmatprep.mubr.bf16.mxu0 %v28018_v16 }
 0x536   :  { %v4354_v36 = vmax.f32 %v28124_v1, %v4336_v31  ;;  %v4355_v35 = vmax.f32 %v28128_v57, %v4337_v24  ;;  %6879 = vmatprep.mubr.bf16.mxu1 %v23007_v9  ;;  %5653 = vmatpush1.bf16.msra.mxu0 %v19124_v26  ;;  %v19127_v31 = vld [vmem:[%s27058_s3 + $0x68] ss:$16 sps:$4 sm:$0xff]   ;;  %v19132_v24 = vld [vmem:[%s27058_s3 + $0x8c] ss:$16 sps:$4 sm:$0xff]   ;;  %v4375_v38 = vmax.f32 %v4363_v32, 0.0 }
 0x537   :  { %v2516_v45 = vpop.f32.mrb[28].mxu0  ;;  %5654 = vmatprep.subr.bf16.mxu0 %v19129_v46  ;;  %v4376_v39 = vmax.f32 %v4364_v21, 0.0  ;;  %v19130_v32 = vld [vmem:[%s27058_s3 + $0x88] ss:$16 sps:$4 sm:$0xff]   ;;  %v28134_v21 = vld [vmem:[#allocation105_spill] sm:$0xff] }
 0x538   :  { %v4366_v56 = vadd.f32 %v4354_v36, %v22641_v34  ;;  %v4367_v47 = vadd.f32 %v4355_v35, %v22649_v15  ;;  %v4342_v8 = vmax.f32 %v2496_v37, %v2516_v45  ;;  %v2518_v6 = vpop.f32.mrb[29].mxu0  ;;  %v28130_v36 = vld [vmem:[#allocation167_spill] sm:$0xff] }
 0x539   :  { %v4343_v14 = vmax.f32 %v2498_v59, %v2518_v6  ;;  %v2520_v26 = vpop.f32.mrb[30].mxu0  ;;  %v28132_v10 = vmax.f32 %v28130_v36, %v28131_v43  ;;  %v28142_v36 = vld [vmem:[#allocation107_spill] sm:$0xff] }
 0x53a   :  { %v4378_v18 = vmax.f32 %v4366_v56, 0.0  ;;  %v4379_v28 = vmax.f32 %v4367_v47, 0.0  ;;  %v4348_v46 = vmax.f32 %v23465_v63, %v2520_v26  ;;  %v2522_v35 = vpop.f32.mrb[31].mxu0  ;;  %5655 = vmatpush1.bf16.msra.mxu0 %v19127_v31  ;;  %v28135_v56 = vld [vmem:[#allocation117_spill] sm:$0xff]  ;;  %v28137_v31 = vld [vmem:[#allocation168_spill] sm:$0xff]  ;;  %v28140_v26 = vld [vmem:[#allocation194_spill] sm:$0xff] }
 0x53b   :  { %v4357_v57 = vmax.f32 %v28132_v10, %v4342_v8  ;;  %v28136_v59 = vmax.f32 %v28134_v21, %v28135_v56  ;;  %v4349_v45 = vmax.f32 %v23467_v51, %v2522_v35  ;;  %5656 = vmatprep.subr.bf16.mxu0 %v19132_v24  ;;  %v19136_v24 = vld [vmem:[%s27058_s3 + $0xa8] ss:$16 sps:$4 sm:$0xff]  }
 0x53c   :  { %v23517_v1 = vpack.c.bf16 %v4378_v18, %v4375_v38  ;;  %v23526_v37 = vpack.c.bf16 %v4379_v28, %v4376_v39  ;;  %v19138_v38 = vld [vmem:[%s27058_s3 + $0xac] ss:$16 sps:$4 sm:$0xff]   ;;  %v28138_v18 = vld [vmem:[#allocation173_spill] sm:$0xff]  ;;  %5508 = vmatmul.mubr.bf16.gmra.mrb[72].mxu0 %v28140_v26 }
 0x53d   :  { %v4358_v47 = vmax.f32 %v28136_v59, %v4343_v14  ;;  %v4369_v63 = vadd.f32 %v4357_v57, %v22641_v34  ;;  %v28139_v8 = vmax.f32 %v28137_v31, %v28138_v18  ;;  %v28141_v28 = vld [vmem:[#allocation109_spill] sm:$0xff]  ;;  %6880 = vmatmul.mubr.bf16.gmra.mrb[56].mxu1 %v28061_v19  ;;  %5517 = vmatprep.mubr.bf16.mxu0 %v28018_v16  ;;  %v19139_v18 = vld [vmem:[%s27058_s3 + $0xc8] ss:$16 sps:$4 sm:$0xff]  }
 0x53e   :  { %28129 = vst [vmem:[#allocation22_spill] sm:$0xff] %v23517_v1  ;;  %28133 = vst [vmem:[#allocation34_spill] sm:$0xff] %v23526_v37  ;;  %v28143_v14 = vmax.f32 %v28141_v28, %v28142_v36  ;;  %6889 = vmatprep.mubr.bf16.mxu1 %v23048_v52  ;;  %5657 = vmatpush1.bf16.msra.mxu0 %v19130_v32  ;;  %v19147_v28 = vld [vmem:[%s27058_s3 + $0x10c] ss:$16 sps:$4 sm:$0xff]   ;;  %v19154_v1 = vld [vmem:[%s27058_s3 + $0x148] ss:$16 sps:$4 sm:$0xff]  }
 0x53f   :  { %v4360_v6 = vmax.f32 %v28139_v8, %v4348_v46  ;;  %v4370_v39 = vadd.f32 %v4358_v47, %v22649_v15  ;;  %v2526_v57 = vpop.f32.mrb[32].mxu0  ;;  %5658 = vmatprep.subr.bf16.mxu0 %v19138_v38  ;;  %v19141_v46 = vld [vmem:[%s27058_s3 + $0xcc] ss:$16 sps:$4 sm:$0xff]   ;;  %v4381_v35 = vmax.f32 %v4369_v63, 0.0 }
 0x540   :  { %v4361_v43 = vmax.f32 %v28143_v14, %v4349_v45  ;;  %v2528_v56 = vpop.f32.mrb[33].mxu0  ;;  %v19144_v38 = vld [vmem:[%s27058_s3 + $0xec] ss:$16 sps:$4 sm:$0xff]  }
 0x541   :  { %v4372_v51 = vadd.f32 %v4360_v6, %v22641_v34  ;;  %v4382_v59 = vmax.f32 %v4370_v39, 0.0  ;;  %v2530_v45 = vpop.f32.mrb[34].mxu0  ;;  %v28146_v63 = vld [vmem:[#allocation196_spill] sm:$0xff] }
 0x542   :  { %v4373_v10 = vadd.f32 %v4361_v43, %v22649_v15  ;;  %v2532_v32 = vpop.f32.mrb[35].mxu0  ;;  %5659 = vmatpush1.bf16.msra.mxu0 %v19136_v24  ;;  %v19142_v6 = vld [vmem:[%s27058_s3 + $0xe8] ss:$16 sps:$4 sm:$0xff]   ;;  %v19153_v24 = vld [vmem:[%s27058_s3 + $0x12c] ss:$16 sps:$4 sm:$0xff]  }
 0x543   :  { %v4384_v21 = vmax.f32 %v4372_v51, 0.0  ;;  %5660 = vmatprep.subr.bf16.mxu0 %v19141_v46  ;;  %v19145_v51 = vld [vmem:[%s27058_s3 + $0x108] ss:$16 sps:$4 sm:$0xff]  }
 0x544   :  { %v4385_v47 = vmax.f32 %v4373_v10, 0.0  ;;  %5518 = vmatmul.mubr.bf16.gmra.mrb[76].mxu0 %v28146_v63  ;;  %v28147_v10 = vld [vmem:[#allocation200_spill] sm:$0xff] }
 0x545   :  { %v23555_v31 = vpack.c.bf16 %v4384_v21, %v4381_v35  ;;  %6890 = vmatmul.mubr.bf16.gmra.mrb[60].mxu1 %v28069_v29  ;;  %5527 = vmatprep.mubr.bf16.mxu0 %v28018_v16  ;;  %v19151_v46 = vld [vmem:[%s27058_s3 + $0x128] ss:$16 sps:$4 sm:$0xff]   ;;  %v19156_v21 = vld [vmem:[%s27058_s3 + $0x14c] ss:$16 sps:$4 sm:$0xff]  }
 0x546   :  { %v23560_v8 = vpack.c.bf16 %v4385_v47, %v4382_v59  ;;  %6899 = vmatprep.mubr.bf16.mxu1 %v23148_v49  ;;  %5661 = vmatpush1.bf16.msra.mxu0 %v19139_v18 }
 0x547   :  { %28144 = vst [vmem:[#allocation15_spill] sm:$0xff] %v23555_v31  ;;  %v2536_v39 = vpop.f32.mrb[36].mxu0  ;;  %5662 = vmatprep.subr.bf16.mxu0 %v19144_v38 }
 0x548   :  { %28145 = vst [vmem:[#allocation23_spill] sm:$0xff] %v23560_v8  ;;  %v2538_v36 = vpop.f32.mrb[37].mxu0 }
 0x549   :  { %v23575_v14 = vpop.f32.mrb[38].mxu0 }
 0x54a   :  { %v23577_v43 = vpop.f32.mrb[39].mxu0  ;;  %5663 = vmatpush1.bf16.msra.mxu0 %v19142_v6  ;;  %v28148_v6 = vld [vmem:[#allocation175_spill] sm:$0xff] }
 0x54b   :  { %5664 = vmatprep.subr.bf16.mxu0 %v19147_v28  ;;  %v28149_v28 = vld [vmem:[#allocation183_spill] sm:$0xff] }
 0x54c   :  { %5528 = vmatmul.mubr.bf16.gmra.mrb[80].mxu0 %v28147_v10  ;;  %v28150_v8 = vmax.f32 %v28148_v6, %v28149_v28  ;;  %v28159_v6 = vld [vmem:[#allocation127_spill] sm:$0xff] }
 0x54d   :  { %6900 = vmatmul.mubr.bf16.gmra.mrb[64].mxu1 %v28079_v40  ;;  %5537 = vmatprep.mubr.bf16.mxu0 %v28018_v16 }
 0x54e   :  { %6909 = vmatprep.mubr.bf16.mxu1 %v23198_v20  ;;  %5665 = vmatpush1.bf16.msra.mxu0 %v19145_v51 }
 0x54f   :  { %v2546_v35 = vpop.f32.mrb[40].mxu0  ;;  %5666 = vmatprep.subr.bf16.mxu0 %v19153_v24  ;;  %v28151_v24 = vld [vmem:[#allocation121_spill] sm:$0xff] }
 0x550   :  { %v4450_v59 = vmax.f32 %v2526_v57, %v2546_v35  ;;  %v2548_v47 = vpop.f32.mrb[41].mxu0  ;;  %v28153_v20 = vmax.f32 %v28151_v24, %v28152_v54  ;;  %v19162_v57 = vld [vmem:[%s27058_s3 + $0x16c] ss:$16 sps:$4 sm:$0xff]  }
 0x551   :  { %v4451_v18 = vmax.f32 %v2528_v56, %v2548_v47  ;;  %v2550_v38 = vpop.f32.mrb[42].mxu0 }
 0x552   :  { %v4471_v37 = vmax.f32 %v28150_v8, %v4450_v59  ;;  %v4456_v31 = vmax.f32 %v2530_v45, %v2550_v38  ;;  %v2552_v51 = vpop.f32.mrb[43].mxu0  ;;  %5667 = vmatpush1.bf16.msra.mxu0 %v19151_v46  ;;  %v28154_v8 = vld [vmem:[#allocation177_spill] sm:$0xff]  ;;  %v28157_v59 = vld [vmem:[#allocation24_spill] sm:$0xff]  ;;  %v28158_v38 = vld [vmem:[#allocation110_spill] sm:$0xff] }
 0x553   :  { %v4472_v40 = vmax.f32 %v28153_v20, %v4451_v18  ;;  %v4457_v49 = vmax.f32 %v2532_v32, %v2552_v51  ;;  %5668 = vmatprep.subr.bf16.mxu0 %v19156_v21  ;;  %v28155_v45 = vld [vmem:[#allocation185_spill] sm:$0xff]  ;;  %v28160_v54 = vmax.f32 %v28158_v38, %v28159_v6  ;;  %v28163_v38 = vld [vmem:[#allocation187_spill] sm:$0xff] }
 0x554   :  { %v4483_v56 = vadd.f32 %v4471_v37, %v22641_v34  ;;  %v28156_v35 = vmax.f32 %v28154_v8, %v28155_v45  ;;  %5538 = vmatmul.mubr.bf16.gmra.mrb[84].mxu0 %v28157_v59  ;;  %v19160_v37 = vld [vmem:[%s27058_s3 + $0x168] ss:$16 sps:$4 sm:$0xff]  }
 0x555   :  { %v4484_v47 = vadd.f32 %v4472_v40, %v22649_v15  ;;  %v4475_v20 = vmax.f32 %v28160_v54, %v4457_v49  ;;  %6910 = vmatmul.mubr.bf16.gmra.mrb[68].mxu1 %v28084_v25  ;;  %5547 = vmatprep.mubr.bf16.mxu0 %v28018_v16  ;;  %v19165_v49 = vld [vmem:[%s27058_s3 + $0x18c] ss:$16 sps:$4 sm:$0xff]  }
 0x556   :  { %v4474_v46 = vmax.f32 %v28156_v35, %v4456_v31  ;;  %6919 = vmatprep.mubr.bf16.mxu1 %v23271_v55  ;;  %5669 = vmatpush1.bf16.msra.mxu0 %v19154_v1  ;;  %v4495_v21 = vmax.f32 %v4483_v56, 0.0  ;;  %v19163_v56 = vld [vmem:[%s27058_s3 + $0x188] ss:$16 sps:$4 sm:$0xff]  }
 0x557   :  { %v4487_v31 = vadd.f32 %v4475_v20, %v22649_v15  ;;  %v2556_v40 = vpop.f32.mrb[44].mxu0  ;;  %5670 = vmatprep.subr.bf16.mxu0 %v19162_v57  ;;  %v4496_v24 = vmax.f32 %v4484_v47, 0.0  ;;  %v28166_v47 = vld [vmem:[#allocation123_spill] sm:$0xff] }
 0x558   :  { %v4486_v32 = vadd.f32 %v4474_v46, %v22641_v34  ;;  %v4462_v28 = vmax.f32 %v2536_v39, %v2556_v40  ;;  %v2558_v51 = vpop.f32.mrb[45].mxu0  ;;  %v28162_v46 = vld [vmem:[#allocation179_spill] sm:$0xff] }
 0x559   :  { %v4499_v8 = vmax.f32 %v4487_v31, 0.0  ;;  %v4463_v45 = vmax.f32 %v2538_v36, %v2558_v51  ;;  %v2560_v1 = vpop.f32.mrb[46].mxu0  ;;  %v28164_v6 = vmax.f32 %v28162_v46, %v28163_v38  ;;  %v28174_v46 = vld [vmem:[#allocation128_spill] sm:$0xff] }
 0x55a   :  { %v4498_v18 = vmax.f32 %v4486_v32, 0.0  ;;  %v4468_v57 = vmax.f32 %v23575_v14, %v2560_v1  ;;  %v2562_v20 = vpop.f32.mrb[47].mxu0  ;;  %5671 = vmatpush1.bf16.msra.mxu0 %v19160_v37  ;;  %v28167_v32 = vld [vmem:[#allocation116_spill] sm:$0xff]  ;;  %v28169_v37 = vld [vmem:[#allocation181_spill] sm:$0xff] }
 0x55b   :  { %v4477_v54 = vmax.f32 %v28164_v6, %v4462_v28  ;;  %v23636_v39 = vpack.c.bf16 %v4499_v8, %v4496_v24  ;;  %v28168_v36 = vmax.f32 %v28166_v47, %v28167_v32  ;;  %v4469_v40 = vmax.f32 %v23577_v43, %v2562_v20  ;;  %5672 = vmatprep.subr.bf16.mxu0 %v19165_v49  ;;  %v28172_v1 = vld [vmem:[#allocation21_spill] sm:$0xff]  ;;  %v19169_v49 = vld [vmem:[%s27058_s3 + $0x1a8] ss:$16 sps:$4 sm:$0xff]  }
 0x55c   :  { %v23627_v35 = vpack.c.bf16 %v4498_v18, %v4495_v21  ;;  %v19171_v21 = vld [vmem:[%s27058_s3 + $0x1ac] ss:$16 sps:$4 sm:$0xff]   ;;  %v28170_v18 = vld [vmem:[#allocation189_spill] sm:$0xff]  ;;  %5548 = vmatmul.mubr.bf16.gmra.mrb[88].mxu0 %v28172_v1 }
 0x55d   :  { %28165 = vst [vmem:[#allocation48_spill] sm:$0xff] %v23636_v39  ;;  %v4478_v31 = vmax.f32 %v28168_v36, %v4463_v45  ;;  %v4489_v14 = vadd.f32 %v4477_v54, %v22641_v34  ;;  %v28171_v28 = vmax.f32 %v28169_v37, %v28170_v18  ;;  %v28173_v8 = vld [vmem:[#allocation113_spill] sm:$0xff]  ;;  %6920 = vmatmul.mubr.bf16.gmra.mrb[72].mxu1 %v28085_v61  ;;  %v19172_v18 = vld [vmem:[%s27058_s3 + $0x1c8] ss:$16 sps:$4 sm:$0xff]  }
 0x55e   :  { %28161 = vst [vmem:[#allocation36_spill] sm:$0xff] %v23627_v35  ;;  %v28175_v45 = vmax.f32 %v28173_v8, %v28174_v46  ;;  %5557 = vmatprep.mubr.bf16.mxu0 %v28018_v16  ;;  %6929 = vmatprep.mubr.bf16.mxu1 %v23295_v4 }
 0x55f   :  { %v4480_v51 = vmax.f32 %v28171_v28, %v4468_v57  ;;  %v4490_v24 = vadd.f32 %v4478_v31, %v22649_v15  ;;  %5673 = vmatpush1.bf16.msra.mxu0 %v19163_v56  ;;  %v2566_v54 = vpop.f32.mrb[48].mxu0  ;;  %v19174_v57 = vld [vmem:[%s27058_s3 + $0x1cc] ss:$16 sps:$4 sm:$0xff]   ;;  %v4501_v20 = vmax.f32 %v4489_v14, 0.0 }
 0x560   :  { %v4481_v38 = vmax.f32 %v28175_v45, %v4469_v40  ;;  %5674 = vmatprep.subr.bf16.mxu0 %v19171_v21  ;;  %v2568_v32 = vpop.f32.mrb[49].mxu0  ;;  %v19180_v21 = vld [vmem:[%s27058_s3 + $0x1ec] ss:$16 sps:$4 sm:$0xff]  }
 0x561   :  { %v4492_v43 = vadd.f32 %v4480_v51, %v22641_v34  ;;  %v4502_v36 = vmax.f32 %v4490_v24, 0.0  ;;  %v2570_v40 = vpop.f32.mrb[50].mxu0  ;;  %v28178_v14 = vld [vmem:[#allocation28_spill] sm:$0xff] }
 0x562   :  { %v4493_v6 = vadd.f32 %v4481_v38, %v22649_v15  ;;  %v2572_v56 = vpop.f32.mrb[51].mxu0  ;;  %v19178_v51 = vld [vmem:[%s27058_s3 + $0x1e8] ss:$16 sps:$4 sm:$0xff]   ;;  %v20186_v38 = vld [vmem:[%s27058_s3 + $0x20c] ss:$16 sps:$4 sm:$0xff]  }
 0x563   :  { %v4504_v47 = vmax.f32 %v4492_v43, 0.0  ;;  %5675 = vmatpush1.bf16.msra.mxu0 %v19169_v49 }
 0x564   :  { %v4505_v31 = vmax.f32 %v4493_v6, 0.0  ;;  %5676 = vmatprep.subr.bf16.mxu0 %v19174_v57  ;;  %5558 = vmatmul.mubr.bf16.gmra.mrb[92].mxu0 %v28178_v14 }
 0x565   :  { %v23665_v37 = vpack.c.bf16 %v4504_v47, %v4501_v20  ;;  %6930 = vmatmul.mubr.bf16.gmra.mrb[76].mxu1 %v28095_v13  ;;  %5567 = vmatprep.mubr.bf16.mxu0 %v28018_v16  ;;  %v28179_v47 = vld [vmem:[#allocation191_spill] sm:$0xff] }
 0x566   :  { %v23670_v28 = vpack.c.bf16 %v4505_v31, %v4502_v36  ;;  %6939 = vmatprep.mubr.bf16.mxu1 %v23326_v33  ;;  %v28180_v36 = vld [vmem:[#allocation6_spill] sm:$0xff]  ;;  %v28185_v33 = vld [vmem:[#allocation193_spill] sm:$0xff] }
 0x567   :  { %28176 = vst [vmem:[#allocation14_spill] sm:$0xff] %v23665_v37  ;;  %5677 = vmatpush1.bf16.msra.mxu0 %v19172_v18  ;;  %v2576_v24 = vpop.f32.mrb[52].mxu0  ;;  %v28181_v31 = vmax.f32 %v28179_v47, %v28180_v36 }
 0x568   :  { %28177 = vst [vmem:[#allocation31_spill] sm:$0xff] %v23670_v28  ;;  %5678 = vmatprep.subr.bf16.mxu0 %v19180_v21  ;;  %v2578_v8 = vpop.f32.mrb[53].mxu0  ;;  %v28183_v28 = vld [vmem:[#allocation176_spill] sm:$0xff] }
 0x569   :  { %v2580_v46 = vpop.f32.mrb[54].mxu0 }
 0x56a   :  { %v2582_v45 = vpop.f32.mrb[55].mxu0 }
 0x56b   :  { %5679 = vmatpush1.bf16.msra.mxu0 %v19178_v51 }
 0x56c   :  { %5841 = vmatprep.subr.bf16.mxu0 %v20186_v38  ;;  %5568 = vmatmul.mubr.bf16.gmra.mrb[96].mxu0 %v23015_v60  ;;  %v28182_v38 = vld [vmem:[#allocation132_spill] sm:$0xff] }
 0x56d   :  { %6940 = vmatmul.mubr.bf16.gmra.mrb[80].mxu1 %v28109_v12  ;;  %5577 = vmatprep.mubr.bf16.mxu0 %v28018_v16  ;;  %v28184_v39 = vmax.f32 %v28182_v38, %v28183_v28 }
 0x56e   :  { %6949 = vmatprep.mubr.bf16.mxu1 %v23350_v5  ;;  %v28186_v5 = vld [vmem:[#allocation199_spill] sm:$0xff] }
 0x56f   :  { %v2586_v43 = vpop.f32.mrb[56].mxu0  ;;  %v28187_v13 = vmax.f32 %v28185_v33, %v28186_v5 }
 0x570   :  { %v4570_v49 = vmax.f32 %v2566_v54, %v2586_v43  ;;  %v2588_v6 = vpop.f32.mrb[57].mxu0  ;;  %v28188_v43 = vld [vmem:[#allocation134_spill] sm:$0xff] }
 0x571   :  { %v4571_v57 = vmax.f32 %v2568_v32, %v2588_v6  ;;  %v2590_v20 = vpop.f32.mrb[58].mxu0  ;;  %v28189_v6 = vld [vmem:[#allocation184_spill] sm:$0xff] }
 0x572   :  { %v4591_v18 = vmax.f32 %v28181_v31, %v4570_v49  ;;  %v4576_v21 = vmax.f32 %v2570_v40, %v2590_v20  ;;  %v2592_v51 = vpop.f32.mrb[59].mxu0  ;;  %v28190_v49 = vmax.f32 %v28188_v43, %v28189_v6  ;;  %v28192_v31 = vld [vmem:[#allocation8_spill] sm:$0xff]  ;;  %v28194_v43 = vld [vmem:[#allocation174_spill] sm:$0xff] }
 0x573   :  { %v4592_v37 = vmax.f32 %v28184_v39, %v4571_v57  ;;  %v4577_v35 = vmax.f32 %v2572_v56, %v2592_v51  ;;  %v28195_v6 = vld [vmem:[#allocation178_spill] sm:$0xff] }
 0x574   :  { %v4603_v12 = vadd.f32 %v4591_v18, %v22641_v34  ;;  %v4594_v54 = vmax.f32 %v28187_v13, %v4576_v21  ;;  %5578 = vmatmul.mubr.bf16.gmra.mrb[100].mxu0 %v23053_v0 }
 0x575   :  { %v4604_v32 = vadd.f32 %v4592_v37, %v22649_v15  ;;  %v4595_v40 = vmax.f32 %v28190_v49, %v4577_v35  ;;  %6950 = vmatmul.mubr.bf16.gmra.mrb[84].mxu1 %v28114_v23  ;;  %5587 = vmatprep.mubr.bf16.mxu0 %v28018_v16  ;;  %v28191_v35 = vld [vmem:[#allocation195_spill] sm:$0xff]  ;;  %v28196_v49 = vmax.f32 %v28194_v43, %v28195_v6  ;;  %v19168_v43 = vld [vmem:[%s27058_s3 + $0x34c] ss:$16 sps:$4 sm:$0xff]   ;;  %v19166_v6 = vld [vmem:[%s27058_s3 + $0x348] ss:$16 sps:$4 sm:$0xff]  }
 0x576   :  { %v4606_v39 = vadd.f32 %v4594_v54, %v22641_v34  ;;  %6959 = vmatprep.mubr.bf16.mxu1 %v23408_v3  ;;  %v4615_v5 = vmax.f32 %v4603_v12, 0.0  ;;  %v28193_v18 = vmax.f32 %v28191_v35, %v28192_v31 }
 0x577   :  { %v4607_v56 = vadd.f32 %v4595_v40, %v22649_v15  ;;  %v2596_v33 = vpop.f32.mrb[60].mxu0  ;;  %v4616_v37 = vmax.f32 %v4604_v32, 0.0  ;;  %v28197_v32 = vld [vmem:[#allocation197_spill] sm:$0xff] }
 0x578   :  { %v4618_v13 = vmax.f32 %v4606_v39, 0.0  ;;  %v4582_v28 = vmax.f32 %v2576_v24, %v2596_v33  ;;  %v2598_v57 = vpop.f32.mrb[61].mxu0 }
 0x579   :  { %v4619_v20 = vmax.f32 %v4607_v56, 0.0  ;;  %v4583_v47 = vmax.f32 %v2578_v8, %v2598_v57  ;;  %v2600_v36 = vpop.f32.mrb[62].mxu0  ;;  %v28198_v8 = vld [vmem:[#allocation201_spill] sm:$0xff] }
 0x57a   :  { %v4597_v21 = vmax.f32 %v28193_v18, %v4582_v28  ;;  %v4588_v51 = vmax.f32 %v2580_v46, %v2600_v36  ;;  %v2602_v38 = vpop.f32.mrb[63].mxu0  ;;  %v23712_v54 = vpack.c.bf16 %v4618_v13, %v4615_v5  ;;  %v28199_v56 = vmax.f32 %v28197_v32, %v28198_v8  ;;  %v28200_v28 = vld [vmem:[#allocation182_spill] sm:$0xff]  ;;  %v28203_v36 = vld [vmem:[#allocation101_spill] sm:$0xff] }
 0x57b   :  { %v4598_v40 = vmax.f32 %v28196_v49, %v4583_v47  ;;  %v4589_v12 = vmax.f32 %v2582_v45, %v2602_v38  ;;  %v23717_v39 = vpack.c.bf16 %v4619_v20, %v4616_v37  ;;  %v28201_v5 = vld [vmem:[#allocation186_spill] sm:$0xff] }
 0x57c   :  { %v4609_v24 = vadd.f32 %v4597_v21, %v22641_v34  ;;  %v4600_v33 = vmax.f32 %v28199_v56, %v4588_v51  ;;  %5588 = vmatmul.mubr.bf16.gmra.mrb[104].mxu0 %v23157_v42  ;;  %v28202_v13 = vmax.f32 %v28200_v28, %v28201_v5  ;;  %v28204_v51 = vld [vmem:[#allocation104_spill] sm:$0xff] }
 0x57d   :  { %v4610_v46 = vadd.f32 %v4598_v40, %v22649_v15  ;;  %6960 = vmatmul.mubr.bf16.gmra.mrb[88].mxu1 %v28203_v36  ;;  %5597 = vmatprep.mubr.bf16.mxu0 %v28018_v16  ;;  %v19157_v38 = vld [vmem:[%s27058_s3 + $0x328] ss:$16 sps:$4 sm:$0xff]   ;;  %v19177_v49 = vld [vmem:[%s27058_s3 + $0x36c] ss:$16 sps:$4 sm:$0xff]  }
 0x57e   :  { %v4601_v57 = vmax.f32 %v28202_v13, %v4589_v12  ;;  %v4612_v45 = vadd.f32 %v4600_v33, %v22641_v34  ;;  %6969 = vmatprep.mubr.bf16.mxu1 %v23445_v7  ;;  %v4621_v20 = vmax.f32 %v4609_v24, 0.0  ;;  %v19159_v34 = vld [vmem:[%s27058_s3 + $0x32c] ss:$16 sps:$4 sm:$0xff]   ;;  %v19175_v40 = vld [vmem:[%s27058_s3 + $0x368] ss:$16 sps:$4 sm:$0xff]  }
 0x57f   :  { %v4622_v35 = vmax.f32 %v4610_v46, 0.0  ;;  %v19183_v12 = vld [vmem:[%s27058_s3 + $0x38c] ss:$16 sps:$4 sm:$0xff]   ;;  %v19181_v24 = vld [vmem:[%s27058_s3 + $0x388] ss:$16 sps:$4 sm:$0xff]  }
 0x580   :  { %v4613_v37 = vadd.f32 %v4601_v57, %v22649_v15  ;;  %v4624_v47 = vmax.f32 %v4612_v45, 0.0  ;;  %v19148_v15 = vld [vmem:[%s27058_s3 + $0x308] ss:$16 sps:$4 sm:$0xff]   ;;  %v19186_v32 = vld [vmem:[%s27058_s3 + $0x3ac] ss:$16 sps:$4 sm:$0xff]  }
 0x581   :  { %v19184_v8 = vld [vmem:[%s27058_s3 + $0x3a8] ss:$16 sps:$4 sm:$0xff]   ;;  %v19189_v56 = vld [vmem:[%s27058_s3 + $0x3cc] ss:$16 sps:$4 sm:$0xff]  }
 0x582   :  { %v4625_v31 = vmax.f32 %v4613_v37, 0.0  ;;  %v23733_v18 = vpack.c.bf16 %v4624_v47, %v4621_v20  ;;  %v19187_v33 = vld [vmem:[%s27058_s3 + $0x3c8] ss:$16 sps:$4 sm:$0xff]   ;;  %v19192_v46 = vld [vmem:[%s27058_s3 + $0x3ec] ss:$16 sps:$4 sm:$0xff]  }
 0x583   :  { %v19190_v28 = vld [vmem:[%s27058_s3 + $0x3e8] ss:$16 sps:$4 sm:$0xff]   ;;  %v19195_v5 = vld [vmem:[%s27058_s3 + $0x40c] ss:$16 sps:$4 sm:$0xff]  }
 0x584   :  { %v23735_v21 = vpack.c.bf16 %v4625_v31, %v4622_v35  ;;  %5598 = vmatmul.mubr.bf16.gmra.mrb[108].mxu0 %v23203_v11  ;;  %v19193_v13 = vld [vmem:[%s27058_s3 + $0x408] ss:$16 sps:$4 sm:$0xff]   ;;  %v19201_v45 = vld [vmem:[%s27058_s3 + $0x44c] ss:$16 sps:$4 sm:$0xff]  }
 0x585   :  { %6970 = vmatmul.mubr.bf16.gmra.mrb[92].mxu1 %v28204_v51  ;;  %5607 = vmatprep.mubr.bf16.mxu0 %v28018_v16  ;;  %v19196_v57 = vld [vmem:[%s27058_s3 + $0x428] ss:$16 sps:$4 sm:$0xff]   ;;  %v19204_v20 = vld [vmem:[%s27058_s3 + $0x46c] ss:$16 sps:$4 sm:$0xff]  }
 0x586   :  { %7012 = vmatprep.mubr.bf16.mxu1 %v28018_v16  ;;  %v19199_v37 = vld [vmem:[%s27058_s3 + $0x448] ss:$16 sps:$4 sm:$0xff]   ;;  %v20190_v35 = vld [vmem:[%s27058_s3 + $0x24c] ss:$16 sps:$4 sm:$0xff]  }
 0x587   :  { %v20189_v47 = vld [vmem:[%s27058_s3 + $0x228] ss:$16 sps:$4 sm:$0xff]  }
 0x588   :  { %v28205_v31 = vld [vmem:[#allocation198_spill] sm:$0xff] }
 0x58c   :  { %5608 = vmatmul.mubr.bf16.gmra.mrb[112].mxu0 %v23276_v2 }
 0x58d   :  { %7013 = vmatmul.mubr.bf16.vlgmr.msra.gmra.mrb[32].mxu1 %v28140_v26  ;;  %5617 = vmatprep.mubr.bf16.mxu0 %v28018_v16 }
 0x58e   :  { %7174 = vmatpush1.bf16.msra.mxu1 %v19148_v15  ;;  %7022 = vmatprep.mubr.bf16.mxu1 %v28018_v16  ;;  %v19202_v15 = vld [vmem:[%s27058_s3 + $0x468] ss:$16 sps:$4 sm:$0xff]  }
 0x58f   :  { %7175 = vmatprep.subr.bf16.mxu1 %v19159_v34  ;;  %v20191_v34 = vld [vmem:[%s27058_s3 + $0x248] ss:$16 sps:$4 sm:$0xff]  }
 0x592   :  { %7176 = vmatpush1.bf16.msra.mxu1 %v19157_v38  ;;  %v20192_v38 = vld [vmem:[%s27058_s3 + $0x26c] ss:$16 sps:$4 sm:$0xff]  }
 0x593   :  { %7177 = vmatprep.subr.bf16.mxu1 %v19168_v43  ;;  %v19205_v43 = vld [vmem:[%s27058_s3 + $0x488] ss:$16 sps:$4 sm:$0xff]  }
 0x594   :  { %5618 = vmatmul.mubr.bf16.gmra.mrb[116].mxu0 %v23297_v30 }
 0x595   :  { %7023 = vmatmul.mubr.bf16.gmra.mrb[36].mxu1 %v28146_v63  ;;  %5627 = vmatprep.mubr.bf16.mxu0 %v28018_v16 }
 0x596   :  { %7032 = vmatprep.mubr.bf16.mxu1 %v28018_v16  ;;  %7178 = vmatpush1.bf16.msra.mxu1 %v19166_v6  ;;  %v19210_v6 = vld [vmem:[%s27058_s3 + $0x4ac] ss:$16 sps:$4 sm:$0xff]  }
 0x597   :  { %7179 = vmatprep.subr.bf16.mxu1 %v19177_v49  ;;  %v20193_v49 = vld [vmem:[%s27058_s3 + $0x268] ss:$16 sps:$4 sm:$0xff]  }
 0x59a   :  { %7180 = vmatpush1.bf16.msra.mxu1 %v19175_v40  ;;  %v28206_v40 = vld [vmem:[#allocation37_spill] sm:$0xff] }
 0x59b   :  { %7181 = vmatprep.subr.bf16.mxu1 %v19183_v12  ;;  %v20194_v12 = vld [vmem:[%s27058_s3 + $0x28c] ss:$16 sps:$4 sm:$0xff]  }
 0x59c   :  { %5628 = vmatmul.mubr.bf16.gmra.mrb[120].mxu0 %v23331_v17 }
 0x59d   :  { %7033 = vmatmul.mubr.bf16.gmra.mrb[40].mxu1 %v28147_v10  ;;  %5637 = vmatprep.mubr.bf16.mxu0 %v28018_v16 }
 0x59e   :  { %7042 = vmatprep.mubr.bf16.mxu1 %v28018_v16  ;;  %7182 = vmatpush1.bf16.msra.mxu1 %v19181_v24  ;;  %v28207_v24 = vld [vmem:[#allocation7_spill] sm:$0xff] }
 0x59f   :  { %7183 = vmatprep.subr.bf16.mxu1 %v19186_v32  ;;  %v19208_v32 = vld [vmem:[%s27058_s3 + $0x4a8] ss:$16 sps:$4 sm:$0xff]  }
 0x5a2   :  { %7184 = vmatpush1.bf16.msra.mxu1 %v19184_v8  ;;  %v19213_v8 = vld [vmem:[%s27058_s3 + $0x4cc] ss:$16 sps:$4 sm:$0xff]  }
 0x5a3   :  { %7185 = vmatprep.subr.bf16.mxu1 %v19189_v56  ;;  %v20195_v56 = vld [vmem:[%s27058_s3 + $0x288] ss:$16 sps:$4 sm:$0xff]  }
 0x5a4   :  { %5638 = vmatmul.mubr.bf16.gmra.mrb[124].mxu0 %v23352_v27 }
 0x5a5   :  { %5680 = vmatprep.mubr.bf16.mxu0 %v22709_v41  ;;  %7043 = vmatmul.mubr.bf16.gmra.mrb[44].mxu1 %v28157_v59  ;;  %v19198_v41 = vld [vmem:[%s27058_s3 + $0x42c] ss:$16 sps:$4 sm:$0xff]  }
 0x5a6   :  { %7052 = vmatprep.mubr.bf16.mxu1 %v28018_v16  ;;  %7186 = vmatpush1.bf16.msra.mxu1 %v19187_v33  ;;  %v20196_v33 = vld [vmem:[%s27058_s3 + $0x2ac] ss:$16 sps:$4 sm:$0xff]  }
 0x5a7   :  { %7187 = vmatprep.subr.bf16.mxu1 %v19192_v46  ;;  %v19211_v46 = vld [vmem:[%s27058_s3 + $0x4c8] ss:$16 sps:$4 sm:$0xff]  }
 0x5aa   :  { %7188 = vmatpush1.bf16.msra.mxu1 %v19190_v28  ;;  %v19216_v28 = vld [vmem:[%s27058_s3 + $0x4ec] ss:$16 sps:$4 sm:$0xff]  }
 0x5ab   :  { %7189 = vmatprep.subr.bf16.mxu1 %v19195_v5  ;;  %v20197_v5 = vld [vmem:[%s27058_s3 + $0x2a8] ss:$16 sps:$4 sm:$0xff]  }
 0x5ac   :  { %5681 = vmatmul.mubr.bf16.vlgmr.msra.gmra.mrb[128].mxu0 %v28019_v62  ;;  %v20187_v62 = vld [vmem:[%s27058_s3 + $0x208] ss:$16 sps:$4 sm:$0xff]  }
 0x5ad   :  { %5690 = vmatprep.mubr.bf16.mxu0 %v22747_v53  ;;  %7053 = vmatmul.mubr.bf16.gmra.mrb[48].mxu1 %v28172_v1  ;;  %v20188_v53 = vld [vmem:[%s27058_s3 + $0x22c] ss:$16 sps:$4 sm:$0xff]  }
 0x5ae   :  { %7062 = vmatprep.mubr.bf16.mxu1 %v28018_v16  ;;  %7190 = vmatpush1.bf16.msra.mxu1 %v19193_v13  ;;  %v20198_v13 = vld [vmem:[%s27058_s3 + $0x2cc] ss:$16 sps:$4 sm:$0xff]  }
 0x5af   :  { %7191 = vmatprep.subr.bf16.mxu1 %v19198_v41  ;;  %5842 = vmatpush1.bf16.msra.mxu0 %v20187_v62  ;;  %v19214_v41 = vld [vmem:[%s27058_s3 + $0x4e8] ss:$16 sps:$4 sm:$0xff]   ;;  %v20200_v62 = vld [vmem:[%s27058_s3 + $0x2ec] ss:$16 sps:$4 sm:$0xff]  }
 0x5b0   :  { %5843 = vmatprep.subr.bf16.mxu0 %v20188_v53  ;;  %v20201_v53 = vld [vmem:[%s27058_s3 + $0x2e8] ss:$16 sps:$4 sm:$0xff]  }
 0x5b2   :  { %7192 = vmatpush1.bf16.msra.mxu1 %v19196_v57  ;;  %v19219_v57 = vld [vmem:[%s27058_s3 + $0x50c] ss:$16 sps:$4 sm:$0xff]  }
 0x5b3   :  { %7193 = vmatprep.subr.bf16.mxu1 %v19201_v45  ;;  %5844 = vmatpush1.bf16.msra.mxu0 %v20189_v47  ;;  %v20199_v45 = vld [vmem:[%s27058_s3 + $0x2c8] ss:$16 sps:$4 sm:$0xff]   ;;  %v28210_v47 = vld [vmem:[#allocation9_spill] sm:$0xff] }
 0x5b4   :  { %5691 = vmatmul.mubr.bf16.gmra.mrb[132].mxu0 %v28027_v44  ;;  %5845 = vmatprep.subr.bf16.mxu0 %v20190_v35  ;;  %v19207_v44 = vld [vmem:[%s27058_s3 + $0x48c] ss:$16 sps:$4 sm:$0xff]   ;;  %v28211_v35 = vld [vmem:[#allocation59_spill] sm:$0xff] }
 0x5b5   :  { %5700 = vmatprep.mubr.bf16.mxu0 %v28205_v31  ;;  %7063 = vmatmul.mubr.bf16.gmra.mrb[52].mxu1 %v28178_v14 }
 0x5b6   :  { %7072 = vmatprep.mubr.bf16.mxu1 %v28018_v16  ;;  %7194 = vmatpush1.bf16.msra.mxu1 %v19199_v37  ;;  %v28208_v37 = vld [vmem:[#allocation12_spill] sm:$0xff] }
 0x5b7   :  { %7195 = vmatprep.subr.bf16.mxu1 %v19204_v20  ;;  %5846 = vmatpush1.bf16.msra.mxu0 %v20191_v34  ;;  %v28209_v20 = vld [vmem:[#allocation44_spill] sm:$0xff]  ;;  %v28214_v34 = vld [vmem:[#allocation77_spill] sm:$0xff] }
 0x5b8   :  { %5847 = vmatprep.subr.bf16.mxu0 %v20192_v38  ;;  %v28215_v38 = vld [vmem:[#allocation203_spill] sm:$0xff] }
 0x5ba   :  { %7196 = vmatpush1.bf16.msra.mxu1 %v19202_v15  ;;  %v28212_v15 = vld [vmem:[#allocation16_spill] sm:$0xff] }
 0x5bb   :  { %7197 = vmatprep.subr.bf16.mxu1 %v19207_v44  ;;  %5848 = vmatpush1.bf16.msra.mxu0 %v20193_v49  ;;  %v28213_v44 = vld [vmem:[#allocation10_spill] sm:$0xff] }
 0x5bc   :  { %5701 = vmatmul.mubr.bf16.gmra.mrb[136].mxu0 %v28206_v40  ;;  %5849 = vmatprep.subr.bf16.mxu0 %v20194_v12 }
 0x5bd   :  { %5710 = vmatprep.mubr.bf16.mxu0 %v28207_v24  ;;  %7073 = vmatmul.mubr.bf16.gmra.mrb[56].mxu1 %v23015_v60 }
 0x5be   :  { %7082 = vmatprep.mubr.bf16.mxu1 %v28018_v16  ;;  %7198 = vmatpush1.bf16.msra.mxu1 %v19205_v43  ;;  %v28216_v43 = vld [vmem:[#allocation13_spill] sm:$0xff] }
 0x5bf   :  { %7199 = vmatprep.subr.bf16.mxu1 %v19210_v6  ;;  %5850 = vmatpush1.bf16.msra.mxu0 %v20195_v56 }
 0x5c0   :  { %5851 = vmatprep.subr.bf16.mxu0 %v20196_v33 }
 0x5c2   :  { %7200 = vmatpush1.bf16.msra.mxu1 %v19208_v32 }
 0x5c3   :  { %7201 = vmatprep.subr.bf16.mxu1 %v19213_v8  ;;  %5852 = vmatpush1.bf16.msra.mxu0 %v20197_v5  ;;  %v28217_v8 = vld [vmem:[#allocation11_spill] sm:$0xff]  ;;  %v19217_v5 = vld [vmem:[%s27058_s3 + $0x508] ss:$16 sps:$4 sm:$0xff]  }
 0x5c4   :  { %5711 = vmatmul.mubr.bf16.gmra.mrb[140].mxu0 %v28040_v50  ;;  %5853 = vmatprep.subr.bf16.mxu0 %v20198_v13  ;;  %v19222_v13 = vld [vmem:[%s27058_s3 + $0x52c] ss:$16 sps:$4 sm:$0xff]  }
 0x5c5   :  { %5720 = vmatprep.mubr.bf16.mxu0 %v22868_v22  ;;  %7083 = vmatmul.mubr.bf16.gmra.mrb[60].mxu1 %v23053_v0 }
 0x5c6   :  { %7092 = vmatprep.mubr.bf16.mxu1 %v28018_v16  ;;  %7202 = vmatpush1.bf16.msra.mxu1 %v19211_v46 }
 0x5c7   :  { %7203 = vmatprep.subr.bf16.mxu1 %v19216_v28  ;;  %5854 = vmatpush1.bf16.msra.mxu0 %v20199_v45 }
 0x5c8   :  { %5855 = vmatprep.subr.bf16.mxu0 %v20200_v62 }
 0x5ca   :  { %7204 = vmatpush1.bf16.msra.mxu1 %v19214_v41 }
 0x5cb   :  { %7366 = vmatprep.subr.bf16.mxu1 %v19219_v57  ;;  %5856 = vmatpush1.bf16.msra.mxu0 %v20201_v53  ;;  %v19225_v57 = vld [vmem:[%s27058_s3 + $0x54c] ss:$16 sps:$4 sm:$0xff]  }
 0x5cc   :  { %5721 = vmatmul.mubr.bf16.gmra.mrb[144].mxu0 %v28041_v58 }
 0x5cd   :  { %5730 = vmatprep.mubr.bf16.mxu0 %v28208_v37  ;;  %7093 = vmatmul.mubr.bf16.gmra.mrb[64].mxu1 %v23157_v42 }
 0x5ce   :  { %7102 = vmatprep.mubr.bf16.mxu1 %v28018_v16 }
 0x5d4   :  { %5731 = vmatmul.mubr.bf16.gmra.mrb[148].mxu0 %v28209_v20 }
 0x5d5   :  { %5740 = vmatprep.mubr.bf16.mxu0 %v28210_v47  ;;  %7103 = vmatmul.mubr.bf16.gmra.mrb[68].mxu1 %v23203_v11 }
 0x5d6   :  { %7112 = vmatprep.mubr.bf16.mxu1 %v28018_v16 }
 0x5dc   :  { %5741 = vmatmul.mubr.bf16.gmra.mrb[152].mxu0 %v28211_v35 }
 0x5dd   :  { %5750 = vmatprep.mubr.bf16.mxu0 %v28212_v15  ;;  %7113 = vmatmul.mubr.bf16.gmra.mrb[72].mxu1 %v23276_v2 }
 0x5de   :  { %7122 = vmatprep.mubr.bf16.mxu1 %v28018_v16 }
 0x5e4   :  { %5751 = vmatmul.mubr.bf16.gmra.mrb[156].mxu0 %v28060_v48 }
 0x5e5   :  { %5760 = vmatprep.mubr.bf16.mxu0 %v23007_v9  ;;  %7123 = vmatmul.mubr.bf16.gmra.mrb[76].mxu1 %v23297_v30 }
 0x5e6   :  { %7132 = vmatprep.mubr.bf16.mxu1 %v28018_v16 }
 0x5ec   :  { %5761 = vmatmul.mubr.bf16.gmra.mrb[160].mxu0 %v28061_v19 }
 0x5ed   :  { %5770 = vmatprep.mubr.bf16.mxu0 %v23048_v52  ;;  %7133 = vmatmul.mubr.bf16.gmra.mrb[80].mxu1 %v23331_v17 }
 0x5ee   :  { %7142 = vmatprep.mubr.bf16.mxu1 %v28018_v16 }
 0x5f4   :  { %5771 = vmatmul.mubr.bf16.gmra.mrb[164].mxu0 %v28069_v29 }
 0x5f5   :  { %5780 = vmatprep.mubr.bf16.mxu0 %v28213_v44  ;;  %7143 = vmatmul.mubr.bf16.gmra.mrb[84].mxu1 %v23352_v27 }
 0x5f6   :  { %7152 = vmatprep.mubr.bf16.mxu1 %v28018_v16 }
 0x5fc   :  { %5781 = vmatmul.mubr.bf16.gmra.mrb[168].mxu0 %v28214_v34 }
 0x5fd   :  { %5790 = vmatprep.mubr.bf16.mxu0 %v28215_v38  ;;  %7153 = vmatmul.mubr.bf16.gmra.mrb[88].mxu1 %v28216_v43 }
 0x5fe   :  { %7162 = vmatprep.mubr.bf16.mxu1 %v28018_v16 }
 0x5ff   :  { %v23942_v6 = vpop.f32.mrb[64].mxu0 }
 0x600   :  { %v23944_v49 = vpop.f32.mrb[65].mxu0 }
 0x601   :  { %v23946_v12 = vpop.f32.mrb[66].mxu0 }
 0x602   :  { %v23948_v32 = vpop.f32.mrb[67].mxu0 }
 0x604   :  { %5791 = vmatmul.mubr.bf16.gmra.mrb[172].mxu0 %v28084_v25 }
 0x605   :  { %5800 = vmatprep.mubr.bf16.mxu0 %v23271_v55  ;;  %7163 = vmatmul.mubr.bf16.gmra.mrb[92].mxu1 %v28217_v8 }
 0x606   :  { %7205 = vmatprep.mubr.bf16.mxu1 %v28205_v31  ;;  %v19220_v31 = vld [vmem:[%s27058_s3 + $0x528] ss:$16 sps:$4 sm:$0xff]  }
 0x607   :  { %v23954_v56 = vpop.f32.mrb[68].mxu0 }
 0x608   :  { %v23956_v33 = vpop.f32.mrb[69].mxu0 }
 0x609   :  { %v23958_v46 = vpop.f32.mrb[70].mxu0 }
 0x60a   :  { %28218 = vst [vmem:[#allocation40_spill] sm:$0xff] %v23958_v46  ;;  %v23960_v28 = vpop.f32.mrb[71].mxu0 }
 0x60b   :  { %28219 = vst [vmem:[#allocation52_spill] sm:$0xff] %v23960_v28 }
 0x60c   :  { %5801 = vmatmul.mubr.bf16.gmra.mrb[176].mxu0 %v28085_v61 }
 0x60d   :  { %5810 = vmatprep.mubr.bf16.mxu0 %v23295_v4  ;;  %7206 = vmatmul.mubr.bf16.vlgmr.msra.gmra.mrb[96].mxu1 %v28206_v40  ;;  %v19223_v40 = vld [vmem:[%s27058_s3 + $0x548] ss:$16 sps:$4 sm:$0xff]  }
 0x60e   :  { %7215 = vmatprep.mubr.bf16.mxu1 %v28207_v24  ;;  %7367 = vmatpush1.bf16.msra.mxu1 %v19217_v5  ;;  %v19228_v24 = vld [vmem:[%s27058_s3 + $0x56c] ss:$16 sps:$4 sm:$0xff]  }
 0x60f   :  { %v23975_v41 = vpop.f32.mrb[72].mxu0  ;;  %7368 = vmatprep.subr.bf16.mxu1 %v19222_v13  ;;  %v28224_v5 = vld [vmem:[#allocation80_spill] sm:$0xff]  ;;  %v28225_v13 = vld [vmem:[#allocation18_spill] sm:$0xff] }
 0x610   :  { %28220 = vst [vmem:[#allocation26_spill] sm:$0xff] %v23975_v41  ;;  %v23980_v45 = vpop.f32.mrb[73].mxu0 }
 0x611   :  { %28221 = vst [vmem:[#allocation20_spill] sm:$0xff] %v23980_v45  ;;  %v23982_v62 = vpop.f32.mrb[74].mxu0 }
 0x612   :  { %28222 = vst [vmem:[#allocation42_spill] sm:$0xff] %v23982_v62  ;;  %v23984_v53 = vpop.f32.mrb[75].mxu0  ;;  %7369 = vmatpush1.bf16.msra.mxu1 %v19220_v31  ;;  %v19226_v31 = vld [vmem:[%s27058_s3 + $0x568] ss:$16 sps:$4 sm:$0xff]  }
 0x613   :  { %28223 = vst [vmem:[#allocation54_spill] sm:$0xff] %v23984_v53  ;;  %7370 = vmatprep.subr.bf16.mxu1 %v19225_v57  ;;  %v19231_v57 = vld [vmem:[%s27058_s3 + $0x58c] ss:$16 sps:$4 sm:$0xff]  }
 0x614   :  { %5811 = vmatmul.mubr.bf16.gmra.mrb[180].mxu0 %v28224_v5 }
 0x615   :  { %5820 = vmatprep.mubr.bf16.mxu0 %v28225_v13  ;;  %7216 = vmatmul.mubr.bf16.gmra.mrb[100].mxu1 %v28040_v50  ;;  %v19229_v50 = vld [vmem:[%s27058_s3 + $0x588] ss:$16 sps:$4 sm:$0xff]  }
 0x616   :  { %7225 = vmatprep.mubr.bf16.mxu1 %v22868_v22  ;;  %7371 = vmatpush1.bf16.msra.mxu1 %v19223_v40  ;;  %v19234_v40 = vld [vmem:[%s27058_s3 + $0x5ac] ss:$16 sps:$4 sm:$0xff]  }
 0x617   :  { %v23999_v53 = vpop.f32.mrb[76].mxu0  ;;  %7372 = vmatprep.subr.bf16.mxu1 %v19228_v24  ;;  %v28230_v24 = vld [vmem:[#allocation87_spill] sm:$0xff] }
 0x618   :  { %28226 = vst [vmem:[#allocation17_spill] sm:$0xff] %v23999_v53  ;;  %v24004_v62 = vpop.f32.mrb[77].mxu0  ;;  %v28231_v53 = vld [vmem:[#allocation30_spill] sm:$0xff] }
 0x619   :  { %28227 = vst [vmem:[#allocation32_spill] sm:$0xff] %v24004_v62  ;;  %v24006_v45 = vpop.f32.mrb[78].mxu0 }
 0x61a   :  { %28228 = vst [vmem:[#allocation46_spill] sm:$0xff] %v24006_v45  ;;  %v24008_v41 = vpop.f32.mrb[79].mxu0  ;;  %7373 = vmatpush1.bf16.msra.mxu1 %v19226_v31  ;;  %v19232_v31 = vld [vmem:[%s27058_s3 + $0x5a8] ss:$16 sps:$4 sm:$0xff]  }
 0x61b   :  { %28229 = vst [vmem:[#allocation58_spill] sm:$0xff] %v24008_v41  ;;  %7374 = vmatprep.subr.bf16.mxu1 %v19231_v57  ;;  %v19237_v57 = vld [vmem:[%s27058_s3 + $0x5cc] ss:$16 sps:$4 sm:$0xff]  }
 0x61c   :  { %5821 = vmatmul.mubr.bf16.gmra.mrb[184].mxu0 %v28230_v24 }
 0x61d   :  { %5830 = vmatprep.mubr.bf16.mxu0 %v28231_v53  ;;  %7226 = vmatmul.mubr.bf16.gmra.mrb[104].mxu1 %v28041_v58 }
 0x61e   :  { %7235 = vmatprep.mubr.bf16.mxu1 %v28208_v37  ;;  %7375 = vmatpush1.bf16.msra.mxu1 %v19229_v50  ;;  %v19235_v50 = vld [vmem:[%s27058_s3 + $0x5c8] ss:$16 sps:$4 sm:$0xff]  }
 0x61f   :  { %v24023_v41 = vpop.f32.mrb[80].mxu0  ;;  %7376 = vmatprep.subr.bf16.mxu1 %v19234_v40  ;;  %v19240_v40 = vld [vmem:[%s27058_s3 + $0x5ec] ss:$16 sps:$4 sm:$0xff]  }
 0x620   :  { %28232 = vst [vmem:[#allocation29_spill] sm:$0xff] %v24023_v41  ;;  %v24028_v45 = vpop.f32.mrb[81].mxu0 }
 0x621   :  { %28233 = vst [vmem:[#allocation33_spill] sm:$0xff] %v24028_v45  ;;  %v24030_v62 = vpop.f32.mrb[82].mxu0 }
 0x622   :  { %28234 = vst [vmem:[#allocation60_spill] sm:$0xff] %v24030_v62  ;;  %v24032_v28 = vpop.f32.mrb[83].mxu0  ;;  %7377 = vmatpush1.bf16.msra.mxu1 %v19232_v31  ;;  %v19238_v31 = vld [vmem:[%s27058_s3 + $0x5e8] ss:$16 sps:$4 sm:$0xff]  }
 0x623   :  { %28235 = vst [vmem:[#allocation72_spill] sm:$0xff] %v24032_v28  ;;  %7378 = vmatprep.subr.bf16.mxu1 %v19237_v57  ;;  %v19243_v57 = vld [vmem:[%s27058_s3 + $0x604] ss:$16 sps:$4 sm:$0xff]  }
 0x624   :  { %5831 = vmatmul.mubr.bf16.gmra.mrb[188].mxu0 %v28114_v23 }
 0x625   :  { %7236 = vmatmul.mubr.bf16.gmra.mrb[108].mxu1 %v28209_v20  ;;  %5873 = vmatprep.mubr.bf16.mxu0 %v28018_v16 }
 0x626   :  { %7245 = vmatprep.mubr.bf16.mxu1 %v28210_v47  ;;  %7379 = vmatpush1.bf16.msra.mxu1 %v19235_v50  ;;  %v28239_v50 = vld [vmem:[#allocation5_spill] sm:$0xff] }
 0x627   :  { %v24047_v28 = vpop.f32.mrb[84].mxu0  ;;  %7380 = vmatprep.subr.bf16.mxu1 %v19240_v40 }
 0x628   :  { %28236 = vst [vmem:[#allocation39_spill] sm:$0xff] %v24047_v28  ;;  %v24052_v62 = vpop.f32.mrb[85].mxu0 }
 0x629   :  { %28237 = vst [vmem:[#allocation49_spill] sm:$0xff] %v24052_v62  ;;  %v24054_v45 = vpop.f32.mrb[86].mxu0 }
 0x62a   :  { %28238 = vst [vmem:[#allocation64_spill] sm:$0xff] %v24054_v45  ;;  %v24056_v41 = vpop.f32.mrb[87].mxu0  ;;  %7381 = vmatpush1.bf16.msra.mxu1 %v19238_v31  ;;  %v28244_v45 = vld [vmem:[#allocation192_spill] sm:$0xff] }
 0x62b   :  { %8568 = vmatprep.subr.bf16.mxu1 %v19243_v57 }
 0x62c   :  { %5874 = vmatmul.mubr.bf16.vlgmr.msra.gmra.mrb[128].mxu0 %v28239_v50 }
 0x62d   :  { %7246 = vmatmul.mubr.bf16.gmra.mrb[112].mxu1 %v28211_v35  ;;  %5883 = vmatprep.mubr.bf16.mxu0 %v28018_v16 }
 0x62e   :  { %7255 = vmatprep.mubr.bf16.mxu1 %v28212_v15 }
 0x62f   :  { %v24062_v40 = vpop.f32.mrb[88].mxu0 }
 0x630   :  { %28240 = vst [vmem:[#allocation76_spill] sm:$0xff] %v24062_v40  ;;  %v24064_v28 = vpop.f32.mrb[89].mxu0 }
 0x631   :  { %28241 = vst [vmem:[#allocation43_spill] sm:$0xff] %v24064_v28  ;;  %v24066_v46 = vpop.f32.mrb[90].mxu0 }
 0x632   :  { %28242 = vst [vmem:[#allocation38_spill] sm:$0xff] %v24066_v46  ;;  %v24068_v62 = vpop.f32.mrb[91].mxu0 }
 0x633   :  { %28243 = vst [vmem:[#allocation66_spill] sm:$0xff] %v24068_v62 }
 0x634   :  { %5884 = vmatmul.mubr.bf16.gmra.mrb[132].mxu0 %v28244_v45 }
 0x635   :  { %7256 = vmatmul.mubr.bf16.gmra.mrb[116].mxu1 %v28060_v48  ;;  %5893 = vmatprep.mubr.bf16.mxu0 %v28018_v16 }
 0x636   :  { %7265 = vmatprep.mubr.bf16.mxu1 %v23007_v9 }
 0x637   :  { %v24074_v31 = vpop.f32.mrb[92].mxu0 }
 0x638   :  { %28245 = vst [vmem:[#allocation78_spill] sm:$0xff] %v24074_v31  ;;  %v24076_v57 = vpop.f32.mrb[93].mxu0 }
 0x639   :  { %28246 = vst [vmem:[#allocation35_spill] sm:$0xff] %v24076_v57  ;;  %v24078_v50 = vpop.f32.mrb[94].mxu0 }
 0x63a   :  { %28247 = vst [vmem:[#allocation50_spill] sm:$0xff] %v24078_v50  ;;  %v24080_v40 = vpop.f32.mrb[95].mxu0 }
 0x63b   :  { %28248 = vst [vmem:[#allocation70_spill] sm:$0xff] %v24080_v40 }
 0x63c   :  { %5894 = vmatmul.mubr.bf16.gmra.mrb[136].mxu0 %v28140_v26 }
 0x63d   :  { %7266 = vmatmul.mubr.bf16.gmra.mrb[120].mxu1 %v28061_v19  ;;  %5903 = vmatprep.mubr.bf16.mxu0 %v28018_v16 }
 0x63e   :  { %7275 = vmatprep.mubr.bf16.mxu1 %v23048_v52 }
 0x63f   :  { %v24086_v45 = vpop.f32.mrb[96].mxu0 }
 0x640   :  { %28249 = vst [vmem:[#allocation82_spill] sm:$0xff] %v24086_v45  ;;  %v24088_v62 = vpop.f32.mrb[97].mxu0 }
 0x641   :  { %28250 = vst [vmem:[#allocation47_spill] sm:$0xff] %v24088_v62  ;;  %v24090_v46 = vpop.f32.mrb[98].mxu0 }
 0x642   :  { %28251 = vst [vmem:[#allocation51_spill] sm:$0xff] %v24090_v46  ;;  %v24092_v31 = vpop.f32.mrb[99].mxu0 }
 0x643   :  { %28252 = vst [vmem:[#allocation84_spill] sm:$0xff] %v24092_v31 }
 0x644   :  { %5904 = vmatmul.mubr.bf16.gmra.mrb[140].mxu0 %v28146_v63 }
 0x645   :  { %7276 = vmatmul.mubr.bf16.gmra.mrb[124].mxu1 %v28069_v29  ;;  %5913 = vmatprep.mubr.bf16.mxu0 %v28018_v16 }
 0x646   :  { %7285 = vmatprep.mubr.bf16.mxu1 %v28213_v44 }
 0x647   :  { %v24098_v40 = vpop.f32.mrb[100].mxu0 }
 0x648   :  { %28253 = vst [vmem:[#allocation96_spill] sm:$0xff] %v24098_v40  ;;  %v24100_v50 = vpop.f32.mrb[101].mxu0 }
 0x649   :  { %28254 = vst [vmem:[#allocation53_spill] sm:$0xff] %v24100_v50  ;;  %v24102_v57 = vpop.f32.mrb[102].mxu0 }
 0x64a   :  { %28255 = vst [vmem:[#allocation61_spill] sm:$0xff] %v24102_v57  ;;  %v24104_v45 = vpop.f32.mrb[103].mxu0 }
 0x64b   :  { %28256 = vst [vmem:[#allocation88_spill] sm:$0xff] %v24104_v45 }
 0x64c   :  { %5914 = vmatmul.mubr.bf16.gmra.mrb[144].mxu0 %v28147_v10 }
 0x64d   :  { %7286 = vmatmul.mubr.bf16.gmra.mrb[0].mxu1 %v28214_v34  ;;  %5923 = vmatprep.mubr.bf16.mxu0 %v28018_v16 }
 0x64e   :  { %7295 = vmatprep.mubr.bf16.mxu1 %v28215_v38 }
 0x64f   :  { %v24110_v31 = vpop.f32.mrb[104].mxu0 }
 0x650   :  { %28257 = vst [vmem:[#allocation100_spill] sm:$0xff] %v24110_v31  ;;  %v24112_v46 = vpop.f32.mrb[105].mxu0 }
 0x651   :  { %28258 = vst [vmem:[#allocation55_spill] sm:$0xff] %v24112_v46  ;;  %v24114_v62 = vpop.f32.mrb[106].mxu0 }
 0x652   :  { %28259 = vst [vmem:[#allocation63_spill] sm:$0xff] %v24114_v62  ;;  %v24116_v40 = vpop.f32.mrb[107].mxu0 }
 0x653   :  { %28260 = vst [vmem:[#allocation90_spill] sm:$0xff] %v24116_v40 }
 0x654   :  { %5924 = vmatmul.mubr.bf16.gmra.mrb[148].mxu0 %v28157_v59 }
 0x655   :  { %7296 = vmatmul.mubr.bf16.gmra.mrb[4].mxu1 %v28084_v25  ;;  %5933 = vmatprep.mubr.bf16.mxu0 %v28018_v16 }
 0x656   :  { %7305 = vmatprep.mubr.bf16.mxu1 %v23271_v55 }
 0x657   :  { %v24122_v45 = vpop.f32.mrb[108].mxu0 }
 0x658   :  { %28261 = vst [vmem:[#allocation102_spill] sm:$0xff] %v24122_v45  ;;  %v24124_v57 = vpop.f32.mrb[109].mxu0 }
 0x659   :  { %28262 = vst [vmem:[#allocation56_spill] sm:$0xff] %v24124_v57  ;;  %v24126_v50 = vpop.f32.mrb[110].mxu0 }
 0x65a   :  { %28263 = vst [vmem:[#allocation67_spill] sm:$0xff] %v24126_v50  ;;  %v24128_v31 = vpop.f32.mrb[111].mxu0 }
 0x65b   :  { %28264 = vst [vmem:[#allocation94_spill] sm:$0xff] %v24128_v31 }
 0x65c   :  { %5934 = vmatmul.mubr.bf16.gmra.mrb[152].mxu0 %v28172_v1 }
 0x65d   :  { %7306 = vmatmul.mubr.bf16.gmra.mrb[8].mxu1 %v28085_v61  ;;  %5943 = vmatprep.mubr.bf16.mxu0 %v28018_v16 }
 0x65e   :  { %7315 = vmatprep.mubr.bf16.mxu1 %v23295_v4 }
 0x65f   :  { %v24134_v40 = vpop.f32.mrb[112].mxu0 }
 0x660   :  { %28265 = vst [vmem:[#allocation106_spill] sm:$0xff] %v24134_v40  ;;  %v24136_v62 = vpop.f32.mrb[113].mxu0 }
 0x661   :  { %28266 = vst [vmem:[#allocation57_spill] sm:$0xff] %v24136_v62  ;;  %v24138_v46 = vpop.f32.mrb[114].mxu0 }
 0x662   :  { %28267 = vst [vmem:[#allocation69_spill] sm:$0xff] %v24138_v46  ;;  %v24140_v45 = vpop.f32.mrb[115].mxu0 }
 0x663   :  { %28268 = vst [vmem:[#allocation108_spill] sm:$0xff] %v24140_v45 }
 0x664   :  { %5944 = vmatmul.mubr.bf16.gmra.mrb[156].mxu0 %v28178_v14 }
 0x665   :  { %7316 = vmatmul.mubr.bf16.gmra.mrb[12].mxu1 %v28224_v5 }
 0x666   :  { %7325 = vmatprep.mubr.bf16.mxu1 %v28225_v13 }
 0x667   :  { %v24145_v31 = vpop.f32.mrb[116].mxu0 }
 0x668   :  { %28269 = vst [vmem:[#allocation120_spill] sm:$0xff] %v24145_v31  ;;  %v24147_v50 = vpop.f32.mrb[117].mxu0 }
 0x669   :  { %28270 = vst [vmem:[#allocation73_spill] sm:$0xff] %v24147_v50  ;;  %v24149_v57 = vpop.f32.mrb[118].mxu0 }
 0x66a   :  { %28271 = vst [vmem:[#allocation112_spill] sm:$0xff] %v24149_v57  ;;  %v24151_v28 = vpop.f32.mrb[119].mxu0 }
 0x66b   :  { %28272 = vst [vmem:[#allocation124_spill] sm:$0xff] %v24151_v28 }
 0x66d   :  { %7326 = vmatmul.mubr.bf16.gmra.mrb[16].mxu1 %v28230_v24 }
 0x66e   :  { %7335 = vmatprep.mubr.bf16.mxu1 %v28231_v53 }
 0x66f   :  { %v24155_v46 = vpop.f32.mrb[120].mxu0 }
 0x670   :  { %28273 = vst [vmem:[#allocation62_spill] sm:$0xff] %v24155_v46  ;;  %v24157_v45 = vpop.f32.mrb[121].mxu0  ;;  %v19330_v46 = vld [vmem:[%s27058_s3 + $0x6ac] ss:$16 sps:$4 sm:$0xff]  }
 0x671   :  { %28274 = vst [vmem:[#allocation114_spill] sm:$0xff] %v24157_v45  ;;  %v24159_v62 = vpop.f32.mrb[122].mxu0 }
 0x672   :  { %28275 = vst [vmem:[#allocation126_spill] sm:$0xff] %v24159_v62  ;;  %v24161_v40 = vpop.f32.mrb[123].mxu0 }
 0x673   :  { %28276 = vst [vmem:[#allocation74_spill] sm:$0xff] %v24161_v40  ;;  %v19241_v40 = vld [vmem:[%s27058_s3 + $0x600] ss:$16 sps:$4 sm:$0xff]  }
 0x675   :  { %7336 = vmatmul.mubr.bf16.gmra.mrb[20].mxu1 %v28114_v23 }
 0x676   :  { %7345 = vmatprep.mubr.bf16.mxu1 %v23408_v3 }
 0x677   :  { %v24165_v50 = vpop.f32.mrb[124].mxu0 }
 0x678   :  { %28277 = vst [vmem:[#allocation118_spill] sm:$0xff] %v24165_v50  ;;  %v24167_v57 = vpop.f32.mrb[125].mxu0  ;;  %v19247_v50 = vld [vmem:[%s27058_s3 + $0x640] ss:$16 sps:$4 sm:$0xff]  }
 0x679   :  { %28278 = vst [vmem:[#allocation130_spill] sm:$0xff] %v24167_v57  ;;  %v24169_v28 = vpop.f32.mrb[126].mxu0  ;;  %v19246_v57 = vld [vmem:[%s27058_s3 + $0x624] ss:$16 sps:$4 sm:$0xff]  }
 0x67a   :  { %28279 = vst [vmem:[#allocation25_spill] sm:$0xff] %v24169_v28  ;;  %v24171_v31 = vpop.f32.mrb[127].mxu0  ;;  %v19249_v28 = vld [vmem:[%s27058_s3 + $0x644] ss:$16 sps:$4 sm:$0xff]  }
 0x67b   :  { %28280 = vst [vmem:[#allocation131_spill] sm:$0xff] %v24171_v31  ;;  %v19244_v31 = vld [vmem:[%s27058_s3 + $0x620] ss:$16 sps:$4 sm:$0xff]  }
 0x67d   :  { %7346 = vmatmul.mubr.bf16.gmra.mrb[24].mxu1 %v28203_v36 }
 0x67e   :  { %7355 = vmatprep.mubr.bf16.mxu1 %v23445_v7 }
 0x685   :  { %7356 = vmatmul.mubr.bf16.gmra.mrb[28].mxu1 %v28204_v51 }
 0x686   :  { %7398 = vmatprep.mubr.bf16.mxu1 %v28018_v16 }
 0x68d   :  { %7399 = vmatmul.mubr.bf16.vlgmr.msra.gmra.mrb[96].mxu1 %v28140_v26  ;;  %v19252_v26 = vld [vmem:[%s27058_s3 + $0x664] ss:$16 sps:$4 sm:$0xff]  }
 0x68e   :  { %8569 = vmatpush1.bf16.msra.mxu1 %v19241_v40  ;;  %7408 = vmatprep.mubr.bf16.mxu1 %v28018_v16  ;;  %v19250_v40 = vld [vmem:[%s27058_s3 + $0x660] ss:$16 sps:$4 sm:$0xff]  }
 0x68f   :  { %8570 = vmatprep.subr.bf16.mxu1 %v19246_v57  ;;  %v19256_v57 = vld [vmem:[%s27058_s3 + $0x6a0] ss:$16 sps:$4 sm:$0xff]  }
 0x692   :  { %8571 = vmatpush1.bf16.msra.mxu1 %v19244_v31  ;;  %v19255_v31 = vld [vmem:[%s27058_s3 + $0x684] ss:$16 sps:$4 sm:$0xff]  }
 0x693   :  { %8572 = vmatprep.subr.bf16.mxu1 %v19249_v28  ;;  %v19253_v28 = vld [vmem:[%s27058_s3 + $0x680] ss:$16 sps:$4 sm:$0xff]  }
 0x695   :  { %7409 = vmatmul.mubr.bf16.gmra.mrb[100].mxu1 %v28146_v63  ;;  %v19258_v63 = vld [vmem:[%s27058_s3 + $0x6a4] ss:$16 sps:$4 sm:$0xff]  }
 0x696   :  { %7418 = vmatprep.mubr.bf16.mxu1 %v28018_v16  ;;  %8573 = vmatpush1.bf16.msra.mxu1 %v19247_v50  ;;  %v19261_v50 = vld [vmem:[%s27058_s3 + $0x6c4] ss:$16 sps:$4 sm:$0xff]  }
 0x697   :  { %8574 = vmatprep.subr.bf16.mxu1 %v19252_v26  ;;  %v19259_v26 = vld [vmem:[%s27058_s3 + $0x6c0] ss:$16 sps:$4 sm:$0xff]  }
 0x69a   :  { %8575 = vmatpush1.bf16.msra.mxu1 %v19250_v40  ;;  %v19264_v40 = vld [vmem:[%s27058_s3 + $0x6e4] ss:$16 sps:$4 sm:$0xff]  }
 0x69b   :  { %8576 = vmatprep.subr.bf16.mxu1 %v19255_v31  ;;  %v19262_v31 = vld [vmem:[%s27058_s3 + $0x6e0] ss:$16 sps:$4 sm:$0xff]  }
 0x69d   :  { %7419 = vmatmul.mubr.bf16.gmra.mrb[104].mxu1 %v28147_v10 }
 0x69e   :  { %7428 = vmatprep.mubr.bf16.mxu1 %v28018_v16  ;;  %8577 = vmatpush1.bf16.msra.mxu1 %v19253_v28  ;;  %v19267_v28 = vld [vmem:[%s27058_s3 + $0x704] ss:$16 sps:$4 sm:$0xff]  }
 0x69f   :  { %8578 = vmatprep.subr.bf16.mxu1 %v19258_v63  ;;  %v19265_v63 = vld [vmem:[%s27058_s3 + $0x700] ss:$16 sps:$4 sm:$0xff]  }
 0x6a2   :  { %8579 = vmatpush1.bf16.msra.mxu1 %v19256_v57  ;;  %v19270_v57 = vld [vmem:[%s27058_s3 + $0x724] ss:$16 sps:$4 sm:$0xff]  }
 0x6a3   :  { %8580 = vmatprep.subr.bf16.mxu1 %v19261_v50  ;;  %v19268_v50 = vld [vmem:[%s27058_s3 + $0x720] ss:$16 sps:$4 sm:$0xff]  }
 0x6a5   :  { %7429 = vmatmul.mubr.bf16.gmra.mrb[108].mxu1 %v28157_v59 }
 0x6a6   :  { %7438 = vmatprep.mubr.bf16.mxu1 %v28018_v16  ;;  %8581 = vmatpush1.bf16.msra.mxu1 %v19259_v26  ;;  %v19273_v26 = vld [vmem:[%s27058_s3 + $0x744] ss:$16 sps:$4 sm:$0xff]  }
 0x6a7   :  { %8582 = vmatprep.subr.bf16.mxu1 %v19264_v40  ;;  %v19271_v40 = vld [vmem:[%s27058_s3 + $0x740] ss:$16 sps:$4 sm:$0xff]  }
 0x6aa   :  { %8583 = vmatpush1.bf16.msra.mxu1 %v19262_v31  ;;  %v19276_v31 = vld [vmem:[%s27058_s3 + $0x764] ss:$16 sps:$4 sm:$0xff]  }
 0x6ab   :  { %8584 = vmatprep.subr.bf16.mxu1 %v19267_v28  ;;  %v19274_v28 = vld [vmem:[%s27058_s3 + $0x760] ss:$16 sps:$4 sm:$0xff]  }
 0x6ad   :  { %7439 = vmatmul.mubr.bf16.gmra.mrb[112].mxu1 %v28172_v1 }
 0x6ae   :  { %7448 = vmatprep.mubr.bf16.mxu1 %v28018_v16  ;;  %8585 = vmatpush1.bf16.msra.mxu1 %v19265_v63  ;;  %v19279_v63 = vld [vmem:[%s27058_s3 + $0x784] ss:$16 sps:$4 sm:$0xff]  }
 0x6af   :  { %8586 = vmatprep.subr.bf16.mxu1 %v19270_v57  ;;  %v19277_v57 = vld [vmem:[%s27058_s3 + $0x780] ss:$16 sps:$4 sm:$0xff]  }
 0x6b2   :  { %8587 = vmatpush1.bf16.msra.mxu1 %v19268_v50  ;;  %v19282_v50 = vld [vmem:[%s27058_s3 + $0x7a4] ss:$16 sps:$4 sm:$0xff]  }
 0x6b3   :  { %8588 = vmatprep.subr.bf16.mxu1 %v19273_v26  ;;  %v19280_v26 = vld [vmem:[%s27058_s3 + $0x7a0] ss:$16 sps:$4 sm:$0xff]  }
 0x6b5   :  { %7449 = vmatmul.mubr.bf16.gmra.mrb[116].mxu1 %v28178_v14 }
 0x6b6   :  { %7458 = vmatprep.mubr.bf16.mxu1 %v28018_v16  ;;  %8589 = vmatpush1.bf16.msra.mxu1 %v19271_v40 }
 0x6b7   :  { %8590 = vmatprep.subr.bf16.mxu1 %v19276_v31  ;;  %v19285_v31 = vld [vmem:[%s27058_s3 + $0x7c4] ss:$16 sps:$4 sm:$0xff]  }
 0x6ba   :  { %8591 = vmatpush1.bf16.msra.mxu1 %v19274_v28 }
 0x6bb   :  { %8592 = vmatprep.subr.bf16.mxu1 %v19279_v63 }
 0x6bd   :  { %7459 = vmatmul.mubr.bf16.gmra.mrb[120].mxu1 %v23015_v60 }
 0x6be   :  { %7468 = vmatprep.mubr.bf16.mxu1 %v28018_v16  ;;  %8593 = vmatpush1.bf16.msra.mxu1 %v19277_v57  ;;  %v19283_v57 = vld [vmem:[%s27058_s3 + $0x7c0] ss:$16 sps:$4 sm:$0xff]  }
 0x6bf   :  { %v24272_v40 = vpop.f32.mrb[160].mxu0  ;;  %8594 = vmatprep.subr.bf16.mxu1 %v19282_v50  ;;  %v19288_v50 = vld [vmem:[%s27058_s3 + $0x7e4] ss:$16 sps:$4 sm:$0xff]  }
 0x6c0   :  { %28281 = vst [vmem:[#allocation137_spill] sm:$0xff] %v24272_v40  ;;  %v24277_v28 = vpop.f32.mrb[161].mxu0 }
 0x6c1   :  { %28282 = vst [vmem:[#allocation133_spill] sm:$0xff] %v24277_v28  ;;  %v24279_v63 = vpop.f32.mrb[162].mxu0 }
 0x6c2   :  { %28283 = vst [vmem:[#allocation138_spill] sm:$0xff] %v24279_v63  ;;  %v24281_v62 = vpop.f32.mrb[163].mxu0  ;;  %8595 = vmatpush1.bf16.msra.mxu1 %v19280_v26  ;;  %v19286_v63 = vld [vmem:[%s27058_s3 + $0x7e0] ss:$16 sps:$4 sm:$0xff]   ;;  %v19291_v26 = vld [vmem:[%s27058_s3 + $0x804] ss:$16 sps:$4 sm:$0xff]  }
 0x6c3   :  { %28284 = vst [vmem:[#allocation27_spill] sm:$0xff] %v24281_v62  ;;  %8596 = vmatprep.subr.bf16.mxu1 %v19285_v31 }
 0x6c5   :  { %7469 = vmatmul.mubr.bf16.gmra.mrb[124].mxu1 %v23053_v0 }
 0x6c6   :  { %7478 = vmatprep.mubr.bf16.mxu1 %v28018_v16  ;;  %8597 = vmatpush1.bf16.msra.mxu1 %v19283_v57 }
 0x6c7   :  { %v24294_v62 = vpop.f32.mrb[164].mxu0  ;;  %8598 = vmatprep.subr.bf16.mxu1 %v19288_v50 }
 0x6c8   :  { %28285 = vst [vmem:[#allocation135_spill] sm:$0xff] %v24294_v62  ;;  %v24299_v31 = vpop.f32.mrb[165].mxu0 }
 0x6c9   :  { %28286 = vst [vmem:[#allocation139_spill] sm:$0xff] %v24299_v31  ;;  %v24301_v28 = vpop.f32.mrb[166].mxu0  ;;  %v19289_v31 = vld [vmem:[%s27058_s3 + $0x800] ss:$16 sps:$4 sm:$0xff]  }
 0x6ca   :  { %28287 = vst [vmem:[#allocation136_spill] sm:$0xff] %v24301_v28  ;;  %v24303_v40 = vpop.f32.mrb[167].mxu0  ;;  %8599 = vmatpush1.bf16.msra.mxu1 %v19286_v63 }
 0x6cb   :  { %28288 = vst [vmem:[#allocation140_spill] sm:$0xff] %v24303_v40  ;;  %8761 = vmatprep.subr.bf16.mxu1 %v19291_v26 }
 0x6cd   :  { %7479 = vmatmul.mubr.bf16.gmra.mrb[0].mxu1 %v23157_v42 }
 0x6ce   :  { %7488 = vmatprep.mubr.bf16.mxu1 %v28018_v16 }
 0x6cf   :  { %v24307_v57 = vpop.f32.mrb[168].mxu0 }
 0x6d0   :  { %28289 = vst [vmem:[#allocation45_spill] sm:$0xff] %v24307_v57  ;;  %v24309_v62 = vpop.f32.mrb[169].mxu0 }
 0x6d1   :  { %28290 = vst [vmem:[#allocation41_spill] sm:$0xff] %v24309_v62  ;;  %v24311_v50 = vpop.f32.mrb[170].mxu0 }
 0x6d2   :  { %28291 = vst [vmem:[#allocation141_spill] sm:$0xff] %v24311_v50  ;;  %v24313_v45 = vpop.f32.mrb[171].mxu0 }
 0x6d3   :  { %28292 = vst [vmem:[#allocation145_spill] sm:$0xff] %v24313_v45 }
 0x6d5   :  { %7489 = vmatmul.mubr.bf16.gmra.mrb[4].mxu1 %v23203_v11 }
 0x6d6   :  { %7498 = vmatprep.mubr.bf16.mxu1 %v28018_v16 }
 0x6d7   :  { %v24317_v28 = vpop.f32.mrb[172].mxu0 }
 0x6d8   :  { %28293 = vst [vmem:[#allocation142_spill] sm:$0xff] %v24317_v28  ;;  %v24319_v63 = vpop.f32.mrb[173].mxu0 }
 0x6d9   :  { %28294 = vst [vmem:[#allocation146_spill] sm:$0xff] %v24319_v63  ;;  %v24321_v26 = vpop.f32.mrb[174].mxu0 }
 0x6da   :  { %28295 = vst [vmem:[#allocation143_spill] sm:$0xff] %v24321_v26  ;;  %v24323_v40 = vpop.f32.mrb[175].mxu0 }
 0x6db   :  { %28296 = vst [vmem:[#allocation147_spill] sm:$0xff] %v24323_v40 }
 0x6dd   :  { %7499 = vmatmul.mubr.bf16.gmra.mrb[8].mxu1 %v23276_v2 }
 0x6de   :  { %7508 = vmatprep.mubr.bf16.mxu1 %v28018_v16 }
 0x6df   :  { %v24327_v62 = vpop.f32.mrb[176].mxu0 }
 0x6e0   :  { %28297 = vst [vmem:[#allocation144_spill] sm:$0xff] %v24327_v62  ;;  %v24329_v50 = vpop.f32.mrb[177].mxu0 }
 0x6e1   :  { %28298 = vst [vmem:[#allocation148_spill] sm:$0xff] %v24329_v50  ;;  %v24331_v45 = vpop.f32.mrb[178].mxu0 }
 0x6e2   :  { %28299 = vst [vmem:[#allocation71_spill] sm:$0xff] %v24331_v45  ;;  %v24333_v57 = vpop.f32.mrb[179].mxu0 }
 0x6e3   :  { %28300 = vst [vmem:[#allocation75_spill] sm:$0xff] %v24333_v57 }
 0x6e5   :  { %7509 = vmatmul.mubr.bf16.gmra.mrb[12].mxu1 %v23297_v30 }
 0x6e6   :  { %7518 = vmatprep.mubr.bf16.mxu1 %v28018_v16 }
 0x6e7   :  { %v24337_v63 = vpop.f32.mrb[180].mxu0 }
 0x6e8   :  { %28301 = vst [vmem:[#allocation149_spill] sm:$0xff] %v24337_v63  ;;  %v24339_v26 = vpop.f32.mrb[181].mxu0 }
 0x6e9   :  { %28302 = vst [vmem:[#allocation153_spill] sm:$0xff] %v24339_v26  ;;  %v24341_v40 = vpop.f32.mrb[182].mxu0 }
 0x6ea   :  { %28303 = vst [vmem:[#allocation150_spill] sm:$0xff] %v24341_v40  ;;  %v24343_v28 = vpop.f32.mrb[183].mxu0 }
 0x6eb   :  { %28304 = vst [vmem:[#allocation154_spill] sm:$0xff] %v24343_v28 }
 0x6ed   :  { %7519 = vmatmul.mubr.bf16.gmra.mrb[16].mxu1 %v23331_v17 }
 0x6ee   :  { %7528 = vmatprep.mubr.bf16.mxu1 %v28018_v16 }
 0x6ef   :  { %v24347_v50 = vpop.f32.mrb[184].mxu0 }
 0x6f0   :  { %28305 = vst [vmem:[#allocation65_spill] sm:$0xff] %v24347_v50  ;;  %v24349_v45 = vpop.f32.mrb[185].mxu0 }
 0x6f1   :  { %28306 = vst [vmem:[#allocation151_spill] sm:$0xff] %v24349_v45  ;;  %v24351_v57 = vpop.f32.mrb[186].mxu0 }
 0x6f2   :  { %28307 = vst [vmem:[#allocation155_spill] sm:$0xff] %v24351_v57  ;;  %v24353_v62 = vpop.f32.mrb[187].mxu0 }
 0x6f3   :  { %28308 = vst [vmem:[#allocation152_spill] sm:$0xff] %v24353_v62 }
 0x6f5   :  { %7529 = vmatmul.mubr.bf16.gmra.mrb[20].mxu1 %v23352_v27 }
 0x6f6   :  { %7538 = vmatprep.mubr.bf16.mxu1 %v28018_v16 }
 0x6f7   :  { %v24357_v26 = vpop.f32.mrb[188].mxu0 }
 0x6f8   :  { %28309 = vst [vmem:[#allocation156_spill] sm:$0xff] %v24357_v26  ;;  %v24359_v40 = vpop.f32.mrb[189].mxu0 }
 0x6f9   :  { %28310 = vst [vmem:[#allocation81_spill] sm:$0xff] %v24359_v40  ;;  %v24361_v28 = vpop.f32.mrb[190].mxu0 }
 0x6fa   :  { %28311 = vst [vmem:[#allocation85_spill] sm:$0xff] %v24361_v28  ;;  %v24363_v63 = vpop.f32.mrb[191].mxu0 }
 0x6fb   :  { %28312 = vst [vmem:[#allocation79_spill] sm:$0xff] %v24363_v63 }
 0x6fd   :  { %7539 = vmatmul.mubr.bf16.gmra.mrb[24].mxu1 %v28216_v43 }
 0x6fe   :  { %7548 = vmatprep.mubr.bf16.mxu1 %v28018_v16 }
 0x6ff   :  { %v24367_v45 = vpop.f32.mrb[128].mxu0 }
 0x700   :  { %28313 = vst [vmem:[#allocation68_spill] sm:$0xff] %v24367_v45  ;;  %v24369_v57 = vpop.f32.mrb[129].mxu0 }
 0x701   :  { %28314 = vst [vmem:[#allocation157_spill] sm:$0xff] %v24369_v57  ;;  %v24371_v62 = vpop.f32.mrb[130].mxu0 }
 0x702   :  { %28315 = vst [vmem:[#allocation161_spill] sm:$0xff] %v24371_v62  ;;  %v24373_v50 = vpop.f32.mrb[131].mxu0 }
 0x703   :  { %28316 = vst [vmem:[#allocation91_spill] sm:$0xff] %v24373_v50  ;;  %v19294_v50 = vld [vmem:[%s27058_s3 + $0x824] ss:$16 sps:$4 sm:$0xff]  }
 0x705   :  { %7549 = vmatmul.mubr.bf16.gmra.mrb[28].mxu1 %v28217_v8 }
 0x706   :  { %8600 = vmatprep.mubr.bf16.mxu1 %v22868_v22 }
 0x707   :  { %v24377_v40 = vpop.f32.mrb[132].mxu0 }
 0x708   :  { %28317 = vst [vmem:[#allocation86_spill] sm:$0xff] %v24377_v40  ;;  %v24379_v28 = vpop.f32.mrb[133].mxu0 }
 0x709   :  { %28318 = vst [vmem:[#allocation158_spill] sm:$0xff] %v24379_v28  ;;  %v24381_v63 = vpop.f32.mrb[134].mxu0  ;;  %v19292_v28 = vld [vmem:[%s27058_s3 + $0x820] ss:$16 sps:$4 sm:$0xff]  }
 0x70a   :  { %28319 = vst [vmem:[#allocation162_spill] sm:$0xff] %v24381_v63  ;;  %v24383_v26 = vpop.f32.mrb[135].mxu0 }
 0x70b   :  { %28320 = vst [vmem:[#allocation93_spill] sm:$0xff] %v24383_v26  ;;  %v19297_v26 = vld [vmem:[%s27058_s3 + $0x844] ss:$16 sps:$4 sm:$0xff]  }
 0x70d   :  { %8601 = vmatmul.mubr.bf16.vlgmr.msra.gmra.mrb[32].mxu1 %v28041_v58 }
 0x70e   :  { %8610 = vmatprep.mubr.bf16.mxu1 %v28208_v37  ;;  %8762 = vmatpush1.bf16.msra.mxu1 %v19289_v31  ;;  %v19295_v31 = vld [vmem:[%s27058_s3 + $0x840] ss:$16 sps:$4 sm:$0xff]  }
 0x70f   :  { %v24396_v63 = vpop.f32.mrb[136].mxu0  ;;  %8763 = vmatprep.subr.bf16.mxu1 %v19294_v50  ;;  %v19300_v50 = vld [vmem:[%s27058_s3 + $0x864] ss:$16 sps:$4 sm:$0xff]  }
 0x710   :  { %28321 = vst [vmem:[#allocation98_spill] sm:$0xff] %v24396_v63  ;;  %v24401_v40 = vpop.f32.mrb[137].mxu0 }
 0x711   :  { %28322 = vst [vmem:[#allocation159_spill] sm:$0xff] %v24401_v40  ;;  %v24403_v62 = vpop.f32.mrb[138].mxu0 }
 0x712   :  { %28323 = vst [vmem:[#allocation163_spill] sm:$0xff] %v24403_v62  ;;  %v24405_v57 = vpop.f32.mrb[139].mxu0  ;;  %8764 = vmatpush1.bf16.msra.mxu1 %v19292_v28  ;;  %v19298_v62 = vld [vmem:[%s27058_s3 + $0x860] ss:$16 sps:$4 sm:$0xff]   ;;  %v19303_v28 = vld [vmem:[%s27058_s3 + $0x884] ss:$16 sps:$4 sm:$0xff]  }
 0x713   :  { %28324 = vst [vmem:[#allocation95_spill] sm:$0xff] %v24405_v57  ;;  %8765 = vmatprep.subr.bf16.mxu1 %v19297_v26 }
 0x715   :  { %8611 = vmatmul.mubr.bf16.gmra.mrb[36].mxu1 %v28209_v20 }
 0x716   :  { %8620 = vmatprep.mubr.bf16.mxu1 %v28210_v47  ;;  %8766 = vmatpush1.bf16.msra.mxu1 %v19295_v31  ;;  %v19301_v31 = vld [vmem:[%s27058_s3 + $0x880] ss:$16 sps:$4 sm:$0xff]  }
 0x717   :  { %v24418_v57 = vpop.f32.mrb[140].mxu0  ;;  %8767 = vmatprep.subr.bf16.mxu1 %v19300_v50  ;;  %v19306_v50 = vld [vmem:[%s27058_s3 + $0x8a4] ss:$16 sps:$4 sm:$0xff]  }
 0x718   :  { %28325 = vst [vmem:[#allocation99_spill] sm:$0xff] %v24418_v57  ;;  %v24423_v26 = vpop.f32.mrb[141].mxu0 }
 0x719   :  { %28326 = vst [vmem:[#allocation160_spill] sm:$0xff] %v24423_v26  ;;  %v24425_v40 = vpop.f32.mrb[142].mxu0 }
 0x71a   :  { %28327 = vst [vmem:[#allocation164_spill] sm:$0xff] %v24425_v40  ;;  %v24427_v63 = vpop.f32.mrb[143].mxu0  ;;  %8768 = vmatpush1.bf16.msra.mxu1 %v19298_v62  ;;  %v19304_v40 = vld [vmem:[%s27058_s3 + $0x8a0] ss:$16 sps:$4 sm:$0xff]   ;;  %v19309_v62 = vld [vmem:[%s27058_s3 + $0x8c4] ss:$16 sps:$4 sm:$0xff]  }
 0x71b   :  { %28328 = vst [vmem:[#allocation97_spill] sm:$0xff] %v24427_v63  ;;  %8769 = vmatprep.subr.bf16.mxu1 %v19303_v28 }
 0x71d   :  { %8621 = vmatmul.mubr.bf16.gmra.mrb[40].mxu1 %v28211_v35 }
 0x71e   :  { %8630 = vmatprep.mubr.bf16.mxu1 %v28212_v15  ;;  %8770 = vmatpush1.bf16.msra.mxu1 %v19301_v31  ;;  %v19307_v31 = vld [vmem:[%s27058_s3 + $0x8c0] ss:$16 sps:$4 sm:$0xff]  }
 0x71f   :  { %v24440_v63 = vpop.f32.mrb[144].mxu0  ;;  %8771 = vmatprep.subr.bf16.mxu1 %v19306_v50  ;;  %v19312_v50 = vld [vmem:[%s27058_s3 + $0x8e4] ss:$16 sps:$4 sm:$0xff]  }
 0x720   :  { %28329 = vst [vmem:[#allocation89_spill] sm:$0xff] %v24440_v63  ;;  %v24445_v28 = vpop.f32.mrb[145].mxu0 }
 0x721   :  { %28330 = vst [vmem:[#allocation83_spill] sm:$0xff] %v24445_v28  ;;  %v24447_v26 = vpop.f32.mrb[146].mxu0 }
 0x722   :  { %28331 = vst [vmem:[#allocation165_spill] sm:$0xff] %v24447_v26  ;;  %v24449_v57 = vpop.f32.mrb[147].mxu0  ;;  %8772 = vmatpush1.bf16.msra.mxu1 %v19304_v40  ;;  %v19310_v26 = vld [vmem:[%s27058_s3 + $0x8e0] ss:$16 sps:$4 sm:$0xff]   ;;  %v19315_v40 = vld [vmem:[%s27058_s3 + $0x60c] ss:$16 sps:$4 sm:$0xff]  }
 0x723   :  { %28332 = vst [vmem:[#allocation169_spill] sm:$0xff] %v24449_v57  ;;  %8773 = vmatprep.subr.bf16.mxu1 %v19309_v62 }
 0x725   :  { %8631 = vmatmul.mubr.bf16.gmra.mrb[44].mxu1 %v28060_v48 }
 0x726   :  { %8640 = vmatprep.mubr.bf16.mxu1 %v23007_v9  ;;  %8774 = vmatpush1.bf16.msra.mxu1 %v19307_v31 }
 0x727   :  { %v24462_v57 = vpop.f32.mrb[148].mxu0  ;;  %8775 = vmatprep.subr.bf16.mxu1 %v19312_v50 }
 0x728   :  { %28333 = vst [vmem:[#allocation103_spill] sm:$0xff] %v24462_v57  ;;  %v24467_v62 = vpop.f32.mrb[149].mxu0 }
 0x729   :  { %28334 = vst [vmem:[#allocation111_spill] sm:$0xff] %v24467_v62  ;;  %v24469_v28 = vpop.f32.mrb[150].mxu0  ;;  %v19319_v62 = vld [vmem:[%s27058_s3 + $0x648] ss:$16 sps:$4 sm:$0xff]  }
 0x72a   :  { %28335 = vst [vmem:[#allocation166_spill] sm:$0xff] %v24469_v28  ;;  %v24471_v63 = vpop.f32.mrb[151].mxu0  ;;  %8776 = vmatpush1.bf16.msra.mxu1 %v19310_v26 }
 0x72b   :  { %28336 = vst [vmem:[#allocation170_spill] sm:$0xff] %v24471_v63  ;;  %8954 = vmatprep.subr.bf16.mxu1 %v19315_v40 }
 0x72d   :  { %8641 = vmatmul.mubr.bf16.gmra.mrb[48].mxu1 %v28061_v19 }
 0x72e   :  { %8650 = vmatprep.mubr.bf16.mxu1 %v23048_v52 }
 0x72f   :  { %v24475_v31 = vpop.f32.mrb[152].mxu0 }
 0x730   :  { %28337 = vst [vmem:[#allocation92_spill] sm:$0xff] %v24475_v31  ;;  %v24477_v57 = vpop.f32.mrb[153].mxu0  ;;  %v19321_v31 = vld [vmem:[%s27058_s3 + $0x64c] ss:$16 sps:$4 sm:$0xff]  }
 0x731   :  { %28338 = vst [vmem:[#allocation115_spill] sm:$0xff] %v24477_v57  ;;  %v24479_v50 = vpop.f32.mrb[154].mxu0  ;;  %v19316_v57 = vld [vmem:[%s27058_s3 + $0x628] ss:$16 sps:$4 sm:$0xff]  }
 0x732   :  { %28339 = vst [vmem:[#allocation167_spill] sm:$0xff] %v24479_v50  ;;  %v24481_v45 = vpop.f32.mrb[155].mxu0  ;;  %v19318_v50 = vld [vmem:[%s27058_s3 + $0x62c] ss:$16 sps:$4 sm:$0xff]  }
 0x733   :  { %28340 = vst [vmem:[#allocation171_spill] sm:$0xff] %v24481_v45  ;;  %v19313_v45 = vld [vmem:[%s27058_s3 + $0x608] ss:$16 sps:$4 sm:$0xff]  }
 0x735   :  { %8651 = vmatmul.mubr.bf16.gmra.mrb[52].mxu1 %v28069_v29 }
 0x736   :  { %8660 = vmatprep.mubr.bf16.mxu1 %v28213_v44 }
 0x737   :  { %v24485_v28 = vpop.f32.mrb[156].mxu0 }
 0x738   :  { %28341 = vst [vmem:[#allocation105_spill] sm:$0xff] %v24485_v28  ;;  %v24487_v26 = vpop.f32.mrb[157].mxu0  ;;  %v28348_v28 = vld [vmem:[#allocation122_spill] sm:$0xff] }
 0x739   :  { %28342 = vst [vmem:[#allocation117_spill] sm:$0xff] %v24487_v26  ;;  %v24489_v40 = vpop.f32.mrb[158].mxu0  ;;  %v28347_v26 = vld [vmem:[#allocation15_spill] sm:$0xff] }
 0x73a   :  { %28343 = vst [vmem:[#allocation168_spill] sm:$0xff] %v24489_v40  ;;  %v24491_v63 = vpop.f32.mrb[159].mxu0  ;;  %v28346_v40 = vld [vmem:[#allocation119_spill] sm:$0xff] }
 0x73b   :  { %28344 = vst [vmem:[#allocation173_spill] sm:$0xff] %v24491_v63  ;;  %v28345_v63 = vld [vmem:[#allocation22_spill] sm:$0xff] }
 0x73d   :  { %8661 = vmatmul.mubr.bf16.gmra.mrb[56].mxu1 %v28214_v34 }
 0x73e   :  { %8670 = vmatprep.mubr.bf16.mxu1 %v28215_v38 }
 0x745   :  { %8671 = vmatmul.mubr.bf16.gmra.mrb[60].mxu1 %v28084_v25 }
 0x746   :  { %8680 = vmatprep.mubr.bf16.mxu1 %v23271_v55 }
 0x74d   :  { %8681 = vmatmul.mubr.bf16.gmra.mrb[64].mxu1 %v28085_v61 }
 0x74e   :  { %8690 = vmatprep.mubr.bf16.mxu1 %v23295_v4 }
 0x755   :  { %8691 = vmatmul.mubr.bf16.gmra.mrb[68].mxu1 %v28224_v5 }
 0x756   :  { %8700 = vmatprep.mubr.bf16.mxu1 %v28225_v13 }
 0x75d   :  { %8701 = vmatmul.mubr.bf16.gmra.mrb[72].mxu1 %v28230_v24 }
 0x75e   :  { %8710 = vmatprep.mubr.bf16.mxu1 %v28231_v53 }
 0x765   :  { %8711 = vmatmul.mubr.bf16.gmra.mrb[76].mxu1 %v28114_v23 }
 0x766   :  { %8720 = vmatprep.mubr.bf16.mxu1 %v23408_v3 }
 0x76d   :  { %8721 = vmatmul.mubr.bf16.gmra.mrb[80].mxu1 %v28203_v36 }
 0x76e   :  { %8730 = vmatprep.mubr.bf16.mxu1 %v23445_v7 }
 0x775   :  { %8731 = vmatmul.mubr.bf16.gmra.mrb[84].mxu1 %v28204_v51 }
 0x776   :  { %8740 = vmatprep.mubr.bf16.mxu1 %v28345_v63 }
 0x77d   :  { %8741 = vmatmul.mubr.bf16.gmra.mrb[88].mxu1 %v28346_v40 }
 0x77e   :  { %8750 = vmatprep.mubr.bf16.mxu1 %v28347_v26 }
 0x785   :  { %8751 = vmatmul.mubr.bf16.gmra.mrb[92].mxu1 %v28348_v28 }
 0x786   :  { %8793 = vmatprep.mubr.bf16.mxu1 %v28018_v16 }
 0x78d   :  { %8794 = vmatmul.mubr.bf16.vlgmr.msra.gmra.mrb[32].mxu1 %v28147_v10 }
 0x78e   :  { %8955 = vmatpush1.bf16.msra.mxu1 %v19313_v45  ;;  %8803 = vmatprep.mubr.bf16.mxu1 %v28018_v16  ;;  %v19324_v45 = vld [vmem:[%s27058_s3 + $0x66c] ss:$16 sps:$4 sm:$0xff]  }
 0x78f   :  { %8956 = vmatprep.subr.bf16.mxu1 %v19318_v50  ;;  %v19322_v50 = vld [vmem:[%s27058_s3 + $0x668] ss:$16 sps:$4 sm:$0xff]  }
 0x792   :  { %8957 = vmatpush1.bf16.msra.mxu1 %v19316_v57  ;;  %v19327_v57 = vld [vmem:[%s27058_s3 + $0x68c] ss:$16 sps:$4 sm:$0xff]  }
 0x793   :  { %8958 = vmatprep.subr.bf16.mxu1 %v19321_v31  ;;  %v19325_v31 = vld [vmem:[%s27058_s3 + $0x688] ss:$16 sps:$4 sm:$0xff]  }
 0x795   :  { %8804 = vmatmul.mubr.bf16.gmra.mrb[36].mxu1 %v28157_v59 }
 0x796   :  { %8813 = vmatprep.mubr.bf16.mxu1 %v28018_v16  ;;  %8959 = vmatpush1.bf16.msra.mxu1 %v19319_v62  ;;  %v19328_v62 = vld [vmem:[%s27058_s3 + $0x6a8] ss:$16 sps:$4 sm:$0xff]  }
 0x797   :  { %8960 = vmatprep.subr.bf16.mxu1 %v19324_v45  ;;  %v19333_v45 = vld [vmem:[%s27058_s3 + $0x6cc] ss:$16 sps:$4 sm:$0xff]  }
 0x79a   :  { %8961 = vmatpush1.bf16.msra.mxu1 %v19322_v50  ;;  %v19331_v50 = vld [vmem:[%s27058_s3 + $0x6c8] ss:$16 sps:$4 sm:$0xff]  }
 0x79b   :  { %8962 = vmatprep.subr.bf16.mxu1 %v19327_v57  ;;  %v19336_v57 = vld [vmem:[%s27058_s3 + $0x6ec] ss:$16 sps:$4 sm:$0xff]  }
 0x79d   :  { %8814 = vmatmul.mubr.bf16.gmra.mrb[40].mxu1 %v28172_v1 }
 0x79e   :  { %8823 = vmatprep.mubr.bf16.mxu1 %v28018_v16  ;;  %8963 = vmatpush1.bf16.msra.mxu1 %v19325_v31  ;;  %v19339_v31 = vld [vmem:[%s27058_s3 + $0x70c] ss:$16 sps:$4 sm:$0xff]  }
 0x79f   :  { %8964 = vmatprep.subr.bf16.mxu1 %v19330_v46  ;;  %v19334_v46 = vld [vmem:[%s27058_s3 + $0x6e8] ss:$16 sps:$4 sm:$0xff]  }
 0x7a2   :  { %8965 = vmatpush1.bf16.msra.mxu1 %v19328_v62  ;;  %v19337_v62 = vld [vmem:[%s27058_s3 + $0x708] ss:$16 sps:$4 sm:$0xff]  }
 0x7a3   :  { %8966 = vmatprep.subr.bf16.mxu1 %v19333_v45  ;;  %v19342_v45 = vld [vmem:[%s27058_s3 + $0x72c] ss:$16 sps:$4 sm:$0xff]  }
 0x7a5   :  { %8824 = vmatmul.mubr.bf16.gmra.mrb[44].mxu1 %v28178_v14 }
 0x7a6   :  { %8833 = vmatprep.mubr.bf16.mxu1 %v28018_v16  ;;  %8967 = vmatpush1.bf16.msra.mxu1 %v19331_v50  ;;  %v19340_v50 = vld [vmem:[%s27058_s3 + $0x728] ss:$16 sps:$4 sm:$0xff]  }
 0x7a7   :  { %8968 = vmatprep.subr.bf16.mxu1 %v19336_v57  ;;  %v19345_v57 = vld [vmem:[%s27058_s3 + $0x74c] ss:$16 sps:$4 sm:$0xff]  }
 0x7aa   :  { %8969 = vmatpush1.bf16.msra.mxu1 %v19334_v46  ;;  %v19343_v46 = vld [vmem:[%s27058_s3 + $0x748] ss:$16 sps:$4 sm:$0xff]  }
 0x7ab   :  { %8970 = vmatprep.subr.bf16.mxu1 %v19339_v31  ;;  %v19348_v31 = vld [vmem:[%s27058_s3 + $0x76c] ss:$16 sps:$4 sm:$0xff]  }
 0x7ad   :  { %8834 = vmatmul.mubr.bf16.gmra.mrb[48].mxu1 %v23015_v60 }
 0x7ae   :  { %8843 = vmatprep.mubr.bf16.mxu1 %v28018_v16  ;;  %8971 = vmatpush1.bf16.msra.mxu1 %v19337_v62  ;;  %v19346_v62 = vld [vmem:[%s27058_s3 + $0x768] ss:$16 sps:$4 sm:$0xff]  }
 0x7af   :  { %8972 = vmatprep.subr.bf16.mxu1 %v19342_v45  ;;  %v19351_v45 = vld [vmem:[%s27058_s3 + $0x78c] ss:$16 sps:$4 sm:$0xff]  }
 0x7b2   :  { %8973 = vmatpush1.bf16.msra.mxu1 %v19340_v50  ;;  %v19349_v50 = vld [vmem:[%s27058_s3 + $0x788] ss:$16 sps:$4 sm:$0xff]  }
 0x7b3   :  { %8974 = vmatprep.subr.bf16.mxu1 %v19345_v57  ;;  %v19354_v57 = vld [vmem:[%s27058_s3 + $0x7ac] ss:$16 sps:$4 sm:$0xff]  }
 0x7b5   :  { %8844 = vmatmul.mubr.bf16.gmra.mrb[52].mxu1 %v23053_v0 }
 0x7b6   :  { %8853 = vmatprep.mubr.bf16.mxu1 %v28018_v16  ;;  %8975 = vmatpush1.bf16.msra.mxu1 %v19343_v46  ;;  %v19352_v46 = vld [vmem:[%s27058_s3 + $0x7a8] ss:$16 sps:$4 sm:$0xff]  }
 0x7b7   :  { %8976 = vmatprep.subr.bf16.mxu1 %v19348_v31  ;;  %v19357_v31 = vld [vmem:[%s27058_s3 + $0x7cc] ss:$16 sps:$4 sm:$0xff]  }
 0x7ba   :  { %8977 = vmatpush1.bf16.msra.mxu1 %v19346_v62  ;;  %v19355_v62 = vld [vmem:[%s27058_s3 + $0x7c8] ss:$16 sps:$4 sm:$0xff]  }
 0x7bb   :  { %8978 = vmatprep.subr.bf16.mxu1 %v19351_v45  ;;  %v19360_v45 = vld [vmem:[%s27058_s3 + $0x7ec] ss:$16 sps:$4 sm:$0xff]  }
 0x7bd   :  { %8854 = vmatmul.mubr.bf16.gmra.mrb[56].mxu1 %v23157_v42 }
 0x7be   :  { %8863 = vmatprep.mubr.bf16.mxu1 %v28018_v16  ;;  %8979 = vmatpush1.bf16.msra.mxu1 %v19349_v50  ;;  %v19358_v50 = vld [vmem:[%s27058_s3 + $0x7e8] ss:$16 sps:$4 sm:$0xff]  }
 0x7bf   :  { %8980 = vmatprep.subr.bf16.mxu1 %v19354_v57  ;;  %v19363_v57 = vld [vmem:[%s27058_s3 + $0x80c] ss:$16 sps:$4 sm:$0xff]  }
 0x7c2   :  { %8981 = vmatpush1.bf16.msra.mxu1 %v19352_v46  ;;  %v28349_v46 = vld [vmem:[#allocation34_spill] sm:$0xff] }
 0x7c3   :  { %8982 = vmatprep.subr.bf16.mxu1 %v19357_v31  ;;  %v28350_v31 = vld [vmem:[#allocation23_spill] sm:$0xff] }
 0x7c5   :  { %8864 = vmatmul.mubr.bf16.gmra.mrb[60].mxu1 %v23203_v11 }
 0x7c6   :  { %8873 = vmatprep.mubr.bf16.mxu1 %v28018_v16  ;;  %8983 = vmatpush1.bf16.msra.mxu1 %v19355_v62  ;;  %v19361_v62 = vld [vmem:[%s27058_s3 + $0x808] ss:$16 sps:$4 sm:$0xff]  }
 0x7c7   :  { %8984 = vmatprep.subr.bf16.mxu1 %v19360_v45  ;;  %v19366_v45 = vld [vmem:[%s27058_s3 + $0x82c] ss:$16 sps:$4 sm:$0xff]  }
 0x7ca   :  { %8985 = vmatpush1.bf16.msra.mxu1 %v19358_v50  ;;  %v19364_v50 = vld [vmem:[%s27058_s3 + $0x828] ss:$16 sps:$4 sm:$0xff]  }
 0x7cb   :  { %9147 = vmatprep.subr.bf16.mxu1 %v19363_v57  ;;  %v19367_v57 = vld [vmem:[%s27058_s3 + $0x848] ss:$16 sps:$4 sm:$0xff]  }
 0x7cd   :  { %8874 = vmatmul.mubr.bf16.gmra.mrb[64].mxu1 %v23276_v2 }
 0x7ce   :  { %8883 = vmatprep.mubr.bf16.mxu1 %v28018_v16 }
 0x7d5   :  { %8884 = vmatmul.mubr.bf16.gmra.mrb[68].mxu1 %v23297_v30 }
 0x7d6   :  { %8893 = vmatprep.mubr.bf16.mxu1 %v28018_v16 }
 0x7dd   :  { %8894 = vmatmul.mubr.bf16.gmra.mrb[72].mxu1 %v23331_v17 }
 0x7de   :  { %8903 = vmatprep.mubr.bf16.mxu1 %v28018_v16 }
 0x7e5   :  { %8904 = vmatmul.mubr.bf16.gmra.mrb[76].mxu1 %v23352_v27 }
 0x7e6   :  { %8913 = vmatprep.mubr.bf16.mxu1 %v28018_v16 }
 0x7ed   :  { %8914 = vmatmul.mubr.bf16.gmra.mrb[80].mxu1 %v28216_v43 }
 0x7ee   :  { %8923 = vmatprep.mubr.bf16.mxu1 %v28018_v16 }
 0x7f5   :  { %8924 = vmatmul.mubr.bf16.gmra.mrb[84].mxu1 %v28217_v8 }
 0x7f6   :  { %8933 = vmatprep.mubr.bf16.mxu1 %v28018_v16 }
 0x7fd   :  { %8934 = vmatmul.mubr.bf16.gmra.mrb[88].mxu1 %v28349_v46 }
 0x7fe   :  { %8943 = vmatprep.mubr.bf16.mxu1 %v28018_v16 }
 0x805   :  { %8944 = vmatmul.mubr.bf16.gmra.mrb[92].mxu1 %v28350_v31 }
 0x806   :  { %8986 = vmatprep.mubr.bf16.mxu1 %v22868_v22  ;;  %v19369_v22 = vld [vmem:[%s27058_s3 + $0x84c] ss:$16 sps:$4 sm:$0xff]  }
 0x80d   :  { %8987 = vmatmul.mubr.bf16.vlgmr.msra.gmra.mrb[96].mxu1 %v28041_v58  ;;  %v19372_v58 = vld [vmem:[%s27058_s3 + $0x86c] ss:$16 sps:$4 sm:$0xff]  }
 0x80e   :  { %8996 = vmatprep.mubr.bf16.mxu1 %v28208_v37  ;;  %9148 = vmatpush1.bf16.msra.mxu1 %v19361_v62  ;;  %v19370_v37 = vld [vmem:[%s27058_s3 + $0x868] ss:$16 sps:$4 sm:$0xff]   ;;  %v19375_v62 = vld [vmem:[%s27058_s3 + $0x88c] ss:$16 sps:$4 sm:$0xff]  }
 0x80f   :  { %9149 = vmatprep.subr.bf16.mxu1 %v19366_v45  ;;  %v19373_v45 = vld [vmem:[%s27058_s3 + $0x888] ss:$16 sps:$4 sm:$0xff]  }
 0x812   :  { %9150 = vmatpush1.bf16.msra.mxu1 %v19364_v50  ;;  %v19376_v50 = vld [vmem:[%s27058_s3 + $0x8a8] ss:$16 sps:$4 sm:$0xff]  }
 0x813   :  { %9151 = vmatprep.subr.bf16.mxu1 %v19369_v22  ;;  %v19381_v22 = vld [vmem:[%s27058_s3 + $0x8cc] ss:$16 sps:$4 sm:$0xff]  }
 0x815   :  { %8997 = vmatmul.mubr.bf16.gmra.mrb[100].mxu1 %v28209_v20  ;;  %v19378_v20 = vld [vmem:[%s27058_s3 + $0x8ac] ss:$16 sps:$4 sm:$0xff]  }
 0x816   :  { %9006 = vmatprep.mubr.bf16.mxu1 %v28210_v47  ;;  %9152 = vmatpush1.bf16.msra.mxu1 %v19367_v57  ;;  %v19379_v57 = vld [vmem:[%s27058_s3 + $0x8c8] ss:$16 sps:$4 sm:$0xff]  }
 0x817   :  { %9153 = vmatprep.subr.bf16.mxu1 %v19372_v58  ;;  %v19384_v58 = vld [vmem:[%s27058_s3 + $0x8ec] ss:$16 sps:$4 sm:$0xff]  }
 0x81a   :  { %9154 = vmatpush1.bf16.msra.mxu1 %v19370_v37  ;;  %v19382_v37 = vld [vmem:[%s27058_s3 + $0x8e8] ss:$16 sps:$4 sm:$0xff]  }
 0x81b   :  { %9155 = vmatprep.subr.bf16.mxu1 %v19375_v62  ;;  %v19387_v62 = vld [vmem:[%s27058_s3 + $0x904] ss:$16 sps:$4 sm:$0xff]  }
 0x81d   :  { %9007 = vmatmul.mubr.bf16.gmra.mrb[104].mxu1 %v28211_v35 }
 0x81e   :  { %9016 = vmatprep.mubr.bf16.mxu1 %v28212_v15  ;;  %9156 = vmatpush1.bf16.msra.mxu1 %v19373_v45  ;;  %v19385_v45 = vld [vmem:[%s27058_s3 + $0x900] ss:$16 sps:$4 sm:$0xff]  }
 0x81f   :  { %9157 = vmatprep.subr.bf16.mxu1 %v19378_v20  ;;  %v19390_v20 = vld [vmem:[%s27058_s3 + $0x924] ss:$16 sps:$4 sm:$0xff]  }
 0x822   :  { %9158 = vmatpush1.bf16.msra.mxu1 %v19376_v50  ;;  %v19388_v50 = vld [vmem:[%s27058_s3 + $0x920] ss:$16 sps:$4 sm:$0xff]  }
 0x823   :  { %9159 = vmatprep.subr.bf16.mxu1 %v19381_v22  ;;  %v19393_v22 = vld [vmem:[%s27058_s3 + $0x944] ss:$16 sps:$4 sm:$0xff]  }
 0x825   :  { %9017 = vmatmul.mubr.bf16.gmra.mrb[108].mxu1 %v28060_v48 }
 0x826   :  { %9026 = vmatprep.mubr.bf16.mxu1 %v23007_v9  ;;  %9160 = vmatpush1.bf16.msra.mxu1 %v19379_v57  ;;  %v19391_v57 = vld [vmem:[%s27058_s3 + $0x940] ss:$16 sps:$4 sm:$0xff]  }
 0x827   :  { %9161 = vmatprep.subr.bf16.mxu1 %v19384_v58  ;;  %v19394_v58 = vld [vmem:[%s27058_s3 + $0x960] ss:$16 sps:$4 sm:$0xff]  }
 0x82a   :  { %9162 = vmatpush1.bf16.msra.mxu1 %v19382_v37  ;;  %v19399_v37 = vld [vmem:[%s27058_s3 + $0x984] ss:$16 sps:$4 sm:$0xff]  }
 0x82b   :  { %10349 = vmatprep.subr.bf16.mxu1 %v19387_v62  ;;  %v19397_v62 = vld [vmem:[%s27058_s3 + $0x980] ss:$16 sps:$4 sm:$0xff]  }
 0x82d   :  { %9027 = vmatmul.mubr.bf16.gmra.mrb[112].mxu1 %v28061_v19 }
 0x82e   :  { %9036 = vmatprep.mubr.bf16.mxu1 %v23048_v52 }
 0x835   :  { %9037 = vmatmul.mubr.bf16.gmra.mrb[116].mxu1 %v28069_v29 }
 0x836   :  { %9046 = vmatprep.mubr.bf16.mxu1 %v28213_v44 }
 0x83d   :  { %9047 = vmatmul.mubr.bf16.gmra.mrb[120].mxu1 %v28214_v34 }
 0x83e   :  { %9056 = vmatprep.mubr.bf16.mxu1 %v28215_v38 }
 0x845   :  { %9057 = vmatmul.mubr.bf16.gmra.mrb[124].mxu1 %v28084_v25 }
 0x846   :  { %9066 = vmatprep.mubr.bf16.mxu1 %v23271_v55 }
 0x84d   :  { %9067 = vmatmul.mubr.bf16.gmra.mrb[0].mxu1 %v28085_v61 }
 0x84e   :  { %9076 = vmatprep.mubr.bf16.mxu1 %v23295_v4 }
 0x855   :  { %9077 = vmatmul.mubr.bf16.gmra.mrb[4].mxu1 %v28224_v5 }
 0x856   :  { %9086 = vmatprep.mubr.bf16.mxu1 %v28225_v13 }
 0x85d   :  { %9087 = vmatmul.mubr.bf16.gmra.mrb[8].mxu1 %v28230_v24 }
 0x85e   :  { %9096 = vmatprep.mubr.bf16.mxu1 %v28231_v53 }
 0x865   :  { %9097 = vmatmul.mubr.bf16.gmra.mrb[12].mxu1 %v28114_v23 }
 0x866   :  { %9106 = vmatprep.mubr.bf16.mxu1 %v23408_v3 }
 0x86d   :  { %9107 = vmatmul.mubr.bf16.gmra.mrb[16].mxu1 %v28203_v36 }
 0x86e   :  { %9116 = vmatprep.mubr.bf16.mxu1 %v23445_v7 }
 0x875   :  { %9117 = vmatmul.mubr.bf16.gmra.mrb[20].mxu1 %v28204_v51 }
 0x876   :  { %9126 = vmatprep.mubr.bf16.mxu1 %v28345_v63 }
 0x87d   :  { %9127 = vmatmul.mubr.bf16.gmra.mrb[24].mxu1 %v28346_v40 }
 0x87e   :  { %9136 = vmatprep.mubr.bf16.mxu1 %v28347_v26 }
 0x885   :  { %9137 = vmatmul.mubr.bf16.gmra.mrb[28].mxu1 %v28348_v28 }
 0x886   :  { %9179 = vmatprep.mubr.bf16.mxu1 %v28018_v16 }
 0x88d   :  { %9180 = vmatmul.mubr.bf16.vlgmr.msra.gmra.mrb[96].mxu1 %v28147_v10  ;;  %v19396_v10 = vld [vmem:[%s27058_s3 + $0x964] ss:$16 sps:$4 sm:$0xff]  }
 0x88e   :  { %10350 = vmatpush1.bf16.msra.mxu1 %v19385_v45  ;;  %9189 = vmatprep.mubr.bf16.mxu1 %v28018_v16  ;;  %v19400_v45 = vld [vmem:[%s27058_s3 + $0x9a0] ss:$16 sps:$4 sm:$0xff]  }
 0x88f   :  { %10351 = vmatprep.subr.bf16.mxu1 %v19390_v20  ;;  %v19405_v20 = vld [vmem:[%s27058_s3 + $0x9c4] ss:$16 sps:$4 sm:$0xff]  }
 0x892   :  { %10352 = vmatpush1.bf16.msra.mxu1 %v19388_v50  ;;  %v19403_v50 = vld [vmem:[%s27058_s3 + $0x9c0] ss:$16 sps:$4 sm:$0xff]  }
 0x893   :  { %10353 = vmatprep.subr.bf16.mxu1 %v19393_v22  ;;  %v19408_v22 = vld [vmem:[%s27058_s3 + $0x9e4] ss:$16 sps:$4 sm:$0xff]  }
 0x895   :  { %9190 = vmatmul.mubr.bf16.gmra.mrb[100].mxu1 %v28157_v59  ;;  %v19402_v59 = vld [vmem:[%s27058_s3 + $0x9a4] ss:$16 sps:$4 sm:$0xff]  }
 0x896   :  { %9199 = vmatprep.mubr.bf16.mxu1 %v28018_v16  ;;  %10354 = vmatpush1.bf16.msra.mxu1 %v19391_v57  ;;  %v19406_v57 = vld [vmem:[%s27058_s3 + $0x9e0] ss:$16 sps:$4 sm:$0xff]  }
 0x897   :  { %10355 = vmatprep.subr.bf16.mxu1 %v19396_v10  ;;  %v19411_v10 = vld [vmem:[%s27058_s3 + $0xa04] ss:$16 sps:$4 sm:$0xff]  }
 0x89a   :  { %10356 = vmatpush1.bf16.msra.mxu1 %v19394_v58  ;;  %v19409_v58 = vld [vmem:[%s27058_s3 + $0xa00] ss:$16 sps:$4 sm:$0xff]  }
 0x89b   :  { %10357 = vmatprep.subr.bf16.mxu1 %v19399_v37  ;;  %v19414_v37 = vld [vmem:[%s27058_s3 + $0xa24] ss:$16 sps:$4 sm:$0xff]  }
 0x89d   :  { %9200 = vmatmul.mubr.bf16.gmra.mrb[104].mxu1 %v28172_v1 }
 0x89e   :  { %9209 = vmatprep.mubr.bf16.mxu1 %v28018_v16  ;;  %10358 = vmatpush1.bf16.msra.mxu1 %v19397_v62  ;;  %v19412_v62 = vld [vmem:[%s27058_s3 + $0xa20] ss:$16 sps:$4 sm:$0xff]  }
 0x89f   :  { %10359 = vmatprep.subr.bf16.mxu1 %v19402_v59  ;;  %v19417_v59 = vld [vmem:[%s27058_s3 + $0xa44] ss:$16 sps:$4 sm:$0xff]  }
 0x8a2   :  { %10360 = vmatpush1.bf16.msra.mxu1 %v19400_v45  ;;  %v19415_v45 = vld [vmem:[%s27058_s3 + $0xa40] ss:$16 sps:$4 sm:$0xff]  }
 0x8a3   :  { %10361 = vmatprep.subr.bf16.mxu1 %v19405_v20  ;;  %v19420_v20 = vld [vmem:[%s27058_s3 + $0xa64] ss:$16 sps:$4 sm:$0xff]  }
 0x8a5   :  { %9210 = vmatmul.mubr.bf16.gmra.mrb[108].mxu1 %v28178_v14 }
 0x8a6   :  { %9219 = vmatprep.mubr.bf16.mxu1 %v28018_v16  ;;  %10362 = vmatpush1.bf16.msra.mxu1 %v19403_v50  ;;  %v19418_v50 = vld [vmem:[%s27058_s3 + $0xa60] ss:$16 sps:$4 sm:$0xff]  }
 0x8a7   :  { %10363 = vmatprep.subr.bf16.mxu1 %v19408_v22  ;;  %v19423_v22 = vld [vmem:[%s27058_s3 + $0xa84] ss:$16 sps:$4 sm:$0xff]  }
 0x8aa   :  { %10364 = vmatpush1.bf16.msra.mxu1 %v19406_v57  ;;  %v19421_v57 = vld [vmem:[%s27058_s3 + $0xa80] ss:$16 sps:$4 sm:$0xff]  }
 0x8ab   :  { %10365 = vmatprep.subr.bf16.mxu1 %v19411_v10  ;;  %v19426_v10 = vld [vmem:[%s27058_s3 + $0xaa4] ss:$16 sps:$4 sm:$0xff]  }
 0x8ad   :  { %9220 = vmatmul.mubr.bf16.gmra.mrb[112].mxu1 %v23015_v60 }
 0x8ae   :  { %9229 = vmatprep.mubr.bf16.mxu1 %v28018_v16  ;;  %10366 = vmatpush1.bf16.msra.mxu1 %v19409_v58  ;;  %v19424_v58 = vld [vmem:[%s27058_s3 + $0xaa0] ss:$16 sps:$4 sm:$0xff]  }
 0x8af   :  { %10367 = vmatprep.subr.bf16.mxu1 %v19414_v37  ;;  %v19429_v37 = vld [vmem:[%s27058_s3 + $0xac4] ss:$16 sps:$4 sm:$0xff]  }
 0x8b2   :  { %10368 = vmatpush1.bf16.msra.mxu1 %v19412_v62  ;;  %v19427_v62 = vld [vmem:[%s27058_s3 + $0xac0] ss:$16 sps:$4 sm:$0xff]  }
 0x8b3   :  { %10369 = vmatprep.subr.bf16.mxu1 %v19417_v59  ;;  %v19432_v59 = vld [vmem:[%s27058_s3 + $0xae4] ss:$16 sps:$4 sm:$0xff]  }
 0x8b5   :  { %9230 = vmatmul.mubr.bf16.gmra.mrb[116].mxu1 %v23053_v0 }
 0x8b6   :  { %9239 = vmatprep.mubr.bf16.mxu1 %v28018_v16  ;;  %10370 = vmatpush1.bf16.msra.mxu1 %v19415_v45  ;;  %v19430_v45 = vld [vmem:[%s27058_s3 + $0xae0] ss:$16 sps:$4 sm:$0xff]  }
 0x8b7   :  { %10371 = vmatprep.subr.bf16.mxu1 %v19420_v20  ;;  %v19435_v20 = vld [vmem:[%s27058_s3 + $0xb04] ss:$16 sps:$4 sm:$0xff]  }
 0x8ba   :  { %10372 = vmatpush1.bf16.msra.mxu1 %v19418_v50  ;;  %v19433_v50 = vld [vmem:[%s27058_s3 + $0xb00] ss:$16 sps:$4 sm:$0xff]  }
 0x8bb   :  { %10373 = vmatprep.subr.bf16.mxu1 %v19423_v22  ;;  %v19438_v22 = vld [vmem:[%s27058_s3 + $0xb24] ss:$16 sps:$4 sm:$0xff]  }
 0x8bd   :  { %9240 = vmatmul.mubr.bf16.gmra.mrb[120].mxu1 %v23157_v42 }
 0x8be   :  { %9249 = vmatprep.mubr.bf16.mxu1 %v28018_v16  ;;  %10374 = vmatpush1.bf16.msra.mxu1 %v19421_v57  ;;  %v19436_v57 = vld [vmem:[%s27058_s3 + $0xb20] ss:$16 sps:$4 sm:$0xff]  }
 0x8bf   :  { %10375 = vmatprep.subr.bf16.mxu1 %v19426_v10  ;;  %v19441_v10 = vld [vmem:[%s27058_s3 + $0xb44] ss:$16 sps:$4 sm:$0xff]  }
 0x8c2   :  { %10376 = vmatpush1.bf16.msra.mxu1 %v19424_v58  ;;  %v19439_v58 = vld [vmem:[%s27058_s3 + $0xb40] ss:$16 sps:$4 sm:$0xff]  }
 0x8c3   :  { %10377 = vmatprep.subr.bf16.mxu1 %v19429_v37  ;;  %v19444_v37 = vld [vmem:[%s27058_s3 + $0xb64] ss:$16 sps:$4 sm:$0xff]  }
 0x8c5   :  { %9250 = vmatmul.mubr.bf16.gmra.mrb[124].mxu1 %v23203_v11 }
 0x8c6   :  { %9259 = vmatprep.mubr.bf16.mxu1 %v28018_v16  ;;  %10378 = vmatpush1.bf16.msra.mxu1 %v19427_v62  ;;  %v19442_v62 = vld [vmem:[%s27058_s3 + $0xb60] ss:$16 sps:$4 sm:$0xff]  }
 0x8c7   :  { %10379 = vmatprep.subr.bf16.mxu1 %v19432_v59  ;;  %v19447_v59 = vld [vmem:[%s27058_s3 + $0xb84] ss:$16 sps:$4 sm:$0xff]  }
 0x8ca   :  { %10380 = vmatpush1.bf16.msra.mxu1 %v19430_v45  ;;  %v19445_v45 = vld [vmem:[%s27058_s3 + $0xb80] ss:$16 sps:$4 sm:$0xff]  }
 0x8cb   :  { %10542 = vmatprep.subr.bf16.mxu1 %v19435_v20  ;;  %v19450_v20 = vld [vmem:[%s27058_s3 + $0xba4] ss:$16 sps:$4 sm:$0xff]  }
 0x8cd   :  { %9260 = vmatmul.mubr.bf16.gmra.mrb[0].mxu1 %v23276_v2 }
 0x8ce   :  { %9269 = vmatprep.mubr.bf16.mxu1 %v28018_v16 }
 0x8d5   :  { %9270 = vmatmul.mubr.bf16.gmra.mrb[4].mxu1 %v23297_v30 }
 0x8d6   :  { %9279 = vmatprep.mubr.bf16.mxu1 %v28018_v16 }
 0x8dd   :  { %9280 = vmatmul.mubr.bf16.gmra.mrb[8].mxu1 %v23331_v17 }
 0x8de   :  { %9289 = vmatprep.mubr.bf16.mxu1 %v28018_v16 }
 0x8e5   :  { %9290 = vmatmul.mubr.bf16.gmra.mrb[12].mxu1 %v23352_v27 }
 0x8e6   :  { %9299 = vmatprep.mubr.bf16.mxu1 %v28018_v16 }
 0x8ed   :  { %9300 = vmatmul.mubr.bf16.gmra.mrb[16].mxu1 %v28216_v43 }
 0x8ee   :  { %9309 = vmatprep.mubr.bf16.mxu1 %v28018_v16 }
 0x8f5   :  { %9310 = vmatmul.mubr.bf16.gmra.mrb[20].mxu1 %v28217_v8 }
 0x8f6   :  { %9319 = vmatprep.mubr.bf16.mxu1 %v28018_v16 }
 0x8fd   :  { %9320 = vmatmul.mubr.bf16.gmra.mrb[24].mxu1 %v28349_v46 }
 0x8fe   :  { %9329 = vmatprep.mubr.bf16.mxu1 %v28018_v16 }
 0x905   :  { %9330 = vmatmul.mubr.bf16.gmra.mrb[28].mxu1 %v28350_v31 }
 0x906   :  { %10381 = vmatprep.mubr.bf16.mxu1 %v28210_v47 }
 0x90d   :  { %10382 = vmatmul.mubr.bf16.vlgmr.msra.gmra.mrb[32].mxu1 %v28211_v35 }
 0x90e   :  { %10391 = vmatprep.mubr.bf16.mxu1 %v28212_v15  ;;  %10543 = vmatpush1.bf16.msra.mxu1 %v19433_v50  ;;  %v19448_v50 = vld [vmem:[%s27058_s3 + $0xba0] ss:$16 sps:$4 sm:$0xff]  }
 0x90f   :  { %10544 = vmatprep.subr.bf16.mxu1 %v19438_v22  ;;  %v19453_v22 = vld [vmem:[%s27058_s3 + $0xbc4] ss:$16 sps:$4 sm:$0xff]  }
 0x912   :  { %10545 = vmatpush1.bf16.msra.mxu1 %v19436_v57  ;;  %v19451_v57 = vld [vmem:[%s27058_s3 + $0xbc0] ss:$16 sps:$4 sm:$0xff]  }
 0x913   :  { %10546 = vmatprep.subr.bf16.mxu1 %v19441_v10  ;;  %v19456_v10 = vld [vmem:[%s27058_s3 + $0xbe4] ss:$16 sps:$4 sm:$0xff]  }
 0x915   :  { %10392 = vmatmul.mubr.bf16.gmra.mrb[36].mxu1 %v28060_v48 }
 0x916   :  { %10401 = vmatprep.mubr.bf16.mxu1 %v23007_v9  ;;  %10547 = vmatpush1.bf16.msra.mxu1 %v19439_v58  ;;  %v19454_v58 = vld [vmem:[%s27058_s3 + $0xbe0] ss:$16 sps:$4 sm:$0xff]  }
 0x917   :  { %10548 = vmatprep.subr.bf16.mxu1 %v19444_v37  ;;  %v19459_v37 = vld [vmem:[%s27058_s3 + $0x90c] ss:$16 sps:$4 sm:$0xff]  }
 0x91a   :  { %10549 = vmatpush1.bf16.msra.mxu1 %v19442_v62  ;;  %v28351_v62 = vld [vmem:[#allocation36_spill] sm:$0xff] }
 0x91b   :  { %10550 = vmatprep.subr.bf16.mxu1 %v19447_v59  ;;  %v28352_v59 = vld [vmem:[#allocation129_spill] sm:$0xff] }
 0x91d   :  { %10402 = vmatmul.mubr.bf16.gmra.mrb[40].mxu1 %v28061_v19 }
 0x91e   :  { %10411 = vmatprep.mubr.bf16.mxu1 %v23048_v52  ;;  %10551 = vmatpush1.bf16.msra.mxu1 %v19445_v45  ;;  %v28353_v45 = vld [vmem:[#allocation14_spill] sm:$0xff] }
 0x91f   :  { %10552 = vmatprep.subr.bf16.mxu1 %v19450_v20  ;;  %v28354_v20 = vld [vmem:[#allocation172_spill] sm:$0xff] }
 0x922   :  { %10553 = vmatpush1.bf16.msra.mxu1 %v19448_v50  ;;  %v19457_v50 = vld [vmem:[%s27058_s3 + $0x908] ss:$16 sps:$4 sm:$0xff]  }
 0x923   :  { %10554 = vmatprep.subr.bf16.mxu1 %v19453_v22  ;;  %v19462_v22 = vld [vmem:[%s27058_s3 + $0x92c] ss:$16 sps:$4 sm:$0xff]  }
 0x925   :  { %10412 = vmatmul.mubr.bf16.gmra.mrb[44].mxu1 %v28069_v29 }
 0x926   :  { %10421 = vmatprep.mubr.bf16.mxu1 %v28213_v44  ;;  %10555 = vmatpush1.bf16.msra.mxu1 %v19451_v57  ;;  %v19460_v57 = vld [vmem:[%s27058_s3 + $0x928] ss:$16 sps:$4 sm:$0xff]  }
 0x927   :  { %10556 = vmatprep.subr.bf16.mxu1 %v19456_v10  ;;  %v19465_v10 = vld [vmem:[%s27058_s3 + $0x94c] ss:$16 sps:$4 sm:$0xff]  }
 0x92a   :  { %10557 = vmatpush1.bf16.msra.mxu1 %v19454_v58  ;;  %v19463_v58 = vld [vmem:[%s27058_s3 + $0x948] ss:$16 sps:$4 sm:$0xff]  }
 0x92b   :  { %10735 = vmatprep.subr.bf16.mxu1 %v19459_v37  ;;  %v19468_v37 = vld [vmem:[%s27058_s3 + $0x96c] ss:$16 sps:$4 sm:$0xff]  }
 0x92d   :  { %10422 = vmatmul.mubr.bf16.gmra.mrb[48].mxu1 %v28214_v34 }
 0x92e   :  { %10431 = vmatprep.mubr.bf16.mxu1 %v28215_v38 }
 0x935   :  { %10432 = vmatmul.mubr.bf16.gmra.mrb[52].mxu1 %v28084_v25 }
 0x936   :  { %10441 = vmatprep.mubr.bf16.mxu1 %v23271_v55 }
 0x93d   :  { %10442 = vmatmul.mubr.bf16.gmra.mrb[56].mxu1 %v28085_v61 }
 0x93e   :  { %10451 = vmatprep.mubr.bf16.mxu1 %v23295_v4 }
 0x945   :  { %10452 = vmatmul.mubr.bf16.gmra.mrb[60].mxu1 %v28224_v5 }
 0x946   :  { %10461 = vmatprep.mubr.bf16.mxu1 %v28225_v13 }
 0x94d   :  { %10462 = vmatmul.mubr.bf16.gmra.mrb[64].mxu1 %v28230_v24 }
 0x94e   :  { %10471 = vmatprep.mubr.bf16.mxu1 %v28231_v53 }
 0x955   :  { %10472 = vmatmul.mubr.bf16.gmra.mrb[68].mxu1 %v28114_v23 }
 0x956   :  { %10481 = vmatprep.mubr.bf16.mxu1 %v23408_v3 }
 0x95d   :  { %10482 = vmatmul.mubr.bf16.gmra.mrb[72].mxu1 %v28203_v36 }
 0x95e   :  { %10491 = vmatprep.mubr.bf16.mxu1 %v23445_v7 }
 0x965   :  { %10492 = vmatmul.mubr.bf16.gmra.mrb[76].mxu1 %v28204_v51 }
 0x966   :  { %10501 = vmatprep.mubr.bf16.mxu1 %v28345_v63 }
 0x96d   :  { %10502 = vmatmul.mubr.bf16.gmra.mrb[80].mxu1 %v28346_v40 }
 0x96e   :  { %10511 = vmatprep.mubr.bf16.mxu1 %v28347_v26 }
 0x975   :  { %10512 = vmatmul.mubr.bf16.gmra.mrb[84].mxu1 %v28348_v28 }
 0x976   :  { %10521 = vmatprep.mubr.bf16.mxu1 %v28351_v62 }
 0x97d   :  { %10522 = vmatmul.mubr.bf16.gmra.mrb[88].mxu1 %v28352_v59 }
 0x97e   :  { %10531 = vmatprep.mubr.bf16.mxu1 %v28353_v45 }
 0x985   :  { %10532 = vmatmul.mubr.bf16.gmra.mrb[92].mxu1 %v28354_v20 }
 0x986   :  { %10574 = vmatprep.mubr.bf16.mxu1 %v28018_v16 }
 0x98d   :  { %10575 = vmatmul.mubr.bf16.vlgmr.msra.gmra.mrb[32].mxu1 %v28172_v1 }
 0x98e   :  { %10736 = vmatpush1.bf16.msra.mxu1 %v19457_v50  ;;  %10584 = vmatprep.mubr.bf16.mxu1 %v28018_v16  ;;  %v19466_v50 = vld [vmem:[%s27058_s3 + $0x968] ss:$16 sps:$4 sm:$0xff]  }
 0x98f   :  { %10737 = vmatprep.subr.bf16.mxu1 %v19462_v22  ;;  %v19471_v22 = vld [vmem:[%s27058_s3 + $0x98c] ss:$16 sps:$4 sm:$0xff]  }
 0x992   :  { %10738 = vmatpush1.bf16.msra.mxu1 %v19460_v57  ;;  %v19469_v57 = vld [vmem:[%s27058_s3 + $0x988] ss:$16 sps:$4 sm:$0xff]  }
 0x993   :  { %10739 = vmatprep.subr.bf16.mxu1 %v19465_v10  ;;  %v19474_v10 = vld [vmem:[%s27058_s3 + $0x9ac] ss:$16 sps:$4 sm:$0xff]  }
 0x995   :  { %10585 = vmatmul.mubr.bf16.gmra.mrb[36].mxu1 %v28178_v14 }
 0x996   :  { %10594 = vmatprep.mubr.bf16.mxu1 %v28018_v16  ;;  %10740 = vmatpush1.bf16.msra.mxu1 %v19463_v58  ;;  %v19472_v58 = vld [vmem:[%s27058_s3 + $0x9a8] ss:$16 sps:$4 sm:$0xff]  }
 0x997   :  { %10741 = vmatprep.subr.bf16.mxu1 %v19468_v37  ;;  %v19477_v37 = vld [vmem:[%s27058_s3 + $0x9cc] ss:$16 sps:$4 sm:$0xff]  }
 0x99a   :  { %10742 = vmatpush1.bf16.msra.mxu1 %v19466_v50  ;;  %v19475_v50 = vld [vmem:[%s27058_s3 + $0x9c8] ss:$16 sps:$4 sm:$0xff]  }
 0x99b   :  { %10743 = vmatprep.subr.bf16.mxu1 %v19471_v22  ;;  %v19480_v22 = vld [vmem:[%s27058_s3 + $0x9ec] ss:$16 sps:$4 sm:$0xff]  }
 0x99d   :  { %10595 = vmatmul.mubr.bf16.gmra.mrb[40].mxu1 %v23015_v60 }
 0x99e   :  { %10604 = vmatprep.mubr.bf16.mxu1 %v28018_v16  ;;  %10744 = vmatpush1.bf16.msra.mxu1 %v19469_v57  ;;  %v19478_v57 = vld [vmem:[%s27058_s3 + $0x9e8] ss:$16 sps:$4 sm:$0xff]  }
 0x99f   :  { %10745 = vmatprep.subr.bf16.mxu1 %v19474_v10  ;;  %v19483_v10 = vld [vmem:[%s27058_s3 + $0xa0c] ss:$16 sps:$4 sm:$0xff]  }
 0x9a2   :  { %10746 = vmatpush1.bf16.msra.mxu1 %v19472_v58  ;;  %v19481_v58 = vld [vmem:[%s27058_s3 + $0xa08] ss:$16 sps:$4 sm:$0xff]  }
 0x9a3   :  { %10747 = vmatprep.subr.bf16.mxu1 %v19477_v37  ;;  %v19486_v37 = vld [vmem:[%s27058_s3 + $0xa2c] ss:$16 sps:$4 sm:$0xff]  }
 0x9a5   :  { %10605 = vmatmul.mubr.bf16.gmra.mrb[44].mxu1 %v23053_v0 }
 0x9a6   :  { %10614 = vmatprep.mubr.bf16.mxu1 %v28018_v16  ;;  %10748 = vmatpush1.bf16.msra.mxu1 %v19475_v50  ;;  %v19484_v50 = vld [vmem:[%s27058_s3 + $0xa28] ss:$16 sps:$4 sm:$0xff]  }
 0x9a7   :  { %10749 = vmatprep.subr.bf16.mxu1 %v19480_v22  ;;  %v19489_v22 = vld [vmem:[%s27058_s3 + $0xa4c] ss:$16 sps:$4 sm:$0xff]  }
 0x9aa   :  { %10750 = vmatpush1.bf16.msra.mxu1 %v19478_v57  ;;  %v19487_v57 = vld [vmem:[%s27058_s3 + $0xa48] ss:$16 sps:$4 sm:$0xff]  }
 0x9ab   :  { %10751 = vmatprep.subr.bf16.mxu1 %v19483_v10  ;;  %v19492_v10 = vld [vmem:[%s27058_s3 + $0xa6c] ss:$16 sps:$4 sm:$0xff]  }
 0x9ad   :  { %10615 = vmatmul.mubr.bf16.gmra.mrb[48].mxu1 %v23157_v42 }
 0x9ae   :  { %10624 = vmatprep.mubr.bf16.mxu1 %v28018_v16  ;;  %10752 = vmatpush1.bf16.msra.mxu1 %v19481_v58  ;;  %v19490_v58 = vld [vmem:[%s27058_s3 + $0xa68] ss:$16 sps:$4 sm:$0xff]  }
 0x9af   :  { %10753 = vmatprep.subr.bf16.mxu1 %v19486_v37  ;;  %v19495_v37 = vld [vmem:[%s27058_s3 + $0xa8c] ss:$16 sps:$4 sm:$0xff]  }
 0x9b2   :  { %10754 = vmatpush1.bf16.msra.mxu1 %v19484_v50  ;;  %v19493_v50 = vld [vmem:[%s27058_s3 + $0xa88] ss:$16 sps:$4 sm:$0xff]  }
 0x9b3   :  { %10755 = vmatprep.subr.bf16.mxu1 %v19489_v22  ;;  %v19498_v22 = vld [vmem:[%s27058_s3 + $0xaac] ss:$16 sps:$4 sm:$0xff]  }
 0x9b5   :  { %10625 = vmatmul.mubr.bf16.gmra.mrb[52].mxu1 %v23203_v11 }
 0x9b6   :  { %10634 = vmatprep.mubr.bf16.mxu1 %v28018_v16  ;;  %10756 = vmatpush1.bf16.msra.mxu1 %v19487_v57  ;;  %v19496_v57 = vld [vmem:[%s27058_s3 + $0xaa8] ss:$16 sps:$4 sm:$0xff]  }
 0x9b7   :  { %10757 = vmatprep.subr.bf16.mxu1 %v19492_v10  ;;  %v19501_v10 = vld [vmem:[%s27058_s3 + $0xacc] ss:$16 sps:$4 sm:$0xff]  }
 0x9ba   :  { %10758 = vmatpush1.bf16.msra.mxu1 %v19490_v58  ;;  %v19499_v58 = vld [vmem:[%s27058_s3 + $0xac8] ss:$16 sps:$4 sm:$0xff]  }
 0x9bb   :  { %10759 = vmatprep.subr.bf16.mxu1 %v19495_v37  ;;  %v19504_v37 = vld [vmem:[%s27058_s3 + $0xaec] ss:$16 sps:$4 sm:$0xff]  }
 0x9bd   :  { %10635 = vmatmul.mubr.bf16.gmra.mrb[56].mxu1 %v23276_v2 }
 0x9be   :  { %10644 = vmatprep.mubr.bf16.mxu1 %v28018_v16  ;;  %10760 = vmatpush1.bf16.msra.mxu1 %v19493_v50  ;;  %v19502_v50 = vld [vmem:[%s27058_s3 + $0xae8] ss:$16 sps:$4 sm:$0xff]  }
 0x9bf   :  { %10761 = vmatprep.subr.bf16.mxu1 %v19498_v22  ;;  %v19507_v22 = vld [vmem:[%s27058_s3 + $0xb0c] ss:$16 sps:$4 sm:$0xff]  }
 0x9c2   :  { %10762 = vmatpush1.bf16.msra.mxu1 %v19496_v57  ;;  %v28355_v57 = vld [vmem:[#allocation48_spill] sm:$0xff] }
 0x9c3   :  { %10763 = vmatprep.subr.bf16.mxu1 %v19501_v10  ;;  %v28356_v10 = vld [vmem:[#allocation31_spill] sm:$0xff] }
 0x9c5   :  { %10645 = vmatmul.mubr.bf16.gmra.mrb[60].mxu1 %v23297_v30 }
 0x9c6   :  { %10654 = vmatprep.mubr.bf16.mxu1 %v28018_v16  ;;  %10764 = vmatpush1.bf16.msra.mxu1 %v19499_v58  ;;  %v19505_v58 = vld [vmem:[%s27058_s3 + $0xb08] ss:$16 sps:$4 sm:$0xff]  }
 0x9c7   :  { %10765 = vmatprep.subr.bf16.mxu1 %v19504_v37  ;;  %v19510_v37 = vld [vmem:[%s27058_s3 + $0xb2c] ss:$16 sps:$4 sm:$0xff]  }
 0x9ca   :  { %10766 = vmatpush1.bf16.msra.mxu1 %v19502_v50  ;;  %v19508_v50 = vld [vmem:[%s27058_s3 + $0xb28] ss:$16 sps:$4 sm:$0xff]  }
 0x9cb   :  { %10928 = vmatprep.subr.bf16.mxu1 %v19507_v22  ;;  %v19511_v22 = vld [vmem:[%s27058_s3 + $0xb48] ss:$16 sps:$4 sm:$0xff]  }
 0x9cd   :  { %10655 = vmatmul.mubr.bf16.gmra.mrb[64].mxu1 %v23331_v17 }
 0x9ce   :  { %10664 = vmatprep.mubr.bf16.mxu1 %v28018_v16 }
 0x9d5   :  { %10665 = vmatmul.mubr.bf16.gmra.mrb[68].mxu1 %v23352_v27 }
 0x9d6   :  { %10674 = vmatprep.mubr.bf16.mxu1 %v28018_v16 }
 0x9dd   :  { %10675 = vmatmul.mubr.bf16.gmra.mrb[72].mxu1 %v28216_v43 }
 0x9de   :  { %10684 = vmatprep.mubr.bf16.mxu1 %v28018_v16 }
 0x9e5   :  { %10685 = vmatmul.mubr.bf16.gmra.mrb[76].mxu1 %v28217_v8 }
 0x9e6   :  { %10694 = vmatprep.mubr.bf16.mxu1 %v28018_v16 }
 0x9ed   :  { %10695 = vmatmul.mubr.bf16.gmra.mrb[80].mxu1 %v28349_v46 }
 0x9ee   :  { %10704 = vmatprep.mubr.bf16.mxu1 %v28018_v16 }
 0x9f5   :  { %10705 = vmatmul.mubr.bf16.gmra.mrb[84].mxu1 %v28350_v31 }
 0x9f6   :  { %10714 = vmatprep.mubr.bf16.mxu1 %v28018_v16 }
 0x9fd   :  { %10715 = vmatmul.mubr.bf16.gmra.mrb[88].mxu1 %v28355_v57 }
 0x9fe   :  { %10724 = vmatprep.mubr.bf16.mxu1 %v28018_v16 }
 0xa05   :  { %10725 = vmatmul.mubr.bf16.gmra.mrb[92].mxu1 %v28356_v10 }
 0xa06   :  { %10767 = vmatprep.mubr.bf16.mxu1 %v28210_v47  ;;  %v19513_v47 = vld [vmem:[%s27058_s3 + $0xb4c] ss:$16 sps:$4 sm:$0xff]  }
 0xa0d   :  { %10768 = vmatmul.mubr.bf16.vlgmr.msra.gmra.mrb[96].mxu1 %v28211_v35  ;;  %v19516_v35 = vld [vmem:[%s27058_s3 + $0xb6c] ss:$16 sps:$4 sm:$0xff]  }
 0xa0e   :  { %10777 = vmatprep.mubr.bf16.mxu1 %v28212_v15  ;;  %10929 = vmatpush1.bf16.msra.mxu1 %v19505_v58  ;;  %v19514_v15 = vld [vmem:[%s27058_s3 + $0xb68] ss:$16 sps:$4 sm:$0xff]   ;;  %v19519_v58 = vld [vmem:[%s27058_s3 + $0xb8c] ss:$16 sps:$4 sm:$0xff]  }
 0xa0f   :  { %10930 = vmatprep.subr.bf16.mxu1 %v19510_v37  ;;  %v19517_v37 = vld [vmem:[%s27058_s3 + $0xb88] ss:$16 sps:$4 sm:$0xff]  }
 0xa12   :  { %10931 = vmatpush1.bf16.msra.mxu1 %v19508_v50  ;;  %v19520_v50 = vld [vmem:[%s27058_s3 + $0xba8] ss:$16 sps:$4 sm:$0xff]  }
 0xa13   :  { %10932 = vmatprep.subr.bf16.mxu1 %v19513_v47  ;;  %v19525_v47 = vld [vmem:[%s27058_s3 + $0xbcc] ss:$16 sps:$4 sm:$0xff]  }
 0xa15   :  { %10778 = vmatmul.mubr.bf16.gmra.mrb[100].mxu1 %v28060_v48  ;;  %v19522_v48 = vld [vmem:[%s27058_s3 + $0xbac] ss:$16 sps:$4 sm:$0xff]  }
 0xa16   :  { %10787 = vmatprep.mubr.bf16.mxu1 %v23007_v9  ;;  %10933 = vmatpush1.bf16.msra.mxu1 %v19511_v22  ;;  %v19523_v22 = vld [vmem:[%s27058_s3 + $0xbc8] ss:$16 sps:$4 sm:$0xff]  }
 0xa17   :  { %10934 = vmatprep.subr.bf16.mxu1 %v19516_v35  ;;  %v19528_v35 = vld [vmem:[%s27058_s3 + $0xbec] ss:$16 sps:$4 sm:$0xff]  }
 0xa1a   :  { %10935 = vmatpush1.bf16.msra.mxu1 %v19514_v15  ;;  %v19526_v15 = vld [vmem:[%s27058_s3 + $0xbe8] ss:$16 sps:$4 sm:$0xff]  }
 0xa1b   :  { %10936 = vmatprep.subr.bf16.mxu1 %v19519_v58  ;;  %v19531_v58 = vld [vmem:[%s27058_s3 + $0xc04] ss:$16 sps:$4 sm:$0xff]  }
 0xa1d   :  { %10788 = vmatmul.mubr.bf16.gmra.mrb[104].mxu1 %v28061_v19 }
 0xa1e   :  { %10797 = vmatprep.mubr.bf16.mxu1 %v23048_v52  ;;  %10937 = vmatpush1.bf16.msra.mxu1 %v19517_v37  ;;  %v19529_v37 = vld [vmem:[%s27058_s3 + $0xc00] ss:$16 sps:$4 sm:$0xff]  }
 0xa1f   :  { %10938 = vmatprep.subr.bf16.mxu1 %v19522_v48  ;;  %v19534_v48 = vld [vmem:[%s27058_s3 + $0xc24] ss:$16 sps:$4 sm:$0xff]  }
 0xa22   :  { %10939 = vmatpush1.bf16.msra.mxu1 %v19520_v50  ;;  %v19532_v50 = vld [vmem:[%s27058_s3 + $0xc20] ss:$16 sps:$4 sm:$0xff]  }
 0xa23   :  { %10940 = vmatprep.subr.bf16.mxu1 %v19525_v47  ;;  %v19537_v47 = vld [vmem:[%s27058_s3 + $0xc44] ss:$16 sps:$4 sm:$0xff]  }
 0xa25   :  { %10798 = vmatmul.mubr.bf16.gmra.mrb[108].mxu1 %v28069_v29 }
 0xa26   :  { %10807 = vmatprep.mubr.bf16.mxu1 %v28213_v44  ;;  %10941 = vmatpush1.bf16.msra.mxu1 %v19523_v22  ;;  %v19535_v22 = vld [vmem:[%s27058_s3 + $0xc40] ss:$16 sps:$4 sm:$0xff]  }
 0xa27   :  { %10942 = vmatprep.subr.bf16.mxu1 %v19528_v35  ;;  %v19538_v35 = vld [vmem:[%s27058_s3 + $0xc60] ss:$16 sps:$4 sm:$0xff]  }
 0xa2a   :  { %10943 = vmatpush1.bf16.msra.mxu1 %v19526_v15  ;;  %v19543_v15 = vld [vmem:[%s27058_s3 + $0xc84] ss:$16 sps:$4 sm:$0xff]  }
 0xa2b   :  { %12130 = vmatprep.subr.bf16.mxu1 %v19531_v58  ;;  %v19541_v58 = vld [vmem:[%s27058_s3 + $0xc80] ss:$16 sps:$4 sm:$0xff]  }
 0xa2d   :  { %10808 = vmatmul.mubr.bf16.gmra.mrb[112].mxu1 %v28214_v34 }
 0xa2e   :  { %10817 = vmatprep.mubr.bf16.mxu1 %v28215_v38 }
 0xa35   :  { %10818 = vmatmul.mubr.bf16.gmra.mrb[116].mxu1 %v28084_v25 }
 0xa36   :  { %10827 = vmatprep.mubr.bf16.mxu1 %v23271_v55 }
 0xa3d   :  { %10828 = vmatmul.mubr.bf16.gmra.mrb[120].mxu1 %v28085_v61 }
 0xa3e   :  { %10837 = vmatprep.mubr.bf16.mxu1 %v23295_v4 }
 0xa45   :  { %10838 = vmatmul.mubr.bf16.gmra.mrb[124].mxu1 %v28224_v5 }
 0xa46   :  { %10847 = vmatprep.mubr.bf16.mxu1 %v28225_v13 }
 0xa4d   :  { %10848 = vmatmul.mubr.bf16.gmra.mrb[0].mxu1 %v28230_v24 }
 0xa4e   :  { %10857 = vmatprep.mubr.bf16.mxu1 %v28231_v53 }
 0xa55   :  { %10858 = vmatmul.mubr.bf16.gmra.mrb[4].mxu1 %v28114_v23 }
 0xa56   :  { %10867 = vmatprep.mubr.bf16.mxu1 %v23408_v3 }
 0xa5d   :  { %10868 = vmatmul.mubr.bf16.gmra.mrb[8].mxu1 %v28203_v36 }
 0xa5e   :  { %10877 = vmatprep.mubr.bf16.mxu1 %v23445_v7 }
 0xa65   :  { %10878 = vmatmul.mubr.bf16.gmra.mrb[12].mxu1 %v28204_v51 }
 0xa66   :  { %10887 = vmatprep.mubr.bf16.mxu1 %v28345_v63 }
 0xa6d   :  { %10888 = vmatmul.mubr.bf16.gmra.mrb[16].mxu1 %v28346_v40 }
 0xa6e   :  { %10897 = vmatprep.mubr.bf16.mxu1 %v28347_v26 }
 0xa75   :  { %10898 = vmatmul.mubr.bf16.gmra.mrb[20].mxu1 %v28348_v28 }
 0xa76   :  { %10907 = vmatprep.mubr.bf16.mxu1 %v28351_v62 }
 0xa7d   :  { %10908 = vmatmul.mubr.bf16.gmra.mrb[24].mxu1 %v28352_v59 }
 0xa7e   :  { %10917 = vmatprep.mubr.bf16.mxu1 %v28353_v45 }
 0xa85   :  { %10918 = vmatmul.mubr.bf16.gmra.mrb[28].mxu1 %v28354_v20 }
 0xa86   :  { %10960 = vmatprep.mubr.bf16.mxu1 %v28018_v16 }
 0xa8d   :  { %10961 = vmatmul.mubr.bf16.vlgmr.msra.gmra.mrb[96].mxu1 %v28172_v1  ;;  %v19540_v1 = vld [vmem:[%s27058_s3 + $0xc64] ss:$16 sps:$4 sm:$0xff]  }
 0xa8e   :  { %12131 = vmatpush1.bf16.msra.mxu1 %v19529_v37  ;;  %10970 = vmatprep.mubr.bf16.mxu1 %v28018_v16  ;;  %v19544_v37 = vld [vmem:[%s27058_s3 + $0xca0] ss:$16 sps:$4 sm:$0xff]  }
 0xa8f   :  { %12132 = vmatprep.subr.bf16.mxu1 %v19534_v48  ;;  %v19549_v48 = vld [vmem:[%s27058_s3 + $0xcc4] ss:$16 sps:$4 sm:$0xff]  }
 0xa92   :  { %12133 = vmatpush1.bf16.msra.mxu1 %v19532_v50  ;;  %v19547_v50 = vld [vmem:[%s27058_s3 + $0xcc0] ss:$16 sps:$4 sm:$0xff]  }
 0xa93   :  { %12134 = vmatprep.subr.bf16.mxu1 %v19537_v47  ;;  %v19552_v47 = vld [vmem:[%s27058_s3 + $0xce4] ss:$16 sps:$4 sm:$0xff]  }
 0xa95   :  { %10971 = vmatmul.mubr.bf16.gmra.mrb[100].mxu1 %v28178_v14  ;;  %v19546_v14 = vld [vmem:[%s27058_s3 + $0xca4] ss:$16 sps:$4 sm:$0xff]  }
 0xa96   :  { %10980 = vmatprep.mubr.bf16.mxu1 %v28018_v16  ;;  %12135 = vmatpush1.bf16.msra.mxu1 %v19535_v22  ;;  %v19550_v22 = vld [vmem:[%s27058_s3 + $0xce0] ss:$16 sps:$4 sm:$0xff]  }
 0xa97   :  { %12136 = vmatprep.subr.bf16.mxu1 %v19540_v1  ;;  %v19555_v1 = vld [vmem:[%s27058_s3 + $0xd04] ss:$16 sps:$4 sm:$0xff]  }
 0xa9a   :  { %12137 = vmatpush1.bf16.msra.mxu1 %v19538_v35  ;;  %v19553_v35 = vld [vmem:[%s27058_s3 + $0xd00] ss:$16 sps:$4 sm:$0xff]  }
 0xa9b   :  { %12138 = vmatprep.subr.bf16.mxu1 %v19543_v15  ;;  %v19558_v15 = vld [vmem:[%s27058_s3 + $0xd24] ss:$16 sps:$4 sm:$0xff]  }
 0xa9d   :  { %10981 = vmatmul.mubr.bf16.gmra.mrb[104].mxu1 %v23015_v60 }
 0xa9e   :  { %10990 = vmatprep.mubr.bf16.mxu1 %v28018_v16  ;;  %12139 = vmatpush1.bf16.msra.mxu1 %v19541_v58  ;;  %v19556_v58 = vld [vmem:[%s27058_s3 + $0xd20] ss:$16 sps:$4 sm:$0xff]  }
 0xa9f   :  { %12140 = vmatprep.subr.bf16.mxu1 %v19546_v14  ;;  %v19561_v14 = vld [vmem:[%s27058_s3 + $0xd44] ss:$16 sps:$4 sm:$0xff]  }
 0xaa2   :  { %12141 = vmatpush1.bf16.msra.mxu1 %v19544_v37  ;;  %v19559_v37 = vld [vmem:[%s27058_s3 + $0xd40] ss:$16 sps:$4 sm:$0xff]  }
 0xaa3   :  { %12142 = vmatprep.subr.bf16.mxu1 %v19549_v48  ;;  %v19564_v48 = vld [vmem:[%s27058_s3 + $0xd64] ss:$16 sps:$4 sm:$0xff]  }
 0xaa5   :  { %10991 = vmatmul.mubr.bf16.gmra.mrb[108].mxu1 %v23053_v0 }
 0xaa6   :  { %11000 = vmatprep.mubr.bf16.mxu1 %v28018_v16  ;;  %12143 = vmatpush1.bf16.msra.mxu1 %v19547_v50  ;;  %v19562_v50 = vld [vmem:[%s27058_s3 + $0xd60] ss:$16 sps:$4 sm:$0xff]  }
 0xaa7   :  { %12144 = vmatprep.subr.bf16.mxu1 %v19552_v47  ;;  %v19567_v47 = vld [vmem:[%s27058_s3 + $0xd84] ss:$16 sps:$4 sm:$0xff]  }
 0xaaa   :  { %12145 = vmatpush1.bf16.msra.mxu1 %v19550_v22  ;;  %v19565_v22 = vld [vmem:[%s27058_s3 + $0xd80] ss:$16 sps:$4 sm:$0xff]  }
 0xaab   :  { %12146 = vmatprep.subr.bf16.mxu1 %v19555_v1  ;;  %v19570_v1 = vld [vmem:[%s27058_s3 + $0xda4] ss:$16 sps:$4 sm:$0xff]  }
 0xaad   :  { %11001 = vmatmul.mubr.bf16.gmra.mrb[112].mxu1 %v23157_v42 }
 0xaae   :  { %11010 = vmatprep.mubr.bf16.mxu1 %v28018_v16  ;;  %12147 = vmatpush1.bf16.msra.mxu1 %v19553_v35  ;;  %v19568_v35 = vld [vmem:[%s27058_s3 + $0xda0] ss:$16 sps:$4 sm:$0xff]  }
 0xaaf   :  { %12148 = vmatprep.subr.bf16.mxu1 %v19558_v15  ;;  %v19573_v15 = vld [vmem:[%s27058_s3 + $0xdc4] ss:$16 sps:$4 sm:$0xff]  }
 0xab2   :  { %12149 = vmatpush1.bf16.msra.mxu1 %v19556_v58  ;;  %v19571_v58 = vld [vmem:[%s27058_s3 + $0xdc0] ss:$16 sps:$4 sm:$0xff]  }
 0xab3   :  { %12150 = vmatprep.subr.bf16.mxu1 %v19561_v14  ;;  %v19576_v14 = vld [vmem:[%s27058_s3 + $0xde4] ss:$16 sps:$4 sm:$0xff]  }
 0xab5   :  { %11011 = vmatmul.mubr.bf16.gmra.mrb[116].mxu1 %v23203_v11 }
 0xab6   :  { %11020 = vmatprep.mubr.bf16.mxu1 %v28018_v16  ;;  %12151 = vmatpush1.bf16.msra.mxu1 %v19559_v37  ;;  %v19574_v37 = vld [vmem:[%s27058_s3 + $0xde0] ss:$16 sps:$4 sm:$0xff]  }
 0xab7   :  { %12152 = vmatprep.subr.bf16.mxu1 %v19564_v48  ;;  %v19579_v48 = vld [vmem:[%s27058_s3 + $0xe04] ss:$16 sps:$4 sm:$0xff]  }
 0xaba   :  { %12153 = vmatpush1.bf16.msra.mxu1 %v19562_v50  ;;  %v19577_v50 = vld [vmem:[%s27058_s3 + $0xe00] ss:$16 sps:$4 sm:$0xff]  }
 0xabb   :  { %12154 = vmatprep.subr.bf16.mxu1 %v19567_v47  ;;  %v19582_v47 = vld [vmem:[%s27058_s3 + $0xe24] ss:$16 sps:$4 sm:$0xff]  }
 0xabd   :  { %11021 = vmatmul.mubr.bf16.gmra.mrb[120].mxu1 %v23276_v2 }
 0xabe   :  { %11030 = vmatprep.mubr.bf16.mxu1 %v28018_v16  ;;  %12155 = vmatpush1.bf16.msra.mxu1 %v19565_v22  ;;  %v19580_v22 = vld [vmem:[%s27058_s3 + $0xe20] ss:$16 sps:$4 sm:$0xff]  }
 0xabf   :  { %12156 = vmatprep.subr.bf16.mxu1 %v19570_v1  ;;  %v19585_v1 = vld [vmem:[%s27058_s3 + $0xe44] ss:$16 sps:$4 sm:$0xff]  }
 0xac2   :  { %12157 = vmatpush1.bf16.msra.mxu1 %v19568_v35  ;;  %v19583_v35 = vld [vmem:[%s27058_s3 + $0xe40] ss:$16 sps:$4 sm:$0xff]  }
 0xac3   :  { %12158 = vmatprep.subr.bf16.mxu1 %v19573_v15  ;;  %v19588_v15 = vld [vmem:[%s27058_s3 + $0xe64] ss:$16 sps:$4 sm:$0xff]  }
 0xac5   :  { %11031 = vmatmul.mubr.bf16.gmra.mrb[124].mxu1 %v23297_v30 }
 0xac6   :  { %11040 = vmatprep.mubr.bf16.mxu1 %v28018_v16  ;;  %12159 = vmatpush1.bf16.msra.mxu1 %v19571_v58  ;;  %v19586_v58 = vld [vmem:[%s27058_s3 + $0xe60] ss:$16 sps:$4 sm:$0xff]  }
 0xac7   :  { %12160 = vmatprep.subr.bf16.mxu1 %v19576_v14  ;;  %v19591_v14 = vld [vmem:[%s27058_s3 + $0xe84] ss:$16 sps:$4 sm:$0xff]  }
 0xaca   :  { %12161 = vmatpush1.bf16.msra.mxu1 %v19574_v37  ;;  %v19589_v37 = vld [vmem:[%s27058_s3 + $0xe80] ss:$16 sps:$4 sm:$0xff]  }
 0xacb   :  { %12323 = vmatprep.subr.bf16.mxu1 %v19579_v48  ;;  %v19594_v48 = vld [vmem:[%s27058_s3 + $0xea4] ss:$16 sps:$4 sm:$0xff]  }
 0xacd   :  { %11041 = vmatmul.mubr.bf16.gmra.mrb[0].mxu1 %v23331_v17 }
 0xace   :  { %11050 = vmatprep.mubr.bf16.mxu1 %v28018_v16 }
 0xad5   :  { %11051 = vmatmul.mubr.bf16.gmra.mrb[4].mxu1 %v23352_v27 }
 0xad6   :  { %11060 = vmatprep.mubr.bf16.mxu1 %v28018_v16 }
 0xadd   :  { %11061 = vmatmul.mubr.bf16.gmra.mrb[8].mxu1 %v28216_v43 }
 0xade   :  { %11070 = vmatprep.mubr.bf16.mxu1 %v28018_v16 }
 0xae5   :  { %11071 = vmatmul.mubr.bf16.gmra.mrb[12].mxu1 %v28217_v8 }
 0xae6   :  { %11080 = vmatprep.mubr.bf16.mxu1 %v28018_v16 }
 0xaed   :  { %11081 = vmatmul.mubr.bf16.gmra.mrb[16].mxu1 %v28349_v46 }
 0xaee   :  { %11090 = vmatprep.mubr.bf16.mxu1 %v28018_v16 }
 0xaf5   :  { %11091 = vmatmul.mubr.bf16.gmra.mrb[20].mxu1 %v28350_v31 }
 0xaf6   :  { %11100 = vmatprep.mubr.bf16.mxu1 %v28018_v16 }
 0xafd   :  { %11101 = vmatmul.mubr.bf16.gmra.mrb[24].mxu1 %v28355_v57 }
 0xafe   :  { %11110 = vmatprep.mubr.bf16.mxu1 %v28018_v16 }
 0xb05   :  { %11111 = vmatmul.mubr.bf16.gmra.mrb[28].mxu1 %v28356_v10 }
 0xb06   :  { %12162 = vmatprep.mubr.bf16.mxu1 %v23007_v9 }
 0xb0d   :  { %12163 = vmatmul.mubr.bf16.vlgmr.msra.gmra.mrb[32].mxu1 %v28061_v19 }
 0xb0e   :  { %12172 = vmatprep.mubr.bf16.mxu1 %v23048_v52  ;;  %12324 = vmatpush1.bf16.msra.mxu1 %v19577_v50  ;;  %v19592_v50 = vld [vmem:[%s27058_s3 + $0xea0] ss:$16 sps:$4 sm:$0xff]  }
 0xb0f   :  { %12325 = vmatprep.subr.bf16.mxu1 %v19582_v47  ;;  %v19597_v47 = vld [vmem:[%s27058_s3 + $0xec4] ss:$16 sps:$4 sm:$0xff]  }
 0xb12   :  { %12326 = vmatpush1.bf16.msra.mxu1 %v19580_v22  ;;  %v19595_v22 = vld [vmem:[%s27058_s3 + $0xec0] ss:$16 sps:$4 sm:$0xff]  }
 0xb13   :  { %12327 = vmatprep.subr.bf16.mxu1 %v19585_v1  ;;  %v19600_v1 = vld [vmem:[%s27058_s3 + $0xee4] ss:$16 sps:$4 sm:$0xff]  }
 0xb15   :  { %12173 = vmatmul.mubr.bf16.gmra.mrb[36].mxu1 %v28069_v29 }
 0xb16   :  { %12182 = vmatprep.mubr.bf16.mxu1 %v28213_v44  ;;  %12328 = vmatpush1.bf16.msra.mxu1 %v19583_v35  ;;  %v19598_v35 = vld [vmem:[%s27058_s3 + $0xee0] ss:$16 sps:$4 sm:$0xff]  }
 0xb17   :  { %12329 = vmatprep.subr.bf16.mxu1 %v19588_v15  ;;  %v19603_v15 = vld [vmem:[%s27058_s3 + $0xc0c] ss:$16 sps:$4 sm:$0xff]  }
 0xb1a   :  { %12330 = vmatpush1.bf16.msra.mxu1 %v19586_v58  ;;  %v28357_v58 = vld [vmem:[#allocation180_spill] sm:$0xff] }
 0xb1b   :  { %12331 = vmatprep.subr.bf16.mxu1 %v19591_v14  ;;  %v28358_v14 = vld [vmem:[#allocation188_spill] sm:$0xff] }
 0xb1d   :  { %12183 = vmatmul.mubr.bf16.gmra.mrb[40].mxu1 %v28214_v34 }
 0xb1e   :  { %12192 = vmatprep.mubr.bf16.mxu1 %v28215_v38  ;;  %12332 = vmatpush1.bf16.msra.mxu1 %v19589_v37  ;;  %v19601_v37 = vld [vmem:[%s27058_s3 + $0xc08] ss:$16 sps:$4 sm:$0xff]  }
 0xb1f   :  { %12333 = vmatprep.subr.bf16.mxu1 %v19594_v48  ;;  %v19606_v48 = vld [vmem:[%s27058_s3 + $0xc2c] ss:$16 sps:$4 sm:$0xff]  }
 0xb22   :  { %12334 = vmatpush1.bf16.msra.mxu1 %v19592_v50  ;;  %v19604_v50 = vld [vmem:[%s27058_s3 + $0xc28] ss:$16 sps:$4 sm:$0xff]  }
 0xb23   :  { %12335 = vmatprep.subr.bf16.mxu1 %v19597_v47  ;;  %v19609_v47 = vld [vmem:[%s27058_s3 + $0xc4c] ss:$16 sps:$4 sm:$0xff]  }
 0xb25   :  { %12193 = vmatmul.mubr.bf16.gmra.mrb[44].mxu1 %v28084_v25 }
 0xb26   :  { %12202 = vmatprep.mubr.bf16.mxu1 %v23271_v55  ;;  %12336 = vmatpush1.bf16.msra.mxu1 %v19595_v22  ;;  %v19607_v22 = vld [vmem:[%s27058_s3 + $0xc48] ss:$16 sps:$4 sm:$0xff]  }
 0xb27   :  { %12337 = vmatprep.subr.bf16.mxu1 %v19600_v1  ;;  %v19612_v1 = vld [vmem:[%s27058_s3 + $0xc6c] ss:$16 sps:$4 sm:$0xff]  }
 0xb2a   :  { %12338 = vmatpush1.bf16.msra.mxu1 %v19598_v35  ;;  %v19610_v35 = vld [vmem:[%s27058_s3 + $0xc68] ss:$16 sps:$4 sm:$0xff]  }
 0xb2b   :  { %12516 = vmatprep.subr.bf16.mxu1 %v19603_v15  ;;  %v19615_v15 = vld [vmem:[%s27058_s3 + $0xc8c] ss:$16 sps:$4 sm:$0xff]  }
 0xb2d   :  { %12203 = vmatmul.mubr.bf16.gmra.mrb[48].mxu1 %v28085_v61 }
 0xb2e   :  { %12212 = vmatprep.mubr.bf16.mxu1 %v23295_v4 }
 0xb35   :  { %12213 = vmatmul.mubr.bf16.gmra.mrb[52].mxu1 %v28224_v5 }
 0xb36   :  { %12222 = vmatprep.mubr.bf16.mxu1 %v28225_v13 }
 0xb3d   :  { %12223 = vmatmul.mubr.bf16.gmra.mrb[56].mxu1 %v28230_v24 }
 0xb3e   :  { %12232 = vmatprep.mubr.bf16.mxu1 %v28231_v53 }
 0xb45   :  { %12233 = vmatmul.mubr.bf16.gmra.mrb[60].mxu1 %v28114_v23 }
 0xb46   :  { %12242 = vmatprep.mubr.bf16.mxu1 %v23408_v3 }
 0xb4d   :  { %12243 = vmatmul.mubr.bf16.gmra.mrb[64].mxu1 %v28203_v36 }
 0xb4e   :  { %12252 = vmatprep.mubr.bf16.mxu1 %v23445_v7 }
 0xb55   :  { %12253 = vmatmul.mubr.bf16.gmra.mrb[68].mxu1 %v28204_v51 }
 0xb56   :  { %12262 = vmatprep.mubr.bf16.mxu1 %v28345_v63 }
 0xb5d   :  { %12263 = vmatmul.mubr.bf16.gmra.mrb[72].mxu1 %v28346_v40 }
 0xb5e   :  { %12272 = vmatprep.mubr.bf16.mxu1 %v28347_v26 }
 0xb65   :  { %12273 = vmatmul.mubr.bf16.gmra.mrb[76].mxu1 %v28348_v28 }
 0xb66   :  { %12282 = vmatprep.mubr.bf16.mxu1 %v28351_v62 }
 0xb6d   :  { %12283 = vmatmul.mubr.bf16.gmra.mrb[80].mxu1 %v28352_v59 }
 0xb6e   :  { %12292 = vmatprep.mubr.bf16.mxu1 %v28353_v45 }
 0xb75   :  { %12293 = vmatmul.mubr.bf16.gmra.mrb[84].mxu1 %v28354_v20 }
 0xb76   :  { %12302 = vmatprep.mubr.bf16.mxu1 %v23712_v54 }
 0xb7d   :  { %12303 = vmatmul.mubr.bf16.gmra.mrb[88].mxu1 %v28357_v58 }
 0xb7e   :  { %12312 = vmatprep.mubr.bf16.mxu1 %v23733_v18 }
 0xb85   :  { %12313 = vmatmul.mubr.bf16.gmra.mrb[92].mxu1 %v28358_v14 }
 0xb86   :  { %12355 = vmatprep.mubr.bf16.mxu1 %v28018_v16 }
 0xb8d   :  { %12356 = vmatmul.mubr.bf16.vlgmr.msra.gmra.mrb[32].mxu1 %v23015_v60 }
 0xb8e   :  { %12517 = vmatpush1.bf16.msra.mxu1 %v19601_v37  ;;  %12365 = vmatprep.mubr.bf16.mxu1 %v28018_v16  ;;  %v19613_v37 = vld [vmem:[%s27058_s3 + $0xc88] ss:$16 sps:$4 sm:$0xff]  }
 0xb8f   :  { %12518 = vmatprep.subr.bf16.mxu1 %v19606_v48  ;;  %v19618_v48 = vld [vmem:[%s27058_s3 + $0xcac] ss:$16 sps:$4 sm:$0xff]  }
 0xb92   :  { %12519 = vmatpush1.bf16.msra.mxu1 %v19604_v50  ;;  %v19616_v50 = vld [vmem:[%s27058_s3 + $0xca8] ss:$16 sps:$4 sm:$0xff]  }
 0xb93   :  { %12520 = vmatprep.subr.bf16.mxu1 %v19609_v47  ;;  %v19621_v47 = vld [vmem:[%s27058_s3 + $0xccc] ss:$16 sps:$4 sm:$0xff]  }
 0xb95   :  { %12366 = vmatmul.mubr.bf16.gmra.mrb[36].mxu1 %v23053_v0 }
 0xb96   :  { %12375 = vmatprep.mubr.bf16.mxu1 %v28018_v16  ;;  %12521 = vmatpush1.bf16.msra.mxu1 %v19607_v22  ;;  %v19619_v22 = vld [vmem:[%s27058_s3 + $0xcc8] ss:$16 sps:$4 sm:$0xff]  }
 0xb97   :  { %12522 = vmatprep.subr.bf16.mxu1 %v19612_v1  ;;  %v19624_v1 = vld [vmem:[%s27058_s3 + $0xcec] ss:$16 sps:$4 sm:$0xff]  }
 0xb9a   :  { %12523 = vmatpush1.bf16.msra.mxu1 %v19610_v35  ;;  %v19622_v35 = vld [vmem:[%s27058_s3 + $0xce8] ss:$16 sps:$4 sm:$0xff]  }
 0xb9b   :  { %12524 = vmatprep.subr.bf16.mxu1 %v19615_v15  ;;  %v19627_v15 = vld [vmem:[%s27058_s3 + $0xd0c] ss:$16 sps:$4 sm:$0xff]  }
 0xb9d   :  { %12376 = vmatmul.mubr.bf16.gmra.mrb[40].mxu1 %v23157_v42 }
 0xb9e   :  { %12385 = vmatprep.mubr.bf16.mxu1 %v28018_v16  ;;  %12525 = vmatpush1.bf16.msra.mxu1 %v19613_v37  ;;  %v19625_v37 = vld [vmem:[%s27058_s3 + $0xd08] ss:$16 sps:$4 sm:$0xff]  }
 0xb9f   :  { %12526 = vmatprep.subr.bf16.mxu1 %v19618_v48  ;;  %v19630_v48 = vld [vmem:[%s27058_s3 + $0xd2c] ss:$16 sps:$4 sm:$0xff]  }
 0xba2   :  { %12527 = vmatpush1.bf16.msra.mxu1 %v19616_v50  ;;  %v19628_v50 = vld [vmem:[%s27058_s3 + $0xd28] ss:$16 sps:$4 sm:$0xff]  }
 0xba3   :  { %12528 = vmatprep.subr.bf16.mxu1 %v19621_v47  ;;  %v19633_v47 = vld [vmem:[%s27058_s3 + $0xd4c] ss:$16 sps:$4 sm:$0xff]  }
 0xba5   :  { %12386 = vmatmul.mubr.bf16.gmra.mrb[44].mxu1 %v23203_v11 }
 0xba6   :  { %12395 = vmatprep.mubr.bf16.mxu1 %v28018_v16  ;;  %12529 = vmatpush1.bf16.msra.mxu1 %v19619_v22  ;;  %v19631_v22 = vld [vmem:[%s27058_s3 + $0xd48] ss:$16 sps:$4 sm:$0xff]  }
 0xba7   :  { %12530 = vmatprep.subr.bf16.mxu1 %v19624_v1  ;;  %v19636_v1 = vld [vmem:[%s27058_s3 + $0xd6c] ss:$16 sps:$4 sm:$0xff]  }
 0xbaa   :  { %12531 = vmatpush1.bf16.msra.mxu1 %v19622_v35  ;;  %v19634_v35 = vld [vmem:[%s27058_s3 + $0xd68] ss:$16 sps:$4 sm:$0xff]  }
 0xbab   :  { %12532 = vmatprep.subr.bf16.mxu1 %v19627_v15  ;;  %v19639_v15 = vld [vmem:[%s27058_s3 + $0xd8c] ss:$16 sps:$4 sm:$0xff]  }
 0xbad   :  { %12396 = vmatmul.mubr.bf16.gmra.mrb[48].mxu1 %v23276_v2 }
 0xbae   :  { %12405 = vmatprep.mubr.bf16.mxu1 %v28018_v16  ;;  %12533 = vmatpush1.bf16.msra.mxu1 %v19625_v37  ;;  %v19637_v37 = vld [vmem:[%s27058_s3 + $0xd88] ss:$16 sps:$4 sm:$0xff]  }
 0xbaf   :  { %12534 = vmatprep.subr.bf16.mxu1 %v19630_v48  ;;  %v19642_v48 = vld [vmem:[%s27058_s3 + $0xdac] ss:$16 sps:$4 sm:$0xff]  }
 0xbb2   :  { %12535 = vmatpush1.bf16.msra.mxu1 %v19628_v50  ;;  %v19640_v50 = vld [vmem:[%s27058_s3 + $0xda8] ss:$16 sps:$4 sm:$0xff]  }
 0xbb3   :  { %12536 = vmatprep.subr.bf16.mxu1 %v19633_v47  ;;  %v19645_v47 = vld [vmem:[%s27058_s3 + $0xdcc] ss:$16 sps:$4 sm:$0xff]  }
 0xbb5   :  { %12406 = vmatmul.mubr.bf16.gmra.mrb[52].mxu1 %v23297_v30 }
 0xbb6   :  { %12415 = vmatprep.mubr.bf16.mxu1 %v28018_v16  ;;  %12537 = vmatpush1.bf16.msra.mxu1 %v19631_v22  ;;  %v19643_v22 = vld [vmem:[%s27058_s3 + $0xdc8] ss:$16 sps:$4 sm:$0xff]  }
 0xbb7   :  { %12538 = vmatprep.subr.bf16.mxu1 %v19636_v1  ;;  %v19648_v1 = vld [vmem:[%s27058_s3 + $0xdec] ss:$16 sps:$4 sm:$0xff]  }
 0xbba   :  { %12539 = vmatpush1.bf16.msra.mxu1 %v19634_v35  ;;  %v19646_v35 = vld [vmem:[%s27058_s3 + $0xde8] ss:$16 sps:$4 sm:$0xff]  }
 0xbbb   :  { %12540 = vmatprep.subr.bf16.mxu1 %v19639_v15  ;;  %v19651_v15 = vld [vmem:[%s27058_s3 + $0xe0c] ss:$16 sps:$4 sm:$0xff]  }
 0xbbd   :  { %12416 = vmatmul.mubr.bf16.gmra.mrb[56].mxu1 %v23331_v17 }
 0xbbe   :  { %12425 = vmatprep.mubr.bf16.mxu1 %v28018_v16  ;;  %12541 = vmatpush1.bf16.msra.mxu1 %v19637_v37  ;;  %v19649_v37 = vld [vmem:[%s27058_s3 + $0xe08] ss:$16 sps:$4 sm:$0xff]  }
 0xbbf   :  { %12542 = vmatprep.subr.bf16.mxu1 %v19642_v48  ;;  %v19654_v48 = vld [vmem:[%s27058_s3 + $0xe2c] ss:$16 sps:$4 sm:$0xff]  }
 0xbc2   :  { %12543 = vmatpush1.bf16.msra.mxu1 %v19640_v50  ;;  %v19652_v50 = vld [vmem:[%s27058_s3 + $0xe28] ss:$16 sps:$4 sm:$0xff]  }
 0xbc3   :  { %12544 = vmatprep.subr.bf16.mxu1 %v19645_v47  ;;  %v19655_v47 = vld [vmem:[%s27058_s3 + $0xe48] ss:$16 sps:$4 sm:$0xff]  }
 0xbc5   :  { %12426 = vmatmul.mubr.bf16.gmra.mrb[60].mxu1 %v23352_v27 }
 0xbc6   :  { %12435 = vmatprep.mubr.bf16.mxu1 %v28018_v16  ;;  %12545 = vmatpush1.bf16.msra.mxu1 %v19643_v22  ;;  %v19663_v22 = vld [vmem:[%s27058_s3 + $0xe8c] ss:$16 sps:$4 sm:$0xff]  }
 0xbc7   :  { %12546 = vmatprep.subr.bf16.mxu1 %v19648_v1  ;;  %v19661_v1 = vld [vmem:[%s27058_s3 + $0xe88] ss:$16 sps:$4 sm:$0xff]  }
 0xbca   :  { %12547 = vmatpush1.bf16.msra.mxu1 %v19646_v35  ;;  %v19669_v35 = vld [vmem:[%s27058_s3 + $0xecc] ss:$16 sps:$4 sm:$0xff]  }
 0xbcb   :  { %12709 = vmatprep.subr.bf16.mxu1 %v19651_v15  ;;  %v19667_v15 = vld [vmem:[%s27058_s3 + $0xec8] ss:$16 sps:$4 sm:$0xff]  }
 0xbcd   :  { %12436 = vmatmul.mubr.bf16.gmra.mrb[64].mxu1 %v28216_v43 }
 0xbce   :  { %12445 = vmatprep.mubr.bf16.mxu1 %v28018_v16 }
 0xbd5   :  { %12446 = vmatmul.mubr.bf16.gmra.mrb[68].mxu1 %v28217_v8 }
 0xbd6   :  { %12455 = vmatprep.mubr.bf16.mxu1 %v28018_v16 }
 0xbdd   :  { %12456 = vmatmul.mubr.bf16.gmra.mrb[72].mxu1 %v28349_v46 }
 0xbde   :  { %12465 = vmatprep.mubr.bf16.mxu1 %v28018_v16 }
 0xbe5   :  { %12466 = vmatmul.mubr.bf16.gmra.mrb[76].mxu1 %v28350_v31 }
 0xbe6   :  { %12475 = vmatprep.mubr.bf16.mxu1 %v28018_v16 }
 0xbed   :  { %12476 = vmatmul.mubr.bf16.gmra.mrb[80].mxu1 %v28355_v57 }
 0xbee   :  { %12485 = vmatprep.mubr.bf16.mxu1 %v28018_v16 }
 0xbf5   :  { %12486 = vmatmul.mubr.bf16.gmra.mrb[84].mxu1 %v28356_v10 }
 0xbf6   :  { %12495 = vmatprep.mubr.bf16.mxu1 %v28018_v16 }
 0xbfd   :  { %12496 = vmatmul.mubr.bf16.gmra.mrb[88].mxu1 %v23717_v39 }
 0xbfe   :  { %12505 = vmatprep.mubr.bf16.mxu1 %v28018_v16 }
 0xc05   :  { %12506 = vmatmul.mubr.bf16.gmra.mrb[92].mxu1 %v23735_v21 }
 0xc06   :  { %12548 = vmatprep.mubr.bf16.mxu1 %v23007_v9  ;;  %v19657_v9 = vld [vmem:[%s27058_s3 + $0xe4c] ss:$16 sps:$4 sm:$0xff]  }
 0xc0d   :  { %12549 = vmatmul.mubr.bf16.vlgmr.msra.gmra.mrb[96].mxu1 %v28061_v19  ;;  %v19658_v19 = vld [vmem:[%s27058_s3 + $0xe68] ss:$16 sps:$4 sm:$0xff]  }
 0xc0e   :  { %12558 = vmatprep.mubr.bf16.mxu1 %v23048_v52  ;;  %12710 = vmatpush1.bf16.msra.mxu1 %v19649_v37  ;;  %v19660_v52 = vld [vmem:[%s27058_s3 + $0xe6c] ss:$16 sps:$4 sm:$0xff]  }
 0xc0f   :  { %12711 = vmatprep.subr.bf16.mxu1 %v19654_v48  ;;  %v28398_v48 = vld [vmem:[#allocation88_spill] sm:$0xff] }
 0xc12   :  { %12712 = vmatpush1.bf16.msra.mxu1 %v19652_v50  ;;  %v28363_v50 = vld [vmem:[#allocation42_spill] sm:$0xff] }
 0xc13   :  { %12713 = vmatprep.subr.bf16.mxu1 %v19657_v9 }
 0xc15   :  { %12559 = vmatmul.mubr.bf16.gmra.mrb[100].mxu1 %v28069_v29  ;;  %v19666_v29 = vld [vmem:[%s27058_s3 + $0xeac] ss:$16 sps:$4 sm:$0xff]  }
 0xc16   :  { %12568 = vmatprep.mubr.bf16.mxu1 %v28213_v44  ;;  %12714 = vmatpush1.bf16.msra.mxu1 %v19655_v47  ;;  %v19664_v44 = vld [vmem:[%s27058_s3 + $0xea8] ss:$16 sps:$4 sm:$0xff]  }
 0xc17   :  { %12715 = vmatprep.subr.bf16.mxu1 %v19660_v52 }
 0xc1a   :  { %12716 = vmatpush1.bf16.msra.mxu1 %v19658_v19 }
 0xc1b   :  { %12717 = vmatprep.subr.bf16.mxu1 %v19663_v22  ;;  %v28390_v22 = vld [vmem:[#allocation84_spill] sm:$0xff] }
 0xc1d   :  { %12569 = vmatmul.mubr.bf16.gmra.mrb[104].mxu1 %v28214_v34  ;;  %v19672_v34 = vld [vmem:[%s27058_s3 + $0xeec] ss:$16 sps:$4 sm:$0xff]  }
 0xc1e   :  { %12578 = vmatprep.mubr.bf16.mxu1 %v28215_v38  ;;  %12718 = vmatpush1.bf16.msra.mxu1 %v19661_v1  ;;  %v19670_v38 = vld [vmem:[%s27058_s3 + $0xee8] ss:$16 sps:$4 sm:$0xff]  }
 0xc1f   :  { %12719 = vmatprep.subr.bf16.mxu1 %v19666_v29  ;;  %v28365_v29 = vld [vmem:[#allocation17_spill] sm:$0xff] }
 0xc22   :  { %12720 = vmatpush1.bf16.msra.mxu1 %v19664_v44 }
 0xc23   :  { %12721 = vmatprep.subr.bf16.mxu1 %v19669_v35 }
 0xc25   :  { %12579 = vmatmul.mubr.bf16.gmra.mrb[108].mxu1 %v28084_v25 }
 0xc26   :  { %12588 = vmatprep.mubr.bf16.mxu1 %v23271_v55  ;;  %12722 = vmatpush1.bf16.msra.mxu1 %v19667_v15  ;;  %v28366_v15 = vld [vmem:[#allocation32_spill] sm:$0xff] }
 0xc27   :  { %12723 = vmatprep.subr.bf16.mxu1 %v19672_v34 }
 0xc2a   :  { %12724 = vmatpush1.bf16.msra.mxu1 %v19670_v38 }
 0xc2d   :  { %12589 = vmatmul.mubr.bf16.gmra.mrb[112].mxu1 %v28085_v61 }
 0xc2e   :  { %12598 = vmatprep.mubr.bf16.mxu1 %v23295_v4 }
 0xc35   :  { %12599 = vmatmul.mubr.bf16.gmra.mrb[116].mxu1 %v28224_v5 }
 0xc36   :  { %12608 = vmatprep.mubr.bf16.mxu1 %v28225_v13  ;;  %v28359_v13 = vld [vmem:[#allocation40_spill] sm:$0xff] }
 0xc3d   :  { %12609 = vmatmul.mubr.bf16.gmra.mrb[120].mxu1 %v28230_v24 }
 0xc3e   :  { %12618 = vmatprep.mubr.bf16.mxu1 %v28231_v53 }
 0xc45   :  { %12619 = vmatmul.mubr.bf16.gmra.mrb[124].mxu1 %v28114_v23 }
 0xc46   :  { %12628 = vmatprep.mubr.bf16.mxu1 %v23408_v3 }
 0xc4d   :  { %12629 = vmatmul.mubr.bf16.gmra.mrb[0].mxu1 %v28203_v36 }
 0xc4e   :  { %12638 = vmatprep.mubr.bf16.mxu1 %v23445_v7 }
 0xc55   :  { %12639 = vmatmul.mubr.bf16.gmra.mrb[4].mxu1 %v28204_v51 }
 0xc56   :  { %12648 = vmatprep.mubr.bf16.mxu1 %v28345_v63  ;;  %v28360_v63 = vld [vmem:[#allocation52_spill] sm:$0xff] }
 0xc5d   :  { %12649 = vmatmul.mubr.bf16.gmra.mrb[8].mxu1 %v28346_v40 }
 0xc5e   :  { %12658 = vmatprep.mubr.bf16.mxu1 %v28347_v26  ;;  %v28361_v26 = vld [vmem:[#allocation26_spill] sm:$0xff] }
 0xc60   :  { %v12357_v55 = vpop.f32.mrb[32].mxu1 }
 0xc61   :  { %v25541_v4 = vadd.f32 %v12357_v55, %v23942_v6  ;;  %v12359_v25 = vpop.f32.mrb[33].mxu1 }
 0xc62   :  { %v25544_v61 = vadd.f32 %v12359_v25, %v23944_v49  ;;  %v12361_v3 = vpop.f32.mrb[34].mxu1  ;;  %v28367_v25 = vld [vmem:[#allocation46_spill] sm:$0xff] }
 0xc63   :  { %v25547_v23 = vadd.f32 %v12361_v3, %v23946_v12  ;;  %v12363_v7 = vpop.f32.mrb[35].mxu1 }
 0xc64   :  { %v25550_v36 = vadd.f32 %v12363_v7, %v23948_v32 }
 0xc65   :  { %12659 = vmatmul.mubr.bf16.gmra.mrb[12].mxu1 %v28348_v28 }
 0xc66   :  { %12668 = vmatprep.mubr.bf16.mxu1 %v28351_v62  ;;  %v28362_v62 = vld [vmem:[#allocation20_spill] sm:$0xff] }
 0xc68   :  { %v12367_v51 = vpop.f32.mrb[36].mxu1 }
 0xc69   :  { %v25555_v6 = vadd.f32 %v12367_v51, %v23954_v56  ;;  %v12369_v53 = vpop.f32.mrb[37].mxu1 }
 0xc6a   :  { %v25558_v49 = vadd.f32 %v12369_v53, %v23956_v33  ;;  %v12371_v5 = vpop.f32.mrb[38].mxu1 }
 0xc6b   :  { %v25561_v12 = vadd.f32 %v12371_v5, %v28359_v13  ;;  %v12373_v24 = vpop.f32.mrb[39].mxu1 }
 0xc6c   :  { %v25564_v32 = vadd.f32 %v12373_v24, %v28360_v63  ;;  %v28369_v24 = vld [vmem:[#allocation29_spill] sm:$0xff] }
 0xc6d   :  { %12669 = vmatmul.mubr.bf16.gmra.mrb[16].mxu1 %v28352_v59 }
 0xc6e   :  { %12678 = vmatprep.mubr.bf16.mxu1 %v28353_v45  ;;  %v28364_v45 = vld [vmem:[#allocation54_spill] sm:$0xff] }
 0xc70   :  { %v12377_v28 = vpop.f32.mrb[40].mxu1 }
 0xc71   :  { %v25569_v56 = vadd.f32 %v12377_v28, %v28361_v26  ;;  %v12379_v40 = vpop.f32.mrb[41].mxu1  ;;  %v28370_v26 = vld [vmem:[#allocation33_spill] sm:$0xff] }
 0xc72   :  { %v25572_v33 = vadd.f32 %v12379_v40, %v28362_v62  ;;  %v12381_v37 = vpop.f32.mrb[42].mxu1 }
 0xc73   :  { %v25577_v9 = vadd.f32 %v12381_v37, %v28363_v50  ;;  %v12383_v47 = vpop.f32.mrb[43].mxu1  ;;  %v28371_v37 = vld [vmem:[#allocation60_spill] sm:$0xff] }
 0xc74   :  { %v25582_v52 = vadd.f32 %v12383_v47, %v28364_v45  ;;  %v28372_v45 = vld [vmem:[#allocation72_spill] sm:$0xff] }
 0xc75   :  { %12679 = vmatmul.mubr.bf16.gmra.mrb[20].mxu1 %v28354_v20 }
 0xc76   :  { %12688 = vmatprep.mubr.bf16.mxu1 %v23712_v54  ;;  %v28368_v54 = vld [vmem:[#allocation58_spill] sm:$0xff] }
 0xc78   :  { %v12387_v1 = vpop.f32.mrb[44].mxu1 }
 0xc79   :  { %v25591_v44 = vadd.f32 %v12387_v1, %v28365_v29  ;;  %v12389_v35 = vpop.f32.mrb[45].mxu1  ;;  %v28373_v29 = vld [vmem:[#allocation39_spill] sm:$0xff] }
 0xc7a   :  { %v25594_v34 = vadd.f32 %v12389_v35, %v28366_v15  ;;  %v12391_v38 = vpop.f32.mrb[46].mxu1 }
 0xc7b   :  { %v25599_v3 = vadd.f32 %v12391_v38, %v28367_v25  ;;  %v12393_v20 = vpop.f32.mrb[47].mxu1  ;;  %v28374_v38 = vld [vmem:[#allocation49_spill] sm:$0xff] }
 0xc7c   :  { %v25604_v51 = vadd.f32 %v12393_v20, %v28368_v54  ;;  %v28375_v54 = vld [vmem:[#allocation64_spill] sm:$0xff] }
 0xc7d   :  { %12689 = vmatmul.mubr.bf16.gmra.mrb[24].mxu1 %v28357_v58 }
 0xc7e   :  { %12698 = vmatprep.mubr.bf16.mxu1 %v23733_v18  ;;  %v19675_v18 = vld [vmem:[%s27059_s5 + $0x4] ss:$16 sps:$4 sm:$0xff]  }
 0xc7f   :  { %15160 = vmatprep.subr.bf16.mxu1 %v19675_v18 }
 0xc80   :  { %v12397_v13 = vpop.f32.mrb[48].mxu1 }
 0xc81   :  { %v25613_v63 = vadd.f32 %v12397_v13, %v28369_v24  ;;  %v12399_v28 = vpop.f32.mrb[49].mxu1 }
 0xc82   :  { %v25616_v40 = vadd.f32 %v12399_v28, %v28370_v26  ;;  %v12401_v62 = vpop.f32.mrb[50].mxu1  ;;  %v19678_v28 = vld [vmem:[%s27059_s5 + $0x24] ss:$16 sps:$4 sm:$0xff]  }
 0xc83   :  { %v25619_v50 = vadd.f32 %v12401_v62, %v28371_v37  ;;  %v12403_v47 = vpop.f32.mrb[51].mxu1  ;;  %v19676_v62 = vld [vmem:[%s27059_s5 + $0x20] ss:$16 sps:$4 sm:$0xff]   ;;  %v19681_v37 = vld [vmem:[%s27059_s5 + $0x44] ss:$16 sps:$4 sm:$0xff]  }
 0xc84   :  { %v25622_v58 = vadd.f32 %v12403_v47, %v28372_v45  ;;  %v28377_v45 = vld [vmem:[#allocation76_spill] sm:$0xff] }
 0xc85   :  { %12699 = vmatmul.mubr.bf16.gmra.mrb[28].mxu1 %v28358_v14  ;;  %v19673_v14 = vld [vmem:[%s27059_s5] ss:$16 sps:$4 sm:$0xff]  }
 0xc86   :  { %12741 = vmatprep.mubr.bf16.mxu1 %v28018_v16 }
 0xc88   :  { %v12407_v1 = vpop.f32.mrb[52].mxu1 }
 0xc89   :  { %v25630_v35 = vadd.f32 %v12407_v1, %v28373_v29  ;;  %v12409_v15 = vpop.f32.mrb[53].mxu1  ;;  %v19684_v1 = vld [vmem:[%s27059_s5 + $0x64] ss:$16 sps:$4 sm:$0xff]  }
 0xc8a   :  { %v25633_v25 = vadd.f32 %v12409_v15, %v28374_v38  ;;  %v12411_v20 = vpop.f32.mrb[54].mxu1  ;;  %v28378_v29 = vld [vmem:[#allocation43_spill] sm:$0xff] }
 0xc8b   :  { %v25639_v13 = vadd.f32 %v12411_v20, %v28375_v54  ;;  %v12413_v24 = vpop.f32.mrb[55].mxu1 }
 0xc8c   :  { %v25645_v26 = vadd.f32 %v12413_v24, %v24056_v41  ;;  %v19679_v41 = vld [vmem:[%s27059_s5 + $0x40] ss:$16 sps:$4 sm:$0xff]  }
 0xc8d   :  { %12742 = vmatmul.mubr.bf16.vlgmr.msra.gmra.mrb[96].mxu1 %v23015_v60 }
 0xc8e   :  { %28376 = vst [vmem:[#allocation194_spill] sm:$0xff] %v25645_v26  ;;  %12751 = vmatprep.mubr.bf16.mxu1 %v28018_v16  ;;  %15161 = vmatpush1.bf16.msra.mxu1 %v19673_v14  ;;  %v28379_v14 = vld [vmem:[#allocation38_spill] sm:$0xff] }
 0xc8f   :  { %15162 = vmatprep.subr.bf16.mxu1 %v19678_v28  ;;  %v28382_v28 = vld [vmem:[#allocation35_spill] sm:$0xff] }
 0xc90   :  { %v12417_v47 = vpop.f32.mrb[56].mxu1 }
 0xc91   :  { %v25659_v18 = vadd.f32 %v12417_v47, %v28377_v45  ;;  %v12419_v60 = vpop.f32.mrb[57].mxu1  ;;  %v28380_v47 = vld [vmem:[#allocation66_spill] sm:$0xff] }
 0xc92   :  { %v25665_v15 = vadd.f32 %v12419_v60, %v28378_v29  ;;  %v12421_v38 = vpop.f32.mrb[58].mxu1  ;;  %15163 = vmatpush1.bf16.msra.mxu1 %v19676_v62  ;;  %v19682_v60 = vld [vmem:[%s27059_s5 + $0x60] ss:$16 sps:$4 sm:$0xff]   ;;  %v19687_v29 = vld [vmem:[%s27059_s5 + $0x84] ss:$16 sps:$4 sm:$0xff]  }
 0xc93   :  { %v25670_v54 = vadd.f32 %v12421_v38, %v28379_v14  ;;  %v12423_v24 = vpop.f32.mrb[59].mxu1  ;;  %15164 = vmatprep.subr.bf16.mxu1 %v19681_v37  ;;  %v19685_v14 = vld [vmem:[%s27059_s5 + $0x80] ss:$16 sps:$4 sm:$0xff]   ;;  %v19690_v62 = vld [vmem:[%s27059_s5 + $0xa4] ss:$16 sps:$4 sm:$0xff]  }
 0xc94   :  { %v25675_v45 = vadd.f32 %v12423_v24, %v28380_v47  ;;  %v28381_v24 = vld [vmem:[#allocation78_spill] sm:$0xff] }
 0xc95   :  { %12752 = vmatmul.mubr.bf16.gmra.mrb[100].mxu1 %v23053_v0 }
 0xc96   :  { %12761 = vmatprep.mubr.bf16.mxu1 %v28018_v16  ;;  %15165 = vmatpush1.bf16.msra.mxu1 %v19679_v41 }
 0xc97   :  { %15166 = vmatprep.subr.bf16.mxu1 %v19684_v1  ;;  %v28383_v1 = vld [vmem:[#allocation50_spill] sm:$0xff] }
 0xc98   :  { %v12427_v38 = vpop.f32.mrb[60].mxu1 }
 0xc99   :  { %v25693_v47 = vadd.f32 %v12427_v38, %v28381_v24  ;;  %v12429_v0 = vpop.f32.mrb[61].mxu1  ;;  %v28384_v24 = vld [vmem:[#allocation70_spill] sm:$0xff]  ;;  %v28387_v38 = vld [vmem:[#allocation47_spill] sm:$0xff] }
 0xc9a   :  { %v25699_v20 = vadd.f32 %v12429_v0, %v28382_v28  ;;  %v12431_v37 = vpop.f32.mrb[62].mxu1  ;;  %15167 = vmatpush1.bf16.msra.mxu1 %v19682_v60  ;;  %v19688_v28 = vld [vmem:[%s27059_s5 + $0xa0] ss:$16 sps:$4 sm:$0xff]   ;;  %v19696_v60 = vld [vmem:[%s27059_s5 + $0xe4] ss:$16 sps:$4 sm:$0xff]  }
 0xc9b   :  { %v25704_v5 = vadd.f32 %v12431_v37, %v28383_v1  ;;  %v12433_v53 = vpop.f32.mrb[63].mxu1  ;;  %15168 = vmatprep.subr.bf16.mxu1 %v19687_v29  ;;  %v19693_v37 = vld [vmem:[%s27059_s5 + $0xc4] ss:$16 sps:$4 sm:$0xff]   ;;  %v19691_v0 = vld [vmem:[%s27059_s5 + $0xc0] ss:$16 sps:$4 sm:$0xff]   ;;  %v28386_v1 = vld [vmem:[#allocation82_spill] sm:$0xff] }
 0xc9c   :  { %v25709_v7 = vadd.f32 %v12433_v53, %v28384_v24 }
 0xc9d   :  { %12762 = vmatmul.mubr.bf16.gmra.mrb[104].mxu1 %v23157_v42 }
 0xc9e   :  { %28385 = vst [vmem:[#allocation109_spill] sm:$0xff] %v25709_v7  ;;  %12771 = vmatprep.mubr.bf16.mxu1 %v28018_v16  ;;  %15169 = vmatpush1.bf16.msra.mxu1 %v19685_v14  ;;  %v28388_v14 = vld [vmem:[#allocation51_spill] sm:$0xff] }
 0xc9f   :  { %15170 = vmatprep.subr.bf16.mxu1 %v19690_v62 }
 0xca0   :  { %v12437_v53 = vpop.f32.mrb[64].mxu1 }
 0xca1   :  { %v25727_v24 = vadd.f32 %v12437_v53, %v28386_v1  ;;  %v12439_v42 = vpop.f32.mrb[65].mxu1  ;;  %v19694_v53 = vld [vmem:[%s27059_s5 + $0xe0] ss:$16 sps:$4 sm:$0xff]  }
 0xca2   :  { %v25733_v41 = vadd.f32 %v12439_v42, %v28387_v38  ;;  %v12441_v29 = vpop.f32.mrb[66].mxu1  ;;  %15171 = vmatpush1.bf16.msra.mxu1 %v19688_v28  ;;  %v28392_v28 = vld [vmem:[#allocation96_spill] sm:$0xff]  ;;  %v28394_v42 = vld [vmem:[#allocation53_spill] sm:$0xff] }
 0xca3   :  { %v25736_v62 = vadd.f32 %v12441_v29, %v28388_v14  ;;  %v12443_v55 = vpop.f32.mrb[67].mxu1  ;;  %15172 = vmatprep.subr.bf16.mxu1 %v19693_v37 }
 0xca4   :  { %v25739_v19 = vadd.f32 %v12443_v55, %v28390_v22  ;;  %v28396_v55 = vld [vmem:[#allocation61_spill] sm:$0xff] }
 0xca5   :  { %28389 = vst [vmem:[#allocation107_spill] sm:$0xff] %v25736_v62  ;;  %12772 = vmatmul.mubr.bf16.gmra.mrb[108].mxu1 %v23203_v11 }
 0xca6   :  { %28391 = vst [vmem:[#allocation196_spill] sm:$0xff] %v25739_v19  ;;  %12781 = vmatprep.mubr.bf16.mxu1 %v28018_v16  ;;  %15173 = vmatpush1.bf16.msra.mxu1 %v19691_v0  ;;  %v28400_v0 = vld [vmem:[#allocation100_spill] sm:$0xff] }
 0xca7   :  { %15174 = vmatprep.subr.bf16.mxu1 %v19696_v60 }
 0xca8   :  { %v12447_v38 = vpop.f32.mrb[68].mxu1 }
 0xca9   :  { %v25747_v1 = vadd.f32 %v12447_v38, %v28392_v28  ;;  %v12449_v29 = vpop.f32.mrb[69].mxu1 }
 0xcaa   :  { %v25750_v37 = vadd.f32 %v12449_v29, %v28394_v42  ;;  %v12451_v22 = vpop.f32.mrb[70].mxu1  ;;  %15175 = vmatpush1.bf16.msra.mxu1 %v19694_v53  ;;  %v28401_v29 = vld [vmem:[#allocation55_spill] sm:$0xff] }
 0xcab   :  { %28393 = vst [vmem:[#allocation200_spill] sm:$0xff] %v25747_v1  ;;  %v25753_v14 = vadd.f32 %v12451_v22, %v28396_v55  ;;  %v12453_v59 = vpop.f32.mrb[71].mxu1  ;;  %v28402_v55 = vld [vmem:[#allocation63_spill] sm:$0xff]  ;;  %v28408_v22 = vld [vmem:[#allocation56_spill] sm:$0xff] }
 0xcac   :  { %28395 = vst [vmem:[#allocation175_spill] sm:$0xff] %v25750_v37  ;;  %v25756_v11 = vadd.f32 %v12453_v59, %v28398_v48  ;;  %v28404_v59 = vld [vmem:[#allocation90_spill] sm:$0xff]  ;;  %v28427_v37 = vld [vmem:[#allocation124_spill] sm:$0xff] }
 0xcad   :  { %28397 = vst [vmem:[#allocation183_spill] sm:$0xff] %v25753_v14  ;;  %12782 = vmatmul.mubr.bf16.gmra.mrb[112].mxu1 %v23276_v2  ;;  %v28425_v14 = vld [vmem:[#allocation112_spill] sm:$0xff] }
 0xcae   :  { %28399 = vst [vmem:[#allocation121_spill] sm:$0xff] %v25756_v11  ;;  %12791 = vmatprep.mubr.bf16.mxu1 %v28018_v16  ;;  %v28423_v11 = vld [vmem:[#allocation73_spill] sm:$0xff] }
 0xcb0   :  { %v12457_v60 = vpop.f32.mrb[72].mxu1 }
 0xcb1   :  { %v25761_v38 = vadd.f32 %v12457_v60, %v28400_v0  ;;  %v12459_v28 = vpop.f32.mrb[73].mxu1  ;;  %v28410_v60 = vld [vmem:[#allocation67_spill] sm:$0xff] }
 0xcb2   :  { %v25764_v42 = vadd.f32 %v12459_v28, %v28401_v29  ;;  %v12461_v53 = vpop.f32.mrb[74].mxu1  ;;  %v28406_v29 = vld [vmem:[#allocation102_spill] sm:$0xff] }
 0xcb3   :  { %v25769_v7 = vadd.f32 %v12461_v53, %v28402_v55  ;;  %v12463_v48 = vpop.f32.mrb[75].mxu1 }
 0xcb4   :  { %v25774_v26 = vadd.f32 %v12463_v48, %v28404_v59  ;;  %v28415_v59 = vld [vmem:[#allocation57_spill] sm:$0xff] }
 0xcb5   :  { %28403 = vst [vmem:[#allocation125_spill] sm:$0xff] %v25769_v7  ;;  %12792 = vmatmul.mubr.bf16.gmra.mrb[116].mxu1 %v23297_v30 }
 0xcb6   :  { %28405 = vst [vmem:[#allocation177_spill] sm:$0xff] %v25774_v26  ;;  %12801 = vmatprep.mubr.bf16.mxu1 %v28018_v16  ;;  %v28412_v26 = vld [vmem:[#allocation94_spill] sm:$0xff] }
 0xcb8   :  { %v12467_v28 = vpop.f32.mrb[76].mxu1 }
 0xcb9   :  { %v25783_v53 = vadd.f32 %v12467_v28, %v28406_v29  ;;  %v12469_v55 = vpop.f32.mrb[77].mxu1 }
 0xcba   :  { %v25786_v2 = vadd.f32 %v12469_v55, %v28408_v22  ;;  %v12471_v48 = vpop.f32.mrb[78].mxu1 }
 0xcbb   :  { %28407 = vst [vmem:[#allocation185_spill] sm:$0xff] %v25783_v53  ;;  %v25791_v7 = vadd.f32 %v12471_v48, %v28410_v60  ;;  %v12473_v30 = vpop.f32.mrb[79].mxu1  ;;  %v28414_v60 = vld [vmem:[#allocation106_spill] sm:$0xff] }
 0xcbc   :  { %28409 = vst [vmem:[#allocation24_spill] sm:$0xff] %v25786_v2  ;;  %v25796_v19 = vadd.f32 %v12473_v30, %v28412_v26  ;;  %v28417_v30 = vld [vmem:[#allocation69_spill] sm:$0xff]  ;;  %v28430_v53 = vld [vmem:[#allocation114_spill] sm:$0xff] }
 0xcbd   :  { %28411 = vst [vmem:[#allocation110_spill] sm:$0xff] %v25791_v7  ;;  %12802 = vmatmul.mubr.bf16.gmra.mrb[120].mxu1 %v23331_v17  ;;  %v28419_v7 = vld [vmem:[#allocation108_spill] sm:$0xff] }
 0xcbe   :  { %28413 = vst [vmem:[#allocation127_spill] sm:$0xff] %v25796_v19  ;;  %12811 = vmatprep.mubr.bf16.mxu1 %v28018_v16  ;;  %v28421_v19 = vld [vmem:[#allocation120_spill] sm:$0xff] }
 0xcc0   :  { %v12477_v29 = vpop.f32.mrb[80].mxu1 }
 0xcc1   :  { %v25805_v55 = vadd.f32 %v12477_v29, %v28414_v60  ;;  %v12479_v48 = vpop.f32.mrb[81].mxu1 }
 0xcc2   :  { %v25808_v0 = vadd.f32 %v12479_v48, %v28415_v59  ;;  %v12481_v26 = vpop.f32.mrb[82].mxu1 }
 0xcc3   :  { %v25811_v2 = vadd.f32 %v12481_v26, %v28417_v30  ;;  %v12483_v28 = vpop.f32.mrb[83].mxu1 }
 0xcc4   :  { %28416 = vst [vmem:[#allocation179_spill] sm:$0xff] %v25808_v0  ;;  %v25814_v17 = vadd.f32 %v12483_v28, %v28419_v7  ;;  %v28429_v28 = vld [vmem:[#allocation62_spill] sm:$0xff] }
 0xcc5   :  { %28418 = vst [vmem:[#allocation187_spill] sm:$0xff] %v25811_v2  ;;  %12812 = vmatmul.mubr.bf16.gmra.mrb[124].mxu1 %v23352_v27  ;;  %v28457_v2 = vld [vmem:[#allocation190_spill] sm:$0xff] }
 0xcc6   :  { %28420 = vst [vmem:[#allocation123_spill] sm:$0xff] %v25814_v17  ;;  %12821 = vmatprep.mubr.bf16.mxu1 %v28018_v16 }
 0xcc8   :  { %v12487_v22 = vpop.f32.mrb[84].mxu1 }
 0xcc9   :  { %v25819_v29 = vadd.f32 %v12487_v22, %v28421_v19  ;;  %v12489_v60 = vpop.f32.mrb[85].mxu1 }
 0xcca   :  { %v25822_v59 = vadd.f32 %v12489_v60, %v28423_v11  ;;  %v12491_v48 = vpop.f32.mrb[86].mxu1 }
 0xccb   :  { %28422 = vst [vmem:[#allocation116_spill] sm:$0xff] %v25819_v29  ;;  %v25825_v26 = vadd.f32 %v12491_v48, %v28425_v14  ;;  %v12493_v30 = vpop.f32.mrb[87].mxu1  ;;  %v28432_v48 = vld [vmem:[#allocation126_spill] sm:$0xff] }
 0xccc   :  { %28424 = vst [vmem:[#allocation181_spill] sm:$0xff] %v25822_v59  ;;  %v25828_v7 = vadd.f32 %v12493_v30, %v28427_v37  ;;  %v28434_v30 = vld [vmem:[#allocation74_spill] sm:$0xff] }
 0xccd   :  { %28426 = vst [vmem:[#allocation189_spill] sm:$0xff] %v25825_v26  ;;  %12822 = vmatmul.mubr.bf16.gmra.mrb[0].mxu1 %v28216_v43  ;;  %v28438_v14 = vld [vmem:[#allocation130_spill] sm:$0xff] }
 0xcce   :  { %28428 = vst [vmem:[#allocation21_spill] sm:$0xff] %v25828_v7  ;;  %12831 = vmatprep.mubr.bf16.mxu1 %v28018_v16 }
 0xcd0   :  { %v12497_v27 = vpop.f32.mrb[88].mxu1 }
 0xcd1   :  { %v25833_v19 = vadd.f32 %v12497_v27, %v28429_v28  ;;  %v12499_v22 = vpop.f32.mrb[89].mxu1  ;;  %v28440_v27 = vld [vmem:[#allocation25_spill] sm:$0xff] }
 0xcd2   :  { %v25836_v11 = vadd.f32 %v12499_v22, %v28430_v53  ;;  %v12501_v60 = vpop.f32.mrb[90].mxu1  ;;  %v28436_v22 = vld [vmem:[#allocation118_spill] sm:$0xff] }
 0xcd3   :  { %v25841_v1 = vadd.f32 %v12501_v60, %v28432_v48  ;;  %v12503_v37 = vpop.f32.mrb[91].mxu1 }
 0xcd4   :  { %28431 = vst [vmem:[#allocation113_spill] sm:$0xff] %v25836_v11  ;;  %v25846_v62 = vadd.f32 %v12503_v37, %v28434_v30 }
 0xcd5   :  { %28433 = vst [vmem:[#allocation128_spill] sm:$0xff] %v25841_v1  ;;  %12832 = vmatmul.mubr.bf16.gmra.mrb[4].mxu1 %v28217_v8 }
 0xcd6   :  { %28435 = vst [vmem:[#allocation28_spill] sm:$0xff] %v25846_v62  ;;  %12841 = vmatprep.mubr.bf16.mxu1 %v28018_v16  ;;  %v28442_v62 = vld [vmem:[#allocation131_spill] sm:$0xff] }
 0xcd8   :  { %v12507_v28 = vpop.f32.mrb[92].mxu1 }
 0xcd9   :  { %v25855_v60 = vadd.f32 %v12507_v28, %v28436_v22  ;;  %v12509_v48 = vpop.f32.mrb[93].mxu1  ;;  %v19697_v22 = vld [vmem:[%s27059_s5 + $0x200] ss:$16 sps:$4 sm:$0xff]  }
 0xcda   :  { %v25858_v43 = vadd.f32 %v12509_v48, %v28438_v14  ;;  %v12511_v37 = vpop.f32.mrb[94].mxu1  ;;  %v19705_v48 = vld [vmem:[%s27059_s5 + $0x224] ss:$16 sps:$4 sm:$0xff]  }
 0xcdb   :  { %28437 = vst [vmem:[#allocation191_spill] sm:$0xff] %v25855_v60  ;;  %v25863_v1 = vadd.f32 %v12511_v37, %v28440_v27  ;;  %v12513_v8 = vpop.f32.mrb[95].mxu1  ;;  %v19699_v27 = vld [vmem:[%s27059_s5 + $0x204] ss:$16 sps:$4 sm:$0xff]   ;;  %v19703_v37 = vld [vmem:[%s27059_s5 + $0x220] ss:$16 sps:$4 sm:$0xff]  }
 0xcdc   :  { %28439 = vst [vmem:[#allocation6_spill] sm:$0xff] %v25858_v43  ;;  %v25868_v17 = vadd.f32 %v12513_v8, %v28442_v62  ;;  %v19702_v62 = vld [vmem:[%s27059_s5 + $0x104] ss:$16 sps:$4 sm:$0xff]   ;;  %15213 = vmatprep.subr.bf16.mxu0 %v19699_v27  ;;  %v19706_v8 = vld [vmem:[%s27059_s5 + $0x120] ss:$16 sps:$4 sm:$0xff]  }
 0xcdd   :  { %28441 = vst [vmem:[#allocation132_spill] sm:$0xff] %v25863_v1  ;;  %12842 = vmatmul.mubr.bf16.gmra.mrb[8].mxu1 %v28349_v46  ;;  %v19700_v46 = vld [vmem:[%s27059_s5 + $0x100] ss:$16 sps:$4 sm:$0xff]   ;;  %15176 = vmatprep.subr.bf16.mxu1 %v19702_v62  ;;  %v19708_v27 = vld [vmem:[%s27059_s5 + $0x124] ss:$16 sps:$4 sm:$0xff]  }
 0xcde   :  { %28443 = vst [vmem:[#allocation176_spill] sm:$0xff] %v25868_v17  ;;  %12851 = vmatprep.mubr.bf16.mxu1 %v28018_v16  ;;  %15214 = vmatpush1.bf16.msra.mxu0 %v19697_v22  ;;  %v19711_v22 = vld [vmem:[%s27059_s5 + $0x244] ss:$16 sps:$4 sm:$0xff]   ;;  %v19709_v62 = vld [vmem:[%s27059_s5 + $0x240] ss:$16 sps:$4 sm:$0xff]   ;;  %v28449_v17 = vld [vmem:[#allocation158_spill] sm:$0xff] }
 0xcdf   :  { %15177 = vmatpush1.bf16.msra.mxu1 %v19700_v46  ;;  %15215 = vmatprep.subr.bf16.mxu0 %v19705_v48  ;;  %v19714_v46 = vld [vmem:[%s27059_s5 + $0x144] ss:$16 sps:$4 sm:$0xff]  }
 0xce0   :  { %15178 = vmatprep.subr.bf16.mxu1 %v19708_v27  ;;  %v19717_v48 = vld [vmem:[%s27059_s5 + $0x264] ss:$16 sps:$4 sm:$0xff]  }
 0xce1   :  { %v19720_v27 = vld [vmem:[%s27059_s5 + $0x164] ss:$16 sps:$4 sm:$0xff]  }
 0xce2   :  { %15216 = vmatpush1.bf16.msra.mxu0 %v19703_v37  ;;  %v19715_v37 = vld [vmem:[%s27059_s5 + $0x260] ss:$16 sps:$4 sm:$0xff]  }
 0xce3   :  { %15179 = vmatpush1.bf16.msra.mxu1 %v19706_v8  ;;  %15217 = vmatprep.subr.bf16.mxu0 %v19711_v22  ;;  %v19718_v8 = vld [vmem:[%s27059_s5 + $0x160] ss:$16 sps:$4 sm:$0xff]   ;;  %v19723_v22 = vld [vmem:[%s27059_s5 + $0x284] ss:$16 sps:$4 sm:$0xff]  }
 0xce4   :  { %15180 = vmatprep.subr.bf16.mxu1 %v19714_v46  ;;  %v19726_v46 = vld [vmem:[%s27059_s5 + $0x184] ss:$16 sps:$4 sm:$0xff]  }
 0xce5   :  { %12852 = vmatmul.mubr.bf16.gmra.mrb[12].mxu1 %v28350_v31  ;;  %v19712_v31 = vld [vmem:[%s27059_s5 + $0x140] ss:$16 sps:$4 sm:$0xff]  }
 0xce6   :  { %12861 = vmatprep.mubr.bf16.mxu1 %v28018_v16  ;;  %15218 = vmatpush1.bf16.msra.mxu0 %v19709_v62  ;;  %v19721_v62 = vld [vmem:[%s27059_s5 + $0x280] ss:$16 sps:$4 sm:$0xff]  }
 0xce7   :  { %15181 = vmatpush1.bf16.msra.mxu1 %v19712_v31  ;;  %15219 = vmatprep.subr.bf16.mxu0 %v19717_v48  ;;  %v19729_v31 = vld [vmem:[%s27059_s5 + $0x2a4] ss:$16 sps:$4 sm:$0xff]   ;;  %v19727_v48 = vld [vmem:[%s27059_s5 + $0x2a0] ss:$16 sps:$4 sm:$0xff]  }
 0xce8   :  { %15182 = vmatprep.subr.bf16.mxu1 %v19720_v27  ;;  %v19735_v27 = vld [vmem:[%s27059_s5 + $0x2c4] ss:$16 sps:$4 sm:$0xff]  }
 0xce9   :  { %v28447_v14 = vld [vmem:[#allocation91_spill] sm:$0xff] }
 0xcea   :  { %15220 = vmatpush1.bf16.msra.mxu0 %v19715_v37  ;;  %v19732_v37 = vld [vmem:[%s27059_s5 + $0x1a4] ss:$16 sps:$4 sm:$0xff]  }
 0xceb   :  { %15183 = vmatpush1.bf16.msra.mxu1 %v19718_v8  ;;  %15221 = vmatprep.subr.bf16.mxu0 %v19723_v22  ;;  %v19730_v8 = vld [vmem:[%s27059_s5 + $0x1a0] ss:$16 sps:$4 sm:$0xff]  }
 0xcec   :  { %15184 = vmatprep.subr.bf16.mxu1 %v19726_v46  ;;  %v19733_v22 = vld [vmem:[%s27059_s5 + $0x2c0] ss:$16 sps:$4 sm:$0xff]   ;;  %v19741_v46 = vld [vmem:[%s27059_s5 + $0x2e4] ss:$16 sps:$4 sm:$0xff]  }
 0xced   :  { %12862 = vmatmul.mubr.bf16.gmra.mrb[16].mxu1 %v28355_v57  ;;  %v19724_v57 = vld [vmem:[%s27059_s5 + $0x180] ss:$16 sps:$4 sm:$0xff]  }
 0xcee   :  { %12871 = vmatprep.mubr.bf16.mxu1 %v28018_v16  ;;  %15222 = vmatpush1.bf16.msra.mxu0 %v19721_v62  ;;  %v19736_v62 = vld [vmem:[%s27059_s5 + $0x1c0] ss:$16 sps:$4 sm:$0xff]  }
 0xcef   :  { %15185 = vmatpush1.bf16.msra.mxu1 %v19724_v57  ;;  %15223 = vmatprep.subr.bf16.mxu0 %v19729_v31  ;;  %v19739_v57 = vld [vmem:[%s27059_s5 + $0x2e0] ss:$16 sps:$4 sm:$0xff]   ;;  %v19744_v31 = vld [vmem:[%s27059_s5 + $0x1e4] ss:$16 sps:$4 sm:$0xff]  }
 0xcf0   :  { %15186 = vmatprep.subr.bf16.mxu1 %v19732_v37  ;;  %v19747_v37 = vld [vmem:[%s27059_s5 + $0x304] ss:$16 sps:$4 sm:$0xff]  }
 0xcf1   :  { %v28454_v60 = vld [vmem:[#allocation19_spill] sm:$0xff] }
 0xcf2   :  { %15224 = vmatpush1.bf16.msra.mxu0 %v19727_v48  ;;  %v19742_v48 = vld [vmem:[%s27059_s5 + $0x1e0] ss:$16 sps:$4 sm:$0xff]  }
 0xcf3   :  { %15187 = vmatpush1.bf16.msra.mxu1 %v19730_v8  ;;  %15225 = vmatprep.subr.bf16.mxu0 %v19735_v27  ;;  %v19745_v8 = vld [vmem:[%s27059_s5 + $0x300] ss:$16 sps:$4 sm:$0xff]   ;;  %v19753_v27 = vld [vmem:[%s27059_s5 + $0x344] ss:$16 sps:$4 sm:$0xff]  }
 0xcf5   :  { %12872 = vmatmul.mubr.bf16.gmra.mrb[20].mxu1 %v28356_v10  ;;  %v19738_v10 = vld [vmem:[%s27059_s5 + $0x1c4] ss:$16 sps:$4 sm:$0xff]  }
 0xcf6   :  { %12881 = vmatprep.mubr.bf16.mxu1 %v28018_v16  ;;  %15188 = vmatprep.subr.bf16.mxu1 %v19738_v10  ;;  %v19756_v10 = vld [vmem:[%s27059_s5 + $0x364] ss:$16 sps:$4 sm:$0xff]  }
 0xcf7   :  { %15226 = vmatpush1.bf16.msra.mxu0 %v19733_v22  ;;  %15189 = vmatpush1.bf16.msra.mxu1 %v19736_v62  ;;  %v19751_v22 = vld [vmem:[%s27059_s5 + $0x340] ss:$16 sps:$4 sm:$0xff]   ;;  %v19759_v62 = vld [vmem:[%s27059_s5 + $0x384] ss:$16 sps:$4 sm:$0xff]  }
 0xcf8   :  { %15227 = vmatprep.subr.bf16.mxu0 %v19741_v46  ;;  %15190 = vmatprep.subr.bf16.mxu1 %v19744_v31  ;;  %v19757_v46 = vld [vmem:[%s27059_s5 + $0x380] ss:$16 sps:$4 sm:$0xff]  }
 0xcf9   :  { %v19760_v31 = vld [vmem:[%s27059_s5 + $0x3a0] ss:$16 sps:$4 sm:$0xff]  }
 0xcfb   :  { %15228 = vmatpush1.bf16.msra.mxu0 %v19739_v57  ;;  %15191 = vmatpush1.bf16.msra.mxu1 %v19742_v48  ;;  %v19762_v57 = vld [vmem:[%s27059_s5 + $0x3a4] ss:$16 sps:$4 sm:$0xff]  }
 0xcfc   :  { %15229 = vmatprep.subr.bf16.mxu0 %v19747_v37  ;;  %v19765_v48 = vld [vmem:[%s27059_s5 + $0x3c4] ss:$16 sps:$4 sm:$0xff]   ;;  %v19763_v37 = vld [vmem:[%s27059_s5 + $0x3c0] ss:$16 sps:$4 sm:$0xff]  }
 0xcfd   :  { %12882 = vmatmul.mubr.bf16.gmra.mrb[24].mxu1 %v23717_v39  ;;  %v19750_v39 = vld [vmem:[%s27059_s5 + $0x324] ss:$16 sps:$4 sm:$0xff]  }
 0xcfe   :  { %12891 = vmatprep.mubr.bf16.mxu1 %v28018_v16  ;;  %v19748_v16 = vld [vmem:[%s27059_s5 + $0x320] ss:$16 sps:$4 sm:$0xff]  }
 0xcff   :  { %15230 = vmatpush1.bf16.msra.mxu0 %v19745_v8  ;;  %v19768_v8 = vld [vmem:[%s27059_s5 + $0x3e4] ss:$16 sps:$4 sm:$0xff]  }
 0xd00   :  { %15231 = vmatprep.subr.bf16.mxu0 %v19750_v39  ;;  %v19766_v39 = vld [vmem:[%s27059_s5 + $0x3e0] ss:$16 sps:$4 sm:$0xff]  }
 0xd03   :  { %15232 = vmatpush1.bf16.msra.mxu0 %v19748_v16  ;;  %v19771_v16 = vld [vmem:[%s27059_s5 + $0x404] ss:$16 sps:$4 sm:$0xff]  }
 0xd04   :  { %15233 = vmatprep.subr.bf16.mxu0 %v19753_v27 }
 0xd05   :  { %12892 = vmatmul.mubr.bf16.gmra.mrb[28].mxu1 %v23735_v21  ;;  %v19754_v21 = vld [vmem:[%s27059_s5 + $0x360] ss:$16 sps:$4 sm:$0xff]  }
 0xd07   :  { %15234 = vmatpush1.bf16.msra.mxu0 %v19751_v22  ;;  %v28444_v22 = vld [vmem:[#allocation68_spill] sm:$0xff] }
 0xd08   :  { %15235 = vmatprep.subr.bf16.mxu0 %v19756_v10 }
 0xd0b   :  { %15236 = vmatpush1.bf16.msra.mxu0 %v19754_v21 }
 0xd0c   :  { %15237 = vmatprep.subr.bf16.mxu0 %v19759_v62  ;;  %v28445_v62 = vld [vmem:[#allocation157_spill] sm:$0xff] }
 0xd0f   :  { %15238 = vmatpush1.bf16.msra.mxu0 %v19757_v46 }
 0xd10   :  { %15239 = vmatprep.subr.bf16.mxu0 %v19762_v57 }
 0xd13   :  { %15240 = vmatpush1.bf16.msra.mxu0 %v19760_v31  ;;  %v28446_v31 = vld [vmem:[#allocation161_spill] sm:$0xff] }
 0xd14   :  { %15241 = vmatprep.subr.bf16.mxu0 %v19765_v48 }
 0xd17   :  { %15242 = vmatpush1.bf16.msra.mxu0 %v19763_v37 }
 0xd18   :  { %15243 = vmatprep.subr.bf16.mxu0 %v19768_v8  ;;  %v28448_v8 = vld [vmem:[#allocation86_spill] sm:$0xff] }
 0xd1b   :  { %15244 = vmatpush1.bf16.msra.mxu0 %v19766_v39 }
 0xd1c   :  { %15266 = vmatprep.subr.bf16.mxu0 %v19771_v16  ;;  %v28450_v16 = vld [vmem:[#allocation162_spill] sm:$0xff] }
 0xd60   :  { %v12743_v27 = vpop.f32.mrb[96].mxu1 }
 0xd61   :  { %v17566_v10 = vadd.f32 %v12743_v27, %v28444_v22  ;;  %v12745_v21 = vpop.f32.mrb[97].mxu1  ;;  %v28451_v27 = vld [vmem:[#allocation93_spill] sm:$0xff] }
 0xd62   :  { %v17567_v46 = vadd.f32 %v12745_v21, %v28445_v62  ;;  %v12747_v57 = vpop.f32.mrb[98].mxu1  ;;  %v13286_v21 = vld [vmem:[%s27060_s4] sm:$0x3]  ;;  %v28452_v62 = vld [vmem:[#allocation98_spill] sm:$0xff] }
 0xd63   :  { %v17568_v48 = vadd.f32 %v12747_v57, %v28446_v31  ;;  %v12749_v37 = vpop.f32.mrb[99].mxu1  ;;  %v28453_v31 = vld [vmem:[#allocation159_spill] sm:$0xff]  ;;  %v26051_v11 = vrot.slane %v13286_v21, %v28457_v2 }
 0xd64   :  { %v17569_v28 = vadd.f32 %v12749_v37, %v28447_v14 }
 0xd68   :  { %v12753_v53 = vpop.f32.mrb[100].mxu1 }
 0xd69   :  { %v17570_v39 = vadd.f32 %v12753_v53, %v28448_v8  ;;  %v12755_v30 = vpop.f32.mrb[101].mxu1 }
 0xd6a   :  { %v17571_v7 = vadd.f32 %v12755_v30, %v28449_v17  ;;  %v12757_v1 = vpop.f32.mrb[102].mxu1  ;;  %v26046_v17 = vrot.slane %v13286_v21, %v28454_v60  ;;  %v28455_v30 = vld [vmem:[#allocation163_spill] sm:$0xff]  ;;  %v28461_v21 = vmax.f32 %v25550_v36, %v25582_v52 }
 0xd6b   :  { %v17572_v26 = vadd.f32 %v12757_v1, %v28450_v16  ;;  %v12759_v43 = vpop.f32.mrb[103].mxu1 }
 0xd6c   :  { %v17573_v22 = vadd.f32 %v12759_v43, %v28451_v27  ;;  %v28456_v43 = vld [vmem:[#allocation95_spill] sm:$0xff] }
 0xd70   :  { %v12763_v59 = vpop.f32.mrb[104].mxu1 }
 0xd71   :  { %v17574_v57 = vadd.f32 %v12763_v59, %v28452_v62  ;;  %v12765_v14 = vpop.f32.mrb[105].mxu1  ;;  %v28458_v59 = vmax.f32 %v25541_v4, %v25569_v56 }
 0xd72   :  { %v17575_v37 = vadd.f32 %v12765_v14, %v28453_v31  ;;  %v12767_v53 = vpop.f32.mrb[106].mxu1 }
 0xd73   :  { %v13321_v8 = vmax.f32 %v17566_v10, %v17574_v57  ;;  %v17576_v1 = vadd.f32 %v12767_v53, %v28455_v30  ;;  %v12769_v16 = vpop.f32.mrb[107].mxu1  ;;  %v28459_v10 = vmax.f32 %v25544_v61, %v25572_v33  ;;  %v28463_v33 = vld [vmem:[#allocation160_spill] sm:$0xff] }
 0xd74   :  { %v13322_v29 = vmax.f32 %v17567_v46, %v17575_v37  ;;  %v17577_v27 = vadd.f32 %v12769_v16, %v28456_v43  ;;  %v28460_v46 = vmax.f32 %v25547_v23, %v25577_v9 }
 0xd75   :  { %v13335_v62 = vmax.f32 %v28458_v59, %v13321_v8  ;;  %v13325_v0 = vmax.f32 %v17568_v48, %v17576_v1  ;;  %v28462_v48 = vld [vmem:[#allocation99_spill] sm:$0xff] }
 0xd76   :  { %v13336_v57 = vmax.f32 %v28459_v10, %v13322_v29  ;;  %v13326_v14 = vmax.f32 %v17569_v28, %v17577_v27  ;;  %v28465_v27 = vld [vmem:[#allocation97_spill] sm:$0xff] }
 0xd77   :  { %v13354_v31 = vadd.f32 %v26046_v17, %v13335_v62  ;;  %v13337_v37 = vmax.f32 %v28460_v46, %v13325_v0  ;;  %v28464_v0 = vld [vmem:[#allocation164_spill] sm:$0xff] }
 0xd78   :  { %v13338_v53 = vmax.f32 %v28461_v21, %v13326_v14  ;;  %v12773_v30 = vpop.f32.mrb[108].mxu1  ;;  %v13355_v4 = vadd.f32 %v26051_v11, %v13336_v57  ;;  %v28466_v14 = vmax.f32 %v25555_v6, %v25591_v44 }
 0xd79   :  { %v13356_v56 = vadd.f32 %v26046_v17, %v13337_v37  ;;  %v17578_v8 = vadd.f32 %v12773_v30, %v28462_v48  ;;  %v12775_v61 = vpop.f32.mrb[109].mxu1  ;;  %v13362_v16 = vmax.f32 %v13354_v31, 0.0  ;;  %v28467_v31 = vmax.f32 %v25558_v49, %v25594_v34  ;;  %v28470_v49 = vld [vmem:[#allocation89_spill] sm:$0xff] }
 0xd7a   :  { %v17579_v29 = vadd.f32 %v12775_v61, %v28463_v33  ;;  %v12777_v28 = vpop.f32.mrb[110].mxu1  ;;  %v13357_v1 = vadd.f32 %v26051_v11, %v13338_v53  ;;  %v13363_v62 = vmax.f32 %v13355_v4, 0.0  ;;  %v28472_v33 = vld [vmem:[#allocation165_spill] sm:$0xff] }
 0xd7b   :  { %v13364_v23 = vmax.f32 %v13356_v56, 0.0  ;;  %v13329_v9 = vmax.f32 %v17570_v39, %v17578_v8  ;;  %v17580_v43 = vadd.f32 %v12777_v28, %v28464_v0  ;;  %v12779_v36 = vpop.f32.mrb[111].mxu1  ;;  %v28469_v56 = vmax.f32 %v25564_v32, %v25604_v51 }
 0xd7c   :  { %v13330_v52 = vmax.f32 %v17571_v7, %v17579_v29  ;;  %v17581_v59 = vadd.f32 %v12779_v36, %v28465_v27  ;;  %v13365_v10 = vmax.f32 %v13357_v1, 0.0  ;;  %v28468_v7 = vmax.f32 %v25561_v12, %v25599_v3  ;;  %v28471_v12 = vld [vmem:[#allocation83_spill] sm:$0xff]  ;;  %v28473_v1 = vld [vmem:[#allocation169_spill] sm:$0xff] }
 0xd7d   :  { %v26073_v57 = vpack.c.bf16 %v13364_v23, %v13362_v16  ;;  %v13339_v46 = vmax.f32 %v28466_v14, %v13329_v9  ;;  %v13333_v37 = vmax.f32 %v17572_v26, %v17580_v43 }
 0xd7e   :  { %v13340_v21 = vmax.f32 %v28467_v31, %v13330_v52  ;;  %v13334_v39 = vmax.f32 %v17573_v22, %v17581_v59  ;;  %v26081_v53 = vpack.c.bf16 %v13365_v10, %v13363_v62  ;;  %v28474_v52 = vld [vmem:[#allocation103_spill] sm:$0xff] }
 0xd7f   :  { %v13341_v30 = vmax.f32 %v28468_v7, %v13333_v37  ;;  %v13358_v4 = vadd.f32 %v26046_v17, %v13339_v46  ;;  %v28475_v62 = vld [vmem:[#allocation111_spill] sm:$0xff]  ;;  %v28476_v46 = vld [vmem:[#allocation166_spill] sm:$0xff] }
 0xd80   :  { %v13342_v48 = vmax.f32 %v28469_v56, %v13334_v39  ;;  %v12783_v6 = vpop.f32.mrb[112].mxu1  ;;  %15192 = vmatprep.mubr.bf16.mxu1 %v26081_v53  ;;  %v13359_v44 = vadd.f32 %v26051_v11, %v13340_v21  ;;  %v28477_v21 = vld [vmem:[#allocation170_spill] sm:$0xff] }
 0xd81   :  { %v17582_v34 = vadd.f32 %v12783_v6, %v28470_v49  ;;  %v12785_v26 = vpop.f32.mrb[113].mxu1  ;;  %15193 = vmatmul.mubr.bf16.vlgmr.msra.gmra.mrb[128].mxu1 %v26073_v57  ;;  %v13360_v22 = vadd.f32 %v26046_v17, %v13341_v30  ;;  %v13366_v29 = vmax.f32 %v13358_v4, 0.0  ;;  %v28478_v30 = vld [vmem:[#allocation92_spill] sm:$0xff] }
 0xd82   :  { %v17583_v3 = vadd.f32 %v12785_v26, %v28471_v12  ;;  %v12787_v8 = vpop.f32.mrb[114].mxu1  ;;  %v13361_v61 = vadd.f32 %v26051_v11, %v13342_v48  ;;  %v13367_v23 = vmax.f32 %v13359_v44, 0.0  ;;  %v28479_v48 = vld [vmem:[#allocation115_spill] sm:$0xff] }
 0xd83   :  { %v17584_v32 = vadd.f32 %v12787_v8, %v28472_v33  ;;  %v12789_v51 = vpop.f32.mrb[115].mxu1  ;;  %v13368_v28 = vmax.f32 %v13360_v22, 0.0  ;;  %v28480_v26 = vld [vmem:[#allocation167_spill] sm:$0xff] }
 0xd84   :  { %v17585_v16 = vadd.f32 %v12789_v51, %v28473_v1  ;;  %v13369_v9 = vmax.f32 %v13361_v61, 0.0  ;;  %v28481_v61 = vld [vmem:[#allocation171_spill] sm:$0xff]  ;;  %v28482_v51 = vmax.f32 %v25613_v63, %v25659_v18  ;;  %v28483_v1 = vmax.f32 %v25616_v40, %v25665_v15  ;;  %v28487_v15 = vld [vmem:[#allocation117_spill] sm:$0xff] }
 0xd85   :  { %v26099_v0 = vpack.c.bf16 %v13368_v28, %v13366_v29 }
 0xd86   :  { %v26101_v43 = vpack.c.bf16 %v13369_v9, %v13367_v23 }
 0xd88   :  { %v12793_v36 = vpop.f32.mrb[116].mxu1  ;;  %15202 = vmatprep.mubr.bf16.mxu1 %v26101_v43 }
 0xd89   :  { %v17586_v27 = vadd.f32 %v12793_v36, %v28474_v52  ;;  %v12795_v59 = vpop.f32.mrb[117].mxu1  ;;  %15203 = vmatmul.mubr.bf16.gmra.mrb[132].mxu1 %v26099_v0 }
 0xd8a   :  { %v17587_v10 = vadd.f32 %v12795_v59, %v28475_v62  ;;  %v12797_v14 = vpop.f32.mrb[118].mxu1 }
 0xd8b   :  { %v17588_v37 = vadd.f32 %v12797_v14, %v28476_v46  ;;  %v12799_v31 = vpop.f32.mrb[119].mxu1 }
 0xd8c   :  { %v17589_v39 = vadd.f32 %v12799_v31, %v28477_v21 }
 0xd90   :  { %v12803_v7 = vpop.f32.mrb[120].mxu1 }
 0xd91   :  { %v17590_v4 = vadd.f32 %v12803_v7, %v28478_v30  ;;  %v12805_v56 = vpop.f32.mrb[121].mxu1  ;;  %v28488_v7 = vld [vmem:[#allocation168_spill] sm:$0xff] }
 0xd92   :  { %v17591_v6 = vadd.f32 %v12805_v56, %v28479_v48  ;;  %v12807_v44 = vpop.f32.mrb[122].mxu1 }
 0xd93   :  { %v13408_v49 = vmax.f32 %v17582_v34, %v17590_v4  ;;  %v17592_v22 = vadd.f32 %v12807_v44, %v28480_v26  ;;  %v12809_v12 = vpop.f32.mrb[123].mxu1  ;;  %v28484_v34 = vmax.f32 %v25619_v50, %v25670_v54  ;;  %v28489_v4 = vld [vmem:[#allocation173_spill] sm:$0xff] }
 0xd94   :  { %v13409_v8 = vmax.f32 %v17583_v3, %v17591_v6  ;;  %v17593_v33 = vadd.f32 %v12809_v12, %v28481_v61  ;;  %v28485_v3 = vmax.f32 %v25622_v58, %v25675_v45  ;;  %v28491_v12 = vmax.f32 %v25633_v25, %v25699_v20  ;;  %v28494_v25 = vld [vmem:[#allocation109_spill] sm:$0xff] }
 0xd95   :  { %v13422_v29 = vmax.f32 %v28482_v51, %v13408_v49  ;;  %v13412_v28 = vmax.f32 %v17584_v32, %v17592_v22  ;;  %v28486_v32 = vld [vmem:[#allocation105_spill] sm:$0xff]  ;;  %v28490_v49 = vmax.f32 %v25630_v35, %v25693_v47  ;;  %v28492_v51 = vmax.f32 %v25639_v13, %v25704_v5  ;;  %v28493_v47 = vld [vmem:[#allocation194_spill] sm:$0xff] }
 0xd96   :  { %v13423_v23 = vmax.f32 %v28483_v1, %v13409_v8  ;;  %v13413_v9 = vmax.f32 %v17585_v16, %v17593_v33  ;;  %v19774_v35 = vld [vmem:[%s27059_s5 + $0x424] ss:$16 sps:$4 sm:$0xff]   ;;  %v28495_v20 = vmax.f32 %v28493_v47, %v28494_v25 }
 0xd97   :  { %v13430_v36 = vadd.f32 %v13422_v29, %v26046_v17  ;;  %v13424_v52 = vmax.f32 %v28484_v34, %v13412_v28  ;;  %v28497_v5 = vld [vmem:[#allocation133_spill] sm:$0xff] }
 0xd98   :  { %v13425_v59 = vmax.f32 %v28485_v3, %v13413_v9  ;;  %v12813_v62 = vpop.f32.mrb[124].mxu1  ;;  %v13431_v63 = vadd.f32 %v13423_v23, %v26051_v11  ;;  %v28496_v23 = vld [vmem:[#allocation137_spill] sm:$0xff] }
 0xd99   :  { %v13432_v18 = vadd.f32 %v13424_v52, %v26046_v17  ;;  %v17594_v14 = vadd.f32 %v12813_v62, %v28486_v32  ;;  %v12815_v40 = vpop.f32.mrb[125].mxu1  ;;  %v13438_v21 = vmax.f32 %v13430_v36, 0.0  ;;  %v19772_v52 = vld [vmem:[%s27059_s5 + $0x420] ss:$16 sps:$4 sm:$0xff]  }
 0xd9a   :  { %v17595_v16 = vadd.f32 %v12815_v40, %v28487_v15  ;;  %v12817_v46 = vpop.f32.mrb[126].mxu1  ;;  %v13433_v31 = vadd.f32 %v13425_v59, %v26051_v11  ;;  %v13439_v48 = vmax.f32 %v13431_v63, 0.0  ;;  %v28498_v63 = vld [vmem:[#allocation138_spill] sm:$0xff]  ;;  %v28499_v40 = vld [vmem:[#allocation27_spill] sm:$0xff]  ;;  %v28505_v25 = vld [vmem:[#allocation41_spill] sm:$0xff] }
 0xd9b   :  { %v13440_v50 = vmax.f32 %v13432_v18, 0.0  ;;  %v13416_v54 = vmax.f32 %v17586_v27, %v17594_v14  ;;  %v17596_v30 = vadd.f32 %v12817_v46, %v28488_v7  ;;  %v12819_v58 = vpop.f32.mrb[127].mxu1  ;;  %v19777_v14 = vld [vmem:[%s27059_s5 + $0x444] ss:$16 sps:$4 sm:$0xff]  }
 0xd9c   :  { %v13417_v45 = vmax.f32 %v17587_v10, %v17595_v16  ;;  %v17597_v56 = vadd.f32 %v12819_v58, %v28489_v4  ;;  %v13441_v6 = vmax.f32 %v13433_v31, 0.0  ;;  %v19769_v10 = vld [vmem:[%s27059_s5 + $0x400] ss:$16 sps:$4 sm:$0xff]  }
 0xd9d   :  { %v26133_v44 = vpack.c.bf16 %v13440_v50, %v13438_v21  ;;  %v13426_v26 = vmax.f32 %v28490_v49, %v13416_v54  ;;  %v13420_v22 = vmax.f32 %v17588_v37, %v17596_v30  ;;  %v19775_v50 = vld [vmem:[%s27059_s5 + $0x440] ss:$16 sps:$4 sm:$0xff]   ;;  %v19780_v54 = vld [vmem:[%s27059_s5 + $0x464] ss:$16 sps:$4 sm:$0xff]   ;;  %v28502_v49 = vld [vmem:[#allocation136_spill] sm:$0xff] }
 0xd9e   :  { %v13427_v8 = vmax.f32 %v28491_v12, %v13417_v45  ;;  %v13421_v27 = vmax.f32 %v17589_v39, %v17597_v56  ;;  %v26141_v61 = vpack.c.bf16 %v13441_v6, %v13439_v48  ;;  %v28500_v30 = vld [vmem:[#allocation135_spill] sm:$0xff] }
 0xd9f   :  { %v13434_v33 = vadd.f32 %v13426_v26, %v26046_v17  ;;  %v13428_v29 = vmax.f32 %v28492_v51, %v13420_v22  ;;  %v28501_v4 = vld [vmem:[#allocation139_spill] sm:$0xff] }
 0xda0   :  { %v13429_v37 = vmax.f32 %v28495_v20, %v13421_v27  ;;  %v12823_v39 = vpop.f32.mrb[0].mxu1  ;;  %15245 = vmatprep.mubr.bf16.mxu0 %v26141_v61  ;;  %v13435_v28 = vadd.f32 %v13427_v8, %v26051_v11  ;;  %v19778_v6 = vld [vmem:[%s27059_s5 + $0x460] ss:$16 sps:$4 sm:$0xff]   ;;  %v19783_v12 = vld [vmem:[%s27059_s5 + $0x484] ss:$16 sps:$4 sm:$0xff]   ;;  %v28503_v8 = vld [vmem:[#allocation140_spill] sm:$0xff] }
 0xda1   :  { %v13436_v1 = vadd.f32 %v13428_v29, %v26046_v17  ;;  %v17598_v9 = vadd.f32 %v12823_v39, %v28496_v23  ;;  %v12825_v36 = vpop.f32.mrb[1].mxu1  ;;  %15246 = vmatmul.mubr.bf16.vlgmr.msra.gmra.mrb[192].mxu0 %v26133_v44  ;;  %v13442_v59 = vmax.f32 %v13434_v33, 0.0  ;;  %v19786_v33 = vld [vmem:[%s27059_s5 + $0x4a4] ss:$16 sps:$4 sm:$0xff]   ;;  %v19784_v39 = vld [vmem:[%s27059_s5 + $0x4a0] ss:$16 sps:$4 sm:$0xff]  }
 0xda2   :  { %v17599_v13 = vadd.f32 %v12825_v36, %v28497_v5  ;;  %15267 = vmatpush1.bf16.msra.mxu0 %v19769_v10  ;;  %v12827_v34 = vpop.f32.mrb[2].mxu1  ;;  %v13437_v3 = vadd.f32 %v13429_v37, %v26051_v11  ;;  %v13443_v16 = vmax.f32 %v13435_v28, 0.0  ;;  %v19781_v10 = vld [vmem:[%s27059_s5 + $0x480] ss:$16 sps:$4 sm:$0xff]   ;;  %v19789_v5 = vld [vmem:[%s27059_s5 + $0x4c4] ss:$16 sps:$4 sm:$0xff]  }
 0xda3   :  { %v13444_v62 = vmax.f32 %v13436_v1, 0.0  ;;  %v17600_v18 = vadd.f32 %v12827_v34, %v28498_v63  ;;  %v12829_v32 = vpop.f32.mrb[3].mxu1  ;;  %15268 = vmatprep.subr.bf16.mxu0 %v19774_v35  ;;  %v28504_v29 = vld [vmem:[#allocation45_spill] sm:$0xff] }
 0xda4   :  { %v17601_v15 = vadd.f32 %v12829_v32, %v28499_v40  ;;  %v13445_v46 = vmax.f32 %v13437_v3, 0.0  ;;  %v28506_v1 = vld [vmem:[#allocation141_spill] sm:$0xff]  ;;  %v28509_v32 = vmax.f32 %v25733_v41, %v25764_v42 }
 0xda5   :  { %v26171_v31 = vpack.c.bf16 %v13444_v62, %v13442_v59  ;;  %v28508_v59 = vmax.f32 %v25727_v24, %v25761_v38  ;;  %v19787_v40 = vld [vmem:[%s27059_s5 + $0x4c0] ss:$16 sps:$4 sm:$0xff]   ;;  %v19792_v24 = vld [vmem:[%s27059_s5 + $0x4e4] ss:$16 sps:$4 sm:$0xff]   ;;  %v28513_v38 = vld [vmem:[#allocation196_spill] sm:$0xff] }
 0xda6   :  { %15269 = vmatpush1.bf16.msra.mxu0 %v19772_v52  ;;  %v26173_v21 = vpack.c.bf16 %v13445_v46, %v13443_v16  ;;  %v28507_v52 = vld [vmem:[#allocation145_spill] sm:$0xff] }
 0xda7   :  { %15270 = vmatprep.subr.bf16.mxu0 %v19777_v14  ;;  %v28511_v46 = vld [vmem:[#allocation125_spill] sm:$0xff] }
 0xda8   :  { %v12833_v7 = vpop.f32.mrb[4].mxu1  ;;  %15255 = vmatprep.mubr.bf16.mxu0 %v26173_v21  ;;  %v28514_v41 = vld [vmem:[#allocation177_spill] sm:$0xff] }
 0xda9   :  { %v26183_v58 = vadd.f32 %v12833_v7, %v28500_v30  ;;  %v12835_v45 = vpop.f32.mrb[5].mxu1  ;;  %15256 = vmatmul.mubr.bf16.gmra.mrb[196].mxu0 %v26171_v31  ;;  %v28515_v42 = vmax.f32 %v28513_v38, %v28514_v41 }
 0xdaa   :  { %v26187_v56 = vadd.f32 %v12835_v45, %v28501_v4  ;;  %15271 = vmatpush1.bf16.msra.mxu0 %v19775_v50  ;;  %v12837_v48 = vpop.f32.mrb[6].mxu1  ;;  %v28516_v45 = vld [vmem:[#allocation142_spill] sm:$0xff] }
 0xdab   :  { %v26193_v26 = vadd.f32 %v12837_v48, %v28502_v49  ;;  %v12839_v22 = vpop.f32.mrb[7].mxu1  ;;  %15272 = vmatprep.subr.bf16.mxu0 %v19780_v54 }
 0xdac   :  { %v26199_v27 = vadd.f32 %v12839_v22, %v28503_v8 }
 0xdae   :  { %15273 = vmatpush1.bf16.msra.mxu0 %v19778_v6  ;;  %v28517_v6 = vld [vmem:[#allocation146_spill] sm:$0xff] }
 0xdaf   :  { %15274 = vmatprep.subr.bf16.mxu0 %v19783_v12  ;;  %v19790_v12 = vld [vmem:[%s27059_s5 + $0x4e0] ss:$16 sps:$4 sm:$0xff]  }
 0xdb0   :  { %v12843_v51 = vpop.f32.mrb[8].mxu1 }
 0xdb1   :  { %v17606_v35 = vadd.f32 %v12843_v51, %v28504_v29  ;;  %v12845_v47 = vpop.f32.mrb[9].mxu1  ;;  %v28518_v29 = vld [vmem:[#allocation143_spill] sm:$0xff] }
 0xdb2   :  { %v17607_v20 = vadd.f32 %v12845_v47, %v28505_v25  ;;  %15275 = vmatpush1.bf16.msra.mxu0 %v19781_v10  ;;  %v12847_v37 = vpop.f32.mrb[10].mxu1  ;;  %v19795_v25 = vld [vmem:[%s27059_s5 + $0x504] ss:$16 sps:$4 sm:$0xff]  }
 0xdb3   :  { %v13484_v28 = vmax.f32 %v17598_v9, %v17606_v35  ;;  %v17608_v23 = vadd.f32 %v12847_v37, %v28506_v1  ;;  %v12849_v36 = vpop.f32.mrb[11].mxu1  ;;  %15276 = vmatprep.subr.bf16.mxu0 %v19786_v33  ;;  %v28519_v37 = vld [vmem:[#allocation147_spill] sm:$0xff] }
 0xdb4   :  { %v13485_v34 = vmax.f32 %v17599_v13, %v17607_v20  ;;  %v17609_v3 = vadd.f32 %v12849_v36, %v28507_v52  ;;  %v28510_v13 = vld [vmem:[#allocation107_spill] sm:$0xff]  ;;  %v28520_v36 = vld [vmem:[#allocation200_spill] sm:$0xff] }
 0xdb5   :  { %v13498_v62 = vmax.f32 %v28508_v59, %v13484_v28  ;;  %v13488_v63 = vmax.f32 %v17600_v18, %v17608_v23  ;;  %v28512_v50 = vmax.f32 %v28510_v13, %v28511_v46  ;;  %v28524_v59 = vld [vmem:[#allocation24_spill] sm:$0xff] }
 0xdb6   :  { %v13499_v9 = vmax.f32 %v28509_v32, %v13485_v34  ;;  %v13489_v14 = vmax.f32 %v17601_v15, %v17609_v3  ;;  %15277 = vmatpush1.bf16.msra.mxu0 %v19784_v39  ;;  %v28523_v3 = vld [vmem:[#allocation175_spill] sm:$0xff] }
 0xdb7   :  { %v13506_v16 = vadd.f32 %v13498_v62, %v26046_v17  ;;  %v13500_v54 = vmax.f32 %v28512_v50, %v13488_v63  ;;  %15278 = vmatprep.subr.bf16.mxu0 %v19789_v5  ;;  %v28521_v5 = vld [vmem:[#allocation185_spill] sm:$0xff]  ;;  %v28525_v62 = vmax.f32 %v28523_v3, %v28524_v59  ;;  %v28538_v59 = vld [vmem:[#allocation150_spill] sm:$0xff] }
 0xdb8   :  { %v13501_v18 = vmax.f32 %v28515_v42, %v13489_v14  ;;  %v12853_v15 = vpop.f32.mrb[12].mxu1  ;;  %v13507_v7 = vadd.f32 %v13499_v9, %v26051_v11  ;;  %v28522_v34 = vmax.f32 %v28520_v36, %v28521_v5  ;;  %v28529_v50 = vld [vmem:[#allocation121_spill] sm:$0xff] }
 0xdb9   :  { %v13508_v30 = vadd.f32 %v13500_v54, %v26046_v17  ;;  %v17610_v4 = vadd.f32 %v12853_v15, %v28516_v45  ;;  %v12855_v48 = vpop.f32.mrb[13].mxu1  ;;  %v13514_v10 = vmax.f32 %v13506_v16, 0.0  ;;  %v28527_v16 = vld [vmem:[#allocation110_spill] sm:$0xff]  ;;  %v19802_v3 = vld [vmem:[%s27059_s5 + $0x560] ss:$16 sps:$4 sm:$0xff]  }
 0xdba   :  { %v17611_v49 = vadd.f32 %v12855_v48, %v28517_v6  ;;  %15279 = vmatpush1.bf16.msra.mxu0 %v19787_v40  ;;  %v12857_v22 = vpop.f32.mrb[14].mxu1  ;;  %v13509_v8 = vadd.f32 %v13501_v18, %v26051_v11  ;;  %v13515_v28 = vmax.f32 %v13507_v7, 0.0  ;;  %v28526_v40 = vld [vmem:[#allocation183_spill] sm:$0xff]  ;;  %v28532_v18 = vld [vmem:[#allocation144_spill] sm:$0xff] }
 0xdbb   :  { %v13516_v33 = vmax.f32 %v13508_v30, 0.0  ;;  %v13492_v51 = vmax.f32 %v26183_v58, %v17610_v4  ;;  %v17612_v35 = vadd.f32 %v12857_v22, %v28518_v29  ;;  %v12859_v47 = vpop.f32.mrb[15].mxu1  ;;  %15280 = vmatprep.subr.bf16.mxu0 %v19792_v24  ;;  %v28528_v13 = vmax.f32 %v28526_v40, %v28527_v16  ;;  %v28533_v30 = vld [vmem:[#allocation148_spill] sm:$0xff]  ;;  %v19796_v48 = vld [vmem:[%s27059_s5 + $0x520] ss:$16 sps:$4 sm:$0xff]  }
 0xdbc   :  { %v13493_v20 = vmax.f32 %v26187_v56, %v17611_v49  ;;  %v17613_v39 = vadd.f32 %v12859_v47, %v28519_v37  ;;  %v13517_v1 = vmax.f32 %v13509_v8, 0.0  ;;  %v19793_v56 = vld [vmem:[%s27059_s5 + $0x500] ss:$16 sps:$4 sm:$0xff]   ;;  %v19810_v16 = vld [vmem:[%s27059_s5 + $0x5a4] ss:$16 sps:$4 sm:$0xff]  }
 0xdbd   :  { %v26251_v23 = vpack.c.bf16 %v13516_v33, %v13514_v10  ;;  %v13502_v58 = vmax.f32 %v28522_v34, %v13492_v51  ;;  %v13496_v52 = vmax.f32 %v26193_v26, %v17612_v35  ;;  %v19798_v26 = vld [vmem:[%s27059_s5 + $0x524] ss:$16 sps:$4 sm:$0xff]   ;;  %v19805_v40 = vld [vmem:[%s27059_s5 + $0x580] ss:$16 sps:$4 sm:$0xff]  }
 0xdbe   :  { %v13503_v63 = vmax.f32 %v28525_v62, %v13493_v20  ;;  %v13497_v32 = vmax.f32 %v26199_v27, %v17613_v39  ;;  %15281 = vmatpush1.bf16.msra.mxu0 %v19790_v12  ;;  %v26264_v9 = vpack.c.bf16 %v13517_v1, %v13515_v28  ;;  %v28530_v27 = vld [vmem:[#allocation127_spill] sm:$0xff]  ;;  %v28536_v1 = vld [vmem:[#allocation149_spill] sm:$0xff] }
 0xdbf   :  { %v13510_v14 = vadd.f32 %v13502_v58, %v26046_v17  ;;  %v13504_v46 = vmax.f32 %v28528_v13, %v13496_v52  ;;  %15282 = vmatprep.subr.bf16.mxu0 %v19795_v25  ;;  %v28531_v54 = vmax.f32 %v28529_v50, %v28530_v27  ;;  %v28534_v12 = vld [vmem:[#allocation71_spill] sm:$0xff]  ;;  %v28537_v34 = vld [vmem:[#allocation153_spill] sm:$0xff] }
 0xdc0   :  { %v12863_v38 = vpop.f32.mrb[16].mxu1  ;;  %15298 = vmatprep.mubr.bf16.mxu0 %v26264_v9  ;;  %v13511_v41 = vadd.f32 %v13503_v63, %v26051_v11  ;;  %v19801_v33 = vld [vmem:[%s27059_s5 + $0x544] ss:$16 sps:$4 sm:$0xff]   ;;  %v19799_v20 = vld [vmem:[%s27059_s5 + $0x540] ss:$16 sps:$4 sm:$0xff]  }
 0xdc1   :  { %v13505_v24 = vmax.f32 %v28531_v54, %v13497_v32  ;;  %v13512_v42 = vadd.f32 %v13504_v46, %v26046_v17  ;;  %v17614_v15 = vadd.f32 %v12863_v38, %v28532_v18  ;;  %v12865_v7 = vpop.f32.mrb[17].mxu1  ;;  %v13518_v49 = vmax.f32 %v13510_v14, 0.0  ;;  %v28535_v51 = vld [vmem:[#allocation75_spill] sm:$0xff]  ;;  %v28540_v46 = vld [vmem:[#allocation65_spill] sm:$0xff] }
 0xdc2   :  { %v17615_v45 = vadd.f32 %v12865_v7, %v28533_v30  ;;  %15283 = vmatpush1.bf16.msra.mxu0 %v19793_v56  ;;  %v12867_v4 = vpop.f32.mrb[18].mxu1  ;;  %v13519_v35 = vmax.f32 %v13511_v41, 0.0  ;;  %v19804_v39 = vld [vmem:[%s27059_s5 + $0x564] ss:$16 sps:$4 sm:$0xff]   ;;  %v28539_v56 = vld [vmem:[#allocation154_spill] sm:$0xff] }
 0xdc3   :  { %v13513_v6 = vadd.f32 %v13505_v24, %v26051_v11  ;;  %v13520_v22 = vmax.f32 %v13512_v42, 0.0  ;;  %v17616_v8 = vadd.f32 %v12867_v4, %v28534_v12  ;;  %v12869_v10 = vpop.f32.mrb[19].mxu1  ;;  %15284 = vmatprep.subr.bf16.mxu0 %v19798_v26  ;;  %v19807_v32 = vld [vmem:[%s27059_s5 + $0x584] ss:$16 sps:$4 sm:$0xff]   ;;  %v19808_v38 = vld [vmem:[%s27059_s5 + $0x5a0] ss:$16 sps:$4 sm:$0xff]  }
 0xdc4   :  { %v17617_v29 = vadd.f32 %v12869_v10, %v28535_v51  ;;  %v28541_v27 = vld [vmem:[#allocation151_spill] sm:$0xff] }
 0xdc5   :  { %v13521_v47 = vmax.f32 %v13513_v6, 0.0  ;;  %v26290_v25 = vpack.c.bf16 %v13520_v22, %v13518_v49  ;;  %v28542_v42 = vld [vmem:[#allocation155_spill] sm:$0xff]  ;;  %v28544_v49 = vmax.f32 %v25805_v55, %v25833_v19 }
 0xdc6   :  { %15285 = vmatpush1.bf16.msra.mxu0 %v19796_v48  ;;  %v19813_v30 = vld [vmem:[%s27059_s5 + $0x5c4] ss:$16 sps:$4 sm:$0xff]   ;;  %v28543_v48 = vld [vmem:[#allocation152_spill] sm:$0xff] }
 0xdc7   :  { %v26295_v37 = vpack.c.bf16 %v13521_v47, %v13519_v35  ;;  %15286 = vmatprep.subr.bf16.mxu0 %v19801_v33  ;;  %v28545_v10 = vld [vmem:[#allocation179_spill] sm:$0xff]  ;;  %v28546_v33 = vld [vmem:[#allocation113_spill] sm:$0xff] }
 0xdc8   :  { %v12873_v28 = vpop.f32.mrb[20].mxu1  ;;  %v28547_v51 = vmax.f32 %v28545_v10, %v28546_v33  ;;  %v19811_v47 = vld [vmem:[%s27059_s5 + $0x5c0] ss:$16 sps:$4 sm:$0xff]   ;;  %v19816_v55 = vld [vmem:[%s27059_s5 + $0x5e4] ss:$16 sps:$4 sm:$0xff]   ;;  %v28562_v33 = vld [vmem:[#allocation6_spill] sm:$0xff] }
 0xdc9   :  { %v26301_v36 = vadd.f32 %v12873_v28, %v28536_v1  ;;  %v12875_v5 = vpop.f32.mrb[21].mxu1  ;;  %v28551_v19 = vld [vmem:[#allocation123_spill] sm:$0xff]  ;;  %v28561_v10 = vld [vmem:[#allocation181_spill] sm:$0xff] }
 0xdca   :  { %v26304_v58 = vadd.f32 %v12875_v5, %v28537_v34  ;;  %15287 = vmatpush1.bf16.msra.mxu0 %v19799_v20  ;;  %v12877_v52 = vpop.f32.mrb[22].mxu1 }
 0xdcb   :  { %v26310_v62 = vadd.f32 %v12877_v52, %v28538_v59  ;;  %v12879_v63 = vpop.f32.mrb[23].mxu1  ;;  %15288 = vmatprep.subr.bf16.mxu0 %v19804_v39  ;;  %v28549_v39 = vld [vmem:[#allocation128_spill] sm:$0xff] }
 0xdcc   :  { %v26316_v14 = vadd.f32 %v12879_v63, %v28539_v56  ;;  %v28554_v59 = vld [vmem:[#allocation156_spill] sm:$0xff]  ;;  %v28555_v56 = vld [vmem:[#allocation81_spill] sm:$0xff] }
 0xdce   :  { %15289 = vmatpush1.bf16.msra.mxu0 %v19802_v3 }
 0xdcf   :  { %15290 = vmatprep.subr.bf16.mxu0 %v19807_v32 }
 0xdd0   :  { %v12883_v13 = vpop.f32.mrb[24].mxu1 }
 0xdd1   :  { %v17622_v26 = vadd.f32 %v12883_v13, %v28540_v46  ;;  %v12885_v50 = vpop.f32.mrb[25].mxu1  ;;  %v19814_v13 = vld [vmem:[%s27059_s5 + $0x5e0] ss:$16 sps:$4 sm:$0xff]  }
 0xdd2   :  { %v17623_v54 = vadd.f32 %v12885_v50, %v28541_v27  ;;  %15291 = vmatpush1.bf16.msra.mxu0 %v19805_v40  ;;  %v12887_v24 = vpop.f32.mrb[26].mxu1 }
 0xdd3   :  { %v13560_v41 = vmax.f32 %v17614_v15, %v17622_v26  ;;  %v17624_v18 = vadd.f32 %v12887_v24, %v28542_v42  ;;  %v12889_v7 = vpop.f32.mrb[27].mxu1  ;;  %15292 = vmatprep.subr.bf16.mxu0 %v19810_v16 }
 0xdd4   :  { %v13561_v4 = vmax.f32 %v17615_v45, %v17623_v54  ;;  %v17625_v6 = vadd.f32 %v12889_v7, %v28543_v48  ;;  %v28548_v45 = vld [vmem:[#allocation187_spill] sm:$0xff]  ;;  %v28556_v54 = vld [vmem:[#allocation85_spill] sm:$0xff] }
 0xdd5   :  { %v13574_v22 = vmax.f32 %v28544_v49, %v13560_v41  ;;  %v13564_v12 = vmax.f32 %v17616_v8, %v17624_v18  ;;  %v28550_v28 = vmax.f32 %v28548_v45, %v28549_v39  ;;  %v28552_v8 = vld [vmem:[#allocation28_spill] sm:$0xff]  ;;  %v19819_v41 = vld [vmem:[%s27059_s5 + $0x604] ss:$16 sps:$4 sm:$0xff]  }
 0xdd6   :  { %v13575_v15 = vmax.f32 %v28547_v51, %v13561_v4  ;;  %v13565_v35 = vmax.f32 %v17617_v29, %v17625_v6  ;;  %15293 = vmatpush1.bf16.msra.mxu0 %v19808_v38  ;;  %v28553_v5 = vmax.f32 %v28551_v19, %v28552_v8  ;;  %v28557_v18 = vld [vmem:[#allocation79_spill] sm:$0xff]  ;;  %v28558_v6 = vld [vmem:[#allocation116_spill] sm:$0xff]  ;;  %v28563_v51 = vmax.f32 %v28561_v10, %v28562_v33  ;;  %v28564_v45 = vld [vmem:[#allocation189_spill] sm:$0xff] }
 0xdd7   :  { %v13582_v20 = vadd.f32 %v13574_v22, %v26046_v17  ;;  %v13576_v1 = vmax.f32 %v28550_v28, %v13564_v12  ;;  %15294 = vmatprep.subr.bf16.mxu0 %v19813_v30  ;;  %v28559_v49 = vld [vmem:[#allocation191_spill] sm:$0xff]  ;;  %v28565_v39 = vld [vmem:[#allocation132_spill] sm:$0xff] }
 0xdd8   :  { %v13577_v29 = vmax.f32 %v28553_v5, %v13565_v35  ;;  %v12893_v34 = vpop.f32.mrb[28].mxu1  ;;  %v13583_v52 = vadd.f32 %v13575_v15, %v26051_v11  ;;  %v28560_v22 = vmax.f32 %v28558_v6, %v28559_v49  ;;  %v28566_v28 = vmax.f32 %v28564_v45, %v28565_v39  ;;  %v19847_v6 = vld [vmem:[%s27059_s5 + $0x740] ss:$16 sps:$4 sm:$0xff]   ;;  %v19852_v49 = vld [vmem:[%s27059_s5 + $0x764] ss:$16 sps:$4 sm:$0xff]  }
 0xdd9   :  { %v13584_v3 = vadd.f32 %v13576_v1, %v26046_v17  ;;  %v17626_v63 = vadd.f32 %v12893_v34, %v28554_v59  ;;  %v12895_v32 = vpop.f32.mrb[29].mxu1  ;;  %v13590_v26 = vmax.f32 %v13582_v20, 0.0  ;;  %v19820_v34 = vld [vmem:[%s27059_s5 + $0x620] ss:$16 sps:$4 sm:$0xff]   ;;  %v19858_v10 = vld [vmem:[%s27059_s5 + $0x7a4] ss:$16 sps:$4 sm:$0xff]  }
 0xdda   :  { %v17627_v40 = vadd.f32 %v12895_v32, %v28555_v56  ;;  %15295 = vmatpush1.bf16.msra.mxu0 %v19811_v47  ;;  %v12897_v16 = vpop.f32.mrb[30].mxu1  ;;  %v13585_v46 = vadd.f32 %v13577_v29, %v26051_v11  ;;  %v13591_v30 = vmax.f32 %v13583_v52, 0.0  ;;  %v19856_v33 = vld [vmem:[%s27059_s5 + $0x7a0] ss:$16 sps:$4 sm:$0xff]   ;;  %v19865_v45 = vld [vmem:[%s27059_s5 + $0x8] ss:$16 sps:$4 sm:$0xff]  }
 0xddb   :  { %v13592_v50 = vmax.f32 %v13584_v3, 0.0  ;;  %v13568_v27 = vmax.f32 %v26301_v36, %v17626_v63  ;;  %v17628_v24 = vadd.f32 %v12897_v16, %v28556_v54  ;;  %v12899_v38 = vpop.f32.mrb[31].mxu1  ;;  %15296 = vmatprep.subr.bf16.mxu0 %v19816_v55  ;;  %v28567_v55 = vld [vmem:[#allocation21_spill] sm:$0xff]  ;;  %v19870_v39 = vld [vmem:[%s27059_s5 + $0x2c] ss:$16 sps:$4 sm:$0xff]  }
 0xddc   :  { %v13569_v42 = vmax.f32 %v26304_v58, %v17627_v40  ;;  %v17629_v7 = vadd.f32 %v12899_v38, %v28557_v18  ;;  %v13593_v4 = vmax.f32 %v13585_v46, 0.0  ;;  %v19817_v58 = vld [vmem:[%s27059_s5 + $0x600] ss:$16 sps:$4 sm:$0xff]   ;;  %v19825_v63 = vld [vmem:[%s27059_s5 + $0x644] ss:$16 sps:$4 sm:$0xff]  }
 0xddd   :  { %v26368_v48 = vpack.c.bf16 %v13592_v50, %v13590_v26  ;;  %v13578_v36 = vmax.f32 %v28560_v22, %v13568_v27  ;;  %v13572_v12 = vmax.f32 %v26310_v62, %v17628_v24  ;;  %v19822_v62 = vld [vmem:[%s27059_s5 + $0x624] ss:$16 sps:$4 sm:$0xff]   ;;  %v19823_v40 = vld [vmem:[%s27059_s5 + $0x640] ss:$16 sps:$4 sm:$0xff]  }
 0xdde   :  { %v13579_v15 = vmax.f32 %v28563_v51, %v13569_v42  ;;  %v13573_v35 = vmax.f32 %v26316_v14, %v17629_v7  ;;  %15297 = vmatpush1.bf16.msra.mxu0 %v19814_v13  ;;  %v26381_v47 = vpack.c.bf16 %v13593_v4, %v13591_v30  ;;  %v28568_v14 = vld [vmem:[#allocation176_spill] sm:$0xff]  ;;  %v19826_v13 = vld [vmem:[%s27059_s5 + $0x660] ss:$16 sps:$4 sm:$0xff]   ;;  %v19831_v46 = vld [vmem:[%s27059_s5 + $0x684] ss:$16 sps:$4 sm:$0xff]  }
 0xddf   :  { %v13586_v20 = vadd.f32 %v13578_v36, %v26046_v17  ;;  %v13580_v1 = vmax.f32 %v28566_v28, %v13572_v12  ;;  %15319 = vmatprep.subr.bf16.mxu0 %v19819_v41  ;;  %v28569_v19 = vmax.f32 %v28567_v55, %v28568_v14  ;;  %v19829_v26 = vld [vmem:[%s27059_s5 + $0x680] ss:$16 sps:$4 sm:$0xff]   ;;  %v19834_v50 = vld [vmem:[%s27059_s5 + $0x6a4] ss:$16 sps:$4 sm:$0xff]   ;;  %v19868_v28 = vld [vmem:[%s27059_s5 + $0x28] ss:$16 sps:$4 sm:$0xff]  }
 0xde0   :  { %v13587_v5 = vadd.f32 %v13579_v15, %v26051_v11  ;;  %v19832_v27 = vld [vmem:[%s27059_s5 + $0x6a0] ss:$16 sps:$4 sm:$0xff]   ;;  %v19837_v54 = vld [vmem:[%s27059_s5 + $0x6c4] ss:$16 sps:$4 sm:$0xff]   ;;  %v19876_v55 = vld [vmem:[%s27059_s5 + $0x6c] ss:$16 sps:$4 sm:$0xff]  }
 0xde1   :  { %v13581_v8 = vmax.f32 %v28569_v19, %v13573_v35  ;;  %v13588_v29 = vadd.f32 %v13580_v1, %v26046_v17  ;;  %15299 = vmatmul.mubr.bf16.vlgmr.msra.gmra.mrb[192].mxu0 %v26251_v23  ;;  %v13594_v3 = vmax.f32 %v13586_v20, 0.0  ;;  %v19835_v24 = vld [vmem:[%s27059_s5 + $0x6c0] ss:$16 sps:$4 sm:$0xff]   ;;  %v19840_v38 = vld [vmem:[%s27059_s5 + $0x6e4] ss:$16 sps:$4 sm:$0xff]  }
 0xde2   :  { %15308 = vmatprep.mubr.bf16.mxu0 %v26295_v37  ;;  %15320 = vmatpush1.bf16.msra.mxu0 %v19817_v58  ;;  %v13595_v32 = vmax.f32 %v13587_v5, 0.0  ;;  %v19838_v41 = vld [vmem:[%s27059_s5 + $0x6e0] ss:$16 sps:$4 sm:$0xff]   ;;  %v19843_v42 = vld [vmem:[%s27059_s5 + $0x704] ss:$16 sps:$4 sm:$0xff]  }
 0xde3   :  { %v13589_v52 = vadd.f32 %v13581_v8, %v26051_v11  ;;  %v13596_v59 = vmax.f32 %v13588_v29, 0.0  ;;  %15321 = vmatprep.subr.bf16.mxu0 %v19822_v62  ;;  %v19828_v11 = vld [vmem:[%s27059_s5 + $0x664] ss:$16 sps:$4 sm:$0xff]   ;;  %v19841_v18 = vld [vmem:[%s27059_s5 + $0x700] ss:$16 sps:$4 sm:$0xff]  }
 0xde4   :  { %v19846_v7 = vld [vmem:[%s27059_s5 + $0x724] ss:$16 sps:$4 sm:$0xff]   ;;  %v19844_v30 = vld [vmem:[%s27059_s5 + $0x720] ss:$16 sps:$4 sm:$0xff]   ;;  %v19867_v20 = vld [vmem:[%s27059_s5 + $0xc] ss:$16 sps:$4 sm:$0xff]  }
 0xde5   :  { %v13597_v17 = vmax.f32 %v13589_v52, 0.0  ;;  %v26404_v56 = vpack.c.bf16 %v13596_v59, %v13594_v3  ;;  %v19849_v4 = vld [vmem:[%s27059_s5 + $0x744] ss:$16 sps:$4 sm:$0xff]   ;;  %v19850_v22 = vld [vmem:[%s27059_s5 + $0x760] ss:$16 sps:$4 sm:$0xff]  }
 0xde6   :  { %15322 = vmatpush1.bf16.msra.mxu0 %v19820_v34  ;;  %v19855_v36 = vld [vmem:[%s27059_s5 + $0x784] ss:$16 sps:$4 sm:$0xff]   ;;  %v19853_v12 = vld [vmem:[%s27059_s5 + $0x780] ss:$16 sps:$4 sm:$0xff]   ;;  %v19873_v1 = vld [vmem:[%s27059_s5 + $0x4c] ss:$16 sps:$4 sm:$0xff]  }
 0xde7   :  { %v26409_v16 = vpack.c.bf16 %v13597_v17, %v13595_v32  ;;  %15323 = vmatprep.subr.bf16.mxu0 %v19825_v63  ;;  %v19861_v51 = vld [vmem:[%s27059_s5 + $0x7c4] ss:$16 sps:$4 sm:$0xff]   ;;  %v19859_v15 = vld [vmem:[%s27059_s5 + $0x7c0] ss:$16 sps:$4 sm:$0xff]   ;;  %v19871_v62 = vld [vmem:[%s27059_s5 + $0x48] ss:$16 sps:$4 sm:$0xff]  }
 0xde8   :  { %v19864_v35 = vld [vmem:[%s27059_s5 + $0x7e4] ss:$16 sps:$4 sm:$0xff]   ;;  %v19862_v58 = vld [vmem:[%s27059_s5 + $0x7e0] ss:$16 sps:$4 sm:$0xff]   ;;  %v19874_v14 = vld [vmem:[%s27059_s5 + $0x68] ss:$16 sps:$4 sm:$0xff]  }
 0xde9   :  { %15309 = vmatmul.mubr.bf16.gmra.mrb[196].mxu0 %v26290_v25  ;;  %v19879_v19 = vld [vmem:[%s27059_s5 + $0x8c] ss:$16 sps:$4 sm:$0xff]   ;;  %v19877_v8 = vld [vmem:[%s27059_s5 + $0x88] ss:$16 sps:$4 sm:$0xff]  }
 0xdea   :  { %15324 = vmatpush1.bf16.msra.mxu0 %v19823_v40  ;;  %15351 = vmatprep.mubr.bf16.mxu0 %v26381_v47  ;;  %v19882_v5 = vld [vmem:[%s27059_s5 + $0xac] ss:$16 sps:$4 sm:$0xff]   ;;  %v19883_v34 = vld [vmem:[%s27059_s5 + $0xc8] ss:$16 sps:$4 sm:$0xff]  }
 0xdeb   :  { %15325 = vmatprep.subr.bf16.mxu0 %v19828_v11  ;;  %v19885_v29 = vld [vmem:[%s27059_s5 + $0xcc] ss:$16 sps:$4 sm:$0xff]   ;;  %v19886_v3 = vld [vmem:[%s27059_s5 + $0xe8] ss:$16 sps:$4 sm:$0xff]  }
 0xdec   :  { %v19888_v52 = vld [vmem:[%s27059_s5 + $0xec] ss:$16 sps:$4 sm:$0xff]   ;;  %v19889_v63 = vld [vmem:[%s27059_s5 + $0x108] ss:$16 sps:$4 sm:$0xff]  }
 0xded   :  { %v19891_v59 = vld [vmem:[%s27059_s5 + $0x10c] ss:$16 sps:$4 sm:$0xff]   ;;  %v19892_v17 = vld [vmem:[%s27059_s5 + $0x128] ss:$16 sps:$4 sm:$0xff]  }
 0xdee   :  { %15326 = vmatpush1.bf16.msra.mxu0 %v19826_v13  ;;  %v19894_v32 = vld [vmem:[%s27059_s5 + $0x12c] ss:$16 sps:$4 sm:$0xff]   ;;  %v19895_v11 = vld [vmem:[%s27059_s5 + $0x148] ss:$16 sps:$4 sm:$0xff]  }
 0xdef   :  { %15327 = vmatprep.subr.bf16.mxu0 %v19831_v46  ;;  %v19897_v40 = vld [vmem:[%s27059_s5 + $0x14c] ss:$16 sps:$4 sm:$0xff]   ;;  %v19898_v46 = vld [vmem:[%s27059_s5 + $0x168] ss:$16 sps:$4 sm:$0xff]  }
 0xdf0   :  { %v19900_v13 = vld [vmem:[%s27059_s5 + $0x16c] ss:$16 sps:$4 sm:$0xff]  }
 0xdf2   :  { %15328 = vmatpush1.bf16.msra.mxu0 %v19829_v26  ;;  %v19903_v26 = vld [vmem:[%s27059_s5 + $0x18c] ss:$16 sps:$4 sm:$0xff]  }
 0xdf3   :  { %15329 = vmatprep.subr.bf16.mxu0 %v19834_v50  ;;  %v19901_v50 = vld [vmem:[%s27059_s5 + $0x188] ss:$16 sps:$4 sm:$0xff]  }
 0xdf6   :  { %15330 = vmatpush1.bf16.msra.mxu0 %v19832_v27  ;;  %v19906_v27 = vld [vmem:[%s27059_s5 + $0x1ac] ss:$16 sps:$4 sm:$0xff]  }
 0xdf7   :  { %15331 = vmatprep.subr.bf16.mxu0 %v19837_v54  ;;  %v19904_v54 = vld [vmem:[%s27059_s5 + $0x1a8] ss:$16 sps:$4 sm:$0xff]  }
 0xdfa   :  { %15332 = vmatpush1.bf16.msra.mxu0 %v19835_v24  ;;  %v19909_v24 = vld [vmem:[%s27059_s5 + $0x1cc] ss:$16 sps:$4 sm:$0xff]  }
 0xdfb   :  { %15333 = vmatprep.subr.bf16.mxu0 %v19840_v38 }
 0xdfe   :  { %15334 = vmatpush1.bf16.msra.mxu0 %v19838_v41 }
 0xdff   :  { %15335 = vmatprep.subr.bf16.mxu0 %v19843_v42 }
 0xe02   :  { %15336 = vmatpush1.bf16.msra.mxu0 %v19841_v18  ;;  %v19907_v18 = vld [vmem:[%s27059_s5 + $0x1c8] ss:$16 sps:$4 sm:$0xff]  }
 0xe03   :  { %15337 = vmatprep.subr.bf16.mxu0 %v19846_v7 }
 0xe06   :  { %15338 = vmatpush1.bf16.msra.mxu0 %v19844_v30  ;;  %v19912_v30 = vld [vmem:[%s27059_s5 + $0x1ec] ss:$16 sps:$4 sm:$0xff]  }
 0xe07   :  { %15339 = vmatprep.subr.bf16.mxu0 %v19849_v4  ;;  %v19910_v4 = vld [vmem:[%s27059_s5 + $0x1e8] ss:$16 sps:$4 sm:$0xff]  }
 0xe0a   :  { %15340 = vmatpush1.bf16.msra.mxu0 %v19847_v6  ;;  %v19915_v6 = vld [vmem:[%s27059_s5 + $0x20c] ss:$16 sps:$4 sm:$0xff]  }
 0xe0b   :  { %15341 = vmatprep.subr.bf16.mxu0 %v19852_v49 }
 0xe0e   :  { %15342 = vmatpush1.bf16.msra.mxu0 %v19850_v22 }
 0xe0f   :  { %15343 = vmatprep.subr.bf16.mxu0 %v19855_v36 }
 0xe12   :  { %15344 = vmatpush1.bf16.msra.mxu0 %v19853_v12  ;;  %v19913_v12 = vld [vmem:[%s27059_s5 + $0x208] ss:$16 sps:$4 sm:$0xff]  }
 0xe13   :  { %15345 = vmatprep.subr.bf16.mxu0 %v19858_v10 }
 0xe16   :  { %15346 = vmatpush1.bf16.msra.mxu0 %v19856_v33  ;;  %v19918_v33 = vld [vmem:[%s27059_s5 + $0x22c] ss:$16 sps:$4 sm:$0xff]  }
 0xe17   :  { %15347 = vmatprep.subr.bf16.mxu0 %v19861_v51  ;;  %v19916_v51 = vld [vmem:[%s27059_s5 + $0x228] ss:$16 sps:$4 sm:$0xff]  }
 0xe1a   :  { %15348 = vmatpush1.bf16.msra.mxu0 %v19859_v15  ;;  %v19921_v15 = vld [vmem:[%s27059_s5 + $0x24c] ss:$16 sps:$4 sm:$0xff]  }
 0xe1b   :  { %15349 = vmatprep.subr.bf16.mxu0 %v19864_v35  ;;  %v19919_v35 = vld [vmem:[%s27059_s5 + $0x248] ss:$16 sps:$4 sm:$0xff]  }
 0xe1e   :  { %15350 = vmatpush1.bf16.msra.mxu0 %v19862_v58  ;;  %v19927_v58 = vld [vmem:[%s27059_s5 + $0x28c] ss:$16 sps:$4 sm:$0xff]  }
 0xe1f   :  { %15372 = vmatprep.subr.bf16.mxu0 %v19867_v20  ;;  %v19925_v20 = vld [vmem:[%s27059_s5 + $0x288] ss:$16 sps:$4 sm:$0xff]  }
 0xe21   :  { %15352 = vmatmul.mubr.bf16.vlgmr.msra.gmra.mrb[192].mxu0 %v26368_v48 }
 0xe22   :  { %15361 = vmatprep.mubr.bf16.mxu0 %v26409_v16  ;;  %15373 = vmatpush1.bf16.msra.mxu0 %v19865_v45  ;;  %v19933_v45 = vld [vmem:[%s27059_s5 + $0x2cc] ss:$16 sps:$4 sm:$0xff]  }
 0xe23   :  { %15374 = vmatprep.subr.bf16.mxu0 %v19870_v39  ;;  %v19931_v39 = vld [vmem:[%s27059_s5 + $0x2c8] ss:$16 sps:$4 sm:$0xff]  }
 0xe26   :  { %15375 = vmatpush1.bf16.msra.mxu0 %v19868_v28  ;;  %v19936_v28 = vld [vmem:[%s27059_s5 + $0x2ec] ss:$16 sps:$4 sm:$0xff]  }
 0xe27   :  { %15376 = vmatprep.subr.bf16.mxu0 %v19873_v1  ;;  %v19934_v1 = vld [vmem:[%s27059_s5 + $0x2e8] ss:$16 sps:$4 sm:$0xff]  }
 0xe29   :  { %15362 = vmatmul.mubr.bf16.gmra.mrb[196].mxu0 %v26404_v56 }
 0xe2a   :  { %15377 = vmatpush1.bf16.msra.mxu0 %v19871_v62  ;;  %15404 = vmatprep.mubr.bf16.mxu0 %v26081_v53  ;;  %v19880_v53 = vld [vmem:[%s27059_s5 + $0xa8] ss:$16 sps:$4 sm:$0xff]   ;;  %v19939_v62 = vld [vmem:[%s27059_s5 + $0x30c] ss:$16 sps:$4 sm:$0xff]  }
 0xe2b   :  { %15378 = vmatprep.subr.bf16.mxu0 %v19876_v55  ;;  %v19937_v55 = vld [vmem:[%s27059_s5 + $0x308] ss:$16 sps:$4 sm:$0xff]  }
 0xe2e   :  { %15379 = vmatpush1.bf16.msra.mxu0 %v19874_v14  ;;  %v19942_v14 = vld [vmem:[%s27059_s5 + $0x32c] ss:$16 sps:$4 sm:$0xff]  }
 0xe2f   :  { %15380 = vmatprep.subr.bf16.mxu0 %v19879_v19  ;;  %v19940_v19 = vld [vmem:[%s27059_s5 + $0x328] ss:$16 sps:$4 sm:$0xff]  }
 0xe32   :  { %15381 = vmatpush1.bf16.msra.mxu0 %v19877_v8  ;;  %v19945_v8 = vld [vmem:[%s27059_s5 + $0x34c] ss:$16 sps:$4 sm:$0xff]  }
 0xe33   :  { %15382 = vmatprep.subr.bf16.mxu0 %v19882_v5  ;;  %v19943_v5 = vld [vmem:[%s27059_s5 + $0x348] ss:$16 sps:$4 sm:$0xff]  }
 0xe36   :  { %15383 = vmatpush1.bf16.msra.mxu0 %v19880_v53  ;;  %v19948_v53 = vld [vmem:[%s27059_s5 + $0x36c] ss:$16 sps:$4 sm:$0xff]  }
 0xe37   :  { %15384 = vmatprep.subr.bf16.mxu0 %v19885_v29  ;;  %v19946_v29 = vld [vmem:[%s27059_s5 + $0x368] ss:$16 sps:$4 sm:$0xff]  }
 0xe3a   :  { %15385 = vmatpush1.bf16.msra.mxu0 %v19883_v34  ;;  %v19951_v34 = vld [vmem:[%s27059_s5 + $0x38c] ss:$16 sps:$4 sm:$0xff]  }
 0xe3b   :  { %15386 = vmatprep.subr.bf16.mxu0 %v19888_v52  ;;  %v19949_v52 = vld [vmem:[%s27059_s5 + $0x388] ss:$16 sps:$4 sm:$0xff]  }
 0xe3e   :  { %15387 = vmatpush1.bf16.msra.mxu0 %v19886_v3  ;;  %v19954_v3 = vld [vmem:[%s27059_s5 + $0x3ac] ss:$16 sps:$4 sm:$0xff]  }
 0xe3f   :  { %15388 = vmatprep.subr.bf16.mxu0 %v19891_v59  ;;  %v19952_v59 = vld [vmem:[%s27059_s5 + $0x3a8] ss:$16 sps:$4 sm:$0xff]  }
 0xe42   :  { %15389 = vmatpush1.bf16.msra.mxu0 %v19889_v63  ;;  %v19957_v63 = vld [vmem:[%s27059_s5 + $0x3cc] ss:$16 sps:$4 sm:$0xff]  }
 0xe43   :  { %15390 = vmatprep.subr.bf16.mxu0 %v19894_v32  ;;  %v19955_v32 = vld [vmem:[%s27059_s5 + $0x3c8] ss:$16 sps:$4 sm:$0xff]  }
 0xe46   :  { %15391 = vmatpush1.bf16.msra.mxu0 %v19892_v17  ;;  %v19960_v17 = vld [vmem:[%s27059_s5 + $0x3ec] ss:$16 sps:$4 sm:$0xff]  }
 0xe47   :  { %15392 = vmatprep.subr.bf16.mxu0 %v19897_v40  ;;  %v19958_v40 = vld [vmem:[%s27059_s5 + $0x3e8] ss:$16 sps:$4 sm:$0xff]  }
 0xe4a   :  { %15393 = vmatpush1.bf16.msra.mxu0 %v19895_v11  ;;  %v19963_v11 = vld [vmem:[%s27059_s5 + $0x40c] ss:$16 sps:$4 sm:$0xff]  }
 0xe4b   :  { %15394 = vmatprep.subr.bf16.mxu0 %v19900_v13  ;;  %v19961_v13 = vld [vmem:[%s27059_s5 + $0x408] ss:$16 sps:$4 sm:$0xff]  }
 0xe4e   :  { %15395 = vmatpush1.bf16.msra.mxu0 %v19898_v46  ;;  %v19966_v46 = vld [vmem:[%s27059_s5 + $0x42c] ss:$16 sps:$4 sm:$0xff]  }
 0xe4f   :  { %15396 = vmatprep.subr.bf16.mxu0 %v19903_v26  ;;  %v19964_v26 = vld [vmem:[%s27059_s5 + $0x428] ss:$16 sps:$4 sm:$0xff]  }
 0xe52   :  { %15397 = vmatpush1.bf16.msra.mxu0 %v19901_v50  ;;  %v19969_v50 = vld [vmem:[%s27059_s5 + $0x44c] ss:$16 sps:$4 sm:$0xff]  }
 0xe53   :  { %15398 = vmatprep.subr.bf16.mxu0 %v19906_v27  ;;  %v19967_v27 = vld [vmem:[%s27059_s5 + $0x448] ss:$16 sps:$4 sm:$0xff]  }
 0xe54   :  { %v26582_v38 = vpop.f32.mrb[128].mxu1 }
 0xe55   :  { %v26584_v41 = vpop.f32.mrb[129].mxu1 }
 0xe56   :  { %15399 = vmatpush1.bf16.msra.mxu0 %v19904_v54  ;;  %v26586_v42 = vpop.f32.mrb[130].mxu1  ;;  %v19975_v54 = vld [vmem:[%s27059_s5 + $0x48c] ss:$16 sps:$4 sm:$0xff]  }
 0xe57   :  { %v26591_v7 = vpop.f32.mrb[131].mxu1  ;;  %15400 = vmatprep.subr.bf16.mxu0 %v19909_v24  ;;  %v19973_v24 = vld [vmem:[%s27059_s5 + $0x488] ss:$16 sps:$4 sm:$0xff]  }
 0xe5a   :  { %15401 = vmatpush1.bf16.msra.mxu0 %v19907_v18  ;;  %v19981_v18 = vld [vmem:[%s27059_s5 + $0x4cc] ss:$16 sps:$4 sm:$0xff]  }
 0xe5b   :  { %15402 = vmatprep.subr.bf16.mxu0 %v19912_v30  ;;  %v19979_v30 = vld [vmem:[%s27059_s5 + $0x4c8] ss:$16 sps:$4 sm:$0xff]  }
 0xe5c   :  { %v26602_v49 = vpop.f32.mrb[132].mxu1 }
 0xe5d   :  { %v26604_v22 = vpop.f32.mrb[133].mxu1 }
 0xe5e   :  { %15403 = vmatpush1.bf16.msra.mxu0 %v19910_v4  ;;  %v26606_v36 = vpop.f32.mrb[134].mxu1  ;;  %v19984_v4 = vld [vmem:[%s27059_s5 + $0x4ec] ss:$16 sps:$4 sm:$0xff]  }
 0xe5f   :  { %v26611_v10 = vpop.f32.mrb[135].mxu1  ;;  %15425 = vmatprep.subr.bf16.mxu0 %v19915_v6  ;;  %v19982_v6 = vld [vmem:[%s27059_s5 + $0x4e8] ss:$16 sps:$4 sm:$0xff]  }
 0xe61   :  { %15405 = vmatmul.mubr.bf16.vlgmr.msra.gmra.mrb[200].mxu0 %v26073_v57  ;;  %v19924_v57 = vld [vmem:[%s27059_s5 + $0x26c] ss:$16 sps:$4 sm:$0xff]  }
 0xe62   :  { %15414 = vmatprep.mubr.bf16.mxu0 %v26101_v43  ;;  %15426 = vmatpush1.bf16.msra.mxu0 %v19913_v12  ;;  %v19922_v43 = vld [vmem:[%s27059_s5 + $0x268] ss:$16 sps:$4 sm:$0xff]   ;;  %v19987_v12 = vld [vmem:[%s27059_s5 + $0x50c] ss:$16 sps:$4 sm:$0xff]  }
 0xe63   :  { %15427 = vmatprep.subr.bf16.mxu0 %v19918_v33  ;;  %v19985_v33 = vld [vmem:[%s27059_s5 + $0x508] ss:$16 sps:$4 sm:$0xff]  }
 0xe66   :  { %15428 = vmatpush1.bf16.msra.mxu0 %v19916_v51  ;;  %v19990_v51 = vld [vmem:[%s27059_s5 + $0x52c] ss:$16 sps:$4 sm:$0xff]  }
 0xe67   :  { %15429 = vmatprep.subr.bf16.mxu0 %v19921_v15  ;;  %v19988_v15 = vld [vmem:[%s27059_s5 + $0x528] ss:$16 sps:$4 sm:$0xff]  }
 0xe69   :  { %15415 = vmatmul.mubr.bf16.gmra.mrb[204].mxu0 %v26099_v0  ;;  %v19930_v0 = vld [vmem:[%s27059_s5 + $0x2ac] ss:$16 sps:$4 sm:$0xff]  }
 0xe6a   :  { %15430 = vmatpush1.bf16.msra.mxu0 %v19919_v35  ;;  %15457 = vmatprep.mubr.bf16.mxu0 %v26141_v61  ;;  %v19928_v61 = vld [vmem:[%s27059_s5 + $0x2a8] ss:$16 sps:$4 sm:$0xff]   ;;  %v19993_v35 = vld [vmem:[%s27059_s5 + $0x54c] ss:$16 sps:$4 sm:$0xff]  }
 0xe6b   :  { %15431 = vmatprep.subr.bf16.mxu0 %v19924_v57  ;;  %v19991_v57 = vld [vmem:[%s27059_s5 + $0x548] ss:$16 sps:$4 sm:$0xff]  }
 0xe6e   :  { %15432 = vmatpush1.bf16.msra.mxu0 %v19922_v43  ;;  %v19996_v43 = vld [vmem:[%s27059_s5 + $0x56c] ss:$16 sps:$4 sm:$0xff]  }
 0xe6f   :  { %15433 = vmatprep.subr.bf16.mxu0 %v19927_v58  ;;  %v19994_v58 = vld [vmem:[%s27059_s5 + $0x568] ss:$16 sps:$4 sm:$0xff]  }
 0xe72   :  { %15434 = vmatpush1.bf16.msra.mxu0 %v19925_v20  ;;  %v19999_v20 = vld [vmem:[%s27059_s5 + $0x58c] ss:$16 sps:$4 sm:$0xff]  }
 0xe73   :  { %15435 = vmatprep.subr.bf16.mxu0 %v19930_v0  ;;  %v19997_v0 = vld [vmem:[%s27059_s5 + $0x588] ss:$16 sps:$4 sm:$0xff]  }
 0xe76   :  { %15436 = vmatpush1.bf16.msra.mxu0 %v19928_v61  ;;  %v20002_v61 = vld [vmem:[%s27059_s5 + $0x5ac] ss:$16 sps:$4 sm:$0xff]  }
 0xe77   :  { %15437 = vmatprep.subr.bf16.mxu0 %v19933_v45  ;;  %v20000_v45 = vld [vmem:[%s27059_s5 + $0x5a8] ss:$16 sps:$4 sm:$0xff]  }
 0xe7a   :  { %15438 = vmatpush1.bf16.msra.mxu0 %v19931_v39  ;;  %v20005_v39 = vld [vmem:[%s27059_s5 + $0x5cc] ss:$16 sps:$4 sm:$0xff]  }
 0xe7b   :  { %15439 = vmatprep.subr.bf16.mxu0 %v19936_v28  ;;  %v20003_v28 = vld [vmem:[%s27059_s5 + $0x5c8] ss:$16 sps:$4 sm:$0xff]  }
 0xe7e   :  { %15440 = vmatpush1.bf16.msra.mxu0 %v19934_v1  ;;  %v20008_v1 = vld [vmem:[%s27059_s5 + $0x5ec] ss:$16 sps:$4 sm:$0xff]  }
 0xe7f   :  { %15441 = vmatprep.subr.bf16.mxu0 %v19939_v62  ;;  %v20006_v62 = vld [vmem:[%s27059_s5 + $0x5e8] ss:$16 sps:$4 sm:$0xff]  }
 0xe82   :  { %15442 = vmatpush1.bf16.msra.mxu0 %v19937_v55  ;;  %v20011_v55 = vld [vmem:[%s27059_s5 + $0x60c] ss:$16 sps:$4 sm:$0xff]  }
 0xe83   :  { %15443 = vmatprep.subr.bf16.mxu0 %v19942_v14  ;;  %v20009_v14 = vld [vmem:[%s27059_s5 + $0x608] ss:$16 sps:$4 sm:$0xff]  }
 0xe86   :  { %15444 = vmatpush1.bf16.msra.mxu0 %v19940_v19  ;;  %v20014_v19 = vld [vmem:[%s27059_s5 + $0x62c] ss:$16 sps:$4 sm:$0xff]  }
 0xe87   :  { %15445 = vmatprep.subr.bf16.mxu0 %v19945_v8  ;;  %v20012_v8 = vld [vmem:[%s27059_s5 + $0x628] ss:$16 sps:$4 sm:$0xff]  }
 0xe8a   :  { %15446 = vmatpush1.bf16.msra.mxu0 %v19943_v5  ;;  %v20017_v5 = vld [vmem:[%s27059_s5 + $0x64c] ss:$16 sps:$4 sm:$0xff]  }
 0xe8b   :  { %15447 = vmatprep.subr.bf16.mxu0 %v19948_v53  ;;  %v20015_v53 = vld [vmem:[%s27059_s5 + $0x648] ss:$16 sps:$4 sm:$0xff]  }
 0xe8e   :  { %15448 = vmatpush1.bf16.msra.mxu0 %v19946_v29  ;;  %v20023_v29 = vld [vmem:[%s27059_s5 + $0x68c] ss:$16 sps:$4 sm:$0xff]  }
 0xe8f   :  { %15449 = vmatprep.subr.bf16.mxu0 %v19951_v34  ;;  %v26841_v34 = vld [vmem:[%s27062_s6] sm:$0xf] }
 0xe92   :  { %15450 = vmatpush1.bf16.msra.mxu0 %v19949_v52  ;;  %v20026_v52 = vld [vmem:[%s27059_s5 + $0x6ac] ss:$16 sps:$4 sm:$0xff]  }
 0xe93   :  { %15451 = vmatprep.subr.bf16.mxu0 %v19954_v3  ;;  %v13867_v3 = vrot.slane %v26841_v34, %v28457_v2 }
 0xe95   :  { %v15201_v2 = vadd.f32 %v26591_v7, %v13867_v3  ;;  %v20030_v7 = vld [vmem:[%s27059_s5 + $0x6e8] ss:$16 sps:$4 sm:$0xff]  }
 0xe96   :  { %15452 = vmatpush1.bf16.msra.mxu0 %v19952_v59  ;;  %v20024_v59 = vld [vmem:[%s27059_s5 + $0x6a8] ss:$16 sps:$4 sm:$0xff]  }
 0xe97   :  { %15453 = vmatprep.subr.bf16.mxu0 %v19957_v63 }
 0xe9a   :  { %15454 = vmatpush1.bf16.msra.mxu0 %v19955_v32  ;;  %v15197_v32 = vadd.f32 %v26584_v41, %v13867_v3  ;;  %v20032_v41 = vld [vmem:[%s27059_s5 + $0x6ec] ss:$16 sps:$4 sm:$0xff]  }
 0xe9b   :  { %15455 = vmatprep.subr.bf16.mxu0 %v19960_v17 }
 0xe9e   :  { %15456 = vmatpush1.bf16.msra.mxu0 %v19958_v40 }
 0xe9f   :  { %15478 = vmatprep.subr.bf16.mxu0 %v19963_v11 }
 0xea1   :  { %15458 = vmatmul.mubr.bf16.vlgmr.msra.gmra.mrb[200].mxu0 %v26133_v44  ;;  %v19972_v44 = vld [vmem:[%s27059_s5 + $0x46c] ss:$16 sps:$4 sm:$0xff]  }
 0xea2   :  { %15467 = vmatprep.mubr.bf16.mxu0 %v26173_v21  ;;  %15479 = vmatpush1.bf16.msra.mxu0 %v19961_v13  ;;  %v19970_v21 = vld [vmem:[%s27059_s5 + $0x468] ss:$16 sps:$4 sm:$0xff]  }
 0xea3   :  { %15480 = vmatprep.subr.bf16.mxu0 %v19966_v46 }
 0xea6   :  { %15481 = vmatpush1.bf16.msra.mxu0 %v19964_v26 }
 0xea7   :  { %15482 = vmatprep.subr.bf16.mxu0 %v19969_v50 }
 0xea9   :  { %15468 = vmatmul.mubr.bf16.gmra.mrb[204].mxu0 %v26171_v31  ;;  %v19978_v31 = vld [vmem:[%s27059_s5 + $0x4ac] ss:$16 sps:$4 sm:$0xff]  }
 0xeaa   :  { %15483 = vmatpush1.bf16.msra.mxu0 %v19967_v27  ;;  %15510 = vmatprep.mubr.bf16.mxu0 %v26264_v9  ;;  %v19976_v9 = vld [vmem:[%s27059_s5 + $0x4a8] ss:$16 sps:$4 sm:$0xff]  }
 0xeab   :  { %15484 = vmatprep.subr.bf16.mxu0 %v19972_v44 }
 0xeae   :  { %15485 = vmatpush1.bf16.msra.mxu0 %v19970_v21 }
 0xeaf   :  { %15486 = vmatprep.subr.bf16.mxu0 %v19975_v54 }
 0xeb2   :  { %15487 = vmatpush1.bf16.msra.mxu0 %v19973_v24 }
 0xeb3   :  { %15488 = vmatprep.subr.bf16.mxu0 %v19978_v31 }
 0xeb6   :  { %15489 = vmatpush1.bf16.msra.mxu0 %v19976_v9 }
 0xeb7   :  { %15490 = vmatprep.subr.bf16.mxu0 %v19981_v18  ;;  %v20035_v18 = vld [vmem:[%s27059_s5 + $0x70c] ss:$16 sps:$4 sm:$0xff]  }
 0xeba   :  { %15491 = vmatpush1.bf16.msra.mxu0 %v19979_v30  ;;  %v15207_v30 = vadd.f32 %v26604_v22, %v13867_v3  ;;  %v20038_v22 = vld [vmem:[%s27059_s5 + $0x72c] ss:$16 sps:$4 sm:$0xff]  }
 0xebb   :  { %15492 = vmatprep.subr.bf16.mxu0 %v19984_v4 }
 0xebe   :  { %15493 = vmatpush1.bf16.msra.mxu0 %v19982_v6 }
 0xebf   :  { %15494 = vmatprep.subr.bf16.mxu0 %v19987_v12 }
 0xec2   :  { %15495 = vmatpush1.bf16.msra.mxu0 %v19985_v33 }
 0xec3   :  { %15496 = vmatprep.subr.bf16.mxu0 %v19990_v51 }
 0xec6   :  { %15497 = vmatpush1.bf16.msra.mxu0 %v19988_v15  ;;  %v15211_v15 = vadd.f32 %v26611_v10, %v13867_v3  ;;  %v20036_v10 = vld [vmem:[%s27059_s5 + $0x728] ss:$16 sps:$4 sm:$0xff]  }
 0xec7   :  { %15498 = vmatprep.subr.bf16.mxu0 %v19993_v35  ;;  %v20059_v3 = vld [vmem:[%s27061_s7 + $0x48] sm:$0xff]  }
 0xeca   :  { %15499 = vmatpush1.bf16.msra.mxu0 %v19991_v57  ;;  %v20033_v57 = vld [vmem:[%s27059_s5 + $0x708] ss:$16 sps:$4 sm:$0xff]  }
 0xecb   :  { %15500 = vmatprep.subr.bf16.mxu0 %v19996_v43 }
 0xece   :  { %15501 = vmatpush1.bf16.msra.mxu0 %v19994_v58 }
 0xecf   :  { %15502 = vmatprep.subr.bf16.mxu0 %v19999_v20 }
 0xed2   :  { %15503 = vmatpush1.bf16.msra.mxu0 %v19997_v0 }
 0xed3   :  { %15504 = vmatprep.subr.bf16.mxu0 %v20002_v61 }
 0xed6   :  { %15505 = vmatpush1.bf16.msra.mxu0 %v20000_v45 }
 0xed7   :  { %15506 = vmatprep.subr.bf16.mxu0 %v20005_v39 }
 0xeda   :  { %15507 = vmatpush1.bf16.msra.mxu0 %v20003_v28  ;;  %v20041_v28 = vld [vmem:[%s27059_s5 + $0x74c] ss:$16 sps:$4 sm:$0xff]  }
 0xedb   :  { %15508 = vmatprep.subr.bf16.mxu0 %v20008_v1 }
 0xede   :  { %15509 = vmatpush1.bf16.msra.mxu0 %v20006_v62  ;;  %v20039_v62 = vld [vmem:[%s27059_s5 + $0x748] ss:$16 sps:$4 sm:$0xff]  }
 0xedf   :  { %15531 = vmatprep.subr.bf16.mxu0 %v20011_v55  ;;  %v20044_v55 = vld [vmem:[%s27059_s5 + $0x76c] ss:$16 sps:$4 sm:$0xff]  }
 0xee1   :  { %15511 = vmatmul.mubr.bf16.vlgmr.msra.gmra.mrb[200].mxu0 %v26251_v23  ;;  %v20020_v23 = vld [vmem:[%s27059_s5 + $0x66c] ss:$16 sps:$4 sm:$0xff]  }
 0xee2   :  { %15520 = vmatprep.mubr.bf16.mxu0 %v26295_v37  ;;  %15532 = vmatpush1.bf16.msra.mxu0 %v20009_v14  ;;  %v20018_v37 = vld [vmem:[%s27059_s5 + $0x668] ss:$16 sps:$4 sm:$0xff]  }
 0xee3   :  { %15533 = vmatprep.subr.bf16.mxu0 %v20014_v19  ;;  %v20042_v14 = vld [vmem:[%s27059_s5 + $0x768] ss:$16 sps:$4 sm:$0xff]   ;;  %v20047_v19 = vld [vmem:[%s27059_s5 + $0x78c] ss:$16 sps:$4 sm:$0xff]  }
 0xee6   :  { %15534 = vmatpush1.bf16.msra.mxu0 %v20012_v8  ;;  %v20045_v8 = vld [vmem:[%s27059_s5 + $0x788] ss:$16 sps:$4 sm:$0xff]  }
 0xee7   :  { %15535 = vmatprep.subr.bf16.mxu0 %v20017_v5  ;;  %v20050_v5 = vld [vmem:[%s27059_s5 + $0x7ac] ss:$16 sps:$4 sm:$0xff]  }
 0xee9   :  { %15521 = vmatmul.mubr.bf16.gmra.mrb[204].mxu0 %v26290_v25  ;;  %v20021_v25 = vld [vmem:[%s27059_s5 + $0x688] ss:$16 sps:$4 sm:$0xff]  }
 0xeea   :  { %15536 = vmatpush1.bf16.msra.mxu0 %v20015_v53  ;;  %15563 = vmatprep.mubr.bf16.mxu0 %v26381_v47  ;;  %v13863_v47 = vrot.slane %v26841_v34, %v28454_v60  ;;  %v20029_v60 = vld [vmem:[%s27059_s5 + $0x6cc] ss:$16 sps:$4 sm:$0xff]   ;;  %v20048_v53 = vld [vmem:[%s27059_s5 + $0x7a8] ss:$16 sps:$4 sm:$0xff]  }
 0xeeb   :  { %15537 = vmatprep.subr.bf16.mxu0 %v20020_v23  ;;  %v20053_v23 = vld [vmem:[%s27059_s5 + $0x7cc] ss:$16 sps:$4 sm:$0xff]  }
 0xeec   :  { %v15195_v63 = vadd.f32 %v26582_v38, %v13863_v47  ;;  %v15199_v40 = vadd.f32 %v26586_v42, %v13863_v47  ;;  %v20027_v38 = vld [vmem:[%s27059_s5 + $0x6c8] ss:$16 sps:$4 sm:$0xff]   ;;  %v15205_v31 = vadd.f32 %v26602_v49, %v13863_v47  ;;  %v15209_v12 = vadd.f32 %v26606_v36, %v13863_v47  ;;  %v20057_v47 = vld [vmem:[%s27061_s7 + $0x40] sm:$0xff]  }
 0xeee   :  { %15538 = vmatpush1.bf16.msra.mxu0 %v20018_v37  ;;  %v20051_v37 = vld [vmem:[%s27059_s5 + $0x7c8] ss:$16 sps:$4 sm:$0xff]  }
 0xeef   :  { %15539 = vmatprep.subr.bf16.mxu0 %v20023_v29  ;;  %v20056_v29 = vld [vmem:[%s27059_s5 + $0x7ec] ss:$16 sps:$4 sm:$0xff]  }
 0xef2   :  { %15540 = vmatpush1.bf16.msra.mxu0 %v20021_v25  ;;  %v20054_v25 = vld [vmem:[%s27059_s5 + $0x7e8] ss:$16 sps:$4 sm:$0xff]  }
 0xef3   :  { %15541 = vmatprep.subr.bf16.mxu0 %v20026_v52  ;;  %v20058_v52 = vld [vmem:[%s27061_s7] sm:$0xff]  }
 0xef4   :  { %v15353_v17 = vpop.f32.mrb[192].mxu0 }
 0xef5   :  { %v17631_v11 = vadd.f32 %v15353_v17, %v15195_v63  ;;  %v15355_v13 = vpop.f32.mrb[193].mxu0  ;;  %v20061_v63 = vld [vmem:[%s27061_s7 + $0x50] sm:$0xff]   ;;  %v20066_v17 = vld [vmem:[%s27061_s7 + $0x20] sm:$0xff]  }
 0xef6   :  { %v17633_v46 = vadd.f32 %v15355_v13, %v15197_v32  ;;  %v15357_v26 = vpop.f32.mrb[194].mxu0  ;;  %15542 = vmatpush1.bf16.msra.mxu0 %v20024_v59  ;;  %v20060_v59 = vld [vmem:[%s27061_s7 + $0x8] sm:$0xff]   ;;  %v20065_v32 = vld [vmem:[%s27061_s7 + $0x60] sm:$0xff]   ;;  %v20070_v13 = vld [vmem:[%s27061_s7 + $0x30] sm:$0xff]  }
 0xef7   :  { %v17635_v50 = vadd.f32 %v15357_v26, %v15199_v40  ;;  %v15359_v27 = vpop.f32.mrb[195].mxu0  ;;  %15543 = vmatprep.subr.bf16.mxu0 %v20029_v60  ;;  %v15584_v42 = vmax.f32 %v17631_v11, 0.0  ;;  %v20062_v60 = vld [vmem:[%s27061_s7 + $0x10] sm:$0xff]   ;;  %v20068_v40 = vld [vmem:[%s27061_s7 + $0x28] sm:$0xff]   ;;  %v20073_v26 = vld [vmem:[%s27061_s7 + $0xc0] sm:$0xff]  }
 0xef8   :  { %v17637_v44 = vadd.f32 %v15359_v27, %v15201_v2  ;;  %v15585_v54 = vmax.f32 %v17633_v46, 0.0  ;;  %v20069_v11 = vld [vmem:[%s27061_s7 + $0x70] sm:$0xff]   ;;  %v20071_v2 = vld [vmem:[%s27061_s7 + $0x78] sm:$0xff]   ;;  %v20076_v27 = vld [vmem:[%s27061_s7 + $0x88] sm:$0xff]  }
 0xef9   :  { %v15588_v21 = vmax.f32 %v17635_v50, 0.0  ;;  %v20072_v46 = vld [vmem:[%s27061_s7 + $0x38] sm:$0xff]   ;;  %v20075_v50 = vld [vmem:[%s27061_s7 + $0xc8] sm:$0xff]  }
 0xefa   :  { %v15589_v24 = vmax.f32 %v17637_v44, 0.0  ;;  %15544 = vmatpush1.bf16.msra.mxu0 %v20027_v38  ;;  %v20074_v38 = vld [vmem:[%s27061_s7 + $0x80] sm:$0xff]   ;;  %v20078_v44 = vld [vmem:[%s27061_s7 + $0x90] sm:$0xff]  }
 0xefb   :  { %v26873_v9 = vpack.c.bf16 %v15588_v21, %v15584_v42  ;;  %15545 = vmatprep.subr.bf16.mxu0 %v20032_v41  ;;  %v20077_v41 = vld [vmem:[%s27061_s7 + $0xd0] sm:$0xff]   ;;  %v20079_v42 = vld [vmem:[%s27061_s7 + $0xd8] sm:$0xff]  }
 0xefc   :  { %v26879_v4 = vpack.c.bf16 %v15589_v24, %v15585_v54  ;;  %v15363_v6 = vpop.f32.mrb[196].mxu0  ;;  %v20080_v21 = vld [vmem:[%s27061_s7 + $0x98] sm:$0xff]   ;;  %v20081_v54 = vld [vmem:[%s27061_s7 + $0xe0] sm:$0xff]  }
 0xefd   :  { %v17639_v33 = vadd.f32 %v15363_v6, %v15205_v31  ;;  %v15365_v51 = vpop.f32.mrb[197].mxu0  ;;  %v20082_v24 = vld [vmem:[%s27061_s7 + $0xa0] sm:$0xff]   ;;  %v20084_v31 = vld [vmem:[%s27061_s7 + $0xa8] sm:$0xff]  }
 0xefe   :  { %v17641_v35 = vadd.f32 %v15365_v51, %v15207_v30  ;;  %v15367_v49 = vpop.f32.mrb[198].mxu0  ;;  %15546 = vmatpush1.bf16.msra.mxu0 %v20030_v7  ;;  %v20083_v7 = vld [vmem:[%s27061_s7 + $0xe8] sm:$0xff]   ;;  %v20087_v30 = vld [vmem:[%s27061_s7 + $0xf8] sm:$0xff]  }
 0xeff   :  { %v17643_v43 = vadd.f32 %v15367_v49, %v15209_v12  ;;  %v15369_v58 = vpop.f32.mrb[199].mxu0  ;;  %15547 = vmatprep.subr.bf16.mxu0 %v20035_v18  ;;  %v15592_v36 = vmax.f32 %v17639_v33, 0.0  ;;  %v20086_v18 = vld [vmem:[%s27061_s7 + $0xb0] sm:$0xff]   ;;  %v28570_v6 = vld [vmem:[#allocation202_spill] sm:$0xff] }
 0xf00   :  { %v17645_v20 = vadd.f32 %v15369_v58, %v15211_v15  ;;  %v15593_v61 = vmax.f32 %v17641_v35, 0.0  ;;  %v13874_v12 = vsub.s32 3, %v28570_v6  ;;  %v28571_v33 = vsub.s32 2, %v28570_v6 }
 0xf01   :  { %v15596_v0 = vmax.f32 %v17643_v43, 0.0 }
 0xf02   :  { %v15597_v45 = vmax.f32 %v17645_v20, 0.0  ;;  %15548 = vmatpush1.bf16.msra.mxu0 %v20033_v57  ;;  %v13871_v51 = vrot.slane %v26841_v34, %v28571_v33  ;;  %v13875_v15 = vrot.slane %v26841_v34, %v13874_v12 }
 0xf03   :  { %v26892_v39 = vpack.c.bf16 %v15596_v0, %v15592_v36  ;;  %15549 = vmatprep.subr.bf16.mxu0 %v20038_v22 }
 0xf04   :  { %v26897_v1 = vpack.c.bf16 %v15597_v45, %v15593_v61 }
 0xf06   :  { %15550 = vmatpush1.bf16.msra.mxu0 %v20036_v10 }
 0xf07   :  { %15551 = vmatprep.subr.bf16.mxu0 %v20041_v28 }
 0xf0a   :  { %15552 = vmatpush1.bf16.msra.mxu0 %v20039_v62 }
 0xf0b   :  { %15553 = vmatprep.subr.bf16.mxu0 %v20044_v55 }
 0xf0e   :  { %15554 = vmatpush1.bf16.msra.mxu0 %v20042_v14 }
 0xf0f   :  { %15555 = vmatprep.subr.bf16.mxu0 %v20047_v19 }
 0xf12   :  { %15556 = vmatpush1.bf16.msra.mxu0 %v20045_v8 }
 0xf13   :  { %15557 = vmatprep.subr.bf16.mxu0 %v20050_v5 }
 0xf16   :  { %15558 = vmatpush1.bf16.msra.mxu0 %v20048_v53 }
 0xf17   :  { %15559 = vmatprep.subr.bf16.mxu0 %v20053_v23 }
 0xf1a   :  { %15560 = vmatpush1.bf16.msra.mxu0 %v20051_v37 }
 0xf1b   :  { %15561 = vmatprep.subr.bf16.mxu0 %v20056_v29 }
 0xf1e   :  { %15562 = vmatpush1.bf16.msra.mxu0 %v20054_v25 }
 0xf1f   :  { %17430 = vmatprep.subr.bf16.mxu0 %v20057_v47 }
 0xf21   :  { %15564 = vmatmul.mubr.bf16.vlgmr.msra.gmra.mrb[200].mxu0 %v26368_v48  ;;  %v20063_v48 = vld [vmem:[%s27061_s7 + $0x58] sm:$0xff]  }
 0xf22   :  { %15573 = vmatprep.mubr.bf16.mxu0 %v26409_v16  ;;  %17431 = vmatpush3.bf16.msra.mxu0 %v20058_v52  ;;  %v20064_v16 = vld [vmem:[%s27061_s7 + $0x18] sm:$0xff]  }
 0xf23   :  { %17432 = vmatprep.subr.bf16.mxu0 %v20059_v3 }
 0xf26   :  { %17433 = vmatpush3.bf16.msra.mxu0 %v20060_v59 }
 0xf27   :  { %17434 = vmatprep.subr.bf16.mxu0 %v20061_v63 }
 0xf29   :  { %15574 = vmatmul.mubr.bf16.gmra.mrb[204].mxu0 %v26404_v56  ;;  %v20067_v56 = vld [vmem:[%s27061_s7 + $0x68] sm:$0xff]  }
 0xf2a   :  { %17435 = vmatpush3.bf16.msra.mxu0 %v20062_v60  ;;  %15903 = vmatprep.mubr.bf16.mxu0 %v26879_v4  ;;  %v20088_v4 = vld [vmem:[%s27061_s7 + $0xb8] sm:$0xff]  }
 0xf2b   :  { %17436 = vmatprep.subr.bf16.mxu0 %v20063_v48 }
 0xf2e   :  { %17437 = vmatpush3.bf16.msra.mxu0 %v20064_v16 }
 0xf2f   :  { %17438 = vmatprep.subr.bf16.mxu0 %v20065_v32 }
 0xf32   :  { %17439 = vmatpush3.bf16.msra.mxu0 %v20066_v17 }
 0xf33   :  { %17440 = vmatprep.subr.bf16.mxu0 %v20067_v56 }
 0xf36   :  { %17441 = vmatpush3.bf16.msra.mxu0 %v20068_v40 }
 0xf37   :  { %17442 = vmatprep.subr.bf16.mxu0 %v20069_v11 }
 0xf3a   :  { %17443 = vmatpush3.bf16.msra.mxu0 %v20070_v13  ;;  %v17397_v13 = vld [vmem:[%s27063_s8] ss:$0 sm:$0xff] }
 0xf3b   :  { %17444 = vmatprep.subr.bf16.mxu0 %v20071_v2 }
 0xf3e   :  { %17445 = vmatpush3.bf16.msra.mxu0 %v20072_v46 }
 0xf3f   :  { %17458 = vmatprep.subr.bf16.mxu0 %v20073_v26 }
 0xf41   :  { %15904 = vmatmul.mubr.bf16.vlgmr.msra.gmra.mrb[208].mxu0 %v26873_v9  ;;  %v20085_v9 = vld [vmem:[%s27061_s7 + $0xf0] sm:$0xff]  }
 0xf42   :  { %15911 = vmatprep.mubr.bf16.mxu0 %v26897_v1  ;;  %17459 = vmatpush3.bf16.msra.mxu0 %v20074_v38 }
 0xf43   :  { %17460 = vmatprep.subr.bf16.mxu0 %v20075_v50 }
 0xf46   :  { %17461 = vmatpush3.bf16.msra.mxu0 %v20076_v27 }
 0xf47   :  { %17462 = vmatprep.subr.bf16.mxu0 %v20077_v41 }
 0xf49   :  { %15912 = vmatmul.mubr.bf16.gmra.mrb[212].mxu0 %v26892_v39 }
 0xf4a   :  { %17463 = vmatpush3.bf16.msra.mxu0 %v20078_v44 }
 0xf4b   :  { %17464 = vmatprep.subr.bf16.mxu0 %v20079_v42 }
 0xf4e   :  { %17465 = vmatpush3.bf16.msra.mxu0 %v20080_v21 }
 0xf4f   :  { %17466 = vmatprep.subr.bf16.mxu0 %v20081_v54 }
 0xf52   :  { %17467 = vmatpush3.bf16.msra.mxu0 %v20082_v24 }
 0xf53   :  { %17468 = vmatprep.subr.bf16.mxu0 %v20083_v7 }
 0xf56   :  { %17469 = vmatpush3.bf16.msra.mxu0 %v20084_v31 }
 0xf57   :  { %17470 = vmatprep.subr.bf16.mxu0 %v20085_v9 }
 0xf5a   :  { %17471 = vmatpush3.bf16.msra.mxu0 %v20086_v18 }
 0xf5b   :  { %17472 = vmatprep.subr.bf16.mxu0 %v20087_v30 }
 0xf5e   :  { %17473 = vmatpush3.bf16.msra.mxu0 %v20088_v4 }
 0xff4   :  { %v15565_v35 = vpop.f32.mrb[200].mxu0 }
 0xff5   :  { %v17646_v49 = vadd.f32 %v15565_v35, %v13871_v51  ;;  %v15567_v57 = vpop.f32.mrb[201].mxu0 }
 0xff6   :  { %v17647_v43 = vadd.f32 %v15567_v57, %v13875_v15  ;;  %v15569_v58 = vpop.f32.mrb[202].mxu0 }
 0xff7   :  { %v17648_v22 = vadd.f32 %v15569_v58, %v13871_v51  ;;  %v15571_v20 = vpop.f32.mrb[203].mxu0  ;;  %v15586_v0 = vmax.f32 %v17646_v49, 0.0 }
 0xff8   :  { %v17649_v36 = vadd.f32 %v15571_v20, %v13875_v15  ;;  %v15587_v45 = vmax.f32 %v17647_v43, 0.0 }
 0xff9   :  { %v15590_v61 = vmax.f32 %v17648_v22, 0.0 }
 0xffa   :  { %v15591_v10 = vmax.f32 %v17649_v36, 0.0 }
 0xffb   :  { %v15602_v39 = vpack.c.bf16 %v15590_v61, %v15586_v0 }
 0xffc   :  { %v15603_v28 = vpack.c.bf16 %v15591_v10, %v15587_v45  ;;  %v15575_v1 = vpop.f32.mrb[204].mxu0 }
 0xffd   :  { %v17650_v62 = vadd.f32 %v15575_v1, %v13871_v51  ;;  %v15577_v55 = vpop.f32.mrb[205].mxu0 }
 0xffe   :  { %v17651_v14 = vadd.f32 %v15577_v55, %v13875_v15  ;;  %v15579_v19 = vpop.f32.mrb[206].mxu0  ;;  %15952 = vmatprep.mubr.bf16.mxu0 %v15603_v28 }
 0xfff   :  { %v17652_v34 = vadd.f32 %v15579_v19, %v13871_v51  ;;  %v15581_v8 = vpop.f32.mrb[207].mxu0  ;;  %15953 = vmatmul.mubr.bf16.vlgmr.msra.gmra.mrb[216].mxu0 %v15602_v39  ;;  %v15594_v53 = vmax.f32 %v17650_v62, 0.0 }
0x1000   :  { %v17653_v5 = vadd.f32 %v15581_v8, %v13875_v15  ;;  %v15595_v37 = vmax.f32 %v17651_v14, 0.0 }
0x1001   :  { %v15598_v23 = vmax.f32 %v17652_v34, 0.0 }
0x1002   :  { %v15599_v29 = vmax.f32 %v17653_v5, 0.0 }
0x1003   :  { %v15606_v25 = vpack.c.bf16 %v15598_v23, %v15594_v53 }
0x1004   :  { %v15607_v47 = vpack.c.bf16 %v15599_v29, %v15595_v37 }
0x1006   :  { %15960 = vmatprep.mubr.bf16.mxu0 %v15607_v47 }
0x1007   :  { %15961 = vmatmul.mubr.bf16.gmra.mrb[220].mxu0 %v15606_v25 }
0x1014   :  { %v17446_v52 = vpop.f32.mrb[208].mxu0 }
0x1015   :  { %v17447_v3 = vpop.f32.mrb[209].mxu0 }
0x1016   :  { %v17448_v59 = vadd.f32 %v17447_v3, %v17446_v52  ;;  %v17449_v63 = vpop.f32.mrb[210].mxu0 }
0x1017   :  { %v17450_v60 = vpop.f32.mrb[211].mxu0 }
0x1018   :  { %v17451_v48 = vadd.f32 %v17450_v60, %v17449_v63  ;;  %v15906_v26 = vadd.f32 %v17448_v59, %v17397_v13 }
0x101a   :  { %v15909_v41 = vadd.f32 %v17451_v48, %v17397_v13 }
0x101c   :  { %v17452_v16 = vpop.f32.mrb[212].mxu0 }
0x101d   :  { %v17453_v32 = vpop.f32.mrb[213].mxu0 }
0x101e   :  { %v17454_v17 = vadd.f32 %v17453_v32, %v17452_v16  ;;  %v17455_v56 = vpop.f32.mrb[214].mxu0 }
0x101f   :  { %v17456_v40 = vpop.f32.mrb[215].mxu0 }
0x1020   :  { %v17457_v11 = vadd.f32 %v17456_v40, %v17455_v56  ;;  %v15914_v7 = vadd.f32 %v17454_v17, %v17397_v13 }
0x1022   :  { %v15917_v30 = vadd.f32 %v17457_v11, %v17397_v13 }
0x10d2   :  { %v17474_v2 = vpop.f32.mrb[216].mxu0 }
0x10d3   :  { %v17475_v46 = vpop.f32.mrb[217].mxu0 }
0x10d4   :  { %v17476_v38 = vadd.f32 %v17475_v46, %v17474_v2  ;;  %v17477_v50 = vpop.f32.mrb[218].mxu0 }
0x10d5   :  { %v17478_v27 = vpop.f32.mrb[219].mxu0 }
0x10d6   :  { %v15955_v44 = vadd.f32 %v17476_v38, %v15906_v26  ;;  %v17479_v42 = vadd.f32 %v17478_v27, %v17477_v50 }
0x10d8   :  { %15969 = vst [vmem:[%s27064_s9] sm:$0xff] %v15955_v44  ;;  %v15958_v21 = vadd.f32 %v17479_v42, %v15909_v41 }
0x10da   :  { %15970 = vst [vmem:[%s27064_s9 + $0x8] sm:$0xff] %v15958_v21  ;;  %v17480_v54 = vpop.f32.mrb[220].mxu0 }
0x10db   :  { %v17481_v24 = vpop.f32.mrb[221].mxu0 }
0x10dc   :  { %v17482_v31 = vadd.f32 %v17481_v24, %v17480_v54  ;;  %v17483_v9 = vpop.f32.mrb[222].mxu0 }
0x10dd   :  { %v17484_v18 = vpop.f32.mrb[223].mxu0 }
0x10de   :  { %v15963_v4 = vadd.f32 %v17482_v31, %v15914_v7  ;;  %v17485_v6 = vadd.f32 %v17484_v18, %v17483_v9 }
0x10e0   :  { %15971 = vst [vmem:[%s27064_s9 + $0x10] sm:$0xff] %v15963_v4  ;;  %v15966_v12 = vadd.f32 %v17485_v6, %v15917_v30 }
0x10e2   :  { %15972 = vst [vmem:[%s27064_s9 + $0x18] sm:$0xff] %v15966_v12 }

</bundles_post_ra>
